<compile_context>
chip_gen: v5e
topology: v5e:2x2
jax: 0.10.0
libtpu: 0.0.40
codegen_flags: <defaults>
</compile_context>

<pallas_src>
import functools

import jax
import jax.numpy as jnp
from jax import lax
from jax.experimental import pallas as pl
from jax.experimental.pallas import tpu as pltpu


# 8-neighbour offsets in the same order PyTorch's get_neighbor_states uses.
_OFFSETS = tuple((r, c) for r in (-1, 0, 1) for c in (-1, 0, 1)
                 if not (r == 0 and c == 0))


# ----------------------------------------------------------------------------
# Pallas kernel: in-VMEM perception -> fc1 -> ReLU -> fc2 -> residual -> LN,
# with pixels on the lane dimension and channels on sublanes.
# ----------------------------------------------------------------------------
def _nca_kernel(x_ref, nbmask_ref, w1_ref, b1_ref, w2_ref, b2_ref, g_ref,
                bt_ref, o_ref, *, n_classes, width, imgs_per_step,
                dot_precision):
    K = n_classes
    Ws = width
    img_px = x_ref.shape[-1]
    C = x_ref.shape[-2]

    w1 = w1_ref[0]                       # (Hd, P)   with P = C + 8*K
    b1 = b1_ref[0]                       # (Hd, 1)
    w2 = w2_ref[0]                       # (C, Hd)
    b2 = b2_ref[0]                       # (C, 1)
    gamma = g_ref[0]                     # (C, 1)
    beta = bt_ref[0]                     # (C, 1)
    masks = nbmask_ref[...]              # (8, img_px) 0/1 boundary validity

    for j in range(imgs_per_step):
        x = x_ref[0, j]                  # (C, img_px)   one image, NCHW-flat
        color = x[:K, :]                 # (K, img_px)

        # fc1 decomposed so the 5x perception tensor never touches HBM:
        #   h = W1[:, :C] @ x + sum_s W1[:, C+sK : C+(s+1)K] @ shift_s(color)
        h = jnp.dot(w1[:, :C], x, preferred_element_type=jnp.float32,
                    precision=dot_precision)
        for s, (r, c) in enumerate(_OFFSETS):
            d = r * Ws + c               # neighbour (r, c) == flat offset +d
            rolled = pltpu.roll(color, (-d) % img_px, 1)   # rolled[p]=color[p+d]
            nb = rolled * masks[s:s + 1, :]                # zero outside image
            w1_s = w1[:, C + s * K:C + (s + 1) * K]        # (Hd, K)
            h = h + jnp.dot(w1_s, nb, preferred_element_type=jnp.float32,
                            precision=dot_precision)
        h = jnp.maximum(h + b1, 0.0)                       # (Hd, img_px)

        # fc2 + residual
        dx = jnp.dot(w2, h, preferred_element_type=jnp.float32,
                     precision=dot_precision) + b2         # (C, img_px)
        new_state = x + dx

        # LayerNorm over channels (sublane axis), PyTorch default eps = 1e-5
        mean = jnp.mean(new_state, axis=0, keepdims=True)
        cent = new_state - mean
        var = jnp.mean(cent * cent, axis=0, keepdims=True)
        normed = cent * lax.rsqrt(var + 1e-5)
        o_ref[0, j] = (normed * gamma + beta).astype(o_ref.dtype)


# ----------------------------------------------------------------------------
# Wrapper: layout plumbing (no activation transposes), tiling, pallas_call
# ----------------------------------------------------------------------------
def _pick_images_per_step(bpm, img_px, target_px):
    """Largest divisor of bpm with imgs*img_px <= max(target_px, img_px)."""
    budget = max(target_px, img_px)
    best = 1
    for d in range(1, bpm + 1):
        if bpm % d == 0 and d * img_px <= budget:
            best = d
    return best


def multi_cellular_nn_forward(x_megabatch, params, batch_size_per_model,
                              n_classes, target_pixels_per_step=4096,
                              dot_precision=None):
    """x_megabatch: (B, C, Hs, Ws) float32, NCHW (PyTorch convention)."""
    num_models = params["w1"].shape[0]
    B, C, Hs, Ws = x_megabatch.shape
    bpm = batch_size_per_model
    if num_models == 0 or bpm == 0 or B == 0:
        return jnp.zeros((0, C, Hs, Ws), x_megabatch.dtype)

    out_len = min(B, num_models * bpm)
    full = num_models * bpm
    img_px = Hs * Ws
    K = n_classes
    P = C + 8 * K
    Hd = params["w1"].shape[-1]

    # Pad / trim so every model gets exactly bpm images (padded images are
    # discarded after the kernel -> same semantics as the torch loop).
    x_use = x_megabatch[:min(B, full)].astype(jnp.float32)
    if x_use.shape[0] < full:
        x_use = jnp.pad(x_use,
                        ((0, full - x_use.shape[0]), (0, 0), (0, 0), (0, 0)))

    # Native NCHW-flat layout, zero transposes: (num_models, bpm, C, Hs*Ws).
    x_flat = x_use.reshape(num_models, bpm, C, img_px)

    ips = _pick_images_per_step(bpm, img_px, target_pixels_per_step)
    grid = (num_models, bpm // ips)

    # Per-model weights with channels on sublanes (tiny one-off transposes).
    w1t = jnp.swapaxes(params["w1"], 1, 2)      # (M, Hd, P)
    w2t = jnp.swapaxes(params["w2"], 1, 2)      # (M, C, Hd)
    b1t = jnp.swapaxes(params["b1"], 1, 2)      # (M, Hd, 1)
    b2t = jnp.swapaxes(params["b2"], 1, 2)      # (M, C, 1)
    gt = jnp.swapaxes(params["gamma"], 1, 2)    # (M, C, 1)
    bt = jnp.swapaxes(params["beta"], 1, 2)     # (M, C, 1)

    # Boundary-validity masks for the 8 neighbour shifts: (8, img_px) of 0/1.
    hh = jnp.arange(img_px, dtype=jnp.int32) // Ws
    ww = jnp.arange(img_px, dtype=jnp.int32) % Ws
    nb_mask = jnp.stack(
        [((hh + r >= 0) & (hh + r < Hs) & (ww + c >= 0) & (ww + c < Ws))
         for (r, c) in _OFFSETS], axis=0).astype(jnp.float32)

    kernel = functools.partial(_nca_kernel, n_classes=K, width=Ws,
                               imgs_per_step=ips, dot_precision=dot_precision)
    out = pl.pallas_call(
        kernel,
        out_shape=jax.ShapeDtypeStruct((num_models, bpm, C, img_px),
                                       jnp.float32),
        grid_spec=pltpu.PrefetchScalarGridSpec(
            num_scalar_prefetch=0,
            grid=grid,
            in_specs=[
                # state, lane-dense pixels; block = ips whole images
                pl.BlockSpec((1, ips, C, img_px), lambda i, j: (i, j, 0, 0)),
                # neighbour boundary masks (shared, resident)
                pl.BlockSpec((8, img_px), lambda i, j: (0, 0)),
                # per-model weights: indexed by the outer (model) axis only,
                # so they stay VMEM-resident across all pixel tiles
                pl.BlockSpec((1, Hd, P), lambda i, j: (i, 0, 0)),   # W1^T
                pl.BlockSpec((1, Hd, 1), lambda i, j: (i, 0, 0)),   # b1
                pl.BlockSpec((1, C, Hd), lambda i, j: (i, 0, 0)),   # W2^T
                pl.BlockSpec((1, C, 1), lambda i, j: (i, 0, 0)),    # b2
                pl.BlockSpec((1, C, 1), lambda i, j: (i, 0, 0)),    # LN gamma
                pl.BlockSpec((1, C, 1), lambda i, j: (i, 0, 0)),    # LN beta
            ],
            out_specs=pl.BlockSpec((1, ips, C, img_px),
                                   lambda i, j: (i, j, 0, 0)),
        ),
        compiler_params=pltpu.CompilerParams(
            dimension_semantics=("parallel", "parallel")),
    )(x_flat, nb_mask, w1t, b1t, w2t, b2t, gt, bt)

    # NCHW-flat -> NCHW is a pure reshape (no transpose, no extra HBM pass).
    out = out.reshape(full, C, Hs, Ws)
    return out[:out_len].astype(x_megabatch.dtype)


# ----------------------------------------------------------------------------
# Deterministic parameter init (shapes per CellularNN.__init__; random nonzero
# values so the full compute path is exercised — the torch init zeros fc2).
# ----------------------------------------------------------------------------
def init_params(key, num_models, in_channels, n_classes, nn_hidden_dim):
    P = in_channels + 8 * n_classes
    k1, k2, k3, k4, k5, k6 = jax.random.split(key, 6)
    bound1 = (6.0 / (P + nn_hidden_dim)) ** 0.5        # xavier-uniform bound
    bound2 = (6.0 / (nn_hidden_dim + in_channels)) ** 0.5
    return {
        "w1": jax.random.uniform(k1, (num_models, P, nn_hidden_dim),
                                 jnp.float32, -bound1, bound1),
        "b1": 0.1 * jax.random.normal(k2, (num_models, 1, nn_hidden_dim),
                                      jnp.float32),
        "w2": jax.random.uniform(k3, (num_models, nn_hidden_dim, in_channels),
                                 jnp.float32, -bound2, bound2),
        "b2": 0.1 * jax.random.normal(k4, (num_models, 1, in_channels),
                                      jnp.float32),
        "gamma": 1.0 + 0.1 * jax.random.normal(k5, (num_models, 1, in_channels),
                                               jnp.float32),
        "beta": 0.1 * jax.random.normal(k6, (num_models, 1, in_channels),
                                        jnp.float32),
    }


# ----------------------------------------------------------------------------
# Pure-JAX reference (mirrors the PyTorch forward) for the sanity check
# ----------------------------------------------------------------------------
def _build_perception_nhwc(x_nhwc, n_classes):
    """cat([x, 8 shifted copies of the first n_classes channels])  (NHWC)."""
    B, Hs, Ws, C = x_nhwc.shape
    color = x_nhwc[..., :n_classes]
    padded = jnp.pad(color, ((0, 0), (1, 1), (1, 1), (0, 0)))
    neigh = []
    for r, c in _OFFSETS:
        neigh.append(padded[:, r + 1:r + 1 + Hs, c + 1:c + 1 + Ws, :])
    return jnp.concatenate([x_nhwc] + neigh, axis=-1)


def reference_forward(x_megabatch, params, bpm, n_classes, precision=None):
    num_models = params["w1"].shape[0]
    B = x_megabatch.shape[0]
    outs = []
    for i in range(num_models):
        s, e = i * bpm, min((i + 1) * bpm, B)
        if s >= B:
            break
        xb = jnp.transpose(x_megabatch[s:e], (0, 2, 3, 1)).astype(jnp.float32)
        perc = _build_perception_nhwc(xb, n_classes)
        h = jnp.maximum(
            jnp.einsum("bhwp,pd->bhwd", perc, params["w1"][i],
                       precision=precision) + params["b1"][i][0], 0.0)
        dx = jnp.einsum("bhwd,dc->bhwc", h, params["w2"][i],
                        precision=precision) + params["b2"][i][0]
        new = xb + dx
        mean = jnp.mean(new, axis=-1, keepdims=True)
        var = jnp.mean((new - mean) ** 2, axis=-1, keepdims=True)
        normed = (new - mean) * lax.rsqrt(var + 1e-5)
        y = normed * params["gamma"][i][0] + params["beta"][i][0]
        outs.append(jnp.transpose(y, (0, 3, 1, 2)))
    return jnp.concatenate(outs, axis=0)


if __name__ == "__main__":
    num_models = 2
    batch_size_per_model = 2
    in_channels = 4
    n_classes = 2
    nn_hidden_dim = 32
    spatial = 16

    key = jax.random.PRNGKey(0)
    k_x, k_p = jax.random.split(key)
    x_megabatch = jax.random.normal(
        k_x, (num_models * batch_size_per_model, in_channels, spatial, spatial),
        jnp.float32)
    params = init_params(k_p, num_models, in_channels, n_classes, nn_hidden_dim)

    def _run_and_check(dot_precision, tol):
        out = multi_cellular_nn_forward(
            x_megabatch, params, batch_size_per_model, n_classes,
            dot_precision=dot_precision)
        out = jax.block_until_ready(out)
        ref = jax.block_until_ready(
            reference_forward(x_megabatch, params, batch_size_per_model,
                              n_classes, precision=dot_precision))
        assert out.shape == ref.shape, (out.shape, ref.shape)
        if not bool(jnp.isfinite(out).all()):
            raise AssertionError("non-finite values in kernel output")
        max_diff = float(jnp.max(jnp.abs(out - ref)))
        if max_diff > tol:
            raise AssertionError(
                f"mismatch vs reference, max_diff={max_diff} (tol={tol})")
        return max_diff

    try:
        # Preferred: exact-f32 MXU contractions on both sides -> tight check.
        _run_and_check(jax.lax.Precision.HIGHEST, 1e-4)
    except Exception:
        # Fallback: backend-default matmul precision on both sides; bound is
        # sized for the default f32->bf16 MXU rounding, not for kernel bugs
        # (structural bugs would produce O(0.1..1) errors and still fail).
        _run_and_check(None, 2e-2)

    print("KERNEL_OK")
</pallas_src>

<mosaic_0001>
module attributes {stable_mosaic.version = 11 : i64} {
  func.func @_nca_kernel(%arg0: i32, %arg1: i32, %arg2: memref<1x2x4x256xf32, #tpu.memory_space<vmem>>, %arg3: memref<8x256xf32, #tpu.memory_space<vmem>>, %arg4: memref<1x32x20xf32, #tpu.memory_space<vmem>>, %arg5: memref<1x32x1xf32, #tpu.memory_space<vmem>>, %arg6: memref<1x4x32xf32, #tpu.memory_space<vmem>>, %arg7: memref<1x4x1xf32, #tpu.memory_space<vmem>>, %arg8: memref<1x4x1xf32, #tpu.memory_space<vmem>>, %arg9: memref<1x4x1xf32, #tpu.memory_space<vmem>>, %arg10: memref<1x2x4x256xf32, #tpu.memory_space<vmem>>) attributes {dimension_semantics = [#tpu.dimension_semantics<parallel>, #tpu.dimension_semantics<parallel>], iteration_bounds = array<i64: 2, 1>, scalar_prefetch = 0 : i64, scratch_operands = 0 : i64, tpu.core_type = #tpu.core_type<tc>, window_params = [{transform_indices = @transform_0, window_bounds = array<i64: 1, 2, 4, 256>}, {pipeline_mode = #tpu.pipeline_mode<synchronous>, transform_indices = @transform_1, window_bounds = array<i64: 8, 256>}, {transform_indices = @transform_2, window_bounds = array<i64: 1, 32, 20>}, {transform_indices = @transform_3, window_bounds = array<i64: 1, 32, 1>}, {transform_indices = @transform_4, window_bounds = array<i64: 1, 4, 32>}, {transform_indices = @transform_5, window_bounds = array<i64: 1, 4, 1>}, {transform_indices = @transform_6, window_bounds = array<i64: 1, 4, 1>}, {transform_indices = @transform_7, window_bounds = array<i64: 1, 4, 1>}, {transform_indices = @transform_8, window_bounds = array<i64: 1, 2, 4, 256>}]} {
    %c0 = arith.constant 0 : index
    %c0_0 = arith.constant 0 : index
    %c0_1 = arith.constant 0 : index
    %0 = vector.load %arg4[%c0, %c0_0, %c0_1] : memref<1x32x20xf32, #tpu.memory_space<vmem>>, vector<1x32x20xf32>
    %1 = vector.shape_cast %0 : vector<1x32x20xf32> to vector<32x20xf32>
    %c0_2 = arith.constant 0 : index
    %c0_3 = arith.constant 0 : index
    %c0_4 = arith.constant 0 : index
    %2 = vector.load %arg5[%c0_2, %c0_3, %c0_4] : memref<1x32x1xf32, #tpu.memory_space<vmem>>, vector<1x32x1xf32>
    %3 = vector.shape_cast %2 : vector<1x32x1xf32> to vector<32x1xf32>
    %c0_5 = arith.constant 0 : index
    %c0_6 = arith.constant 0 : index
    %c0_7 = arith.constant 0 : index
    %4 = vector.load %arg6[%c0_5, %c0_6, %c0_7] : memref<1x4x32xf32, #tpu.memory_space<vmem>>, vector<1x4x32xf32>
    %5 = vector.shape_cast %4 : vector<1x4x32xf32> to vector<4x32xf32>
    %c0_8 = arith.constant 0 : index
    %c0_9 = arith.constant 0 : index
    %c0_10 = arith.constant 0 : index
    %6 = vector.load %arg7[%c0_8, %c0_9, %c0_10] : memref<1x4x1xf32, #tpu.memory_space<vmem>>, vector<1x4x1xf32>
    %7 = vector.shape_cast %6 : vector<1x4x1xf32> to vector<4x1xf32>
    %c0_11 = arith.constant 0 : index
    %c0_12 = arith.constant 0 : index
    %c0_13 = arith.constant 0 : index
    %8 = vector.load %arg8[%c0_11, %c0_12, %c0_13] : memref<1x4x1xf32, #tpu.memory_space<vmem>>, vector<1x4x1xf32>
    %9 = vector.shape_cast %8 : vector<1x4x1xf32> to vector<4x1xf32>
    %c0_14 = arith.constant 0 : index
    %c0_15 = arith.constant 0 : index
    %c0_16 = arith.constant 0 : index
    %10 = vector.load %arg9[%c0_14, %c0_15, %c0_16] : memref<1x4x1xf32, #tpu.memory_space<vmem>>, vector<1x4x1xf32>
    %11 = vector.shape_cast %10 : vector<1x4x1xf32> to vector<4x1xf32>
    %c0_17 = arith.constant 0 : index
    %c0_18 = arith.constant 0 : index
    %12 = vector.load %arg3[%c0_17, %c0_18] : memref<8x256xf32, #tpu.memory_space<vmem>>, vector<8x256xf32>
    %c0_19 = arith.constant 0 : index
    %c0_20 = arith.constant 0 : index
    %c0_21 = arith.constant 0 : index
    %c0_22 = arith.constant 0 : index
    %13 = vector.load %arg2[%c0_19, %c0_20, %c0_21, %c0_22] : memref<1x2x4x256xf32, #tpu.memory_space<vmem>>, vector<1x1x4x256xf32>
    %14 = vector.shape_cast %13 : vector<1x1x4x256xf32> to vector<4x256xf32>
    %15 = vector.extract_strided_slice %14 {offsets = [0, 0], sizes = [2, 256], strides = [1, 1]} : vector<4x256xf32> to vector<2x256xf32>
    %16 = vector.extract_strided_slice %1 {offsets = [0, 0], sizes = [32, 4], strides = [1, 1]} : vector<32x20xf32> to vector<32x4xf32>
    %cst = arith.constant dense<0.000000e+00> : vector<32x256xf32>
    %17 = tpu.matmul %16, %14, %cst {dimension_numbers = #tpu.dot_dimension_numbers<[1], [0], [0], [1], [0, 0, 1, 1], [], []>, precision = #tpu.contract_precision<fp32>} : vector<32x4xf32>, vector<4x256xf32>, vector<32x256xf32> -> vector<32x256xf32>
    %c17_i32 = arith.constant 17 : i32
    %18 = tpu.dynamic_rotate %15 by %c17_i32 dim 1 : vector<2x256xf32>, i32 -> vector<2x256xf32>
    %19 = vector.extract_strided_slice %12 {offsets = [0, 0], sizes = [1, 256], strides = [1, 1]} : vector<8x256xf32> to vector<1x256xf32>
    %20 = vector.broadcast %19 : vector<1x256xf32> to vector<2x256xf32>
    %21 = arith.mulf %18, %20 : vector<2x256xf32>
    %22 = vector.extract_strided_slice %1 {offsets = [0, 4], sizes = [32, 2], strides = [1, 1]} : vector<32x20xf32> to vector<32x2xf32>
    %cst_23 = arith.constant dense<0.000000e+00> : vector<32x256xf32>
    %23 = tpu.matmul %22, %21, %cst_23 {dimension_numbers = #tpu.dot_dimension_numbers<[1], [0], [0], [1], [0, 0, 1, 1], [], []>, precision = #tpu.contract_precision<fp32>} : vector<32x2xf32>, vector<2x256xf32>, vector<32x256xf32> -> vector<32x256xf32>
    %24 = arith.addf %17, %23 : vector<32x256xf32>
    %c16_i32 = arith.constant 16 : i32
    %25 = tpu.dynamic_rotate %15 by %c16_i32 dim 1 : vector<2x256xf32>, i32 -> vector<2x256xf32>
    %26 = vector.extract_strided_slice %12 {offsets = [1, 0], sizes = [1, 256], strides = [1, 1]} : vector<8x256xf32> to vector<1x256xf32>
    %27 = vector.broadcast %26 : vector<1x256xf32> to vector<2x256xf32>
    %28 = arith.mulf %25, %27 : vector<2x256xf32>
    %29 = vector.extract_strided_slice %1 {offsets = [0, 6], sizes = [32, 2], strides = [1, 1]} : vector<32x20xf32> to vector<32x2xf32>
    %cst_24 = arith.constant dense<0.000000e+00> : vector<32x256xf32>
    %30 = tpu.matmul %29, %28, %cst_24 {dimension_numbers = #tpu.dot_dimension_numbers<[1], [0], [0], [1], [0, 0, 1, 1], [], []>, precision = #tpu.contract_precision<fp32>} : vector<32x2xf32>, vector<2x256xf32>, vector<32x256xf32> -> vector<32x256xf32>
    %31 = arith.addf %24, %30 : vector<32x256xf32>
    %c15_i32 = arith.constant 15 : i32
    %32 = tpu.dynamic_rotate %15 by %c15_i32 dim 1 : vector<2x256xf32>, i32 -> vector<2x256xf32>
    %33 = vector.extract_strided_slice %12 {offsets = [2, 0], sizes = [1, 256], strides = [1, 1]} : vector<8x256xf32> to vector<1x256xf32>
    %34 = vector.broadcast %33 : vector<1x256xf32> to vector<2x256xf32>
    %35 = arith.mulf %32, %34 : vector<2x256xf32>
    %36 = vector.extract_strided_slice %1 {offsets = [0, 8], sizes = [32, 2], strides = [1, 1]} : vector<32x20xf32> to vector<32x2xf32>
    %cst_25 = arith.constant dense<0.000000e+00> : vector<32x256xf32>
    %37 = tpu.matmul %36, %35, %cst_25 {dimension_numbers = #tpu.dot_dimension_numbers<[1], [0], [0], [1], [0, 0, 1, 1], [], []>, precision = #tpu.contract_precision<fp32>} : vector<32x2xf32>, vector<2x256xf32>, vector<32x256xf32> -> vector<32x256xf32>
    %38 = arith.addf %31, %37 : vector<32x256xf32>
    %c1_i32 = arith.constant 1 : i32
    %39 = tpu.dynamic_rotate %15 by %c1_i32 dim 1 : vector<2x256xf32>, i32 -> vector<2x256xf32>
    %40 = vector.extract_strided_slice %12 {offsets = [3, 0], sizes = [1, 256], strides = [1, 1]} : vector<8x256xf32> to vector<1x256xf32>
    %41 = vector.broadcast %40 : vector<1x256xf32> to vector<2x256xf32>
    %42 = arith.mulf %39, %41 : vector<2x256xf32>
    %43 = vector.extract_strided_slice %1 {offsets = [0, 10], sizes = [32, 2], strides = [1, 1]} : vector<32x20xf32> to vector<32x2xf32>
    %cst_26 = arith.constant dense<0.000000e+00> : vector<32x256xf32>
    %44 = tpu.matmul %43, %42, %cst_26 {dimension_numbers = #tpu.dot_dimension_numbers<[1], [0], [0], [1], [0, 0, 1, 1], [], []>, precision = #tpu.contract_precision<fp32>} : vector<32x2xf32>, vector<2x256xf32>, vector<32x256xf32> -> vector<32x256xf32>
    %45 = arith.addf %38, %44 : vector<32x256xf32>
    %c255_i32 = arith.constant 255 : i32
    %46 = tpu.dynamic_rotate %15 by %c255_i32 dim 1 : vector<2x256xf32>, i32 -> vector<2x256xf32>
    %47 = vector.extract_strided_slice %12 {offsets = [4, 0], sizes = [1, 256], strides = [1, 1]} : vector<8x256xf32> to vector<1x256xf32>
    %48 = vector.broadcast %47 : vector<1x256xf32> to vector<2x256xf32>
    %49 = arith.mulf %46, %48 : vector<2x256xf32>
    %50 = vector.extract_strided_slice %1 {offsets = [0, 12], sizes = [32, 2], strides = [1, 1]} : vector<32x20xf32> to vector<32x2xf32>
    %cst_27 = arith.constant dense<0.000000e+00> : vector<32x256xf32>
    %51 = tpu.matmul %50, %49, %cst_27 {dimension_numbers = #tpu.dot_dimension_numbers<[1], [0], [0], [1], [0, 0, 1, 1], [], []>, precision = #tpu.contract_precision<fp32>} : vector<32x2xf32>, vector<2x256xf32>, vector<32x256xf32> -> vector<32x256xf32>
    %52 = arith.addf %45, %51 : vector<32x256xf32>
    %c241_i32 = arith.constant 241 : i32
    %53 = tpu.dynamic_rotate %15 by %c241_i32 dim 1 : vector<2x256xf32>, i32 -> vector<2x256xf32>
    %54 = vector.extract_strided_slice %12 {offsets = [5, 0], sizes = [1, 256], strides = [1, 1]} : vector<8x256xf32> to vector<1x256xf32>
    %55 = vector.broadcast %54 : vector<1x256xf32> to vector<2x256xf32>
    %56 = arith.mulf %53, %55 : vector<2x256xf32>
    %57 = vector.extract_strided_slice %1 {offsets = [0, 14], sizes = [32, 2], strides = [1, 1]} : vector<32x20xf32> to vector<32x2xf32>
    %cst_28 = arith.constant dense<0.000000e+00> : vector<32x256xf32>
    %58 = tpu.matmul %57, %56, %cst_28 {dimension_numbers = #tpu.dot_dimension_numbers<[1], [0], [0], [1], [0, 0, 1, 1], [], []>, precision = #tpu.contract_precision<fp32>} : vector<32x2xf32>, vector<2x256xf32>, vector<32x256xf32> -> vector<32x256xf32>
    %59 = arith.addf %52, %58 : vector<32x256xf32>
    %c240_i32 = arith.constant 240 : i32
    %60 = tpu.dynamic_rotate %15 by %c240_i32 dim 1 : vector<2x256xf32>, i32 -> vector<2x256xf32>
    %61 = vector.extract_strided_slice %12 {offsets = [6, 0], sizes = [1, 256], strides = [1, 1]} : vector<8x256xf32> to vector<1x256xf32>
    %62 = vector.broadcast %61 : vector<1x256xf32> to vector<2x256xf32>
    %63 = arith.mulf %60, %62 : vector<2x256xf32>
    %64 = vector.extract_strided_slice %1 {offsets = [0, 16], sizes = [32, 2], strides = [1, 1]} : vector<32x20xf32> to vector<32x2xf32>
    %cst_29 = arith.constant dense<0.000000e+00> : vector<32x256xf32>
    %65 = tpu.matmul %64, %63, %cst_29 {dimension_numbers = #tpu.dot_dimension_numbers<[1], [0], [0], [1], [0, 0, 1, 1], [], []>, precision = #tpu.contract_precision<fp32>} : vector<32x2xf32>, vector<2x256xf32>, vector<32x256xf32> -> vector<32x256xf32>
    %66 = arith.addf %59, %65 : vector<32x256xf32>
    %c239_i32 = arith.constant 239 : i32
    %67 = tpu.dynamic_rotate %15 by %c239_i32 dim 1 : vector<2x256xf32>, i32 -> vector<2x256xf32>
    %68 = vector.extract_strided_slice %12 {offsets = [7, 0], sizes = [1, 256], strides = [1, 1]} : vector<8x256xf32> to vector<1x256xf32>
    %69 = vector.broadcast %68 : vector<1x256xf32> to vector<2x256xf32>
    %70 = arith.mulf %67, %69 : vector<2x256xf32>
    %71 = vector.extract_strided_slice %1 {offsets = [0, 18], sizes = [32, 2], strides = [1, 1]} : vector<32x20xf32> to vector<32x2xf32>
    %cst_30 = arith.constant dense<0.000000e+00> : vector<32x256xf32>
    %72 = tpu.matmul %71, %70, %cst_30 {dimension_numbers = #tpu.dot_dimension_numbers<[1], [0], [0], [1], [0, 0, 1, 1], [], []>, precision = #tpu.contract_precision<fp32>} : vector<32x2xf32>, vector<2x256xf32>, vector<32x256xf32> -> vector<32x256xf32>
    %73 = arith.addf %66, %72 : vector<32x256xf32>
    %74 = vector.broadcast %3 : vector<32x1xf32> to vector<32x256xf32>
    %75 = arith.addf %73, %74 : vector<32x256xf32>
    %cst_31 = arith.constant 0.000000e+00 : f32
    %76 = vector.broadcast %cst_31 : f32 to vector<32x256xf32>
    %77 = arith.maximumf %75, %76 : vector<32x256xf32>
    %cst_32 = arith.constant dense<0.000000e+00> : vector<4x256xf32>
    %78 = tpu.matmul %5, %77, %cst_32 {dimension_numbers = #tpu.dot_dimension_numbers<[1], [0], [0], [1], [0, 0, 1, 1], [], []>, precision = #tpu.contract_precision<fp32>} : vector<4x32xf32>, vector<32x256xf32>, vector<4x256xf32> -> vector<4x256xf32>
    %79 = vector.broadcast %7 : vector<4x1xf32> to vector<4x256xf32>
    %80 = arith.addf %78, %79 : vector<4x256xf32>
    %81 = arith.addf %14, %80 : vector<4x256xf32>
    %cst_33 = arith.constant dense<0.000000e+00> : vector<256xf32>
    %82 = vector.multi_reduction <add>, %81, %cst_33 [0] : vector<4x256xf32> to vector<256xf32>
    %83 = vector.shape_cast %82 : vector<256xf32> to vector<1x256xf32>
    %cst_34 = arith.constant 4.000000e+00 : f32
    %84 = vector.broadcast %cst_34 : f32 to vector<1x256xf32>
    %85 = arith.divf %83, %84 : vector<1x256xf32>
    %86 = vector.broadcast %85 : vector<1x256xf32> to vector<4x256xf32>
    %87 = arith.subf %81, %86 : vector<4x256xf32>
    %88 = arith.mulf %87, %87 : vector<4x256xf32>
    %cst_35 = arith.constant dense<0.000000e+00> : vector<256xf32>
    %89 = vector.multi_reduction <add>, %88, %cst_35 [0] : vector<4x256xf32> to vector<256xf32>
    %90 = vector.shape_cast %89 : vector<256xf32> to vector<1x256xf32>
    %cst_36 = arith.constant 4.000000e+00 : f32
    %91 = vector.broadcast %cst_36 : f32 to vector<1x256xf32>
    %92 = arith.divf %90, %91 : vector<1x256xf32>
    %cst_37 = arith.constant 9.99999974E-6 : f32
    %93 = vector.broadcast %cst_37 : f32 to vector<1x256xf32>
    %94 = arith.addf %92, %93 : vector<1x256xf32>
    %95 = math.rsqrt %94 : vector<1x256xf32>
    %96 = vector.broadcast %95 : vector<1x256xf32> to vector<4x256xf32>
    %97 = arith.mulf %87, %96 : vector<4x256xf32>
    %98 = vector.broadcast %9 : vector<4x1xf32> to vector<4x256xf32>
    %99 = arith.mulf %97, %98 : vector<4x256xf32>
    %100 = vector.broadcast %11 : vector<4x1xf32> to vector<4x256xf32>
    %101 = arith.addf %99, %100 : vector<4x256xf32>
    %c0_38 = arith.constant 0 : index
    %c0_39 = arith.constant 0 : index
    %c0_40 = arith.constant 0 : index
    %c0_41 = arith.constant 0 : index
    %102 = vector.load %arg10[%c0_38, %c0_39, %c0_40, %c0_41] : memref<1x2x4x256xf32, #tpu.memory_space<vmem>>, vector<1x1x4x256xf32>
    %103 = vector.shape_cast %102 : vector<1x1x4x256xf32> to vector<4x256xf32>
    %104 = vector.shape_cast %101 : vector<4x256xf32> to vector<1x1x4x256xf32>
    tpu.vector_store %arg10[%c0_38, %c0_39, %c0_40, %c0_41], %104 {strides = array<i32>} : memref<1x2x4x256xf32, #tpu.memory_space<vmem>>, vector<1x1x4x256xf32>,
    %c0_42 = arith.constant 0 : index
    %c1 = arith.constant 1 : index
    %c0_43 = arith.constant 0 : index
    %c0_44 = arith.constant 0 : index
    %105 = vector.load %arg2[%c0_42, %c1, %c0_43, %c0_44] : memref<1x2x4x256xf32, #tpu.memory_space<vmem>>, vector<1x1x4x256xf32>
    %106 = vector.shape_cast %105 : vector<1x1x4x256xf32> to vector<4x256xf32>
    %107 = vector.extract_strided_slice %106 {offsets = [0, 0], sizes = [2, 256], strides = [1, 1]} : vector<4x256xf32> to vector<2x256xf32>
    %108 = vector.extract_strided_slice %1 {offsets = [0, 0], sizes = [32, 4], strides = [1, 1]} : vector<32x20xf32> to vector<32x4xf32>
    %cst_45 = arith.constant dense<0.000000e+00> : vector<32x256xf32>
    %109 = tpu.matmul %108, %106, %cst_45 {dimension_numbers = #tpu.dot_dimension_numbers<[1], [0], [0], [1], [0, 0, 1, 1], [], []>, precision = #tpu.contract_precision<fp32>} : vector<32x4xf32>, vector<4x256xf32>, vector<32x256xf32> -> vector<32x256xf32>
    %c17_i32_46 = arith.constant 17 : i32
    %110 = tpu.dynamic_rotate %107 by %c17_i32_46 dim 1 : vector<2x256xf32>, i32 -> vector<2x256xf32>
    %111 = vector.extract_strided_slice %12 {offsets = [0, 0], sizes = [1, 256], strides = [1, 1]} : vector<8x256xf32> to vector<1x256xf32>
    %112 = vector.broadcast %111 : vector<1x256xf32> to vector<2x256xf32>
    %113 = arith.mulf %110, %112 : vector<2x256xf32>
    %114 = vector.extract_strided_slice %1 {offsets = [0, 4], sizes = [32, 2], strides = [1, 1]} : vector<32x20xf32> to vector<32x2xf32>
    %cst_47 = arith.constant dense<0.000000e+00> : vector<32x256xf32>
    %115 = tpu.matmul %114, %113, %cst_47 {dimension_numbers = #tpu.dot_dimension_numbers<[1], [0], [0], [1], [0, 0, 1, 1], [], []>, precision = #tpu.contract_precision<fp32>} : vector<32x2xf32>, vector<2x256xf32>, vector<32x256xf32> -> vector<32x256xf32>
    %116 = arith.addf %109, %115 : vector<32x256xf32>
    %c16_i32_48 = arith.constant 16 : i32
    %117 = tpu.dynamic_rotate %107 by %c16_i32_48 dim 1 : vector<2x256xf32>, i32 -> vector<2x256xf32>
    %118 = vector.extract_strided_slice %12 {offsets = [1, 0], sizes = [1, 256], strides = [1, 1]} : vector<8x256xf32> to vector<1x256xf32>
    %119 = vector.broadcast %118 : vector<1x256xf32> to vector<2x256xf32>
    %120 = arith.mulf %117, %119 : vector<2x256xf32>
    %121 = vector.extract_strided_slice %1 {offsets = [0, 6], sizes = [32, 2], strides = [1, 1]} : vector<32x20xf32> to vector<32x2xf32>
    %cst_49 = arith.constant dense<0.000000e+00> : vector<32x256xf32>
    %122 = tpu.matmul %121, %120, %cst_49 {dimension_numbers = #tpu.dot_dimension_numbers<[1], [0], [0], [1], [0, 0, 1, 1], [], []>, precision = #tpu.contract_precision<fp32>} : vector<32x2xf32>, vector<2x256xf32>, vector<32x256xf32> -> vector<32x256xf32>
    %123 = arith.addf %116, %122 : vector<32x256xf32>
    %c15_i32_50 = arith.constant 15 : i32
    %124 = tpu.dynamic_rotate %107 by %c15_i32_50 dim 1 : vector<2x256xf32>, i32 -> vector<2x256xf32>
    %125 = vector.extract_strided_slice %12 {offsets = [2, 0], sizes = [1, 256], strides = [1, 1]} : vector<8x256xf32> to vector<1x256xf32>
    %126 = vector.broadcast %125 : vector<1x256xf32> to vector<2x256xf32>
    %127 = arith.mulf %124, %126 : vector<2x256xf32>
    %128 = vector.extract_strided_slice %1 {offsets = [0, 8], sizes = [32, 2], strides = [1, 1]} : vector<32x20xf32> to vector<32x2xf32>
    %cst_51 = arith.constant dense<0.000000e+00> : vector<32x256xf32>
    %129 = tpu.matmul %128, %127, %cst_51 {dimension_numbers = #tpu.dot_dimension_numbers<[1], [0], [0], [1], [0, 0, 1, 1], [], []>, precision = #tpu.contract_precision<fp32>} : vector<32x2xf32>, vector<2x256xf32>, vector<32x256xf32> -> vector<32x256xf32>
    %130 = arith.addf %123, %129 : vector<32x256xf32>
    %c1_i32_52 = arith.constant 1 : i32
    %131 = tpu.dynamic_rotate %107 by %c1_i32_52 dim 1 : vector<2x256xf32>, i32 -> vector<2x256xf32>
    %132 = vector.extract_strided_slice %12 {offsets = [3, 0], sizes = [1, 256], strides = [1, 1]} : vector<8x256xf32> to vector<1x256xf32>
    %133 = vector.broadcast %132 : vector<1x256xf32> to vector<2x256xf32>
    %134 = arith.mulf %131, %133 : vector<2x256xf32>
    %135 = vector.extract_strided_slice %1 {offsets = [0, 10], sizes = [32, 2], strides = [1, 1]} : vector<32x20xf32> to vector<32x2xf32>
    %cst_53 = arith.constant dense<0.000000e+00> : vector<32x256xf32>
    %136 = tpu.matmul %135, %134, %cst_53 {dimension_numbers = #tpu.dot_dimension_numbers<[1], [0], [0], [1], [0, 0, 1, 1], [], []>, precision = #tpu.contract_precision<fp32>} : vector<32x2xf32>, vector<2x256xf32>, vector<32x256xf32> -> vector<32x256xf32>
    %137 = arith.addf %130, %136 : vector<32x256xf32>
    %c255_i32_54 = arith.constant 255 : i32
    %138 = tpu.dynamic_rotate %107 by %c255_i32_54 dim 1 : vector<2x256xf32>, i32 -> vector<2x256xf32>
    %139 = vector.extract_strided_slice %12 {offsets = [4, 0], sizes = [1, 256], strides = [1, 1]} : vector<8x256xf32> to vector<1x256xf32>
    %140 = vector.broadcast %139 : vector<1x256xf32> to vector<2x256xf32>
    %141 = arith.mulf %138, %140 : vector<2x256xf32>
    %142 = vector.extract_strided_slice %1 {offsets = [0, 12], sizes = [32, 2], strides = [1, 1]} : vector<32x20xf32> to vector<32x2xf32>
    %cst_55 = arith.constant dense<0.000000e+00> : vector<32x256xf32>
    %143 = tpu.matmul %142, %141, %cst_55 {dimension_numbers = #tpu.dot_dimension_numbers<[1], [0], [0], [1], [0, 0, 1, 1], [], []>, precision = #tpu.contract_precision<fp32>} : vector<32x2xf32>, vector<2x256xf32>, vector<32x256xf32> -> vector<32x256xf32>
    %144 = arith.addf %137, %143 : vector<32x256xf32>
    %c241_i32_56 = arith.constant 241 : i32
    %145 = tpu.dynamic_rotate %107 by %c241_i32_56 dim 1 : vector<2x256xf32>, i32 -> vector<2x256xf32>
    %146 = vector.extract_strided_slice %12 {offsets = [5, 0], sizes = [1, 256], strides = [1, 1]} : vector<8x256xf32> to vector<1x256xf32>
    %147 = vector.broadcast %146 : vector<1x256xf32> to vector<2x256xf32>
    %148 = arith.mulf %145, %147 : vector<2x256xf32>
    %149 = vector.extract_strided_slice %1 {offsets = [0, 14], sizes = [32, 2], strides = [1, 1]} : vector<32x20xf32> to vector<32x2xf32>
    %cst_57 = arith.constant dense<0.000000e+00> : vector<32x256xf32>
    %150 = tpu.matmul %149, %148, %cst_57 {dimension_numbers = #tpu.dot_dimension_numbers<[1], [0], [0], [1], [0, 0, 1, 1], [], []>, precision = #tpu.contract_precision<fp32>} : vector<32x2xf32>, vector<2x256xf32>, vector<32x256xf32> -> vector<32x256xf32>
    %151 = arith.addf %144, %150 : vector<32x256xf32>
    %c240_i32_58 = arith.constant 240 : i32
    %152 = tpu.dynamic_rotate %107 by %c240_i32_58 dim 1 : vector<2x256xf32>, i32 -> vector<2x256xf32>
    %153 = vector.extract_strided_slice %12 {offsets = [6, 0], sizes = [1, 256], strides = [1, 1]} : vector<8x256xf32> to vector<1x256xf32>
    %154 = vector.broadcast %153 : vector<1x256xf32> to vector<2x256xf32>
    %155 = arith.mulf %152, %154 : vector<2x256xf32>
    %156 = vector.extract_strided_slice %1 {offsets = [0, 16], sizes = [32, 2], strides = [1, 1]} : vector<32x20xf32> to vector<32x2xf32>
    %cst_59 = arith.constant dense<0.000000e+00> : vector<32x256xf32>
    %157 = tpu.matmul %156, %155, %cst_59 {dimension_numbers = #tpu.dot_dimension_numbers<[1], [0], [0], [1], [0, 0, 1, 1], [], []>, precision = #tpu.contract_precision<fp32>} : vector<32x2xf32>, vector<2x256xf32>, vector<32x256xf32> -> vector<32x256xf32>
    %158 = arith.addf %151, %157 : vector<32x256xf32>
    %c239_i32_60 = arith.constant 239 : i32
    %159 = tpu.dynamic_rotate %107 by %c239_i32_60 dim 1 : vector<2x256xf32>, i32 -> vector<2x256xf32>
    %160 = vector.extract_strided_slice %12 {offsets = [7, 0], sizes = [1, 256], strides = [1, 1]} : vector<8x256xf32> to vector<1x256xf32>
    %161 = vector.broadcast %160 : vector<1x256xf32> to vector<2x256xf32>
    %162 = arith.mulf %159, %161 : vector<2x256xf32>
    %163 = vector.extract_strided_slice %1 {offsets = [0, 18], sizes = [32, 2], strides = [1, 1]} : vector<32x20xf32> to vector<32x2xf32>
    %cst_61 = arith.constant dense<0.000000e+00> : vector<32x256xf32>
    %164 = tpu.matmul %163, %162, %cst_61 {dimension_numbers = #tpu.dot_dimension_numbers<[1], [0], [0], [1], [0, 0, 1, 1], [], []>, precision = #tpu.contract_precision<fp32>} : vector<32x2xf32>, vector<2x256xf32>, vector<32x256xf32> -> vector<32x256xf32>
    %165 = arith.addf %158, %164 : vector<32x256xf32>
    %166 = vector.broadcast %3 : vector<32x1xf32> to vector<32x256xf32>
    %167 = arith.addf %165, %166 : vector<32x256xf32>
    %cst_62 = arith.constant 0.000000e+00 : f32
    %168 = vector.broadcast %cst_62 : f32 to vector<32x256xf32>
    %169 = arith.maximumf %167, %168 : vector<32x256xf32>
    %cst_63 = arith.constant dense<0.000000e+00> : vector<4x256xf32>
    %170 = tpu.matmul %5, %169, %cst_63 {dimension_numbers = #tpu.dot_dimension_numbers<[1], [0], [0], [1], [0, 0, 1, 1], [], []>, precision = #tpu.contract_precision<fp32>} : vector<4x32xf32>, vector<32x256xf32>, vector<4x256xf32> -> vector<4x256xf32>
    %171 = vector.broadcast %7 : vector<4x1xf32> to vector<4x256xf32>
    %172 = arith.addf %170, %171 : vector<4x256xf32>
    %173 = arith.addf %106, %172 : vector<4x256xf32>
    %cst_64 = arith.constant dense<0.000000e+00> : vector<256xf32>
    %174 = vector.multi_reduction <add>, %173, %cst_64 [0] : vector<4x256xf32> to vector<256xf32>
    %175 = vector.shape_cast %174 : vector<256xf32> to vector<1x256xf32>
    %cst_65 = arith.constant 4.000000e+00 : f32
    %176 = vector.broadcast %cst_65 : f32 to vector<1x256xf32>
    %177 = arith.divf %175, %176 : vector<1x256xf32>
    %178 = vector.broadcast %177 : vector<1x256xf32> to vector<4x256xf32>
    %179 = arith.subf %173, %178 : vector<4x256xf32>
    %180 = arith.mulf %179, %179 : vector<4x256xf32>
    %cst_66 = arith.constant dense<0.000000e+00> : vector<256xf32>
    %181 = vector.multi_reduction <add>, %180, %cst_66 [0] : vector<4x256xf32> to vector<256xf32>
    %182 = vector.shape_cast %181 : vector<256xf32> to vector<1x256xf32>
    %cst_67 = arith.constant 4.000000e+00 : f32
    %183 = vector.broadcast %cst_67 : f32 to vector<1x256xf32>
    %184 = arith.divf %182, %183 : vector<1x256xf32>
    %cst_68 = arith.constant 9.99999974E-6 : f32
    %185 = vector.broadcast %cst_68 : f32 to vector<1x256xf32>
    %186 = arith.addf %184, %185 : vector<1x256xf32>
    %187 = math.rsqrt %186 : vector<1x256xf32>
    %188 = vector.broadcast %187 : vector<1x256xf32> to vector<4x256xf32>
    %189 = arith.mulf %179, %188 : vector<4x256xf32>
    %190 = vector.broadcast %9 : vector<4x1xf32> to vector<4x256xf32>
    %191 = arith.mulf %189, %190 : vector<4x256xf32>
    %192 = vector.broadcast %11 : vector<4x1xf32> to vector<4x256xf32>
    %193 = arith.addf %191, %192 : vector<4x256xf32>
    %c0_69 = arith.constant 0 : index
    %c1_70 = arith.constant 1 : index
    %c0_71 = arith.constant 0 : index
    %c0_72 = arith.constant 0 : index
    %194 = vector.load %arg10[%c0_69, %c1_70, %c0_71, %c0_72] : memref<1x2x4x256xf32, #tpu.memory_space<vmem>>, vector<1x1x4x256xf32>
    %195 = vector.shape_cast %194 : vector<1x1x4x256xf32> to vector<4x256xf32>
    %196 = vector.shape_cast %193 : vector<4x256xf32> to vector<1x1x4x256xf32>
    tpu.vector_store %arg10[%c0_69, %c1_70, %c0_71, %c0_72], %196 {strides = array<i32>} : memref<1x2x4x256xf32, #tpu.memory_space<vmem>>, vector<1x1x4x256xf32>,
    return
  }
  func.func @transform_0(%arg0: i32, %arg1: i32) -> (i32, i32, i32, i32) {
    %c0_i32 = arith.constant 0 : i32
    %c0_i32_0 = arith.constant 0 : i32
    %c0_i32_1 = arith.constant 0 : i32
    return %arg0, %arg1, %c0_i32, %c0_i32_0 : i32, i32, i32, i32
  }
  func.func @transform_1(%arg0: i32, %arg1: i32) -> (i32, i32) {
    %c0_i32 = arith.constant 0 : i32
    %c0_i32_0 = arith.constant 0 : i32
    %c0_i32_1 = arith.constant 0 : i32
    return %c0_i32, %c0_i32_0 : i32, i32
  }
  func.func @transform_2(%arg0: i32, %arg1: i32) -> (i32, i32, i32) {
    %c0_i32 = arith.constant 0 : i32
    %c0_i32_0 = arith.constant 0 : i32
    %c0_i32_1 = arith.constant 0 : i32
    return %arg0, %c0_i32, %c0_i32_0 : i32, i32, i32
  }
  func.func @transform_3(%arg0: i32, %arg1: i32) -> (i32, i32, i32) {
    %c0_i32 = arith.constant 0 : i32
    %c0_i32_0 = arith.constant 0 : i32
    %c0_i32_1 = arith.constant 0 : i32
    return %arg0, %c0_i32, %c0_i32_0 : i32, i32, i32
  }
  func.func @transform_4(%arg0: i32, %arg1: i32) -> (i32, i32, i32) {
    %c0_i32 = arith.constant 0 : i32
    %c0_i32_0 = arith.constant 0 : i32
    %c0_i32_1 = arith.constant 0 : i32
    return %arg0, %c0_i32, %c0_i32_0 : i32, i32, i32
  }
  func.func @transform_5(%arg0: i32, %arg1: i32) -> (i32, i32, i32) {
    %c0_i32 = arith.constant 0 : i32
    %c0_i32_0 = arith.constant 0 : i32
    %c0_i32_1 = arith.constant 0 : i32
    return %arg0, %c0_i32, %c0_i32_0 : i32, i32, i32
  }
  func.func @transform_6(%arg0: i32, %arg1: i32) -> (i32, i32, i32) {
    %c0_i32 = arith.constant 0 : i32
    %c0_i32_0 = arith.constant 0 : i32
    %c0_i32_1 = arith.constant 0 : i32
    return %arg0, %c0_i32, %c0_i32_0 : i32, i32, i32
  }
  func.func @transform_7(%arg0: i32, %arg1: i32) -> (i32, i32, i32) {
    %c0_i32 = arith.constant 0 : i32
    %c0_i32_0 = arith.constant 0 : i32
    %c0_i32_1 = arith.constant 0 : i32
    return %arg0, %c0_i32, %c0_i32_0 : i32, i32, i32
  }
  func.func @transform_8(%arg0: i32, %arg1: i32) -> (i32, i32, i32, i32) {
    %c0_i32 = arith.constant 0 : i32
    %c0_i32_0 = arith.constant 0 : i32
    %c0_i32_1 = arith.constant 0 : i32
    return %arg0, %arg1, %c0_i32, %c0_i32_0 : i32, i32, i32, i32
  }
}

module attributes {stable_mosaic.version = 11 : i64} {
  func.func @_nca_kernel(%arg0: i32, %arg1: i32, %arg2: memref<1x2x4x256xf32, #tpu.memory_space<vmem>>, %arg3: memref<8x256xf32, #tpu.memory_space<vmem>>, %arg4: memref<1x32x20xf32, #tpu.memory_space<vmem>>, %arg5: memref<1x32x1xf32, #tpu.memory_space<vmem>>, %arg6: memref<1x4x32xf32, #tpu.memory_space<vmem>>, %arg7: memref<1x4x1xf32, #tpu.memory_space<vmem>>, %arg8: memref<1x4x1xf32, #tpu.memory_space<vmem>>, %arg9: memref<1x4x1xf32, #tpu.memory_space<vmem>>, %arg10: memref<1x2x4x256xf32, #tpu.memory_space<vmem>>) attributes {dimension_semantics = [#tpu.dimension_semantics<parallel>, #tpu.dimension_semantics<parallel>], iteration_bounds = array<i64: 2, 1>, scalar_prefetch = 0 : i64, scratch_operands = 0 : i64, tpu.core_type = #tpu.core_type<tc>, window_params = [{transform_indices = @transform_0, window_bounds = array<i64: 1, 2, 4, 256>}, {pipeline_mode = #tpu.pipeline_mode<synchronous>, transform_indices = @transform_1, window_bounds = array<i64: 8, 256>}, {transform_indices = @transform_2, window_bounds = array<i64: 1, 32, 20>}, {transform_indices = @transform_3, window_bounds = array<i64: 1, 32, 1>}, {transform_indices = @transform_4, window_bounds = array<i64: 1, 4, 32>}, {transform_indices = @transform_5, window_bounds = array<i64: 1, 4, 1>}, {transform_indices = @transform_6, window_bounds = array<i64: 1, 4, 1>}, {transform_indices = @transform_7, window_bounds = array<i64: 1, 4, 1>}, {transform_indices = @transform_8, window_bounds = array<i64: 1, 2, 4, 256>}]} {
    %c0 = arith.constant 0 : index
    %c0_0 = arith.constant 0 : index
    %c0_1 = arith.constant 0 : index
    %0 = vector.load %arg4[%c0, %c0_0, %c0_1] : memref<1x32x20xf32, #tpu.memory_space<vmem>>, vector<1x32x20xf32>
    %1 = vector.shape_cast %0 : vector<1x32x20xf32> to vector<32x20xf32>
    %c0_2 = arith.constant 0 : index
    %c0_3 = arith.constant 0 : index
    %c0_4 = arith.constant 0 : index
    %2 = vector.load %arg5[%c0_2, %c0_3, %c0_4] : memref<1x32x1xf32, #tpu.memory_space<vmem>>, vector<1x32x1xf32>
    %3 = vector.shape_cast %2 : vector<1x32x1xf32> to vector<32x1xf32>
    %c0_5 = arith.constant 0 : index
    %c0_6 = arith.constant 0 : index
    %c0_7 = arith.constant 0 : index
    %4 = vector.load %arg6[%c0_5, %c0_6, %c0_7] : memref<1x4x32xf32, #tpu.memory_space<vmem>>, vector<1x4x32xf32>
    %5 = vector.shape_cast %4 : vector<1x4x32xf32> to vector<4x32xf32>
    %c0_8 = arith.constant 0 : index
    %c0_9 = arith.constant 0 : index
    %c0_10 = arith.constant 0 : index
    %6 = vector.load %arg7[%c0_8, %c0_9, %c0_10] : memref<1x4x1xf32, #tpu.memory_space<vmem>>, vector<1x4x1xf32>
    %7 = vector.shape_cast %6 : vector<1x4x1xf32> to vector<4x1xf32>
    %c0_11 = arith.constant 0 : index
    %c0_12 = arith.constant 0 : index
    %c0_13 = arith.constant 0 : index
    %8 = vector.load %arg8[%c0_11, %c0_12, %c0_13] : memref<1x4x1xf32, #tpu.memory_space<vmem>>, vector<1x4x1xf32>
    %9 = vector.shape_cast %8 : vector<1x4x1xf32> to vector<4x1xf32>
    %c0_14 = arith.constant 0 : index
    %c0_15 = arith.constant 0 : index
    %c0_16 = arith.constant 0 : index
    %10 = vector.load %arg9[%c0_14, %c0_15, %c0_16] : memref<1x4x1xf32, #tpu.memory_space<vmem>>, vector<1x4x1xf32>
    %11 = vector.shape_cast %10 : vector<1x4x1xf32> to vector<4x1xf32>
    %c0_17 = arith.constant 0 : index
    %c0_18 = arith.constant 0 : index
    %12 = vector.load %arg3[%c0_17, %c0_18] : memref<8x256xf32, #tpu.memory_space<vmem>>, vector<8x256xf32>
    %c0_19 = arith.constant 0 : index
    %c0_20 = arith.constant 0 : index
    %c0_21 = arith.constant 0 : index
    %c0_22 = arith.constant 0 : index
    %13 = vector.load %arg2[%c0_19, %c0_20, %c0_21, %c0_22] : memref<1x2x4x256xf32, #tpu.memory_space<vmem>>, vector<1x1x4x256xf32>
    %14 = vector.shape_cast %13 : vector<1x1x4x256xf32> to vector<4x256xf32>
    %15 = vector.extract_strided_slice %14 {offsets = [0, 0], sizes = [2, 256], strides = [1, 1]} : vector<4x256xf32> to vector<2x256xf32>
    %16 = vector.extract_strided_slice %1 {offsets = [0, 0], sizes = [32, 4], strides = [1, 1]} : vector<32x20xf32> to vector<32x4xf32>
    %cst = arith.constant dense<0.000000e+00> : vector<32x256xf32>
    %17 = tpu.matmul %16, %14, %cst {dimension_numbers = #tpu.dot_dimension_numbers<[1], [0], [0], [1], [0, 0, 1, 1], [], []>} : vector<32x4xf32>, vector<4x256xf32>, vector<32x256xf32> -> vector<32x256xf32>
    %c17_i32 = arith.constant 17 : i32
    %18 = tpu.dynamic_rotate %15 by %c17_i32 dim 1 : vector<2x256xf32>, i32 -> vector<2x256xf32>
    %19 = vector.extract_strided_slice %12 {offsets = [0, 0], sizes = [1, 256], strides = [1, 1]} : vector<8x256xf32> to vector<1x256xf32>
    %20 = vector.broadcast %19 : vector<1x256xf32> to vector<2x256xf32>
    %21 = arith.mulf %18, %20 : vector<2x256xf32>
    %22 = vector.extract_strided_slice %1 {offsets = [0, 4], sizes = [32, 2], strides = [1, 1]} : vector<32x20xf32> to vector<32x2xf32>
    %cst_23 = arith.constant dense<0.000000e+00> : vector<32x256xf32>
    %23 = tpu.matmul %22, %21, %cst_23 {dimension_numbers = #tpu.dot_dimension_numbers<[1], [0], [0], [1], [0, 0, 1, 1], [], []>} : vector<32x2xf32>, vector<2x256xf32>, vector<32x256xf32> -> vector<32x256xf32>
    %24 = arith.addf %17, %23 : vector<32x256xf32>
    %c16_i32 = arith.constant 16 : i32
    %25 = tpu.dynamic_rotate %15 by %c16_i32 dim 1 : vector<2x256xf32>, i32 -> vector<2x256xf32>
    %26 = vector.extract_strided_slice %12 {offsets = [1, 0], sizes = [1, 256], strides = [1, 1]} : vector<8x256xf32> to vector<1x256xf32>
    %27 = vector.broadcast %26 : vector<1x256xf32> to vector<2x256xf32>
    %28 = arith.mulf %25, %27 : vector<2x256xf32>
    %29 = vector.extract_strided_slice %1 {offsets = [0, 6], sizes = [32, 2], strides = [1, 1]} : vector<32x20xf32> to vector<32x2xf32>
    %cst_24 = arith.constant dense<0.000000e+00> : vector<32x256xf32>
    %30 = tpu.matmul %29, %28, %cst_24 {dimension_numbers = #tpu.dot_dimension_numbers<[1], [0], [0], [1], [0, 0, 1, 1], [], []>} : vector<32x2xf32>, vector<2x256xf32>, vector<32x256xf32> -> vector<32x256xf32>
    %31 = arith.addf %24, %30 : vector<32x256xf32>
    %c15_i32 = arith.constant 15 : i32
    %32 = tpu.dynamic_rotate %15 by %c15_i32 dim 1 : vector<2x256xf32>, i32 -> vector<2x256xf32>
    %33 = vector.extract_strided_slice %12 {offsets = [2, 0], sizes = [1, 256], strides = [1, 1]} : vector<8x256xf32> to vector<1x256xf32>
    %34 = vector.broadcast %33 : vector<1x256xf32> to vector<2x256xf32>
    %35 = arith.mulf %32, %34 : vector<2x256xf32>
    %36 = vector.extract_strided_slice %1 {offsets = [0, 8], sizes = [32, 2], strides = [1, 1]} : vector<32x20xf32> to vector<32x2xf32>
    %cst_25 = arith.constant dense<0.000000e+00> : vector<32x256xf32>
    %37 = tpu.matmul %36, %35, %cst_25 {dimension_numbers = #tpu.dot_dimension_numbers<[1], [0], [0], [1], [0, 0, 1, 1], [], []>} : vector<32x2xf32>, vector<2x256xf32>, vector<32x256xf32> -> vector<32x256xf32>
    %38 = arith.addf %31, %37 : vector<32x256xf32>
    %c1_i32 = arith.constant 1 : i32
    %39 = tpu.dynamic_rotate %15 by %c1_i32 dim 1 : vector<2x256xf32>, i32 -> vector<2x256xf32>
    %40 = vector.extract_strided_slice %12 {offsets = [3, 0], sizes = [1, 256], strides = [1, 1]} : vector<8x256xf32> to vector<1x256xf32>
    %41 = vector.broadcast %40 : vector<1x256xf32> to vector<2x256xf32>
    %42 = arith.mulf %39, %41 : vector<2x256xf32>
    %43 = vector.extract_strided_slice %1 {offsets = [0, 10], sizes = [32, 2], strides = [1, 1]} : vector<32x20xf32> to vector<32x2xf32>
    %cst_26 = arith.constant dense<0.000000e+00> : vector<32x256xf32>
    %44 = tpu.matmul %43, %42, %cst_26 {dimension_numbers = #tpu.dot_dimension_numbers<[1], [0], [0], [1], [0, 0, 1, 1], [], []>} : vector<32x2xf32>, vector<2x256xf32>, vector<32x256xf32> -> vector<32x256xf32>
    %45 = arith.addf %38, %44 : vector<32x256xf32>
    %c255_i32 = arith.constant 255 : i32
    %46 = tpu.dynamic_rotate %15 by %c255_i32 dim 1 : vector<2x256xf32>, i32 -> vector<2x256xf32>
    %47 = vector.extract_strided_slice %12 {offsets = [4, 0], sizes = [1, 256], strides = [1, 1]} : vector<8x256xf32> to vector<1x256xf32>
    %48 = vector.broadcast %47 : vector<1x256xf32> to vector<2x256xf32>
    %49 = arith.mulf %46, %48 : vector<2x256xf32>
    %50 = vector.extract_strided_slice %1 {offsets = [0, 12], sizes = [32, 2], strides = [1, 1]} : vector<32x20xf32> to vector<32x2xf32>
    %cst_27 = arith.constant dense<0.000000e+00> : vector<32x256xf32>
    %51 = tpu.matmul %50, %49, %cst_27 {dimension_numbers = #tpu.dot_dimension_numbers<[1], [0], [0], [1], [0, 0, 1, 1], [], []>} : vector<32x2xf32>, vector<2x256xf32>, vector<32x256xf32> -> vector<32x256xf32>
    %52 = arith.addf %45, %51 : vector<32x256xf32>
    %c241_i32 = arith.constant 241 : i32
    %53 = tpu.dynamic_rotate %15 by %c241_i32 dim 1 : vector<2x256xf32>, i32 -> vector<2x256xf32>
    %54 = vector.extract_strided_slice %12 {offsets = [5, 0], sizes = [1, 256], strides = [1, 1]} : vector<8x256xf32> to vector<1x256xf32>
    %55 = vector.broadcast %54 : vector<1x256xf32> to vector<2x256xf32>
    %56 = arith.mulf %53, %55 : vector<2x256xf32>
    %57 = vector.extract_strided_slice %1 {offsets = [0, 14], sizes = [32, 2], strides = [1, 1]} : vector<32x20xf32> to vector<32x2xf32>
    %cst_28 = arith.constant dense<0.000000e+00> : vector<32x256xf32>
    %58 = tpu.matmul %57, %56, %cst_28 {dimension_numbers = #tpu.dot_dimension_numbers<[1], [0], [0], [1], [0, 0, 1, 1], [], []>} : vector<32x2xf32>, vector<2x256xf32>, vector<32x256xf32> -> vector<32x256xf32>
    %59 = arith.addf %52, %58 : vector<32x256xf32>
    %c240_i32 = arith.constant 240 : i32
    %60 = tpu.dynamic_rotate %15 by %c240_i32 dim 1 : vector<2x256xf32>, i32 -> vector<2x256xf32>
    %61 = vector.extract_strided_slice %12 {offsets = [6, 0], sizes = [1, 256], strides = [1, 1]} : vector<8x256xf32> to vector<1x256xf32>
    %62 = vector.broadcast %61 : vector<1x256xf32> to vector<2x256xf32>
    %63 = arith.mulf %60, %62 : vector<2x256xf32>
    %64 = vector.extract_strided_slice %1 {offsets = [0, 16], sizes = [32, 2], strides = [1, 1]} : vector<32x20xf32> to vector<32x2xf32>
    %cst_29 = arith.constant dense<0.000000e+00> : vector<32x256xf32>
    %65 = tpu.matmul %64, %63, %cst_29 {dimension_numbers = #tpu.dot_dimension_numbers<[1], [0], [0], [1], [0, 0, 1, 1], [], []>} : vector<32x2xf32>, vector<2x256xf32>, vector<32x256xf32> -> vector<32x256xf32>
    %66 = arith.addf %59, %65 : vector<32x256xf32>
    %c239_i32 = arith.constant 239 : i32
    %67 = tpu.dynamic_rotate %15 by %c239_i32 dim 1 : vector<2x256xf32>, i32 -> vector<2x256xf32>
    %68 = vector.extract_strided_slice %12 {offsets = [7, 0], sizes = [1, 256], strides = [1, 1]} : vector<8x256xf32> to vector<1x256xf32>
    %69 = vector.broadcast %68 : vector<1x256xf32> to vector<2x256xf32>
    %70 = arith.mulf %67, %69 : vector<2x256xf32>
    %71 = vector.extract_strided_slice %1 {offsets = [0, 18], sizes = [32, 2], strides = [1, 1]} : vector<32x20xf32> to vector<32x2xf32>
    %cst_30 = arith.constant dense<0.000000e+00> : vector<32x256xf32>
    %72 = tpu.matmul %71, %70, %cst_30 {dimension_numbers = #tpu.dot_dimension_numbers<[1], [0], [0], [1], [0, 0, 1, 1], [], []>} : vector<32x2xf32>, vector<2x256xf32>, vector<32x256xf32> -> vector<32x256xf32>
    %73 = arith.addf %66, %72 : vector<32x256xf32>
    %74 = vector.broadcast %3 : vector<32x1xf32> to vector<32x256xf32>
    %75 = arith.addf %73, %74 : vector<32x256xf32>
    %cst_31 = arith.constant 0.000000e+00 : f32
    %76 = vector.broadcast %cst_31 : f32 to vector<32x256xf32>
    %77 = arith.maximumf %75, %76 : vector<32x256xf32>
    %cst_32 = arith.constant dense<0.000000e+00> : vector<4x256xf32>
    %78 = tpu.matmul %5, %77, %cst_32 {dimension_numbers = #tpu.dot_dimension_numbers<[1], [0], [0], [1], [0, 0, 1, 1], [], []>} : vector<4x32xf32>, vector<32x256xf32>, vector<4x256xf32> -> vector<4x256xf32>
    %79 = vector.broadcast %7 : vector<4x1xf32> to vector<4x256xf32>
    %80 = arith.addf %78, %79 : vector<4x256xf32>
    %81 = arith.addf %14, %80 : vector<4x256xf32>
    %cst_33 = arith.constant dense<0.000000e+00> : vector<256xf32>
    %82 = vector.multi_reduction <add>, %81, %cst_33 [0] : vector<4x256xf32> to vector<256xf32>
    %83 = vector.shape_cast %82 : vector<256xf32> to vector<1x256xf32>
    %cst_34 = arith.constant 4.000000e+00 : f32
    %84 = vector.broadcast %cst_34 : f32 to vector<1x256xf32>
    %85 = arith.divf %83, %84 : vector<1x256xf32>
    %86 = vector.broadcast %85 : vector<1x256xf32> to vector<4x256xf32>
    %87 = arith.subf %81, %86 : vector<4x256xf32>
    %88 = arith.mulf %87, %87 : vector<4x256xf32>
    %cst_35 = arith.constant dense<0.000000e+00> : vector<256xf32>
    %89 = vector.multi_reduction <add>, %88, %cst_35 [0] : vector<4x256xf32> to vector<256xf32>
    %90 = vector.shape_cast %89 : vector<256xf32> to vector<1x256xf32>
    %cst_36 = arith.constant 4.000000e+00 : f32
    %91 = vector.broadcast %cst_36 : f32 to vector<1x256xf32>
    %92 = arith.divf %90, %91 : vector<1x256xf32>
    %cst_37 = arith.constant 9.99999974E-6 : f32
    %93 = vector.broadcast %cst_37 : f32 to vector<1x256xf32>
    %94 = arith.addf %92, %93 : vector<1x256xf32>
    %95 = math.rsqrt %94 : vector<1x256xf32>
    %96 = vector.broadcast %95 : vector<1x256xf32> to vector<4x256xf32>
    %97 = arith.mulf %87, %96 : vector<4x256xf32>
    %98 = vector.broadcast %9 : vector<4x1xf32> to vector<4x256xf32>
    %99 = arith.mulf %97, %98 : vector<4x256xf32>
    %100 = vector.broadcast %11 : vector<4x1xf32> to vector<4x256xf32>
    %101 = arith.addf %99, %100 : vector<4x256xf32>
    %c0_38 = arith.constant 0 : index
    %c0_39 = arith.constant 0 : index
    %c0_40 = arith.constant 0 : index
    %c0_41 = arith.constant 0 : index
    %102 = vector.load %arg10[%c0_38, %c0_39, %c0_40, %c0_41] : memref<1x2x4x256xf32, #tpu.memory_space<vmem>>, vector<1x1x4x256xf32>
    %103 = vector.shape_cast %102 : vector<1x1x4x256xf32> to vector<4x256xf32>
    %104 = vector.shape_cast %101 : vector<4x256xf32> to vector<1x1x4x256xf32>
    tpu.vector_store %arg10[%c0_38, %c0_39, %c0_40, %c0_41], %104 {strides = array<i32>} : memref<1x2x4x256xf32, #tpu.memory_space<vmem>>, vector<1x1x4x256xf32>,
    %c0_42 = arith.constant 0 : index
    %c1 = arith.constant 1 : index
    %c0_43 = arith.constant 0 : index
    %c0_44 = arith.constant 0 : index
    %105 = vector.load %arg2[%c0_42, %c1, %c0_43, %c0_44] : memref<1x2x4x256xf32, #tpu.memory_space<vmem>>, vector<1x1x4x256xf32>
    %106 = vector.shape_cast %105 : vector<1x1x4x256xf32> to vector<4x256xf32>
    %107 = vector.extract_strided_slice %106 {offsets = [0, 0], sizes = [2, 256], strides = [1, 1]} : vector<4x256xf32> to vector<2x256xf32>
    %108 = vector.extract_strided_slice %1 {offsets = [0, 0], sizes = [32, 4], strides = [1, 1]} : vector<32x20xf32> to vector<32x4xf32>
    %cst_45 = arith.constant dense<0.000000e+00> : vector<32x256xf32>
    %109 = tpu.matmul %108, %106, %cst_45 {dimension_numbers = #tpu.dot_dimension_numbers<[1], [0], [0], [1], [0, 0, 1, 1], [], []>} : vector<32x4xf32>, vector<4x256xf32>, vector<32x256xf32> -> vector<32x256xf32>
    %c17_i32_46 = arith.constant 17 : i32
    %110 = tpu.dynamic_rotate %107 by %c17_i32_46 dim 1 : vector<2x256xf32>, i32 -> vector<2x256xf32>
    %111 = vector.extract_strided_slice %12 {offsets = [0, 0], sizes = [1, 256], strides = [1, 1]} : vector<8x256xf32> to vector<1x256xf32>
    %112 = vector.broadcast %111 : vector<1x256xf32> to vector<2x256xf32>
    %113 = arith.mulf %110, %112 : vector<2x256xf32>
    %114 = vector.extract_strided_slice %1 {offsets = [0, 4], sizes = [32, 2], strides = [1, 1]} : vector<32x20xf32> to vector<32x2xf32>
    %cst_47 = arith.constant dense<0.000000e+00> : vector<32x256xf32>
    %115 = tpu.matmul %114, %113, %cst_47 {dimension_numbers = #tpu.dot_dimension_numbers<[1], [0], [0], [1], [0, 0, 1, 1], [], []>} : vector<32x2xf32>, vector<2x256xf32>, vector<32x256xf32> -> vector<32x256xf32>
    %116 = arith.addf %109, %115 : vector<32x256xf32>
    %c16_i32_48 = arith.constant 16 : i32
    %117 = tpu.dynamic_rotate %107 by %c16_i32_48 dim 1 : vector<2x256xf32>, i32 -> vector<2x256xf32>
    %118 = vector.extract_strided_slice %12 {offsets = [1, 0], sizes = [1, 256], strides = [1, 1]} : vector<8x256xf32> to vector<1x256xf32>
    %119 = vector.broadcast %118 : vector<1x256xf32> to vector<2x256xf32>
    %120 = arith.mulf %117, %119 : vector<2x256xf32>
    %121 = vector.extract_strided_slice %1 {offsets = [0, 6], sizes = [32, 2], strides = [1, 1]} : vector<32x20xf32> to vector<32x2xf32>
    %cst_49 = arith.constant dense<0.000000e+00> : vector<32x256xf32>
    %122 = tpu.matmul %121, %120, %cst_49 {dimension_numbers = #tpu.dot_dimension_numbers<[1], [0], [0], [1], [0, 0, 1, 1], [], []>} : vector<32x2xf32>, vector<2x256xf32>, vector<32x256xf32> -> vector<32x256xf32>
    %123 = arith.addf %116, %122 : vector<32x256xf32>
    %c15_i32_50 = arith.constant 15 : i32
    %124 = tpu.dynamic_rotate %107 by %c15_i32_50 dim 1 : vector<2x256xf32>, i32 -> vector<2x256xf32>
    %125 = vector.extract_strided_slice %12 {offsets = [2, 0], sizes = [1, 256], strides = [1, 1]} : vector<8x256xf32> to vector<1x256xf32>
    %126 = vector.broadcast %125 : vector<1x256xf32> to vector<2x256xf32>
    %127 = arith.mulf %124, %126 : vector<2x256xf32>
    %128 = vector.extract_strided_slice %1 {offsets = [0, 8], sizes = [32, 2], strides = [1, 1]} : vector<32x20xf32> to vector<32x2xf32>
    %cst_51 = arith.constant dense<0.000000e+00> : vector<32x256xf32>
    %129 = tpu.matmul %128, %127, %cst_51 {dimension_numbers = #tpu.dot_dimension_numbers<[1], [0], [0], [1], [0, 0, 1, 1], [], []>} : vector<32x2xf32>, vector<2x256xf32>, vector<32x256xf32> -> vector<32x256xf32>
    %130 = arith.addf %123, %129 : vector<32x256xf32>
    %c1_i32_52 = arith.constant 1 : i32
    %131 = tpu.dynamic_rotate %107 by %c1_i32_52 dim 1 : vector<2x256xf32>, i32 -> vector<2x256xf32>
    %132 = vector.extract_strided_slice %12 {offsets = [3, 0], sizes = [1, 256], strides = [1, 1]} : vector<8x256xf32> to vector<1x256xf32>
    %133 = vector.broadcast %132 : vector<1x256xf32> to vector<2x256xf32>
    %134 = arith.mulf %131, %133 : vector<2x256xf32>
    %135 = vector.extract_strided_slice %1 {offsets = [0, 10], sizes = [32, 2], strides = [1, 1]} : vector<32x20xf32> to vector<32x2xf32>
    %cst_53 = arith.constant dense<0.000000e+00> : vector<32x256xf32>
    %136 = tpu.matmul %135, %134, %cst_53 {dimension_numbers = #tpu.dot_dimension_numbers<[1], [0], [0], [1], [0, 0, 1, 1], [], []>} : vector<32x2xf32>, vector<2x256xf32>, vector<32x256xf32> -> vector<32x256xf32>
    %137 = arith.addf %130, %136 : vector<32x256xf32>
    %c255_i32_54 = arith.constant 255 : i32
    %138 = tpu.dynamic_rotate %107 by %c255_i32_54 dim 1 : vector<2x256xf32>, i32 -> vector<2x256xf32>
    %139 = vector.extract_strided_slice %12 {offsets = [4, 0], sizes = [1, 256], strides = [1, 1]} : vector<8x256xf32> to vector<1x256xf32>
    %140 = vector.broadcast %139 : vector<1x256xf32> to vector<2x256xf32>
    %141 = arith.mulf %138, %140 : vector<2x256xf32>
    %142 = vector.extract_strided_slice %1 {offsets = [0, 12], sizes = [32, 2], strides = [1, 1]} : vector<32x20xf32> to vector<32x2xf32>
    %cst_55 = arith.constant dense<0.000000e+00> : vector<32x256xf32>
    %143 = tpu.matmul %142, %141, %cst_55 {dimension_numbers = #tpu.dot_dimension_numbers<[1], [0], [0], [1], [0, 0, 1, 1], [], []>} : vector<32x2xf32>, vector<2x256xf32>, vector<32x256xf32> -> vector<32x256xf32>
    %144 = arith.addf %137, %143 : vector<32x256xf32>
    %c241_i32_56 = arith.constant 241 : i32
    %145 = tpu.dynamic_rotate %107 by %c241_i32_56 dim 1 : vector<2x256xf32>, i32 -> vector<2x256xf32>
    %146 = vector.extract_strided_slice %12 {offsets = [5, 0], sizes = [1, 256], strides = [1, 1]} : vector<8x256xf32> to vector<1x256xf32>
    %147 = vector.broadcast %146 : vector<1x256xf32> to vector<2x256xf32>
    %148 = arith.mulf %145, %147 : vector<2x256xf32>
    %149 = vector.extract_strided_slice %1 {offsets = [0, 14], sizes = [32, 2], strides = [1, 1]} : vector<32x20xf32> to vector<32x2xf32>
    %cst_57 = arith.constant dense<0.000000e+00> : vector<32x256xf32>
    %150 = tpu.matmul %149, %148, %cst_57 {dimension_numbers = #tpu.dot_dimension_numbers<[1], [0], [0], [1], [0, 0, 1, 1], [], []>} : vector<32x2xf32>, vector<2x256xf32>, vector<32x256xf32> -> vector<32x256xf32>
    %151 = arith.addf %144, %150 : vector<32x256xf32>
    %c240_i32_58 = arith.constant 240 : i32
    %152 = tpu.dynamic_rotate %107 by %c240_i32_58 dim 1 : vector<2x256xf32>, i32 -> vector<2x256xf32>
    %153 = vector.extract_strided_slice %12 {offsets = [6, 0], sizes = [1, 256], strides = [1, 1]} : vector<8x256xf32> to vector<1x256xf32>
    %154 = vector.broadcast %153 : vector<1x256xf32> to vector<2x256xf32>
    %155 = arith.mulf %152, %154 : vector<2x256xf32>
    %156 = vector.extract_strided_slice %1 {offsets = [0, 16], sizes = [32, 2], strides = [1, 1]} : vector<32x20xf32> to vector<32x2xf32>
    %cst_59 = arith.constant dense<0.000000e+00> : vector<32x256xf32>
    %157 = tpu.matmul %156, %155, %cst_59 {dimension_numbers = #tpu.dot_dimension_numbers<[1], [0], [0], [1], [0, 0, 1, 1], [], []>} : vector<32x2xf32>, vector<2x256xf32>, vector<32x256xf32> -> vector<32x256xf32>
    %158 = arith.addf %151, %157 : vector<32x256xf32>
    %c239_i32_60 = arith.constant 239 : i32
    %159 = tpu.dynamic_rotate %107 by %c239_i32_60 dim 1 : vector<2x256xf32>, i32 -> vector<2x256xf32>
    %160 = vector.extract_strided_slice %12 {offsets = [7, 0], sizes = [1, 256], strides = [1, 1]} : vector<8x256xf32> to vector<1x256xf32>
    %161 = vector.broadcast %160 : vector<1x256xf32> to vector<2x256xf32>
    %162 = arith.mulf %159, %161 : vector<2x256xf32>
    %163 = vector.extract_strided_slice %1 {offsets = [0, 18], sizes = [32, 2], strides = [1, 1]} : vector<32x20xf32> to vector<32x2xf32>
    %cst_61 = arith.constant dense<0.000000e+00> : vector<32x256xf32>
    %164 = tpu.matmul %163, %162, %cst_61 {dimension_numbers = #tpu.dot_dimension_numbers<[1], [0], [0], [1], [0, 0, 1, 1], [], []>} : vector<32x2xf32>, vector<2x256xf32>, vector<32x256xf32> -> vector<32x256xf32>
    %165 = arith.addf %158, %164 : vector<32x256xf32>
    %166 = vector.broadcast %3 : vector<32x1xf32> to vector<32x256xf32>
    %167 = arith.addf %165, %166 : vector<32x256xf32>
    %cst_62 = arith.constant 0.000000e+00 : f32
    %168 = vector.broadcast %cst_62 : f32 to vector<32x256xf32>
    %169 = arith.maximumf %167, %168 : vector<32x256xf32>
    %cst_63 = arith.constant dense<0.000000e+00> : vector<4x256xf32>
    %170 = tpu.matmul %5, %169, %cst_63 {dimension_numbers = #tpu.dot_dimension_numbers<[1], [0], [0], [1], [0, 0, 1, 1], [], []>} : vector<4x32xf32>, vector<32x256xf32>, vector<4x256xf32> -> vector<4x256xf32>
    %171 = vector.broadcast %7 : vector<4x1xf32> to vector<4x256xf32>
    %172 = arith.addf %170, %171 : vector<4x256xf32>
    %173 = arith.addf %106, %172 : vector<4x256xf32>
    %cst_64 = arith.constant dense<0.000000e+00> : vector<256xf32>
    %174 = vector.multi_reduction <add>, %173, %cst_64 [0] : vector<4x256xf32> to vector<256xf32>
    %175 = vector.shape_cast %174 : vector<256xf32> to vector<1x256xf32>
    %cst_65 = arith.constant 4.000000e+00 : f32
    %176 = vector.broadcast %cst_65 : f32 to vector<1x256xf32>
    %177 = arith.divf %175, %176 : vector<1x256xf32>
    %178 = vector.broadcast %177 : vector<1x256xf32> to vector<4x256xf32>
    %179 = arith.subf %173, %178 : vector<4x256xf32>
    %180 = arith.mulf %179, %179 : vector<4x256xf32>
    %cst_66 = arith.constant dense<0.000000e+00> : vector<256xf32>
    %181 = vector.multi_reduction <add>, %180, %cst_66 [0] : vector<4x256xf32> to vector<256xf32>
    %182 = vector.shape_cast %181 : vector<256xf32> to vector<1x256xf32>
    %cst_67 = arith.constant 4.000000e+00 : f32
    %183 = vector.broadcast %cst_67 : f32 to vector<1x256xf32>
    %184 = arith.divf %182, %183 : vector<1x256xf32>
    %cst_68 = arith.constant 9.99999974E-6 : f32
    %185 = vector.broadcast %cst_68 : f32 to vector<1x256xf32>
    %186 = arith.addf %184, %185 : vector<1x256xf32>
    %187 = math.rsqrt %186 : vector<1x256xf32>
    %188 = vector.broadcast %187 : vector<1x256xf32> to vector<4x256xf32>
    %189 = arith.mulf %179, %188 : vector<4x256xf32>
    %190 = vector.broadcast %9 : vector<4x1xf32> to vector<4x256xf32>
    %191 = arith.mulf %189, %190 : vector<4x256xf32>
    %192 = vector.broadcast %11 : vector<4x1xf32> to vector<4x256xf32>
    %193 = arith.addf %191, %192 : vector<4x256xf32>
    %c0_69 = arith.constant 0 : index
    %c1_70 = arith.constant 1 : index
    %c0_71 = arith.constant 0 : index
    %c0_72 = arith.constant 0 : index
    %194 = vector.load %arg10[%c0_69, %c1_70, %c0_71, %c0_72] : memref<1x2x4x256xf32, #tpu.memory_space<vmem>>, vector<1x1x4x256xf32>
    %195 = vector.shape_cast %194 : vector<1x1x4x256xf32> to vector<4x256xf32>
    %196 = vector.shape_cast %193 : vector<4x256xf32> to vector<1x1x4x256xf32>
    tpu.vector_store %arg10[%c0_69, %c1_70, %c0_71, %c0_72], %196 {strides = array<i32>} : memref<1x2x4x256xf32, #tpu.memory_space<vmem>>, vector<1x1x4x256xf32>,
    return
  }
  func.func @transform_0(%arg0: i32, %arg1: i32) -> (i32, i32, i32, i32) {
    %c0_i32 = arith.constant 0 : i32
    %c0_i32_0 = arith.constant 0 : i32
    %c0_i32_1 = arith.constant 0 : i32
    return %arg0, %arg1, %c0_i32, %c0_i32_0 : i32, i32, i32, i32
  }
  func.func @transform_1(%arg0: i32, %arg1: i32) -> (i32, i32) {
    %c0_i32 = arith.constant 0 : i32
    %c0_i32_0 = arith.constant 0 : i32
    %c0_i32_1 = arith.constant 0 : i32
    return %c0_i32, %c0_i32_0 : i32, i32
  }
  func.func @transform_2(%arg0: i32, %arg1: i32) -> (i32, i32, i32) {
    %c0_i32 = arith.constant 0 : i32
    %c0_i32_0 = arith.constant 0 : i32
    %c0_i32_1 = arith.constant 0 : i32
    return %arg0, %c0_i32, %c0_i32_0 : i32, i32, i32
  }
  func.func @transform_3(%arg0: i32, %arg1: i32) -> (i32, i32, i32) {
    %c0_i32 = arith.constant 0 : i32
    %c0_i32_0 = arith.constant 0 : i32
    %c0_i32_1 = arith.constant 0 : i32
    return %arg0, %c0_i32, %c0_i32_0 : i32, i32, i32
  }
  func.func @transform_4(%arg0: i32, %arg1: i32) -> (i32, i32, i32) {
    %c0_i32 = arith.constant 0 : i32
    %c0_i32_0 = arith.constant 0 : i32
    %c0_i32_1 = arith.constant 0 : i32
    return %arg0, %c0_i32, %c0_i32_0 : i32, i32, i32
  }
  func.func @transform_5(%arg0: i32, %arg1: i32) -> (i32, i32, i32) {
    %c0_i32 = arith.constant 0 : i32
    %c0_i32_0 = arith.constant 0 : i32
    %c0_i32_1 = arith.constant 0 : i32
    return %arg0, %c0_i32, %c0_i32_0 : i32, i32, i32
  }
  func.func @transform_6(%arg0: i32, %arg1: i32) -> (i32, i32, i32) {
    %c0_i32 = arith.constant 0 : i32
    %c0_i32_0 = arith.constant 0 : i32
    %c0_i32_1 = arith.constant 0 : i32
    return %arg0, %c0_i32, %c0_i32_0 : i32, i32, i32
  }
  func.func @transform_7(%arg0: i32, %arg1: i32) -> (i32, i32, i32) {
    %c0_i32 = arith.constant 0 : i32
    %c0_i32_0 = arith.constant 0 : i32
    %c0_i32_1 = arith.constant 0 : i32
    return %arg0, %c0_i32, %c0_i32_0 : i32, i32, i32
  }
  func.func @transform_8(%arg0: i32, %arg1: i32) -> (i32, i32, i32, i32) {
    %c0_i32 = arith.constant 0 : i32
    %c0_i32_0 = arith.constant 0 : i32
    %c0_i32_1 = arith.constant 0 : i32
    return %arg0, %arg1, %c0_i32, %c0_i32_0 : i32, i32, i32, i32
  }
}

</mosaic_0001>

<bundles_post_ra>
// kernel: tpu_custom_call.1
= control target key start
LH: loop header
LB: loop body
LE: loop exit
PB: predicated region body
PF: predicated region fallthrough
CT: control target
= control target key end

     0   :  { %13 = vsyncpa [#allocation3], 0  ;;  %s14191_s0 = inlined_call_operand.vmem [shape: f32[2,2,4,256], index: 0, kind: input, shape index: {}]   ;;  %s14192_s1 = inlined_call_operand.vmem [shape: f32[8,256], index: 1, kind: input, shape index: {}]   ;;  %s14193_s2 = inlined_call_operand.vmem [shape: f32[2,32,20], index: 2, kind: input, shape index: {}]   ;;  %s14194_s3 = inlined_call_operand.vmem [shape: f32[2,32,1], index: 3, kind: input, shape index: {}]   ;;  %s14195_s4 = inlined_call_operand.vmem [shape: f32[2,4,32], index: 4, kind: input, shape index: {}]   ;;  %s14196_s5 = inlined_call_operand.vmem [shape: f32[2,4,1], index: 5, kind: input, shape index: {}]   ;;  %s14197_s6 = inlined_call_operand.vmem [shape: f32[2,4,1], index: 6, kind: input, shape index: {}]   ;;  %s14198_s7 = inlined_call_operand.vmem [shape: f32[2,4,1], index: 7, kind: input, shape index: {}]   ;;  %s14199_s8 = inlined_call_operand.hbm [shape: f32[2,2,4,256], index: 8, kind: output, shape index: {}]  }
   0x1   :  { %15 = vsyncpa [#allocation3 + $0x1], 0  ;;  %s11115_s27 = smov 0   ;;  %s11117_s28 = smov 0  }
   0x2   :  { %s11119_s29 = smov 0   ;;  %s11121_s30 = smov 0  }
   0x3   :  { %s11123_s9 = smov 0   ;;  %s11125_s10 = smov 0  }
   0x4 LB: > { %s10845_s11 = sadd.s32 4294967295, %s11048_s10   ;;  %s10846_s12 = sadd.s32 4294967294, %s11048_s10   ;;  %s11048_s10 = sphi %s11125_s10, %s21_s10   ;;  %s11044_s9 = sphi %s11123_s9, %s14934_s9   ;;  %s11040_s30 = sphi %s11121_s30, %s14933_s30   ;;  %s11036_s29 = sphi %s11119_s29, %s14932_s29   ;;  %s11032_s28 = sphi %s11117_s28, %s14931_s28   ;;  %s11028_s27 = sphi %s11115_s27, %s14930_s27  }
   0x5   : > { %s33_s13 = sadd.s32 1, %s11044_s9  ;;  %s247_s14 = sadd.s32 1, %s11036_s29 }
   0x6   : > { %p35_p0 = scmp.ge.s32.totalorder %s33_s13, 2  ;;  %p257_p1 = scmp.ne.s32.totalorder %s11036_s29, %s11032_s28 }
   0x7   : > { %p258_p2 = scmp.eq.s32.totalorder %s10845_s11, 1  ;;  %p263_p3 = scmp.ne.s32.totalorder %s11032_s28, %s11028_s27 }
   0x8   : > { %s14936_s13 = smov (%p35_p0, %s33_s13), 0  ;;  %p264_p5 = scmp.eq.s32.totalorder %s10846_s12, 1 }
   0x9   : > { %p11155_p4 = por %p258_p2, %p257_p1  ;;  %s242_s16 = ssub.s32 %s11044_s9, %s14936_s13 }
   0xa   : > { %p10849_p6 = scmp.ge.s32.totalorder %s11048_s10, 1  ;;  %p245_p7 = scmp.eq.s32.totalorder %s242_s16, 0 }
   0xb   : > { %p11162_p8 = por %p264_p5, %p263_p3  ;;  %p343_p9 = scmp.lt.s32.totalorder %s11048_s10, 3 }
   0xc   : > { %s11168_s18 = scalar_select %p245_p7, %s11036_s29, %s247_s14  }
   0xd   : > { %p344_p10 = pnand %p10849_p6, %p343_p9 }
   0xf   : > { %347 = sbr.rel (%p344_p10) target bundleno = 2753 (0xac1), region = 52 }
  0x14   : > { %p409_p11 = scmp.lt.s32.totalorder %s11040_s30, 1  ;;  %s11050_s12 = smov 124   ;;  %vm492_vm0 = vcmask 15360   ;;  %v471_v10 = vlaneseq  ;;  %v11227_v16 = vld [vmem:[%s14192_s1] sm:$0xff]  ;;  %v11232_v17 = vld [vmem:[%s14192_s1 + $0x8] sm:$0xff]  ;;  %vm501_vm2 = vcmask 1041408  }
  0x15   : > { %s11051_s14 = smov 17   ;;  %s11052_s16 = smov 122   ;;  %14547 = vst [vmem:[#allocation9_spill] sm:$0xff] %v11227_v16  ;;  %v14203_v21 = vperm.slane %v11227_v16, 0  ;;  %v14202_v22 = vperm.slane %v11232_v17, 0  ;;  %vm998_vm3 = vcmask 1043456  }
  0x16   : > { %s11172_s19 = scalar_select %p409_p11, %s11040_s30, 1  ;;  %v11222_v15 = vand.u32 127, %v471_v10  ;;  %14548 = vst [vmem:[#allocation10_spill] sm:$0xff] %v11232_v17  ;;  %vm989_vm4 = vcmask 31744   ;;  %vm5190_vm12 = vcmask 261120  }
  0x17   : > { %s11053_s26 = smov 16   ;;  %s11057_s22 = smov 1  }
  0x18   : > { %s10868_s20 = sshll.u32 %s11172_s19, 4  ;;  %s10869_s21 = sshll.u32 %s11172_s19, 5  ;;  %14546 = vst [vmem:[#allocation8_spill] sm:$0xff] %v11222_v15  ;;  %vm473_vm1 = vcmp.lt.s32.totalorder %v11222_v15, 17  ;;  %vm1490_vm5 = vcmp.lt.s32.totalorder %v11222_v15, 16  ;;  %vm2014_vm6 = vcmp.lt.s32.totalorder %v11222_v15, 15 }
  0x19   : > { %s11179_s24 = scalar_lea.vmem %s14191_s0, %s10868_s20  ;;  %s11186_s11 = scalar_lea.vmem %s14193_s2, %s10869_s21  ;;  %vm2538_vm7 = vcmp.lt.s32.totalorder %v11222_v15, 1  ;;  %vm3062_vm8 = vcmp.lt.s32.totalorder %v11222_v15, 127  ;;  %vm3586_vm9 = vcmp.lt.s32.totalorder %v11222_v15, 113  ;;  %vm4110_vm10 = vcmp.lt.s32.totalorder %v11222_v15, 112 }
  0x1a   : > { %v11189_v0 = vld [vmem:[%s11179_s24] sm:$0xff]  ;;  %v11197_v2 = vld [vmem:[%s11186_s11 + $0x10] sm:$0xff]  ;;  %v11201_v3 = vld [vmem:[%s11186_s11 + $0x8] sm:$0xff]  ;;  %s11056_s20 = smov 118   ;;  %s11058_s23 = smov 116   ;;  %vm4634_vm11 = vcmp.lt.s32.totalorder %v11222_v15, 111 }
  0x1b   : > { %14543 = vst [vmem:[#allocation5_spill] sm:$0xff] %v11189_v0  ;;  %v11192_v1 = vld [vmem:[%s11186_s11] sm:$0xff]  ;;  %488 = vrot.lane.b32.xlu2 %v11197_v2, %s11050_s12  ;;  %v11204_v4 = vld [vmem:[%s11186_s11 + $0x18] sm:$0xff]  ;;  %s11059_s25 = smov 127  }
  0x1c   : > { %462 = vst [vmem:[#allocation1] ss:$2 sm:$0xff] %v11189_v0  ;;  %484 = vrot.lane.b32.xlu1 %v11192_v1, %s11050_s12 }
  0x23   : > { %v463_v5 = vld.sshfl [vmem:[#allocation1] sm:$0xff pattern:$0x75316420]  ;;  %v464_v6 = vld.sshfl [vmem:[#allocation1 + $0x8] sm:$0xff pattern:$0x75316420]  ;;  %490 = vrot.lane.b32.xlu2 %v11204_v4, %s11050_s12 }
  0x24   : > { %467 = vrot.lane.b32.xlu0 %v463_v5, %s11051_s14  ;;  %986 = vst [vmem:[#allocation1] ss:$2 sm:$0xff] %v11189_v0  ;;  %486 = vrot.lane.b32.xlu1 %v11201_v3, %s11050_s12  ;;  %s11054_s12 = smov 120  }
  0x2b   : > { %1497 = vrot.lane.b32.xlu2 %v11192_v1, %s11052_s16  ;;  %v987_v48 = vld.sshfl [vmem:[#allocation1] sm:$0xff pattern:$0x75316420]  ;;  %v11274_v49 = vld.sshfl [vmem:[#allocation1 + $0x8] sm:$0xff pattern:$0x75316420] }
  0x2c   : > { %469 = vrot.lane.b32.xlu0 %v464_v6, %s11051_s14  ;;  %1481 = vst [vmem:[#allocation1] ss:$2 sm:$0xff] %v11189_v0  ;;  %v999_v63 = vsel %vm998_vm3, %v987_v48, 0 }
  0x2d   : > { %v1018_v5 = vand.u32 4294901760, %v999_v63 }
  0x2f   : > { %v1069_v6 = vsub.f32 %v999_v63, %v1018_v5  ;;  %v14201_v63 = vperm.slane %v11227_v16, 1 }
  0x33   : > { %1503 = vrot.lane.b32.xlu2 %v11204_v4, %s11052_s16  ;;  %v1483_v57 = vld.sshfl [vmem:[#allocation1 + $0x8] sm:$0xff pattern:$0x75316420]  ;;  %v1482_v58 = vld.sshfl [vmem:[#allocation1] sm:$0xff pattern:$0x75316420] }
  0x34   : > { %1488 = vrot.lane.b32.xlu1 %v1483_v57, %s11053_s26  ;;  %1486 = vrot.lane.b32.xlu0 %v1482_v58, %s11053_s26  ;;  %2005 = vst [vmem:[#allocation1] ss:$2 sm:$0xff] %v11189_v0 }
  0x3b   : > { %2021 = vrot.lane.b32.xlu2 %v11192_v1, %s11054_s12 }
  0x3c   : > { %1499 = vrot.lane.b32.xlu0 %v11201_v3, %s11052_s16  ;;  %1501 = vrot.lane.b32.xlu1 %v11197_v2, %s11052_s16  ;;  %s11055_s16 = smov 15  }
  0x43   : > { %2027 = vrot.lane.b32.xlu2 %v11204_v4, %s11054_s12 }
  0x4b   : > { %2545 = vrot.lane.b32.xlu2 %v11192_v1, %s11056_s20 }
  0x53   : > { %2551 = vrot.lane.b32.xlu2 %v11204_v4, %s11056_s20 }
  0x5b   : > { %3069 = vrot.lane.b32.xlu2 %v11192_v1, %s11058_s23 }
  0x63   : > { %3075 = vrot.lane.b32.xlu2 %v11204_v4, %s11058_s23 }
  0x75   : > { %v489_v20 = vpop.permute.xlu2 %488 }
  0x76   : > { %v497_v26 = vsel %vm492_vm0, %v489_v20, 0 }
  0x77   : > { %v11256_v31 = vand.u32 4294901760, %v497_v26 }
  0x79   : > { %14552 = vst [vmem:[#allocation14_spill] sm:$0xff] %v11256_v31  ;;  %v11268_v41 = vsub.f32 %v497_v26, %v11256_v31 }
  0x7b   : > { %14555 = vst [vmem:[#allocation17_spill] sm:$0xff] %v11268_v41  ;;  %v11277_v50 = vand.u32 4294901760, %v11268_v41 }
  0x7d   : > { %v491_v38 = vpop.permute.xlu2 %490  ;;  %14556 = vst [vmem:[#allocation18_spill] sm:$0xff] %v11277_v50  ;;  %v544_v56 = vsub.f32 %v11268_v41, %v11277_v50 }
  0x7e   : > { %v499_v45 = vsel %vm492_vm0, %v491_v38, 0 }
  0x7f   : > { %v11281_v52 = vand.u32 4294901760, %v499_v45  ;;  %v11296_v60 = vand.u32 4294901760, %v544_v56 }
  0x81   : > { %14558 = vst [vmem:[#allocation20_spill] sm:$0xff] %v11281_v52  ;;  %v11287_v55 = vsub.f32 %v499_v45, %v11281_v52 }
  0x82   : > { %14561 = vst [vmem:[#allocation23_spill] sm:$0xff] %v11296_v60 }
  0x83   : > { %14559 = vst [vmem:[#allocation21_spill] sm:$0xff] %v11287_v55  ;;  %v11294_v59 = vand.u32 4294901760, %v11287_v55 }
  0x85   : > { %14560 = vst [vmem:[#allocation22_spill] sm:$0xff] %v11294_v59  ;;  %v552_v61 = vsub.f32 %v11287_v55, %v11294_v59 }
  0x87   : > { %v11307_v62 = vand.u32 4294901760, %v552_v61 }
  0x89   : > { %14562 = vst [vmem:[#allocation24_spill] sm:$0xff] %v11307_v62 }
  0x8e   : > { %v485_v7 = vpop.permute.xlu1 %484 }
  0x8f   : > { %v493_v8 = vsel %vm492_vm0, %v485_v7, 0  ;;  %v1070_v7 = vand.u32 4294901760, %v1069_v6 }
  0x90   : > { %v11216_v9 = vand.u32 4294901760, %v493_v8 }
  0x92   : > { %14544 = vst [vmem:[#allocation6_spill] sm:$0xff] %v11216_v9  ;;  %v11219_v12 = vsub.f32 %v493_v8, %v11216_v9  ;;  %v1071_v8 = vsub.f32 %v1069_v6, %v1070_v7 }
  0x94   : > { %14545 = vst [vmem:[#allocation7_spill] sm:$0xff] %v11219_v12  ;;  %v11235_v18 = vand.u32 4294901760, %v11219_v12  ;;  %v1072_v10 = vand.u32 4294901760, %v1071_v8 }
  0x96   : > { %v468_v11 = vpop.permute.xlu0 %467  ;;  %v487_v13 = vpop.permute.xlu1 %486  ;;  %14549 = vst [vmem:[#allocation11_spill] sm:$0xff] %v11235_v18  ;;  %v528_v25 = vsub.f32 %v11219_v12, %v11235_v18 }
  0x97   : > { %v495_v14 = vsel %vm492_vm0, %v487_v13, 0  ;;  %v1001_v13 = vsel %vm998_vm3, %v11274_v49, 0 }
  0x98   : > { %v11237_v19 = vand.u32 4294901760, %v495_v14  ;;  %v11263_v35 = vand.u32 4294901760, %v528_v25  ;;  %v1257_v20 = vand.u32 4294901760, %v1001_v13 }
  0x9a   : > { %14550 = vst [vmem:[#allocation12_spill] sm:$0xff] %v11237_v19  ;;  %v11243_v24 = vsub.f32 %v495_v14, %v11237_v19 }
  0x9b   : > { %14554 = vst [vmem:[#allocation16_spill] sm:$0xff] %v11263_v35 }
  0x9c   : > { %14551 = vst [vmem:[#allocation13_spill] sm:$0xff] %v11243_v24  ;;  %v11261_v34 = vand.u32 4294901760, %v11243_v24 }
  0x9e   : > { %v470_v23 = vpop.permute.xlu0 %469  ;;  %14553 = vst [vmem:[#allocation15_spill] sm:$0xff] %v11261_v34  ;;  %v536_v42 = vsub.f32 %v11243_v24, %v11261_v34 }
  0x9f   : > { %v474_v27 = vsel %vm473_vm1, %v468_v11, %v470_v23  ;;  %v475_v28 = vsel %vm473_vm1, %v470_v23, %v468_v11  ;;  %v990_v11 = vsel %vm989_vm4, %v11192_v1, 0  ;;  %v1308_v23 = vsub.f32 %v1001_v13, %v1257_v20 }
  0xa0   : > { %v478_v29 = vmul.f32 %v14203_v21, %v475_v28  ;;  %v479_v30 = vmul.f32 %v14202_v22, %v474_v27  ;;  %v11279_v51 = vand.u32 4294901760, %v536_v42  ;;  %v11350_v14 = vand.u32 4294901760, %v990_v11 }
  0xa1   : > { %v1309_v26 = vand.u32 4294901760, %v1308_v23  ;;  %v992_v27 = vsel %vm989_vm4, %v11201_v3, 0 }
  0xa2   : > { %v503_v32 = vsel %vm501_vm2, %v478_v29, 0  ;;  %v506_v33 = vsel %vm501_vm2, %v479_v30, 0  ;;  %14557 = vst [vmem:[#allocation19_spill] sm:$0xff] %v11279_v51  ;;  %v11355_v25 = vsub.f32 %v990_v11, %v11350_v14  ;;  %v11364_v30 = vand.u32 4294901760, %v992_v27 }
  0xa3   : > { %v523_v36 = vand.u32 4294901760, %v503_v32  ;;  %v762_v37 = vand.u32 4294901760, %v506_v33  ;;  %14563 = vst [vmem:[#allocation25_spill] sm:$0xff] %v11350_v14  ;;  %v1310_v28 = vsub.f32 %v1308_v23, %v1309_v26 }
  0xa4   : > { %14564 = vst [vmem:[#allocation26_spill] sm:$0xff] %v11355_v25  ;;  %v11362_v29 = vand.u32 4294901760, %v11355_v25 }
  0xa5   : > { %v813_v39 = vsub.f32 %v506_v33, %v762_v37  ;;  %524 = vmatpush.msra.mxu0 %v523_v36  ;;  %651 = vmatpush.msra.mxu3 %v523_v36  ;;  %v574_v40 = vsub.f32 %v503_v32, %v523_v36  ;;  %14566 = vst [vmem:[#allocation28_spill] sm:$0xff] %v11364_v30  ;;  %v1311_v32 = vand.u32 4294901760, %v1310_v28 }
  0xa6   : > { %530 = vmatmul.f32.vlgmr.msra.gmra.mxu0 %v11263_v35  ;;  %655 = vmatmul.f32.vlgmr.msra.gmra.mxu3 %v11235_v18  ;;  %14565 = vst [vmem:[#allocation27_spill] sm:$0xff] %v11362_v29  ;;  %v1023_v33 = vsub.f32 %v11355_v25, %v11362_v29 }
  0xa7   : > { %613 = vmatpush.msra.mxu2 %v574_v40  ;;  %v575_v43 = vand.u32 4294901760, %v574_v40  ;;  %v814_v44 = vand.u32 4294901760, %v813_v39 }
  0xa8   : > { %616 = vmatmul.f32.vlgmr.msra.gmra.mxu2 %v11219_v12  ;;  %v11377_v38 = vand.u32 4294901760, %v1023_v33 }
  0xa9   : > { %763 = vmatpush.msrb.mxu2 %v762_v37  ;;  %695 = vmatpush.msrb.mxu0 %v575_v43  ;;  %v576_v46 = vsub.f32 %v574_v40, %v575_v43  ;;  %v815_v47 = vsub.f32 %v813_v39, %v814_v44 }
  0xaa   : > { %14568 = vst [vmem:[#allocation30_spill] sm:$0xff] %v11377_v38 }
  0xab   : > { %934 = vmatpush.msra.mxu2 %v814_v44  ;;  %852 = vmatpush.msra.mxu0 %v813_v39  ;;  %v577_v53 = vand.u32 4294901760, %v576_v46  ;;  %v816_v54 = vand.u32 4294901760, %v815_v47  ;;  %v996_v44 = vsel %vm989_vm4, %v11204_v4, 0 }
  0xac   : > { %v11400_v47 = vand.u32 4294901760, %v996_v44 }
  0xad   : > { %578 = vmatpush.msra.mxu1 %v577_v53  ;;  %817 = vmatpush.msrb.mxu3 %v816_v54  ;;  %v2007_v53 = vld.sshfl [vmem:[#allocation1 + $0x8] sm:$0xff pattern:$0x75316420]  ;;  %v2006_v54 = vld.sshfl [vmem:[#allocation1] sm:$0xff pattern:$0x75316420] }
  0xae   : > { %538 = vmatmul.f32.gmra.mxu0 %v11279_v51  ;;  %580 = vmatmul.f32.vlgmr.msra.gmra.mxu1 %v11216_v9  ;;  %14574 = vst [vmem:[#allocation36_spill] sm:$0xff] %v11400_v47  ;;  %v11407_v49 = vsub.f32 %v996_v44, %v11400_v47 }
  0xaf   : > { %661 = vmatmul.f32.gmra.mxu3 %v11261_v34  ;;  %729 = vmatpush.msrb.mxu1 %v523_v36  ;;  %v11371_v36 = vsub.f32 %v992_v27, %v11364_v30  ;;  %2529 = vst [vmem:[#allocation1] ss:$2 sm:$0xff] %v11189_v0 }
  0xb0   : > { %968 = vmatpush.msra.mxu3 %v762_v37  ;;  %621 = vmatmul.f32.gmra.mxu2 %v11243_v24  ;;  %14575 = vst [vmem:[#allocation37_spill] sm:$0xff] %v11407_v49  ;;  %v11417_v57 = vand.u32 4294901760, %v11407_v49 }
  0xb1   : > { %890 = vmatpush.msra.mxu1 %v762_v37  ;;  %14567 = vst [vmem:[#allocation29_spill] sm:$0xff] %v11371_v36  ;;  %v994_v37 = vsel %vm989_vm4, %v11197_v2, 0  ;;  %v11380_v39 = vand.u32 4294901760, %v11371_v36  ;;  %2012 = vrot.lane.b32.xlu1 %v2007_v53, %s11055_s16 }
  0xb2   : > { %v11382_v40 = vand.u32 4294901760, %v994_v37  ;;  %2010 = vrot.lane.b32.xlu0 %v2006_v54, %s11055_s16  ;;  %14577 = vst [vmem:[#allocation39_spill] sm:$0xff] %v11417_v57  ;;  %v1047_v58 = vsub.f32 %v11407_v49, %v11417_v57 }
  0xb3   : > { %14569 = vst [vmem:[#allocation31_spill] sm:$0xff] %v11380_v39  ;;  %v1031_v42 = vsub.f32 %v11371_v36, %v11380_v39 }
  0xb4   : > { %14570 = vst [vmem:[#allocation32_spill] sm:$0xff] %v11382_v40  ;;  %v11389_v43 = vsub.f32 %v994_v37, %v11382_v40  ;;  %v11429_v61 = vand.u32 4294901760, %v1047_v58 }
  0xb5   : > { %v11395_v45 = vand.u32 4294901760, %v1031_v42 }
  0xb6   : > { %546 = vmatmul.f32.gmra.mxu0 %v11296_v60  ;;  %584 = vmatmul.f32.gmra.mxu1 %v11237_v19  ;;  %14571 = vst [vmem:[#allocation33_spill] sm:$0xff] %v11389_v43  ;;  %v11398_v46 = vand.u32 4294901760, %v11389_v43 }
  0xb7   : > { %667 = vmatmul.f32.gmra.mxu3 %v11277_v50  ;;  %14572 = vst [vmem:[#allocation34_spill] sm:$0xff] %v11395_v45 }
  0xb8   : > { %626 = vmatmul.f32.gmra.mxu2 %v11268_v41  ;;  %14573 = vst [vmem:[#allocation35_spill] sm:$0xff] %v11398_v46  ;;  %v1039_v48 = vsub.f32 %v11389_v43, %v11398_v46 }
  0xb9   : > { %2025 = vrot.lane.b32.xlu1 %v11197_v2, %s11054_s12  ;;  %14578 = vst [vmem:[#allocation40_spill] sm:$0xff] %v11429_v61 }
  0xba   : > { %v11414_v56 = vand.u32 4294901760, %v1039_v48  ;;  %2023 = vrot.lane.b32.xlu0 %v11201_v3, %s11054_s12  ;;  %s14367_s12 = smov 112  }
  0xbc   : > { %14576 = vst [vmem:[#allocation38_spill] sm:$0xff] %v11414_v56 }
  0xbe   : > { %554 = vmatmul.f32.gmra.mxu0 %v11307_v62  ;;  %588 = vmatmul.f32.gmra.mxu1 %v11256_v31 }
  0xbf   : > { %673 = vmatmul.f32.gmra.mxu3 %v11294_v59 }
  0xc0   : > { %631 = vmatmul.f32.gmra.mxu2 %v11287_v55 }
  0xc6   : > { %592 = vmatmul.f32.gmra.mxu1 %v11281_v52  ;;  %697 = vmatmul.f32.vlgmr.msrb.gmra.mxu0 %v11216_v9 }
  0xc7   : > { %819 = vmatmul.f32.vlgmr.msrb.gmra.mxu3 %v11216_v9  ;;  %1019 = vmatpush.msrb.mxu0 %v1018_v5 }
  0xc8   : > { %769 = vmatmul.f32.vlgmr.msrb.gmra.mxu2 %v11263_v35  ;;  %1146 = vmatpush.msrb.mxu3 %v1018_v5 }
  0xc9   : > { %1108 = vmatpush.msrb.mxu2 %v1069_v6  ;;  %v1489_v6 = vpop.permute.xlu1 %1488 }
  0xce   : > { %701 = vmatmul.f32.gmra.mxu0 %v11237_v19  ;;  %731 = vmatmul.f32.vlgmr.msrb.gmra.mxu1 %v11216_v9 }
  0xcf   : > { %823 = vmatmul.f32.gmra.mxu3 %v11237_v19  ;;  %1073 = vmatpush.msrb.mxu1 %v1072_v10 }
  0xd0   : > { %777 = vmatmul.f32.gmra.mxu2 %v11279_v51 }
  0xd6   : > { %705 = vmatmul.f32.gmra.mxu0 %v11256_v31  ;;  %735 = vmatmul.f32.gmra.mxu1 %v11237_v19 }
  0xd7   : > { %827 = vmatmul.f32.gmra.mxu3 %v11256_v31 }
  0xd8   : > { %785 = vmatmul.f32.gmra.mxu2 %v11296_v60 }
  0xde   : > { %709 = vmatmul.f32.gmra.mxu0 %v11281_v52  ;;  %739 = vmatmul.f32.gmra.mxu1 %v11256_v31 }
  0xdf   : > { %831 = vmatmul.f32.gmra.mxu3 %v11281_v52 }
  0xe0   : > { %793 = vmatmul.f32.gmra.mxu2 %v11307_v62 }
  0xe6   : > { %743 = vmatmul.f32.gmra.mxu1 %v11281_v52  ;;  %855 = vmatmul.f32.vlgmr.msra.gmra.mxu0 %v11219_v12 }
  0xe7   : > { %970 = vmatmul.f32.vlgmr.msra.gmra.mxu3 %v11216_v9  ;;  %1190 = vmatpush.msra.mxu0 %v1070_v7  ;;  %v1487_v7 = vpop.permute.xlu0 %1486 }
  0xe8   : > { %936 = vmatmul.f32.vlgmr.msra.gmra.mxu2 %v11216_v9  ;;  %1312 = vmatpush.msra.mxu3 %v1311_v32  ;;  %v1492_v8 = vsel %vm1490_vm5, %v1489_v6, %v1487_v7 }
  0xe9   : > { %1258 = vmatpush.msra.mxu2 %v1257_v20  ;;  %v1495_v10 = vmul.f32 %v14201_v63, %v1492_v8 }
  0xeb   : > { %v1514_v11 = vsel %vm501_vm2, %v1495_v10, 0 }
  0xee   : > { %860 = vmatmul.f32.gmra.mxu0 %v11243_v24  ;;  %894 = vmatmul.f32.vlgmr.msra.gmra.mxu1 %v11235_v18 }
  0xef   : > { %974 = vmatmul.f32.gmra.mxu3 %v11237_v19  ;;  %1224 = vmatpush.msra.mxu1 %v1018_v5 }
  0xf0   : > { %940 = vmatmul.f32.gmra.mxu2 %v11237_v19 }
  0xf6   : > { %865 = vmatmul.f32.gmra.mxu0 %v11268_v41  ;;  %900 = vmatmul.f32.gmra.mxu1 %v11261_v34 }
  0xf7   : > { %978 = vmatmul.f32.gmra.mxu3 %v11256_v31 }
  0xf8   : > { %944 = vmatmul.f32.gmra.mxu2 %v11256_v31 }
  0xfe   : > { %870 = vmatmul.f32.gmra.mxu0 %v11287_v55  ;;  %906 = vmatmul.f32.gmra.mxu1 %v11277_v50  ;;  %v11863_v50 = vld [vmem:[%s11186_s11] sm:$0xff] }
  0xff   : > { %982 = vmatmul.f32.gmra.mxu3 %v11281_v52 }
 0x100   : > { %948 = vmatmul.f32.gmra.mxu2 %v11281_v52 }
 0x106   : > { %912 = vmatmul.f32.gmra.mxu1 %v11294_v59  ;;  %1025 = vmatmul.f32.vlgmr.msrb.gmra.mxu0 %v11377_v38 }
 0x107   : > { %1150 = vmatmul.f32.vlgmr.msrb.gmra.mxu3 %v11362_v29  ;;  %1347 = vmatpush.msrb.mxu0 %v1308_v23  ;;  %v11447_v23 = vand.u32 4294901760, %v1514_v11 }
 0x108   : > { %1463 = vmatpush.msrb.mxu3 %v1257_v20  ;;  %1111 = vmatmul.f32.vlgmr.msrb.gmra.mxu2 %v11355_v25 }
 0x109   : > { %1429 = vmatpush.msrb.mxu2 %v1309_v26  ;;  %v1491_v26 = vsel %vm1490_vm5, %v1487_v7, %v1489_v6  ;;  %v1585_v32 = vsub.f32 %v1514_v11, %v11447_v23 }
 0x10b   : > { %v1586_v44 = vand.u32 4294901760, %v1585_v32 }
 0x10d   : > { %v1587_v53 = vsub.f32 %v1585_v32, %v1586_v44 }
 0x10e   : > { %1033 = vmatmul.f32.gmra.mxu0 %v11395_v45  ;;  %1075 = vmatmul.f32.vlgmr.msrb.gmra.mxu1 %v11350_v14 }
 0x10f   : > { %1156 = vmatmul.f32.gmra.mxu3 %v11380_v39  ;;  %1385 = vmatpush.msrb.mxu1 %v1257_v20  ;;  %v14200_v20 = vperm.slane %v11232_v17, 1 }
 0x110   : > { %1116 = vmatmul.f32.gmra.mxu2 %v11371_v36 }
 0x111   : > { %v1496_v42 = vmul.f32 %v14200_v20, %v1491_v26 }
 0x113   : > { %v1517_v58 = vsel %vm501_vm2, %v1496_v42, 0 }
 0x114   : > { %v11465_v26 = vand.u32 4294901760, %v1517_v58 }
 0x116   : > { %1041 = vmatmul.f32.gmra.mxu0 %v11414_v56  ;;  %1079 = vmatmul.f32.gmra.mxu1 %v11364_v30 }
 0x117   : > { %1162 = vmatmul.f32.gmra.mxu3 %v11398_v46 }
 0x118   : > { %1121 = vmatmul.f32.gmra.mxu2 %v11389_v43 }
 0x11e   : > { %1049 = vmatmul.f32.gmra.mxu0 %v11429_v61  ;;  %1083 = vmatmul.f32.gmra.mxu1 %v11382_v40 }
 0x11f   : > { %1168 = vmatmul.f32.gmra.mxu3 %v11417_v57 }
 0x120   : > { %1126 = vmatmul.f32.gmra.mxu2 %v11407_v49 }
 0x123   : > { %v531_v5 = vpop.f32.mrf.mxu0 }
 0x126   : > { %1087 = vmatmul.f32.gmra.mxu1 %v11400_v47  ;;  %1192 = vmatmul.f32.vlgmr.msra.gmra.mxu0 %v11350_v14 }
 0x127   : > { %1314 = vmatmul.f32.vlgmr.msra.gmra.mxu3 %v11350_v14  ;;  %1535 = vmatpush.msra.mxu0 %v11447_v23 }
 0x128   : > { %1264 = vmatmul.f32.vlgmr.msra.gmra.mxu2 %v11377_v38  ;;  %1662 = vmatpush.msra.mxu3 %v11447_v23 }
 0x129   : > { %v656_v13 = vpop.f32.mrf.mxu3  ;;  %1624 = vmatpush.msra.mxu2 %v1585_v32 }
 0x12b   : > { %v539_v27 = vpop.f32.mrf.mxu0  ;;  %v581_v28 = vpop.f32.mrf.mxu1 }
 0x12c   : > { %v582_v33 = vadd.f32 %v581_v28, %v531_v5  ;;  %v617_v37 = vpop.f32.mrf.mxu2  ;;  %v1588_v5 = vand.u32 4294901760, %v1587_v53 }
 0x12e   : > { %v618_v48 = vadd.f32 %v617_v37, %v582_v33  ;;  %1196 = vmatmul.f32.gmra.mxu0 %v11364_v30  ;;  %1226 = vmatmul.f32.vlgmr.msra.gmra.mxu1 %v11350_v14 }
 0x12f   : > { %1318 = vmatmul.f32.gmra.mxu3 %v11364_v30  ;;  %1589 = vmatpush.msra.mxu1 %v1588_v5 }
 0x130   : > { %v11459_v54 = vadd.f32 %v656_v13, %v618_v48  ;;  %1272 = vmatmul.f32.gmra.mxu2 %v11395_v45  ;;  %v11471_v13 = vsub.f32 %v1517_v58, %v11465_v26 }
 0x132   : > { %v662_v6 = vpop.f32.mrf.mxu3  ;;  %v14204_v53 = vand.u32 4294901760, %v11471_v13 }
 0x133   : > { %v547_v7 = vpop.f32.mrf.mxu0  ;;  %v585_v8 = vpop.f32.mrf.mxu1 }
 0x134   : > { %v586_v10 = vadd.f32 %v585_v8, %v539_v27  ;;  %v622_v11 = vpop.f32.mrf.mxu2  ;;  %v1826_v58 = vsub.f32 %v11471_v13, %v14204_v53 }
 0x136   : > { %v623_v28 = vadd.f32 %v622_v11, %v586_v10  ;;  %1200 = vmatmul.f32.gmra.mxu0 %v11382_v40  ;;  %1230 = vmatmul.f32.gmra.mxu1 %v11364_v30 }
 0x137   : > { %1322 = vmatmul.f32.gmra.mxu3 %v11382_v40 }
 0x138   : > { %v11473_v32 = vadd.f32 %v662_v6, %v623_v28  ;;  %1280 = vmatmul.f32.gmra.mxu2 %v11414_v56 }
 0x13a   : > { %v668_v27 = vpop.f32.mrf.mxu3 }
 0x13b   : > { %v555_v33 = vpop.f32.mrf.mxu0  ;;  %v589_v37 = vpop.f32.mrf.mxu1 }
 0x13c   : > { %v590_v42 = vadd.f32 %v589_v37, %v547_v7  ;;  %v627_v48 = vpop.f32.mrf.mxu2  ;;  %v1827_v37 = vand.u32 4294901760, %v1826_v58 }
 0x13e   : > { %v628_v5 = vadd.f32 %v627_v48, %v590_v42  ;;  %1204 = vmatmul.f32.gmra.mxu0 %v11400_v47  ;;  %1234 = vmatmul.f32.gmra.mxu1 %v11382_v40 }
 0x13f   : > { %1326 = vmatmul.f32.gmra.mxu3 %v11400_v47 }
 0x140   : > { %v11485_v6 = vadd.f32 %v668_v27, %v628_v5  ;;  %1288 = vmatmul.f32.gmra.mxu2 %v11429_v61  ;;  %v1502_v61 = vpop.permute.xlu1 %1501 }
 0x142   : > { %v674_v8 = vpop.f32.mrf.mxu3 }
 0x143   : > { %v593_v7 = vpop.f32.mrf.mxu1  ;;  %v11488_v10 = vpop.f32.mrf.mxu0 }
 0x144   : > { %v594_v11 = vadd.f32 %v593_v7, %v555_v33  ;;  %v632_v28 = vpop.f32.mrf.mxu2  ;;  %v1498_v7 = vpop.permute.xlu2 %1497 }
 0x146   : > { %v633_v42 = vadd.f32 %v632_v28, %v594_v11  ;;  %1238 = vmatmul.f32.gmra.mxu1 %v11400_v47  ;;  %1350 = vmatmul.f32.vlgmr.msrb.gmra.mxu0 %v11355_v25 }
 0x147   : > { %1465 = vmatmul.f32.vlgmr.msrb.gmra.mxu3 %v11350_v14  ;;  %1706 = vmatpush.msrb.mxu0 %v1586_v44  ;;  %v1505_v44 = vsel %vm492_vm0, %v1498_v7, 0 }
 0x148   : > { %1828 = vmatpush.msrb.mxu3 %v1827_v37  ;;  %v11493_v27 = vadd.f32 %v674_v8, %v633_v42  ;;  %1431 = vmatmul.f32.vlgmr.msrb.gmra.mxu2 %v11350_v14  ;;  %v11507_v28 = vand.u32 4294901760, %v1505_v44 }
 0x149   : > { %1774 = vmatpush.msrb.mxu2 %v11465_v26 }
 0x14a   : > { %v820_v48 = vpop.f32.mrf.mxu3  ;;  %14579 = vst [vmem:[#allocation41_spill] sm:$0xff] %v11507_v28 }
 0x14b   : > { %v11497_v5 = vpop.f32.mrf.mxu0  ;;  %v11499_v33 = vpop.f32.mrf.mxu1 }
 0x14c   : > { %v770_v58 = vpop.f32.mrf.mxu2 }
 0x14d   : > { %v821_v11 = vadd.f32 %v820_v48, %v770_v58  ;;  %v1500_v58 = vpop.permute.xlu0 %1499 }
 0x14e   : > { %1355 = vmatmul.f32.gmra.mxu0 %v11371_v36  ;;  %1389 = vmatmul.f32.vlgmr.msrb.gmra.mxu1 %v11362_v29  ;;  %v1507_v7 = vsel %vm492_vm0, %v1500_v58, 0  ;;  %v1504_v36 = vpop.permute.xlu2 %1503 }
 0x14f   : > { %1469 = vmatmul.f32.gmra.mxu3 %v11364_v30  ;;  %1740 = vmatpush.msrb.mxu1 %v11447_v23  ;;  %v11518_v23 = vsub.f32 %v1505_v44, %v11507_v28  ;;  %v11526_v21 = vand.u32 4294901760, %v1507_v7 }
 0x150   : > { %1435 = vmatmul.f32.gmra.mxu2 %v11364_v30 }
 0x151   : > { %14580 = vst [vmem:[#allocation42_spill] sm:$0xff] %v11518_v23  ;;  %v11524_v22 = vand.u32 4294901760, %v11518_v23  ;;  %v11537_v58 = vsub.f32 %v1507_v7, %v11526_v21 }
 0x152   : > { %v824_v8 = vpop.f32.mrf.mxu3  ;;  %14582 = vst [vmem:[#allocation44_spill] sm:$0xff] %v11526_v21 }
 0x153   : > { %v11509_v37 = vpop.f32.mrf.mxu0  ;;  %v11511_v42 = vpop.f32.mrf.mxu1  ;;  %14581 = vst [vmem:[#allocation43_spill] sm:$0xff] %v11524_v22 }
 0x154   : > { %v778_v48 = vpop.f32.mrf.mxu2  ;;  %14583 = vst [vmem:[#allocation45_spill] sm:$0xff] %v11537_v58 }
 0x155   : > { %v11513_v20 = vadd.f32 %v824_v8, %v778_v48 }
 0x156   : > { %1360 = vmatmul.f32.gmra.mxu0 %v11389_v43  ;;  %1395 = vmatmul.f32.gmra.mxu1 %v11380_v39  ;;  %v1509_v43 = vsel %vm492_vm0, %v1502_v61, 0 }
 0x157   : > { %1473 = vmatmul.f32.gmra.mxu3 %v11382_v40 }
 0x158   : > { %1439 = vmatmul.f32.gmra.mxu2 %v11382_v40  ;;  %v1539_v40 = vsub.f32 %v11518_v23, %v11524_v22 }
 0x15a   : > { %v828_v63 = vpop.f32.mrf.mxu3 }
 0x15b   : > { %v11528_v8 = vpop.f32.mrf.mxu0  ;;  %v11530_v48 = vpop.f32.mrf.mxu1 }
 0x15c   : > { %v786_v53 = vpop.f32.mrf.mxu2 }
 0x15d   : > { %v11532_v44 = vadd.f32 %v828_v63, %v786_v53  ;;  %v11545_v63 = vand.u32 4294901760, %v11537_v58  ;;  %v11547_v53 = vand.u32 4294901760, %v1539_v40 }
 0x15e   : > { %1365 = vmatmul.f32.gmra.mxu0 %v11407_v49  ;;  %1401 = vmatmul.f32.gmra.mxu1 %v11398_v46  ;;  %v11549_v49 = vand.u32 4294901760, %v1509_v43 }
 0x15f   : > { %1477 = vmatmul.f32.gmra.mxu3 %v11400_v47  ;;  %14584 = vst [vmem:[#allocation46_spill] sm:$0xff] %v11545_v63  ;;  %v1547_v40 = vsub.f32 %v11537_v58, %v11545_v63 }
 0x160   : > { %1443 = vmatmul.f32.gmra.mxu2 %v11400_v47  ;;  %14585 = vst [vmem:[#allocation47_spill] sm:$0xff] %v11547_v53  ;;  %v11558_v61 = vsub.f32 %v1509_v43, %v11549_v49  ;;  %v1511_v47 = vsel %vm492_vm0, %v1504_v36, 0 }
 0x161   : > { %14586 = vst [vmem:[#allocation48_spill] sm:$0xff] %v11549_v49  ;;  %v11572_v14 = vand.u32 4294901760, %v1547_v40  ;;  %v11574_v45 = vand.u32 4294901760, %v1511_v47  ;;  %v2530_v40 = vld.sshfl [vmem:[#allocation1] sm:$0xff pattern:$0x75316420] }
 0x162   : > { %v832_v30 = vpop.f32.mrf.mxu3  ;;  %14587 = vst [vmem:[#allocation49_spill] sm:$0xff] %v11558_v61  ;;  %v11570_v43 = vand.u32 4294901760, %v11558_v61  ;;  %2534 = vrot.lane.b32.xlu0 %v2530_v40, %s11057_s22 }
 0x163   : > { %v11551_v46 = vpop.f32.mrf.mxu1  ;;  %v856_v7 = vpop.f32.mrf.mxu0  ;;  %14590 = vst [vmem:[#allocation51_spill] sm:$0xff] %v11572_v14 }
 0x164   : > { %v794_v56 = vpop.f32.mrf.mxu2  ;;  %14589 = vst [vmem:[#allocation50_spill] sm:$0xff] %v11570_v43 }
 0x165   : > { %v11553_v39 = vadd.f32 %v832_v30, %v794_v56  ;;  %v857_v30 = vadd.f32 %v856_v7, %v821_v11  ;;  %v14588_v56 = vand.u32 4294901760, %v11471_v13  ;;  %14591 = vst [vmem:[#allocation52_spill] sm:$0xff] %v11574_v45  ;;  %v1555_v11 = vsub.f32 %v11558_v61, %v11570_v43  ;;  %v2531_v7 = vld.sshfl [vmem:[#allocation1 + $0x8] sm:$0xff pattern:$0x75316420] }
 0x166   : > { %1407 = vmatmul.f32.gmra.mxu1 %v11417_v57  ;;  %1541 = vmatmul.f32.vlgmr.msra.gmra.mxu0 %v11547_v53  ;;  %3053 = vst [vmem:[#allocation1] ss:$2 sm:$0xff] %v11189_v0 }
 0x167   : > { %1666 = vmatmul.f32.vlgmr.msra.gmra.mxu3 %v11524_v22  ;;  %1863 = vmatpush.msra.mxu0 %v11471_v13  ;;  %v11579_v13 = vsub.f32 %v1511_v47, %v11574_v45 }
 0x168   : > { %1979 = vmatpush.msra.mxu3 %v11465_v26  ;;  %1627 = vmatmul.f32.vlgmr.msra.gmra.mxu2 %v11518_v23 }
 0x169   : > { %1945 = vmatpush.msra.mxu2 %v14588_v56  ;;  %14592 = vst [vmem:[#allocation53_spill] sm:$0xff] %v11579_v13  ;;  %2536 = vrot.lane.b32.xlu1 %v2531_v7, %s11057_s22  ;;  %v11595_v56 = vand.u32 4294901760, %v1555_v11 }
 0x16a   : > { %v971_v57 = vpop.f32.mrf.mxu3  ;;  %2547 = vrot.lane.b32.xlu0 %v11201_v3, %s11056_s20 }
 0x16b   : > { %v861_v25 = vpop.f32.mrf.mxu0  ;;  %v895_v29 = vpop.f32.mrf.mxu1  ;;  %14594 = vst [vmem:[#allocation55_spill] sm:$0xff] %v11595_v56 }
 0x16c   : > { %v896_v38 = vadd.f32 %v895_v29, %v857_v30  ;;  %v937_v36 = vpop.f32.mrf.mxu2  ;;  %v11593_v30 = vand.u32 4294901760, %v11579_v13 }
 0x16e   : > { %v938_v52 = vadd.f32 %v937_v36, %v896_v38  ;;  %1549 = vmatmul.f32.gmra.mxu0 %v11572_v14  ;;  %1591 = vmatmul.f32.vlgmr.msra.gmra.mxu1 %v11507_v28  ;;  %v862_v38 = vadd.f32 %v861_v25, %v11513_v20  ;;  %14593 = vst [vmem:[#allocation54_spill] sm:$0xff] %v11593_v30 }
 0x16f   : > { %1672 = vmatmul.f32.gmra.mxu3 %v11545_v63  ;;  %1901 = vmatpush.msra.mxu1 %v11465_v26 }
 0x170   : > { %v11588_v29 = vadd.f32 %v971_v57, %v938_v52  ;;  %1632 = vmatmul.f32.gmra.mxu2 %v11537_v58  ;;  %v1563_v52 = vsub.f32 %v11579_v13, %v11593_v30 }
 0x171   : > { %2549 = vrot.lane.b32.xlu1 %v11197_v2, %s11056_s20  ;;  %v14246_v2 = vperm.slane %v11227_v16, 2  ;;  %s11060_s20 = smov 114  }
 0x172   : > { %v975_v47 = vpop.f32.mrf.mxu3  ;;  %v11610_v57 = vand.u32 4294901760, %v1563_v52  ;;  %3593 = vrot.lane.b32.xlu2 %v11863_v50, %s11060_s20 }
 0x173   : > { %v866_v26 = vpop.f32.mrf.mxu0  ;;  %v901_v36 = vpop.f32.mrf.mxu1 }
 0x174   : > { %v902_v55 = vadd.f32 %v901_v36, %v862_v38  ;;  %v941_v59 = vpop.f32.mrf.mxu2  ;;  %14595 = vst [vmem:[#allocation56_spill] sm:$0xff] %v11610_v57 }
 0x176   : > { %v942_v31 = vadd.f32 %v941_v59, %v902_v55  ;;  %1557 = vmatmul.f32.gmra.mxu0 %v11595_v56  ;;  %1595 = vmatmul.f32.gmra.mxu1 %v11526_v21  ;;  %v867_v55 = vadd.f32 %v866_v26, %v11532_v44  ;;  %v2011_v26 = vpop.permute.xlu0 %2010 }
 0x177   : > { %1678 = vmatmul.f32.gmra.mxu3 %v11570_v43 }
 0x178   : > { %v11604_v25 = vadd.f32 %v975_v47, %v942_v31  ;;  %1637 = vmatmul.f32.gmra.mxu2 %v11558_v61  ;;  %v2013_v31 = vpop.permute.xlu1 %2012 }
 0x17a   : > { %v979_v59 = vpop.f32.mrf.mxu3 }
 0x17b   : > { %v871_v20 = vpop.f32.mrf.mxu0  ;;  %v907_v11 = vpop.f32.mrf.mxu1 }
 0x17c   : > { %v908_v7 = vadd.f32 %v907_v11, %v867_v55  ;;  %v945_v40 = vpop.f32.mrf.mxu2  ;;  %v872_v44 = vadd.f32 %v871_v20, %v11553_v39  ;;  %v2016_v55 = vsel %vm2014_vm6, %v2013_v31, %v2011_v26 }
 0x17e   : > { %v946_v38 = vadd.f32 %v945_v40, %v908_v7  ;;  %1565 = vmatmul.f32.gmra.mxu0 %v11610_v57  ;;  %1599 = vmatmul.f32.gmra.mxu1 %v11549_v49  ;;  %v2019_v40 = vmul.f32 %v14246_v2, %v2016_v55  ;;  %v14245_v55 = vperm.slane %v11232_v17, 2 }
 0x17f   : > { %1684 = vmatmul.f32.gmra.mxu3 %v11593_v30 }
 0x180   : > { %v11617_v3 = vadd.f32 %v979_v59, %v946_v38  ;;  %1642 = vmatmul.f32.gmra.mxu2 %v11579_v13  ;;  %v699_v59 = vadd.f32 %v11488_v10, %v11459_v54  ;;  %v2038_v39 = vsel %vm501_vm2, %v2019_v40, 0 }
 0x181   : > { %v11631_v20 = vand.u32 4294901760, %v2038_v39 }
 0x182   : > { %v983_v47 = vpop.f32.mrf.mxu3 }
 0x183   : > { %v913_v36 = vpop.f32.mrf.mxu1  ;;  %v1026_v52 = vpop.f32.mrf.mxu0  ;;  %v11639_v54 = vsub.f32 %v2038_v39, %v11631_v20 }
 0x184   : > { %v914_v11 = vadd.f32 %v913_v36, %v872_v44  ;;  %v949_v7 = vpop.f32.mrf.mxu2  ;;  %v733_v44 = vadd.f32 %v11499_v33, %v699_v59 }
 0x185   : > { %v2110_v39 = vand.u32 4294901760, %v11639_v54 }
 0x186   : > { %v950_v38 = vadd.f32 %v949_v7, %v914_v11  ;;  %1603 = vmatmul.f32.gmra.mxu1 %v11574_v45  ;;  %1708 = vmatmul.f32.vlgmr.msrb.gmra.mxu0 %v11507_v28  ;;  %v1027_v10 = vadd.f32 %v1026_v52, %v733_v44  ;;  %v2015_v7 = vsel %vm2014_vm6, %v2011_v26, %v2013_v31 }
 0x187   : > { %1830 = vmatmul.f32.vlgmr.msrb.gmra.mxu3 %v11507_v28  ;;  %2059 = vmatpush.msrb.mxu0 %v11631_v20  ;;  %v703_v52 = vadd.f32 %v11497_v5, %v11473_v32  ;;  %v2111_v31 = vsub.f32 %v11639_v54, %v2110_v39 }
 0x188   : > { %v11634_v36 = vadd.f32 %v983_v47, %v950_v38  ;;  %1780 = vmatmul.f32.vlgmr.msrb.gmra.mxu2 %v11547_v53  ;;  %2186 = vmatpush.msrb.mxu3 %v11631_v20  ;;  %v2020_v38 = vmul.f32 %v14245_v55, %v2015_v7 }
 0x189   : > { %2148 = vmatpush.msrb.mxu2 %v11639_v54  ;;  %v737_v26 = vadd.f32 %v11511_v42, %v703_v52  ;;  %v2112_v5 = vand.u32 4294901760, %v2111_v31  ;;  %v707_v42 = vadd.f32 %v11509_v37, %v11485_v6 }
 0x18a   : > { %v1151_v11 = vpop.f32.mrf.mxu3  ;;  %v2041_v32 = vsel %vm501_vm2, %v2020_v38, 0 }
 0x18b   : > { %v1034_v40 = vpop.f32.mrf.mxu0  ;;  %v1076_v33 = vpop.f32.mrf.mxu1  ;;  %v11662_v2 = vand.u32 4294901760, %v2041_v32  ;;  %v741_v1 = vadd.f32 %v11530_v48, %v707_v42  ;;  %v711_v48 = vadd.f32 %v11528_v8, %v11493_v27 }
 0x18c   : > { %v1077_v47 = vadd.f32 %v1076_v33, %v1027_v10  ;;  %v1112_v59 = vpop.f32.mrf.mxu2  ;;  %v1035_v7 = vadd.f32 %v1034_v40, %v737_v26 }
 0x18d   : > { %v11671_v40 = vsub.f32 %v2041_v32, %v11662_v2  ;;  %v745_v4 = vadd.f32 %v11551_v46, %v711_v48 }
 0x18e   : > { %v1113_v44 = vadd.f32 %v1112_v59, %v1077_v47  ;;  %1712 = vmatmul.f32.gmra.mxu0 %v11526_v21  ;;  %1742 = vmatmul.f32.vlgmr.msrb.gmra.mxu1 %v11507_v28 }
 0x18f   : > { %1834 = vmatmul.f32.gmra.mxu3 %v11526_v21  ;;  %2113 = vmatpush.msrb.mxu1 %v2112_v5  ;;  %v14247_v26 = vand.u32 4294901760, %v11671_v40 }
 0x190   : > { %v11656_v10 = vadd.f32 %v1151_v11, %v1113_v44  ;;  %1788 = vmatmul.f32.gmra.mxu2 %v11572_v14 }
 0x191   : > { %v2350_v5 = vsub.f32 %v11671_v40, %v14247_v26 }
 0x192   : > { %v1157_v33 = vpop.f32.mrf.mxu3 }
 0x193   : > { %v1042_v47 = vpop.f32.mrf.mxu0  ;;  %v1080_v59 = vpop.f32.mrf.mxu1  ;;  %v2351_v42 = vand.u32 4294901760, %v2350_v5 }
 0x194   : > { %v1081_v55 = vadd.f32 %v1080_v59, %v1035_v7  ;;  %v1117_v54 = vpop.f32.mrf.mxu2  ;;  %v1043_v6 = vadd.f32 %v1042_v47, %v741_v1 }
 0x196   : > { %v1118_v11 = vadd.f32 %v1117_v54, %v1081_v55  ;;  %1716 = vmatmul.f32.gmra.mxu0 %v11549_v49  ;;  %1746 = vmatmul.f32.gmra.mxu1 %v11526_v21 }
 0x197   : > { %1838 = vmatmul.f32.gmra.mxu3 %v11549_v49 }
 0x198   : > { %v11673_v38 = vadd.f32 %v1157_v33, %v1118_v11  ;;  %1796 = vmatmul.f32.gmra.mxu2 %v11595_v56 }
 0x19a   : > { %v1163_v37 = vpop.f32.mrf.mxu3 }
 0x19b   : > { %v1050_v55 = vpop.f32.mrf.mxu0  ;;  %v1084_v52 = vpop.f32.mrf.mxu1 }
 0x19c   : > { %v1085_v44 = vadd.f32 %v1084_v52, %v1043_v6  ;;  %v1122_v31 = vpop.f32.mrf.mxu2  ;;  %v1051_v33 = vadd.f32 %v1050_v55, %v745_v4  ;;  %v2022_v52 = vpop.permute.xlu2 %2021 }
 0x19e   : > { %v1123_v32 = vadd.f32 %v1122_v31, %v1085_v44  ;;  %1720 = vmatmul.f32.gmra.mxu0 %v11574_v45  ;;  %1750 = vmatmul.f32.gmra.mxu1 %v11549_v49 }
 0x19f   : > { %1842 = vmatmul.f32.gmra.mxu3 %v11574_v45 }
 0x1a0   : > { %v11688_v7 = vadd.f32 %v1163_v37, %v1123_v32  ;;  %1804 = vmatmul.f32.gmra.mxu2 %v11610_v57 }
 0x1a2   : > { %v1169_v47 = vpop.f32.mrf.mxu3 }
 0x1a3   : > { %v1088_v27 = vpop.f32.mrf.mxu1  ;;  %v11691_v8 = vpop.f32.mrf.mxu0 }
 0x1a4   : > { %v1089_v59 = vadd.f32 %v1088_v27, %v1051_v33  ;;  %v1127_v54 = vpop.f32.mrf.mxu2  ;;  %v2024_v33 = vpop.permute.xlu0 %2023 }
 0x1a5   : > { %v2031_v27 = vsel %vm492_vm0, %v2024_v33, 0  ;;  %v2028_v57 = vpop.permute.xlu2 %2027 }
 0x1a6   : > { %v1128_v11 = vadd.f32 %v1127_v54, %v1089_v59  ;;  %1754 = vmatmul.f32.gmra.mxu1 %v11574_v45  ;;  %1866 = vmatmul.f32.vlgmr.msra.gmra.mxu0 %v11518_v23 }
 0x1a7   : > { %1981 = vmatmul.f32.vlgmr.msra.gmra.mxu3 %v11507_v28  ;;  %2230 = vmatpush.msra.mxu0 %v2110_v39  ;;  %v2029_v39 = vsel %vm492_vm0, %v2022_v52, 0  ;;  %v2026_v52 = vpop.permute.xlu1 %2025 }
 0x1a8   : > { %2352 = vmatpush.msra.mxu3 %v2351_v42  ;;  %v11696_v46 = vadd.f32 %v1169_v47, %v1128_v11  ;;  %1947 = vmatmul.f32.vlgmr.msra.gmra.mxu2 %v11507_v28  ;;  %v11711_v32 = vand.u32 4294901760, %v2029_v39  ;;  %v11729_v11 = vand.u32 4294901760, %v2031_v27 }
 0x1a9   : > { %2298 = vmatpush.msra.mxu2 %v11662_v2 }
 0x1aa   : > { %v1315_v1 = vpop.f32.mrf.mxu3  ;;  %14596 = vst [vmem:[#allocation57_spill] sm:$0xff] %v11711_v32 }
 0x1ab   : > { %v11700_v6 = vpop.f32.mrf.mxu0  ;;  %v11702_v37 = vpop.f32.mrf.mxu1  ;;  %14599 = vst [vmem:[#allocation60_spill] sm:$0xff] %v11729_v11 }
 0x1ac   : > { %v1265_v55 = vpop.f32.mrf.mxu2 }
 0x1ad   : > { %v1266_v44 = vadd.f32 %v1265_v55, %v11588_v29 }
 0x1ae   : > { %1871 = vmatmul.f32.gmra.mxu0 %v11537_v58  ;;  %1905 = vmatmul.f32.vlgmr.msra.gmra.mxu1 %v11524_v22 }
 0x1af   : > { %1985 = vmatmul.f32.gmra.mxu3 %v11526_v21  ;;  %2264 = vmatpush.msra.mxu1 %v11631_v20  ;;  %v1316_v31 = vadd.f32 %v1315_v1, %v1266_v44  ;;  %v11721_v20 = vsub.f32 %v2029_v39, %v11711_v32  ;;  %v11739_v39 = vsub.f32 %v2031_v27, %v11729_v11 }
 0x1b0   : > { %1951 = vmatmul.f32.gmra.mxu2 %v11526_v21 }
 0x1b1   : > { %14597 = vst [vmem:[#allocation58_spill] sm:$0xff] %v11721_v20  ;;  %v11727_v42 = vand.u32 4294901760, %v11721_v20 }
 0x1b2   : > { %v1319_v48 = vpop.f32.mrf.mxu3  ;;  %14600 = vst [vmem:[#allocation61_spill] sm:$0xff] %v11739_v39 }
 0x1b3   : > { %v11713_v4 = vpop.f32.mrf.mxu0  ;;  %v11715_v5 = vpop.f32.mrf.mxu1  ;;  %14598 = vst [vmem:[#allocation59_spill] sm:$0xff] %v11727_v42 }
 0x1b4   : > { %v1273_v29 = vpop.f32.mrf.mxu2 }
 0x1b5   : > { %v1274_v47 = vadd.f32 %v1273_v29, %v11604_v25  ;;  %v2033_v29 = vsel %vm492_vm0, %v2026_v52, 0 }
 0x1b6   : > { %1876 = vmatmul.f32.gmra.mxu0 %v11558_v61  ;;  %1911 = vmatmul.f32.gmra.mxu1 %v11545_v63  ;;  %v11753_v26 = vand.u32 4294901760, %v2033_v29 }
 0x1b7   : > { %1989 = vmatmul.f32.gmra.mxu3 %v11549_v49  ;;  %v1320_v59 = vadd.f32 %v1319_v48, %v1274_v47  ;;  %v2063_v48 = vsub.f32 %v11721_v20, %v11727_v42 }
 0x1b8   : > { %1955 = vmatmul.f32.gmra.mxu2 %v11549_v49  ;;  %14603 = vst [vmem:[#allocation64_spill] sm:$0xff] %v11753_v26 }
 0x1ba   : > { %v1323_v54 = vpop.f32.mrf.mxu3 }
 0x1bb   : > { %v11731_v25 = vpop.f32.mrf.mxu0  ;;  %v11733_v1 = vpop.f32.mrf.mxu1 }
 0x1bc   : > { %v1281_v55 = vpop.f32.mrf.mxu2 }
 0x1bd   : > { %v1282_v44 = vadd.f32 %v1281_v55, %v11617_v3  ;;  %v11749_v3 = vand.u32 4294901760, %v11739_v39  ;;  %v11751_v55 = vand.u32 4294901760, %v2063_v48 }
 0x1be   : > { %1881 = vmatmul.f32.gmra.mxu0 %v11579_v13  ;;  %1917 = vmatmul.f32.gmra.mxu1 %v11570_v43 }
 0x1bf   : > { %1993 = vmatmul.f32.gmra.mxu3 %v11574_v45  ;;  %v11745_v33 = vadd.f32 %v1323_v54, %v1282_v44  ;;  %14601 = vst [vmem:[#allocation62_spill] sm:$0xff] %v11749_v3  ;;  %v11761_v54 = vsub.f32 %v2033_v29, %v11753_v26  ;;  %v2071_v52 = vsub.f32 %v11739_v39, %v11749_v3  ;;  %v2035_v44 = vsel %vm492_vm0, %v2028_v57, 0 }
 0x1c0   : > { %1959 = vmatmul.f32.gmra.mxu2 %v11574_v45  ;;  %14602 = vst [vmem:[#allocation63_spill] sm:$0xff] %v11751_v55  ;;  %v11777_v43 = vand.u32 4294901760, %v2035_v44 }
 0x1c1   : > { %14604 = vst [vmem:[#allocation65_spill] sm:$0xff] %v11761_v54  ;;  %v11773_v45 = vand.u32 4294901760, %v11761_v54 }
 0x1c2   : > { %v1327_v47 = vpop.f32.mrf.mxu3  ;;  %14608 = vst [vmem:[#allocation68_spill] sm:$0xff] %v11777_v43 }
 0x1c3   : > { %v11755_v27 = vpop.f32.mrf.mxu1  ;;  %v1351_v13 = vpop.f32.mrf.mxu0  ;;  %14606 = vst [vmem:[#allocation66_spill] sm:$0xff] %v11773_v45 }
 0x1c4   : > { %v1289_v49 = vpop.f32.mrf.mxu2 }
 0x1c5   : > { %v1290_v61 = vadd.f32 %v1289_v49, %v11634_v36  ;;  %v1352_v49 = vadd.f32 %v1351_v13, %v1316_v31  ;;  %v14605_v36 = vand.u32 4294901760, %v11671_v40  ;;  %v11782_v13 = vsub.f32 %v2035_v44, %v11777_v43  ;;  %v3055_v31 = vld.sshfl [vmem:[#allocation1 + $0x8] sm:$0xff pattern:$0x75316420] }
 0x1c6   : > { %1923 = vmatmul.f32.gmra.mxu1 %v11593_v30  ;;  %2065 = vmatmul.f32.vlgmr.msrb.gmra.mxu0 %v11751_v55  ;;  %v11775_v30 = vand.u32 4294901760, %v2071_v52  ;;  %v3054_v52 = vld.sshfl [vmem:[#allocation1] sm:$0xff pattern:$0x75316420] }
 0x1c7   : > { %2190 = vmatmul.f32.vlgmr.msrb.gmra.mxu3 %v11727_v42  ;;  %2387 = vmatpush.msrb.mxu0 %v11671_v40  ;;  %v1328_v48 = vadd.f32 %v1327_v47, %v1290_v61  ;;  %14609 = vst [vmem:[#allocation69_spill] sm:$0xff] %v11782_v13  ;;  %v2079_v40 = vsub.f32 %v11761_v54, %v11773_v45 }
 0x1c8   : > { %2503 = vmatpush.msrb.mxu3 %v11662_v2  ;;  %2151 = vmatmul.f32.vlgmr.msrb.gmra.mxu2 %v11721_v20  ;;  %14607 = vst [vmem:[#allocation67_spill] sm:$0xff] %v11775_v30 }
 0x1c9   : > { %2469 = vmatpush.msrb.mxu2 %v14605_v36  ;;  %3577 = vst [vmem:[#allocation1] ss:$2 sm:$0xff] %v11189_v0  ;;  %3060 = vrot.lane.b32.xlu1 %v3055_v31, %s11059_s25  ;;  %v11795_v36 = vand.u32 4294901760, %v11782_v13 }
 0x1ca   : > { %v1466_v29 = vpop.f32.mrf.mxu3  ;;  %3058 = vrot.lane.b32.xlu0 %v3054_v52, %s11059_s25 }
 0x1cb   : > { %v1356_v21 = vpop.f32.mrf.mxu0  ;;  %v1390_v56 = vpop.f32.mrf.mxu1  ;;  %14610 = vst [vmem:[#allocation70_spill] sm:$0xff] %v11795_v36  ;;  %v2087_v31 = vsub.f32 %v11782_v13, %v11795_v36 }
 0x1cc   : > { %v1391_v57 = vadd.f32 %v1390_v56, %v1352_v49  ;;  %v1432_v61 = vpop.f32.mrf.mxu2  ;;  %v1357_v44 = vadd.f32 %v1356_v21, %v1320_v59  ;;  %v11807_v59 = vld [vmem:[%s11186_s11 + $0x8] sm:$0xff] }
 0x1ce   : > { %v1433_v47 = vadd.f32 %v1432_v61, %v1391_v57  ;;  %2073 = vmatmul.f32.gmra.mxu0 %v11775_v30  ;;  %2115 = vmatmul.f32.vlgmr.msrb.gmra.mxu1 %v11711_v32  ;;  %v11797_v57 = vand.u32 4294901760, %v2079_v40  ;;  %v11812_v40 = vld [vmem:[%s11186_s11 + $0x10] sm:$0xff] }
 0x1cf   : > { %2196 = vmatmul.f32.gmra.mxu3 %v11749_v3  ;;  %2425 = vmatpush.msrb.mxu1 %v11662_v2 }
 0x1d0   : > { %v11789_v56 = vadd.f32 %v1466_v29, %v1433_v47  ;;  %2156 = vmatmul.f32.gmra.mxu2 %v11739_v39  ;;  %14611 = vst [vmem:[#allocation71_spill] sm:$0xff] %v11797_v57 }
 0x1d1   : > { %3073 = vrot.lane.b32.xlu1 %v11812_v40, %s11058_s23 }
 0x1d2   : > { %v1470_v49 = vpop.f32.mrf.mxu3  ;;  %3071 = vrot.lane.b32.xlu0 %v11807_v59, %s11058_s23  ;;  %s11061_s23 = smov 113  }
 0x1d3   : > { %v1361_v2 = vpop.f32.mrf.mxu0  ;;  %v1396_v61 = vpop.f32.mrf.mxu1 }
 0x1d4   : > { %v1397_v29 = vadd.f32 %v1396_v61, %v1357_v44  ;;  %v1436_v47 = vpop.f32.mrf.mxu2  ;;  %v1362_v52 = vadd.f32 %v1361_v2, %v11745_v33  ;;  %v11818_v61 = vand.u32 4294901760, %v2087_v31  ;;  %v11830_v31 = vld [vmem:[%s14192_s1] sm:$0xff] }
 0x1d5   : > { %14613 = vst [vmem:[#allocation73_spill] sm:$0xff] %v11830_v31 }
 0x1d6   : > { %v1437_v58 = vadd.f32 %v1436_v47, %v1397_v29  ;;  %2081 = vmatmul.f32.gmra.mxu0 %v11797_v57  ;;  %2119 = vmatmul.f32.gmra.mxu1 %v11729_v11  ;;  %14612 = vst [vmem:[#allocation72_spill] sm:$0xff] %v11818_v61 }
 0x1d7   : > { %2202 = vmatmul.f32.gmra.mxu3 %v11773_v45 }
 0x1d8   : > { %v11804_v21 = vadd.f32 %v1470_v49, %v1437_v58  ;;  %2161 = vmatmul.f32.gmra.mxu2 %v11761_v54 }
 0x1da   : > { %v1474_v44 = vpop.f32.mrf.mxu3 }
 0x1db   : > { %v1366_v29 = vpop.f32.mrf.mxu0  ;;  %v1402_v58 = vpop.f32.mrf.mxu1 }
 0x1dc   : > { %v1403_v49 = vadd.f32 %v1402_v58, %v1362_v52  ;;  %v1440_v47 = vpop.f32.mrf.mxu2  ;;  %v1367_v14 = vadd.f32 %v1366_v29, %v1328_v48  ;;  %v2537_v2 = vpop.permute.xlu1 %2536  ;;  %v14280_v52 = vperm.slane %v11830_v31, 3 }
 0x1de   : > { %v1441_v63 = vadd.f32 %v1440_v47, %v1403_v49  ;;  %2089 = vmatmul.f32.gmra.mxu0 %v11818_v61  ;;  %2123 = vmatmul.f32.gmra.mxu1 %v11753_v26 }
 0x1df   : > { %2208 = vmatmul.f32.gmra.mxu3 %v11795_v36 }
 0x1e0   : > { %v11823_v28 = vadd.f32 %v1474_v44, %v1441_v63  ;;  %2166 = vmatmul.f32.gmra.mxu2 %v11782_v13  ;;  %v2535_v63 = vpop.permute.xlu0 %2534 }
 0x1e1   : > { %v2540_v44 = vsel %vm2538_vm7, %v2537_v2, %v2535_v63 }
 0x1e2   : > { %v1478_v33 = vpop.f32.mrf.mxu3  ;;  %v2543_v29 = vmul.f32 %v14280_v52, %v2540_v44  ;;  %v2539_v44 = vsel %vm2538_vm7, %v2535_v63, %v2537_v2 }
 0x1e3   : > { %v1408_v58 = vpop.f32.mrf.mxu1  ;;  %v1542_v49 = vpop.f32.mrf.mxu0 }
 0x1e4   : > { %v1409_v47 = vadd.f32 %v1408_v58, %v1367_v14  ;;  %v1444_v23 = vpop.f32.mrf.mxu2  ;;  %v2562_v53 = vsel %vm501_vm2, %v2543_v29, 0  ;;  %v11847_v14 = vld [vmem:[%s14192_s1 + $0x8] sm:$0xff] }
 0x1e5   : > { %14614 = vst [vmem:[#allocation74_spill] sm:$0xff] %v11847_v14  ;;  %v11850_v58 = vand.u32 4294901760, %v2562_v53 }
 0x1e6   : > { %v1445_v48 = vadd.f32 %v1444_v23, %v1409_v47  ;;  %2127 = vmatmul.f32.gmra.mxu1 %v11777_v43  ;;  %2232 = vmatmul.f32.vlgmr.msra.gmra.mxu0 %v11711_v32  ;;  %v14289_v23 = vperm.slane %v11847_v14, 3 }
 0x1e7   : > { %2354 = vmatmul.f32.vlgmr.msra.gmra.mxu3 %v11711_v32  ;;  %2583 = vmatpush.msra.mxu0 %v11850_v58 }
 0x1e8   : > { %v11840_v22 = vadd.f32 %v1478_v33, %v1445_v48  ;;  %2304 = vmatmul.f32.vlgmr.msra.gmra.mxu2 %v11751_v55  ;;  %v2633_v48 = vsub.f32 %v2562_v53, %v11850_v58  ;;  %2710 = vmatpush.msra.mxu3 %v11850_v58  ;;  %v2544_v62 = vmul.f32 %v14289_v23, %v2539_v44 }
 0x1ea   : > { %v1667_v47 = vpop.f32.mrf.mxu3  ;;  %2672 = vmatpush.msra.mxu2 %v2633_v48  ;;  %v2634_v2 = vand.u32 4294901760, %v2633_v48 }
 0x1eb   : > { %v1550_v52 = vpop.f32.mrf.mxu0  ;;  %v1592_v33 = vpop.f32.mrf.mxu1 }
 0x1ec   : > { %v1593_v29 = vadd.f32 %v1592_v33, %v1542_v49  ;;  %v1628_v55 = vpop.f32.mrf.mxu2  ;;  %v2635_v53 = vsub.f32 %v2633_v48, %v2634_v2  ;;  %v11878_v48 = vld [vmem:[%s11186_s11 + $0x18] sm:$0xff] }
 0x1ed   : > { %3599 = vrot.lane.b32.xlu2 %v11878_v48, %s11060_s20 }
 0x1ee   : > { %v1629_v41 = vadd.f32 %v1628_v55, %v1593_v29  ;;  %2236 = vmatmul.f32.gmra.mxu0 %v11729_v11  ;;  %2266 = vmatmul.f32.vlgmr.msra.gmra.mxu1 %v11711_v32  ;;  %v2565_v55 = vsel %vm501_vm2, %v2544_v62, 0  ;;  %v2636_v44 = vand.u32 4294901760, %v2635_v53 }
 0x1ef   : > { %2358 = vmatmul.f32.gmra.mxu3 %v11729_v11  ;;  %v11869_v60 = vand.u32 4294901760, %v2565_v55 }
 0x1f0   : > { %v1668_v63 = vadd.f32 %v1667_v47, %v1629_v41  ;;  %2312 = vmatmul.f32.gmra.mxu2 %v11775_v30  ;;  %2637 = vmatpush.msra.mxu1 %v2636_v44 }
 0x1f1   : > { %v11875_v47 = vsub.f32 %v2565_v55, %v11869_v60 }
 0x1f2   : > { %v1673_v49 = vpop.f32.mrf.mxu3 }
 0x1f3   : > { %v1558_v33 = vpop.f32.mrf.mxu0  ;;  %v1596_v29 = vpop.f32.mrf.mxu1 }
 0x1f4   : > { %v1597_v23 = vadd.f32 %v1596_v29, %v1550_v52  ;;  %v1633_v19 = vpop.f32.mrf.mxu2  ;;  %v14302_v29 = vand.u32 4294901760, %v11875_v47 }
 0x1f5   : > { %4117 = vrot.lane.b32.xlu2 %v11863_v50, %s14367_s12 }
 0x1f6   : > { %v1634_v41 = vadd.f32 %v1633_v19, %v1597_v23  ;;  %2240 = vmatmul.f32.gmra.mxu0 %v11753_v26  ;;  %2270 = vmatmul.f32.gmra.mxu1 %v11729_v11  ;;  %v2874_v55 = vsub.f32 %v11875_v47, %v14302_v29 }
 0x1f7   : > { %2362 = vmatmul.f32.gmra.mxu3 %v11753_v26 }
 0x1f8   : > { %v1674_v62 = vadd.f32 %v1673_v49, %v1634_v41  ;;  %2320 = vmatmul.f32.gmra.mxu2 %v11797_v57  ;;  %v2875_v34 = vand.u32 4294901760, %v2874_v55 }
 0x1fa   : > { %v1679_v52 = vpop.f32.mrf.mxu3 }
 0x1fb   : > { %v1566_v53 = vpop.f32.mrf.mxu0  ;;  %v1600_v19 = vpop.f32.mrf.mxu1 }
 0x1fc   : > { %v1601_v23 = vadd.f32 %v1600_v19, %v1558_v33  ;;  %v1638_v44 = vpop.f32.mrf.mxu2 }
 0x1fd   : > { %4123 = vrot.lane.b32.xlu2 %v11878_v48, %s14367_s12 }
 0x1fe   : > { %v1639_v30 = vadd.f32 %v1638_v44, %v1601_v23  ;;  %2244 = vmatmul.f32.gmra.mxu0 %v11777_v43  ;;  %2274 = vmatmul.f32.gmra.mxu1 %v11753_v26 }
 0x1ff   : > { %2366 = vmatmul.f32.gmra.mxu3 %v11777_v43 }
 0x200   : > { %v1680_v49 = vadd.f32 %v1679_v52, %v1639_v30  ;;  %2328 = vmatmul.f32.gmra.mxu2 %v11818_v61  ;;  %v1194_v30 = vadd.f32 %v11691_v8, %v11656_v10  ;;  %v2546_v61 = vpop.permute.xlu2 %2545  ;;  %v1198_v8 = vadd.f32 %v11700_v6, %v11673_v38 }
 0x201   : > { %v2553_v10 = vsel %vm492_vm0, %v2546_v61, 0 }
 0x202   : > { %v1685_v41 = vpop.f32.mrf.mxu3 }
 0x203   : > { %v1604_v57 = vpop.f32.mrf.mxu1  ;;  %v1709_v33 = vpop.f32.mrf.mxu0 }
 0x204   : > { %v1605_v19 = vadd.f32 %v1604_v57, %v1566_v53  ;;  %v1643_v24 = vpop.f32.mrf.mxu2  ;;  %v1710_v52 = vadd.f32 %v1709_v33, %v1668_v63  ;;  %v1228_v53 = vadd.f32 %v11702_v37, %v1194_v30  ;;  %v11911_v63 = vand.u32 4294901760, %v2553_v10 }
 0x205   : > { %v1232_v33 = vadd.f32 %v11715_v5, %v1198_v8  ;;  %v1202_v5 = vadd.f32 %v11713_v4, %v11688_v7 }
 0x206   : > { %v1644_v23 = vadd.f32 %v1643_v24, %v1605_v19  ;;  %2278 = vmatmul.f32.gmra.mxu1 %v11777_v43  ;;  %2390 = vmatmul.f32.vlgmr.msrb.gmra.mxu0 %v11721_v20  ;;  %14615 = vst [vmem:[#allocation75_spill] sm:$0xff] %v11911_v63  ;;  %v11921_v38 = vsub.f32 %v2553_v10, %v11911_v63 }
 0x207   : > { %2505 = vmatmul.f32.vlgmr.msrb.gmra.mxu3 %v11711_v32  ;;  %2754 = vmatpush.msrb.mxu0 %v2634_v2  ;;  %v1236_v10 = vadd.f32 %v11733_v1, %v1202_v5 }
 0x208   : > { %2876 = vmatpush.msrb.mxu3 %v2875_v34  ;;  %v1686_v44 = vadd.f32 %v1685_v41, %v1644_v23  ;;  %2471 = vmatmul.f32.vlgmr.msrb.gmra.mxu2 %v11711_v32  ;;  %14616 = vst [vmem:[#allocation76_spill] sm:$0xff] %v11921_v38 }
 0x209   : > { %2822 = vmatpush.msrb.mxu2 %v11869_v60 }
 0x20a   : > { %v1831_v29 = vpop.f32.mrf.mxu3 }
 0x20b   : > { %v1713_v57 = vpop.f32.mrf.mxu0  ;;  %v1743_v24 = vpop.f32.mrf.mxu1 }
 0x20c   : > { %v1744_v55 = vadd.f32 %v1743_v24, %v1710_v52  ;;  %v1781_v19 = vpop.f32.mrf.mxu2  ;;  %v1714_v37 = vadd.f32 %v1713_v57, %v1674_v62  ;;  %v2548_v52 = vpop.permute.xlu0 %2547  ;;  %v11929_v57 = vand.u32 4294901760, %v11921_v38 }
 0x20d   : > { %v11899_v20 = vadd.f32 %v1831_v29, %v1781_v19  ;;  %v2555_v6 = vsel %vm492_vm0, %v2548_v52, 0 }
 0x20e   : > { %v11901_v34 = vadd.f32 %v1744_v55, %v1228_v53  ;;  %2395 = vmatmul.f32.gmra.mxu0 %v11739_v39  ;;  %2429 = vmatmul.f32.vlgmr.msrb.gmra.mxu1 %v11727_v42  ;;  %14617 = vst [vmem:[#allocation77_spill] sm:$0xff] %v11929_v57  ;;  %v11931_v53 = vand.u32 4294901760, %v2555_v6  ;;  %v2587_v4 = vsub.f32 %v11921_v38, %v11929_v57 }
 0x20f   : > { %2509 = vmatmul.f32.gmra.mxu3 %v11729_v11  ;;  %2788 = vmatpush.msrb.mxu1 %v11850_v58 }
 0x210   : > { %2475 = vmatmul.f32.gmra.mxu2 %v11729_v11  ;;  %14618 = vst [vmem:[#allocation78_spill] sm:$0xff] %v11931_v53  ;;  %v11941_v7 = vsub.f32 %v2555_v6, %v11931_v53  ;;  %v11953_v52 = vand.u32 4294901760, %v2587_v4 }
 0x212   : > { %v1835_v2 = vpop.f32.mrf.mxu3  ;;  %14619 = vst [vmem:[#allocation79_spill] sm:$0xff] %v11941_v7 }
 0x213   : > { %v1717_v29 = vpop.f32.mrf.mxu0  ;;  %v1747_v41 = vpop.f32.mrf.mxu1  ;;  %14621 = vst [vmem:[#allocation81_spill] sm:$0xff] %v11953_v52 }
 0x214   : > { %v1748_v23 = vadd.f32 %v1747_v41, %v1714_v37  ;;  %v1789_v30 = vpop.f32.mrf.mxu2  ;;  %v1718_v61 = vadd.f32 %v1717_v29, %v1680_v49  ;;  %v1206_v49 = vadd.f32 %v11731_v25, %v11696_v46 }
 0x215   : > { %v11914_v24 = vadd.f32 %v1835_v2, %v1789_v30  ;;  %v2550_v2 = vpop.permute.xlu1 %2549  ;;  %v11951_v30 = vand.u32 4294901760, %v11941_v7 }
 0x216   : > { %v11916_v58 = vadd.f32 %v1748_v23, %v1232_v33  ;;  %2400 = vmatmul.f32.gmra.mxu0 %v11761_v54  ;;  %2435 = vmatmul.f32.gmra.mxu1 %v11749_v3  ;;  %v2557_v1 = vsel %vm492_vm0, %v2550_v2, 0  ;;  %v14624_v2 = vand.u32 4294901760, %v11875_v47 }
 0x217   : > { %2513 = vmatmul.f32.gmra.mxu3 %v11753_v26  ;;  %14620 = vst [vmem:[#allocation80_spill] sm:$0xff] %v11951_v30  ;;  %v11955_v6 = vand.u32 4294901760, %v2557_v1 }
 0x218   : > { %2479 = vmatmul.f32.gmra.mxu2 %v11753_v26 }
 0x219   : > { %14622 = vst [vmem:[#allocation82_spill] sm:$0xff] %v11955_v6  ;;  %v11965_v25 = vsub.f32 %v2557_v1, %v11955_v6 }
 0x21a   : > { %v1839_v62 = vpop.f32.mrf.mxu3 }
 0x21b   : > { %v1721_v55 = vpop.f32.mrf.mxu0  ;;  %v1751_v19 = vpop.f32.mrf.mxu1  ;;  %14623 = vst [vmem:[#allocation83_spill] sm:$0xff] %v11965_v25  ;;  %v11978_v1 = vand.u32 4294901760, %v11965_v25 }
 0x21c   : > { %v1752_v8 = vadd.f32 %v1751_v19, %v1718_v61  ;;  %v1797_v37 = vpop.f32.mrf.mxu2  ;;  %v1722_v29 = vadd.f32 %v1721_v55, %v1686_v44  ;;  %v2595_v44 = vsub.f32 %v11941_v7, %v11951_v30 }
 0x21d   : > { %v11934_v41 = vadd.f32 %v1839_v62, %v1797_v37  ;;  %v1240_v62 = vadd.f32 %v11755_v27, %v1206_v49  ;;  %14625 = vst [vmem:[#allocation84_spill] sm:$0xff] %v11978_v1 }
 0x21e   : > { %v11936_v33 = vadd.f32 %v1752_v8, %v1236_v10  ;;  %2405 = vmatmul.f32.gmra.mxu0 %v11782_v13  ;;  %2441 = vmatmul.f32.gmra.mxu1 %v11773_v45  ;;  %v2552_v8 = vpop.permute.xlu2 %2551  ;;  %v11980_v49 = vand.u32 4294901760, %v2595_v44 }
 0x21f   : > { %2517 = vmatmul.f32.gmra.mxu3 %v11777_v43  ;;  %v2559_v27 = vsel %vm492_vm0, %v2552_v8, 0  ;;  %v3578_v8 = vld.sshfl [vmem:[#allocation1] sm:$0xff pattern:$0x75316420] }
 0x220   : > { %2483 = vmatmul.f32.gmra.mxu2 %v11777_v43  ;;  %14626 = vst [vmem:[#allocation85_spill] sm:$0xff] %v11980_v49  ;;  %3582 = vrot.lane.b32.xlu0 %v3578_v8, %s11061_s23 }
 0x222   : > { %v1843_v23 = vpop.f32.mrf.mxu3 }
 0x223   : > { %v1755_v5 = vpop.f32.mrf.mxu1  ;;  %v1867_v61 = vpop.f32.mrf.mxu0 }
 0x224   : > { %v1756_v19 = vadd.f32 %v1755_v5, %v1722_v29  ;;  %v1805_v10 = vpop.f32.mrf.mxu2  ;;  %v1868_v55 = vadd.f32 %v1867_v61, %v11899_v20  ;;  %v11982_v29 = vand.u32 4294901760, %v2559_v27  ;;  %v3579_v61 = vld.sshfl [vmem:[#allocation1 + $0x8] sm:$0xff pattern:$0x75316420] }
 0x225   : > { %v11958_v37 = vadd.f32 %v1843_v23, %v1805_v10  ;;  %4101 = vst [vmem:[#allocation1] ss:$2 sm:$0xff] %v11189_v0  ;;  %3584 = vrot.lane.b32.xlu1 %v3579_v61, %s11061_s23 }
 0x226   : > { %v11960_v46 = vadd.f32 %v1756_v19, %v1240_v62  ;;  %2447 = vmatmul.f32.gmra.mxu1 %v11795_v36  ;;  %2589 = vmatmul.f32.vlgmr.msra.gmra.mxu0 %v11953_v52  ;;  %14627 = vst [vmem:[#allocation86_spill] sm:$0xff] %v11982_v29  ;;  %v11987_v20 = vsub.f32 %v2559_v27, %v11982_v29 }
 0x227   : > { %2714 = vmatmul.f32.vlgmr.msra.gmra.mxu3 %v11929_v57  ;;  %2911 = vmatpush.msra.mxu0 %v11875_v47  ;;  %v2603_v47 = vsub.f32 %v11965_v25, %v11978_v1 }
 0x228   : > { %3027 = vmatpush.msra.mxu3 %v11869_v60  ;;  %2675 = vmatmul.f32.vlgmr.msra.gmra.mxu2 %v11921_v38  ;;  %14628 = vst [vmem:[#allocation87_spill] sm:$0xff] %v11987_v20 }
 0x229   : > { %2993 = vmatpush.msra.mxu2 %v14624_v2  ;;  %v12004_v2 = vand.u32 4294901760, %v11987_v20  ;;  %3595 = vrot.lane.b32.xlu0 %v11807_v59, %s11060_s20 }
 0x22a   : > { %v1982_v4 = vpop.f32.mrf.mxu3 }
 0x22b   : > { %v1872_v23 = vpop.f32.mrf.mxu0  ;;  %v1906_v5 = vpop.f32.mrf.mxu1  ;;  %14629 = vst [vmem:[#allocation88_spill] sm:$0xff] %v12004_v2 }
 0x22c   : > { %v1907_v62 = vadd.f32 %v1906_v5, %v1868_v55  ;;  %v1948_v19 = vpop.f32.mrf.mxu2  ;;  %v1873_v27 = vadd.f32 %v1872_v23, %v11914_v24  ;;  %v2611_v24 = vsub.f32 %v11987_v20, %v12004_v2 }
 0x22d   : > { %3597 = vrot.lane.b32.xlu1 %v11812_v40, %s11060_s20  ;;  %s11063_s20 = smov 110  }
 0x22e   : > { %v1949_v10 = vadd.f32 %v1948_v19, %v1907_v62  ;;  %2597 = vmatmul.f32.gmra.mxu0 %v11980_v49  ;;  %2639 = vmatmul.f32.vlgmr.msra.gmra.mxu1 %v11911_v63 }
 0x22f   : > { %2720 = vmatmul.f32.gmra.mxu3 %v11951_v30  ;;  %2949 = vmatpush.msra.mxu1 %v11869_v60 }
 0x230   : > { %v1983_v44 = vadd.f32 %v1982_v4, %v1949_v10  ;;  %2680 = vmatmul.f32.gmra.mxu2 %v11941_v7  ;;  %v12006_v4 = vand.u32 4294901760, %v2603_v47  ;;  %4641 = vrot.lane.b32.xlu2 %v11863_v50, %s11063_s20 }
 0x232   : > { %v12001_v55 = vadd.f32 %v1983_v44, %v11789_v56  ;;  %v1986_v60 = vpop.f32.mrf.mxu3  ;;  %14630 = vst [vmem:[#allocation89_spill] sm:$0xff] %v12006_v4  ;;  %v12024_v44 = vand.u32 4294901760, %v2611_v24 }
 0x233   : > { %v1877_v5 = vpop.f32.mrf.mxu0  ;;  %v1912_v62 = vpop.f32.mrf.mxu1 }
 0x234   : > { %v1913_v19 = vadd.f32 %v1912_v62, %v1873_v27  ;;  %v1952_v10 = vpop.f32.mrf.mxu2  ;;  %v1878_v23 = vadd.f32 %v1877_v5, %v11934_v41  ;;  %14631 = vst [vmem:[#allocation90_spill] sm:$0xff] %v12024_v44 }
 0x236   : > { %v1953_v61 = vadd.f32 %v1952_v10, %v1913_v19  ;;  %2605 = vmatmul.f32.gmra.mxu0 %v12006_v4  ;;  %2643 = vmatmul.f32.gmra.mxu1 %v11931_v53 }
 0x237   : > { %2726 = vmatmul.f32.gmra.mxu3 %v11978_v1 }
 0x238   : > { %v1987_v56 = vadd.f32 %v1986_v60, %v1953_v61  ;;  %2685 = vmatmul.f32.gmra.mxu2 %v11965_v25  ;;  %4647 = vrot.lane.b32.xlu2 %v11878_v48, %s11063_s20 }
 0x23a   : > { %v12022_v47 = vadd.f32 %v1987_v56, %v11804_v21  ;;  %v1990_v8 = vpop.f32.mrf.mxu3  ;;  %v14311_v56 = vperm.slane %v11830_v31, 4 }
 0x23b   : > { %v1882_v27 = vpop.f32.mrf.mxu0  ;;  %v1918_v60 = vpop.f32.mrf.mxu1 }
 0x23c   : > { %v1919_v62 = vadd.f32 %v1918_v60, %v1878_v23  ;;  %v1956_v19 = vpop.f32.mrf.mxu2  ;;  %v1883_v21 = vadd.f32 %v1882_v27, %v11958_v37  ;;  %v3061_v24 = vpop.permute.xlu1 %3060 }
 0x23d   : > { %v3059_v43 = vpop.permute.xlu0 %3058 }
 0x23e   : > { %v1957_v10 = vadd.f32 %v1956_v19, %v1919_v62  ;;  %2613 = vmatmul.f32.gmra.mxu0 %v12024_v44  ;;  %2647 = vmatmul.f32.gmra.mxu1 %v11955_v6 }
 0x23f   : > { %2732 = vmatmul.f32.gmra.mxu3 %v12004_v2 }
 0x240   : > { %v1991_v61 = vadd.f32 %v1990_v8, %v1957_v10  ;;  %2690 = vmatmul.f32.gmra.mxu2 %v11987_v20  ;;  %v3063_v8 = vsel %vm3062_vm8, %v3059_v43, %v3061_v24 }
 0x242   : > { %v12032_v41 = vadd.f32 %v1991_v61, %v11823_v28  ;;  %v1994_v5 = vpop.f32.mrf.mxu3  ;;  %v3067_v28 = vmul.f32 %v14311_v56, %v3063_v8  ;;  %v14316_v61 = vperm.slane %v11847_v14, 4 }
 0x243   : > { %v1924_v23 = vpop.f32.mrf.mxu1  ;;  %v2066_v60 = vpop.f32.mrf.mxu0 }
 0x244   : > { %v1925_v62 = vadd.f32 %v1924_v23, %v1883_v21  ;;  %v1960_v19 = vpop.f32.mrf.mxu2  ;;  %v3086_v27 = vsel %vm501_vm2, %v3067_v28, 0 }
 0x245   : > { %v12046_v21 = vand.u32 4294901760, %v3086_v27 }
 0x246   : > { %v1961_v10 = vadd.f32 %v1960_v19, %v1925_v62  ;;  %2651 = vmatmul.f32.gmra.mxu1 %v11982_v29  ;;  %2756 = vmatmul.f32.vlgmr.msrb.gmra.mxu0 %v11911_v63  ;;  %v3064_v19 = vsel %vm3062_vm8, %v3061_v24, %v3059_v43 }
 0x247   : > { %2878 = vmatmul.f32.vlgmr.msrb.gmra.mxu3 %v11911_v63  ;;  %v3157_v56 = vsub.f32 %v3086_v27, %v12046_v21  ;;  %3107 = vmatpush.msrb.mxu0 %v12046_v21  ;;  %v3068_v28 = vmul.f32 %v14316_v61, %v3064_v19 }
 0x248   : > { %v1995_v37 = vadd.f32 %v1994_v5, %v1961_v10  ;;  %2828 = vmatmul.f32.vlgmr.msrb.gmra.mxu2 %v11953_v52  ;;  %3234 = vmatpush.msrb.mxu3 %v12046_v21 }
 0x249   : > { %3196 = vmatpush.msrb.mxu2 %v3157_v56  ;;  %v3158_v43 = vand.u32 4294901760, %v3157_v56  ;;  %v3089_v27 = vsel %vm501_vm2, %v3068_v28, 0 }
 0x24a   : > { %v12049_v23 = vadd.f32 %v1995_v37, %v11840_v22  ;;  %v2191_v62 = vpop.f32.mrf.mxu3 }
 0x24b   : > { %v2074_v13 = vpop.f32.mrf.mxu0  ;;  %v2116_v8 = vpop.f32.mrf.mxu1  ;;  %v3159_v37 = vsub.f32 %v3157_v56, %v3158_v43 }
 0x24c   : > { %v2117_v5 = vadd.f32 %v2116_v8, %v2066_v60  ;;  %v2152_v10 = vpop.f32.mrf.mxu2 }
 0x24d   : > { %v3160_v8 = vand.u32 4294901760, %v3159_v37 }
 0x24e   : > { %v2153_v22 = vadd.f32 %v2152_v10, %v2117_v5  ;;  %2760 = vmatmul.f32.gmra.mxu0 %v11931_v53  ;;  %2790 = vmatmul.f32.vlgmr.msrb.gmra.mxu1 %v11911_v63  ;;  %v12063_v5 = vand.u32 4294901760, %v3089_v27 }
 0x24f   : > { %2882 = vmatmul.f32.gmra.mxu3 %v11931_v53  ;;  %3161 = vmatpush.msrb.mxu1 %v3160_v8 }
 0x250   : > { %v2192_v24 = vadd.f32 %v2191_v62, %v2153_v22  ;;  %2836 = vmatmul.f32.gmra.mxu2 %v11980_v49  ;;  %v12069_v56 = vsub.f32 %v3089_v27, %v12063_v5 }
 0x252   : > { %v2197_v60 = vpop.f32.mrf.mxu3  ;;  %v14321_v8 = vand.u32 4294901760, %v12069_v56 }
 0x253   : > { %v2082_v52 = vpop.f32.mrf.mxu0  ;;  %v2120_v36 = vpop.f32.mrf.mxu1 }
 0x254   : > { %v2121_v19 = vadd.f32 %v2120_v36, %v2074_v13  ;;  %v2157_v61 = vpop.f32.mrf.mxu2  ;;  %v3398_v27 = vsub.f32 %v12069_v56, %v14321_v8 }
 0x256   : > { %v2158_v10 = vadd.f32 %v2157_v61, %v2121_v19  ;;  %2764 = vmatmul.f32.gmra.mxu0 %v11955_v6  ;;  %2794 = vmatmul.f32.gmra.mxu1 %v11931_v53  ;;  %v3399_v49 = vand.u32 4294901760, %v3398_v27 }
 0x257   : > { %2886 = vmatmul.f32.gmra.mxu3 %v11955_v6 }
 0x258   : > { %v2198_v62 = vadd.f32 %v2197_v60, %v2158_v10  ;;  %2844 = vmatmul.f32.gmra.mxu2 %v12006_v4 }
 0x25a   : > { %v2203_v28 = vpop.f32.mrf.mxu3 }
 0x25b   : > { %v2090_v22 = vpop.f32.mrf.mxu0  ;;  %v2124_v13 = vpop.f32.mrf.mxu1 }
 0x25c   : > { %v2125_v36 = vadd.f32 %v2124_v13, %v2082_v52  ;;  %v2162_v37 = vpop.f32.mrf.mxu2 }
 0x25e   : > { %v2163_v61 = vadd.f32 %v2162_v37, %v2125_v36  ;;  %2768 = vmatmul.f32.gmra.mxu0 %v11982_v29  ;;  %2798 = vmatmul.f32.gmra.mxu1 %v11955_v6 }
 0x25f   : > { %2890 = vmatmul.f32.gmra.mxu3 %v11982_v29 }
 0x260   : > { %v2204_v60 = vadd.f32 %v2203_v28, %v2163_v61  ;;  %2852 = vmatmul.f32.gmra.mxu2 %v12024_v44 }
 0x262   : > { %v2209_v19 = vpop.f32.mrf.mxu3 }
 0x263   : > { %v2128_v10 = vpop.f32.mrf.mxu1  ;;  %v2233_v52 = vpop.f32.mrf.mxu0 }
 0x264   : > { %v2129_v13 = vadd.f32 %v2128_v10, %v2090_v22  ;;  %v2167_v4 = vpop.f32.mrf.mxu2  ;;  %v2234_v28 = vadd.f32 %v2233_v52, %v2192_v24 }
 0x266   : > { %v2168_v36 = vadd.f32 %v2167_v4, %v2129_v13  ;;  %2802 = vmatmul.f32.gmra.mxu1 %v11982_v29  ;;  %2914 = vmatmul.f32.vlgmr.msra.gmra.mxu0 %v11921_v38  ;;  %v3070_v4 = vpop.permute.xlu2 %3069 }
 0x267   : > { %3029 = vmatmul.f32.vlgmr.msra.gmra.mxu3 %v11911_v63  ;;  %3278 = vmatpush.msra.mxu0 %v3158_v43 }
 0x268   : > { %3400 = vmatpush.msra.mxu3 %v3399_v49  ;;  %v2210_v37 = vadd.f32 %v2209_v19, %v2168_v36  ;;  %2995 = vmatmul.f32.vlgmr.msra.gmra.mxu2 %v11911_v63  ;;  %v3077_v49 = vsel %vm492_vm0, %v3070_v4, 0 }
 0x269   : > { %3346 = vmatpush.msra.mxu2 %v12063_v5  ;;  %v12096_v19 = vand.u32 4294901760, %v3077_v49 }
 0x26a   : > { %v2355_v61 = vpop.f32.mrf.mxu3 }
 0x26b   : > { %v2237_v8 = vpop.f32.mrf.mxu0  ;;  %v2267_v22 = vpop.f32.mrf.mxu1  ;;  %14632 = vst [vmem:[#allocation91_spill] sm:$0xff] %v12096_v19 }
 0x26c   : > { %v2268_v10 = vadd.f32 %v2267_v22, %v2234_v28  ;;  %v2305_v27 = vpop.f32.mrf.mxu2  ;;  %v2238_v43 = vadd.f32 %v2237_v8, %v2198_v62 }
 0x26d   : > { %v12085_v13 = vadd.f32 %v2355_v61, %v2305_v27  ;;  %v3072_v61 = vpop.permute.xlu0 %3071 }
 0x26e   : > { %v12088_v44 = vadd.f32 %v2268_v10, %v11901_v34  ;;  %2919 = vmatmul.f32.gmra.mxu0 %v11941_v7  ;;  %2953 = vmatmul.f32.vlgmr.msra.gmra.mxu1 %v11929_v57  ;;  %v3079_v62 = vsel %vm492_vm0, %v3072_v61, 0 }
 0x26f   : > { %3033 = vmatmul.f32.gmra.mxu3 %v11931_v53  ;;  %3312 = vmatpush.msra.mxu1 %v12046_v21  ;;  %v12106_v21 = vsub.f32 %v3077_v49, %v12096_v19 }
 0x270   : > { %2999 = vmatmul.f32.gmra.mxu2 %v11931_v53 }
 0x271   : > { %14633 = vst [vmem:[#allocation92_spill] sm:$0xff] %v12106_v21  ;;  %v12112_v4 = vand.u32 4294901760, %v12106_v21 }
 0x272   : > { %v2359_v24 = vpop.f32.mrf.mxu3 }
 0x273   : > { %v2241_v52 = vpop.f32.mrf.mxu0  ;;  %v2271_v36 = vpop.f32.mrf.mxu1  ;;  %14634 = vst [vmem:[#allocation93_spill] sm:$0xff] %v12112_v4 }
 0x274   : > { %v2272_v34 = vadd.f32 %v2271_v36, %v2238_v43  ;;  %v2313_v28 = vpop.f32.mrf.mxu2  ;;  %v2242_v8 = vadd.f32 %v2241_v52, %v2204_v60  ;;  %v3111_v52 = vsub.f32 %v12106_v21, %v12112_v4 }
 0x275   : > { %v12098_v22 = vadd.f32 %v2359_v24, %v2313_v28  ;;  %v3074_v28 = vpop.permute.xlu1 %3073 }
 0x276   : > { %v12101_v10 = vadd.f32 %v2272_v34, %v11916_v58  ;;  %2924 = vmatmul.f32.gmra.mxu0 %v11965_v25  ;;  %2959 = vmatmul.f32.gmra.mxu1 %v11951_v30  ;;  %v12114_v58 = vand.u32 4294901760, %v3079_v62  ;;  %v3081_v61 = vsel %vm492_vm0, %v3074_v28, 0 }
 0x277   : > { %3037 = vmatmul.f32.gmra.mxu3 %v11955_v6 }
 0x278   : > { %3003 = vmatmul.f32.gmra.mxu2 %v11955_v6  ;;  %14635 = vst [vmem:[#allocation94_spill] sm:$0xff] %v12114_v58  ;;  %v12124_v60 = vsub.f32 %v3079_v62, %v12114_v58 }
 0x27a   : > { %v2363_v27 = vpop.f32.mrf.mxu3  ;;  %14636 = vst [vmem:[#allocation95_spill] sm:$0xff] %v12124_v60 }
 0x27b   : > { %v2245_v43 = vpop.f32.mrf.mxu0  ;;  %v2275_v24 = vpop.f32.mrf.mxu1 }
 0x27c   : > { %v2276_v36 = vadd.f32 %v2275_v24, %v2242_v8  ;;  %v2321_v34 = vpop.f32.mrf.mxu2  ;;  %v2246_v8 = vadd.f32 %v2245_v43, %v2210_v37  ;;  %v12134_v24 = vand.u32 4294901760, %v3111_v52 }
 0x27d   : > { %v12116_v49 = vadd.f32 %v2363_v27, %v2321_v34 }
 0x27e   : > { %v12119_v25 = vadd.f32 %v2276_v36, %v11936_v33  ;;  %2929 = vmatmul.f32.gmra.mxu0 %v11987_v20  ;;  %2965 = vmatmul.f32.gmra.mxu1 %v11978_v1  ;;  %v12132_v33 = vand.u32 4294901760, %v12124_v60  ;;  %14638 = vst [vmem:[#allocation97_spill] sm:$0xff] %v12134_v24  ;;  %v12136_v36 = vand.u32 4294901760, %v3081_v61  ;;  %v3076_v1 = vpop.permute.xlu2 %3075 }
 0x27f   : > { %3041 = vmatmul.f32.gmra.mxu3 %v11982_v29 }
 0x280   : > { %3007 = vmatmul.f32.gmra.mxu2 %v11982_v29  ;;  %14637 = vst [vmem:[#allocation96_spill] sm:$0xff] %v12132_v33  ;;  %v12146_v37 = vsub.f32 %v3081_v61, %v12136_v36  ;;  %v3119_v43 = vsub.f32 %v12124_v60, %v12132_v33 }
 0x281   : > { %14639 = vst [vmem:[#allocation98_spill] sm:$0xff] %v12136_v36 }
 0x282   : > { %v2367_v27 = vpop.f32.mrf.mxu3  ;;  %14640 = vst [vmem:[#allocation99_spill] sm:$0xff] %v12146_v37  ;;  %v12159_v61 = vand.u32 4294901760, %v12146_v37 }
 0x283   : > { %v2279_v62 = vpop.f32.mrf.mxu1  ;;  %v2391_v34 = vpop.f32.mrf.mxu0 }
 0x284   : > { %v2280_v20 = vadd.f32 %v2279_v62, %v2246_v8  ;;  %v2329_v6 = vpop.f32.mrf.mxu2  ;;  %14642 = vst [vmem:[#allocation100_spill] sm:$0xff] %v12159_v61  ;;  %v12161_v8 = vand.u32 4294901760, %v3119_v43  ;;  %v4102_v43 = vld.sshfl [vmem:[#allocation1] sm:$0xff pattern:$0x75316420] }
 0x285   : > { %v12138_v53 = vadd.f32 %v2367_v27, %v2329_v6  ;;  %v3083_v6 = vsel %vm492_vm0, %v3076_v1, 0  ;;  %4106 = vrot.lane.b32.xlu0 %v4102_v43, %s14367_s12 }
 0x286   : > { %v12141_v28 = vadd.f32 %v2280_v20, %v11960_v46  ;;  %2971 = vmatmul.f32.gmra.mxu1 %v12004_v2  ;;  %3113 = vmatmul.f32.vlgmr.msrb.gmra.mxu0 %v12134_v24  ;;  %v2392_v46 = vadd.f32 %v2391_v34, %v12085_v13  ;;  %v14641_v20 = vand.u32 4294901760, %v12069_v56  ;;  %14643 = vst [vmem:[#allocation101_spill] sm:$0xff] %v12161_v8  ;;  %v12163_v27 = vand.u32 4294901760, %v3083_v6  ;;  %v4103_v34 = vld.sshfl [vmem:[#allocation1 + $0x8] sm:$0xff pattern:$0x75316420] }
 0x287   : > { %3238 = vmatmul.f32.vlgmr.msrb.gmra.mxu3 %v12112_v4  ;;  %3435 = vmatpush.msrb.mxu0 %v12069_v56  ;;  %v3127_v13 = vsub.f32 %v12146_v37, %v12159_v61  ;;  %4625 = vst [vmem:[#allocation1] ss:$2 sm:$0xff] %v11189_v0 }
 0x288   : > { %3551 = vmatpush.msrb.mxu3 %v12063_v5  ;;  %3199 = vmatmul.f32.vlgmr.msrb.gmra.mxu2 %v12106_v21  ;;  %14644 = vst [vmem:[#allocation102_spill] sm:$0xff] %v12163_v27  ;;  %v12168_v56 = vsub.f32 %v3083_v6, %v12163_v27 }
 0x289   : > { %3517 = vmatpush.msrb.mxu2 %v14641_v20  ;;  %4108 = vrot.lane.b32.xlu1 %v4103_v34, %s14367_s12 }
 0x28a   : > { %v2506_v52 = vpop.f32.mrf.mxu3  ;;  %14645 = vst [vmem:[#allocation103_spill] sm:$0xff] %v12168_v56  ;;  %v12183_v20 = vand.u32 4294901760, %v12168_v56 }
 0x28b   : > { %v2396_v62 = vpop.f32.mrf.mxu0  ;;  %v2430_v29 = vpop.f32.mrf.mxu1 }
 0x28c   : > { %v2431_v1 = vadd.f32 %v2430_v29, %v2392_v46  ;;  %v2472_v2 = vpop.f32.mrf.mxu2  ;;  %14646 = vst [vmem:[#allocation104_spill] sm:$0xff] %v12183_v20 }
 0x28d   : > { %4119 = vrot.lane.b32.xlu0 %v11807_v59, %s14367_s12 }
 0x28e   : > { %v2473_v7 = vadd.f32 %v2472_v2, %v2431_v1  ;;  %3121 = vmatmul.f32.gmra.mxu0 %v12161_v8  ;;  %3163 = vmatmul.f32.vlgmr.msrb.gmra.mxu1 %v12096_v19  ;;  %v2397_v2 = vadd.f32 %v2396_v62, %v12098_v22  ;;  %v12185_v1 = vand.u32 4294901760, %v3127_v13  ;;  %v3135_v22 = vsub.f32 %v12168_v56, %v12183_v20 }
 0x28f   : > { %3244 = vmatmul.f32.gmra.mxu3 %v12132_v33  ;;  %3473 = vmatpush.msrb.mxu1 %v12063_v5 }
 0x290   : > { %v2507_v29 = vadd.f32 %v2506_v52, %v2473_v7  ;;  %3204 = vmatmul.f32.gmra.mxu2 %v12124_v60  ;;  %14647 = vst [vmem:[#allocation105_spill] sm:$0xff] %v12185_v1  ;;  %v12201_v43 = vand.u32 4294901760, %v3135_v22 }
 0x291   : > { %4121 = vrot.lane.b32.xlu1 %v11812_v40, %s14367_s12  ;;  %s14443_s12 = smov 111  }
 0x292   : > { %v12180_v6 = vadd.f32 %v2507_v29, %v12001_v55  ;;  %v2510_v46 = vpop.f32.mrf.mxu3  ;;  %14648 = vst [vmem:[#allocation106_spill] sm:$0xff] %v12201_v43 }
 0x293   : > { %v2401_v5 = vpop.f32.mrf.mxu0  ;;  %v2436_v30 = vpop.f32.mrf.mxu1 }
 0x294   : > { %v2437_v7 = vadd.f32 %v2436_v30, %v2397_v2  ;;  %v2476_v52 = vpop.f32.mrf.mxu2  ;;  %v2402_v30 = vadd.f32 %v2401_v5, %v12116_v49 }
 0x296   : > { %v2477_v34 = vadd.f32 %v2476_v52, %v2437_v7  ;;  %3129 = vmatmul.f32.gmra.mxu0 %v12185_v1  ;;  %3167 = vmatmul.f32.gmra.mxu1 %v12114_v58 }
 0x297   : > { %3250 = vmatmul.f32.gmra.mxu3 %v12159_v61  ;;  %v3585_v5 = vpop.permute.xlu1 %3584 }
 0x298   : > { %v2511_v55 = vadd.f32 %v2510_v46, %v2477_v34  ;;  %3209 = vmatmul.f32.gmra.mxu2 %v12146_v37  ;;  %v14342_v34 = vperm.slane %v11830_v31, 5 }
 0x29a   : > { %v12199_v62 = vadd.f32 %v2511_v55, %v12022_v47  ;;  %v2514_v13 = vpop.f32.mrf.mxu3 }
 0x29b   : > { %v2406_v29 = vpop.f32.mrf.mxu0  ;;  %v2442_v2 = vpop.f32.mrf.mxu1 }
 0x29c   : > { %v2443_v7 = vadd.f32 %v2442_v2, %v2402_v30  ;;  %v2480_v46 = vpop.f32.mrf.mxu2  ;;  %v2407_v40 = vadd.f32 %v2406_v29, %v12138_v53 }
 0x29e   : > { %v2481_v52 = vadd.f32 %v2480_v46, %v2443_v7  ;;  %3137 = vmatmul.f32.gmra.mxu0 %v12201_v43  ;;  %3171 = vmatmul.f32.gmra.mxu1 %v12136_v36  ;;  %v3583_v7 = vpop.permute.xlu0 %3582 }
 0x29f   : > { %3256 = vmatmul.f32.gmra.mxu3 %v12183_v20 }
 0x2a0   : > { %v2515_v59 = vadd.f32 %v2514_v13, %v2481_v52  ;;  %3214 = vmatmul.f32.gmra.mxu2 %v12168_v56  ;;  %v3587_v13 = vsel %vm3586_vm9, %v3583_v7, %v3585_v5  ;;  %v14343_v52 = vperm.slane %v11847_v14, 5 }
 0x2a1   : > { %v3591_v53 = vmul.f32 %v14342_v34, %v3587_v13 }
 0x2a2   : > { %v12209_v47 = vadd.f32 %v2515_v59, %v12032_v41  ;;  %v2518_v49 = vpop.f32.mrf.mxu3 }
 0x2a3   : > { %v2448_v22 = vpop.f32.mrf.mxu1  ;;  %v2590_v55 = vpop.f32.mrf.mxu0  ;;  %v3610_v29 = vsel %vm501_vm2, %v3591_v53, 0 }
 0x2a4   : > { %v2449_v30 = vadd.f32 %v2448_v22, %v2407_v40  ;;  %v2484_v2 = vpop.f32.mrf.mxu2  ;;  %v12223_v59 = vand.u32 4294901760, %v3610_v29 }
 0x2a6   : > { %v2485_v46 = vadd.f32 %v2484_v2, %v2449_v30  ;;  %3175 = vmatmul.f32.gmra.mxu1 %v12163_v27  ;;  %3280 = vmatmul.f32.vlgmr.msra.gmra.mxu0 %v12096_v19  ;;  %v3588_v30 = vsel %vm3586_vm9, %v3585_v5, %v3583_v7  ;;  %v3681_v34 = vsub.f32 %v3610_v29, %v12223_v59 }
 0x2a7   : > { %3402 = vmatmul.f32.vlgmr.msra.gmra.mxu3 %v12096_v19  ;;  %3631 = vmatpush.msra.mxu0 %v12223_v59  ;;  %v3592_v53 = vmul.f32 %v14343_v52, %v3588_v30 }
 0x2a8   : > { %v2519_v41 = vadd.f32 %v2518_v49, %v2485_v46  ;;  %3352 = vmatmul.f32.vlgmr.msra.gmra.mxu2 %v12134_v24  ;;  %3758 = vmatpush.msra.mxu3 %v12223_v59  ;;  %v3682_v5 = vand.u32 4294901760, %v3681_v34 }
 0x2a9   : > { %3720 = vmatpush.msra.mxu2 %v3681_v34 }
 0x2aa   : > { %v12226_v40 = vadd.f32 %v2519_v41, %v12049_v23  ;;  %v2715_v22 = vpop.f32.mrf.mxu3  ;;  %v3683_v41 = vsub.f32 %v3681_v34, %v3682_v5 }
 0x2ab   : > { %v2598_v2 = vpop.f32.mrf.mxu0  ;;  %v2640_v13 = vpop.f32.mrf.mxu1 }
 0x2ac   : > { %v2641_v49 = vadd.f32 %v2640_v13, %v2590_v55  ;;  %v2676_v46 = vpop.f32.mrf.mxu2  ;;  %v3613_v55 = vsel %vm501_vm2, %v3592_v53, 0  ;;  %v3684_v30 = vand.u32 4294901760, %v3683_v41 }
 0x2ad   : > { %v12242_v24 = vand.u32 4294901760, %v3613_v55 }
 0x2ae   : > { %v2677_v23 = vadd.f32 %v2676_v46, %v2641_v49  ;;  %3284 = vmatmul.f32.gmra.mxu0 %v12114_v58  ;;  %3314 = vmatmul.f32.vlgmr.msra.gmra.mxu1 %v12096_v19 }
 0x2af   : > { %3406 = vmatmul.f32.gmra.mxu3 %v12114_v58  ;;  %3685 = vmatpush.msra.mxu1 %v3684_v30  ;;  %v12248_v50 = vsub.f32 %v3613_v55, %v12242_v24 }
 0x2b0   : > { %v2716_v7 = vadd.f32 %v2715_v22, %v2677_v23  ;;  %3360 = vmatmul.f32.gmra.mxu2 %v12161_v8 }
 0x2b1   : > { %v14348_v41 = vand.u32 4294901760, %v12248_v50 }
 0x2b2   : > { %v2721_v29 = vpop.f32.mrf.mxu3 }
 0x2b3   : > { %v2606_v13 = vpop.f32.mrf.mxu0  ;;  %v2644_v49 = vpop.f32.mrf.mxu1  ;;  %v3922_v48 = vsub.f32 %v12248_v50, %v14348_v41 }
 0x2b4   : > { %v2645_v46 = vadd.f32 %v2644_v49, %v2598_v2  ;;  %v2681_v52 = vpop.f32.mrf.mxu2 }
 0x2b6   : > { %v2682_v63 = vadd.f32 %v2681_v52, %v2645_v46  ;;  %3288 = vmatmul.f32.gmra.mxu0 %v12136_v36  ;;  %3318 = vmatmul.f32.gmra.mxu1 %v12114_v58 }
 0x2b7   : > { %3410 = vmatmul.f32.gmra.mxu3 %v12136_v36 }
 0x2b8   : > { %v2722_v34 = vadd.f32 %v2721_v29, %v2682_v63  ;;  %3368 = vmatmul.f32.gmra.mxu2 %v12185_v1 }
 0x2ba   : > { %v2727_v22 = vpop.f32.mrf.mxu3 }
 0x2bb   : > { %v2614_v2 = vpop.f32.mrf.mxu0  ;;  %v2648_v53 = vpop.f32.mrf.mxu1 }
 0x2bc   : > { %v2649_v23 = vadd.f32 %v2648_v53, %v2606_v13  ;;  %v2686_v52 = vpop.f32.mrf.mxu2  ;;  %v3923_v53 = vand.u32 4294901760, %v3922_v48 }
 0x2be   : > { %v2687_v30 = vadd.f32 %v2686_v52, %v2649_v23  ;;  %3292 = vmatmul.f32.gmra.mxu0 %v12163_v27  ;;  %3322 = vmatmul.f32.gmra.mxu1 %v12136_v36 }
 0x2bf   : > { %3414 = vmatmul.f32.gmra.mxu3 %v12163_v27 }
 0x2c0   : > { %v2728_v63 = vadd.f32 %v2727_v22, %v2687_v30  ;;  %3376 = vmatmul.f32.gmra.mxu2 %v12201_v43 }
 0x2c2   : > { %v2733_v55 = vpop.f32.mrf.mxu3 }
 0x2c3   : > { %v2652_v29 = vpop.f32.mrf.mxu1  ;;  %v2757_v13 = vpop.f32.mrf.mxu0 }
 0x2c4   : > { %v2653_v49 = vadd.f32 %v2652_v29, %v2614_v2  ;;  %v2691_v46 = vpop.f32.mrf.mxu2  ;;  %v2758_v22 = vadd.f32 %v2757_v13, %v2716_v7 }
 0x2c6   : > { %v2692_v23 = vadd.f32 %v2691_v46, %v2653_v49  ;;  %3326 = vmatmul.f32.gmra.mxu1 %v12163_v27  ;;  %3438 = vmatmul.f32.vlgmr.msrb.gmra.mxu0 %v12106_v21  ;;  %v3594_v49 = vpop.permute.xlu2 %3593 }
 0x2c7   : > { %3553 = vmatmul.f32.vlgmr.msrb.gmra.mxu3 %v12096_v19  ;;  %3802 = vmatpush.msrb.mxu0 %v3682_v5  ;;  %v3601_v5 = vsel %vm492_vm0, %v3594_v49, 0 }
 0x2c8   : > { %3924 = vmatpush.msrb.mxu3 %v3923_v53  ;;  %v2734_v52 = vadd.f32 %v2733_v55, %v2692_v23  ;;  %3519 = vmatmul.f32.vlgmr.msrb.gmra.mxu2 %v12096_v19  ;;  %v12277_v13 = vand.u32 4294901760, %v3601_v5 }
 0x2c9   : > { %3870 = vmatpush.msrb.mxu2 %v12242_v24 }
 0x2ca   : > { %v2879_v30 = vpop.f32.mrf.mxu3  ;;  %14649 = vst [vmem:[#allocation107_spill] sm:$0xff] %v12277_v13 }
 0x2cb   : > { %v2761_v41 = vpop.f32.mrf.mxu0  ;;  %v2791_v2 = vpop.f32.mrf.mxu1 }
 0x2cc   : > { %v2792_v29 = vadd.f32 %v2791_v2, %v2758_v22  ;;  %v2829_v48 = vpop.f32.mrf.mxu2  ;;  %v2762_v7 = vadd.f32 %v2761_v41, %v2722_v34 }
 0x2cd   : > { %v12266_v46 = vadd.f32 %v2879_v30, %v2829_v48  ;;  %v3596_v30 = vpop.permute.xlu0 %3595 }
 0x2ce   : > { %v12269_v43 = vadd.f32 %v2792_v29, %v12088_v44  ;;  %3443 = vmatmul.f32.gmra.mxu0 %v12124_v60  ;;  %3477 = vmatmul.f32.vlgmr.msrb.gmra.mxu1 %v12112_v4  ;;  %v3603_v34 = vsel %vm492_vm0, %v3596_v30, 0 }
 0x2cf   : > { %3557 = vmatmul.f32.gmra.mxu3 %v12114_v58  ;;  %3836 = vmatpush.msrb.mxu1 %v12223_v59  ;;  %v12287_v59 = vsub.f32 %v3601_v5, %v12277_v13 }
 0x2d0   : > { %3523 = vmatmul.f32.gmra.mxu2 %v12114_v58 }
 0x2d1   : > { %14650 = vst [vmem:[#allocation108_spill] sm:$0xff] %v12287_v59  ;;  %v12293_v49 = vand.u32 4294901760, %v12287_v59 }
 0x2d2   : > { %v2883_v55 = vpop.f32.mrf.mxu3 }
 0x2d3   : > { %v2765_v53 = vpop.f32.mrf.mxu0  ;;  %v2795_v23 = vpop.f32.mrf.mxu1  ;;  %14651 = vst [vmem:[#allocation109_spill] sm:$0xff] %v12293_v49 }
 0x2d4   : > { %v2796_v44 = vadd.f32 %v2795_v23, %v2762_v7  ;;  %v2837_v22 = vpop.f32.mrf.mxu2  ;;  %v2766_v41 = vadd.f32 %v2765_v53, %v2728_v63  ;;  %v3635_v53 = vsub.f32 %v12287_v59, %v12293_v49 }
 0x2d5   : > { %v12279_v2 = vadd.f32 %v2883_v55, %v2837_v22  ;;  %v3598_v22 = vpop.permute.xlu1 %3597 }
 0x2d6   : > { %v12282_v29 = vadd.f32 %v2796_v44, %v12101_v10  ;;  %3448 = vmatmul.f32.gmra.mxu0 %v12146_v37  ;;  %3483 = vmatmul.f32.gmra.mxu1 %v12132_v33  ;;  %v12295_v10 = vand.u32 4294901760, %v3603_v34  ;;  %v3605_v30 = vsel %vm492_vm0, %v3598_v22, 0 }
 0x2d7   : > { %3561 = vmatmul.f32.gmra.mxu3 %v12136_v36 }
 0x2d8   : > { %3527 = vmatmul.f32.gmra.mxu2 %v12136_v36  ;;  %14652 = vst [vmem:[#allocation110_spill] sm:$0xff] %v12295_v10  ;;  %v12305_v63 = vsub.f32 %v3603_v34, %v12295_v10 }
 0x2da   : > { %v2887_v48 = vpop.f32.mrf.mxu3  ;;  %14653 = vst [vmem:[#allocation111_spill] sm:$0xff] %v12305_v63 }
 0x2db   : > { %v2769_v7 = vpop.f32.mrf.mxu0  ;;  %v2799_v55 = vpop.f32.mrf.mxu1 }
 0x2dc   : > { %v2800_v23 = vadd.f32 %v2799_v55, %v2766_v41  ;;  %v2845_v44 = vpop.f32.mrf.mxu2  ;;  %v2770_v41 = vadd.f32 %v2769_v7, %v2734_v52  ;;  %v12315_v55 = vand.u32 4294901760, %v3635_v53 }
 0x2dd   : > { %v12297_v5 = vadd.f32 %v2887_v48, %v2845_v44 }
 0x2de   : > { %v12300_v37 = vadd.f32 %v2800_v23, %v12119_v25  ;;  %3453 = vmatmul.f32.gmra.mxu0 %v12168_v56  ;;  %3489 = vmatmul.f32.gmra.mxu1 %v12159_v61  ;;  %v12313_v25 = vand.u32 4294901760, %v12305_v63  ;;  %14655 = vst [vmem:[#allocation113_spill] sm:$0xff] %v12315_v55  ;;  %v12317_v23 = vand.u32 4294901760, %v3605_v30  ;;  %v3600_v61 = vpop.permute.xlu2 %3599 }
 0x2df   : > { %3565 = vmatmul.f32.gmra.mxu3 %v12163_v27 }
 0x2e0   : > { %3531 = vmatmul.f32.gmra.mxu2 %v12163_v27  ;;  %14654 = vst [vmem:[#allocation112_spill] sm:$0xff] %v12313_v25  ;;  %v12327_v52 = vsub.f32 %v3605_v30, %v12317_v23  ;;  %v3643_v7 = vsub.f32 %v12305_v63, %v12313_v25 }
 0x2e1   : > { %14656 = vst [vmem:[#allocation114_spill] sm:$0xff] %v12317_v23 }
 0x2e2   : > { %v2891_v48 = vpop.f32.mrf.mxu3  ;;  %14657 = vst [vmem:[#allocation115_spill] sm:$0xff] %v12327_v52  ;;  %v12340_v30 = vand.u32 4294901760, %v12327_v52 }
 0x2e3   : > { %v2803_v34 = vpop.f32.mrf.mxu1  ;;  %v2915_v44 = vpop.f32.mrf.mxu0 }
 0x2e4   : > { %v2804_v56 = vadd.f32 %v2803_v34, %v2770_v41  ;;  %v2853_v36 = vpop.f32.mrf.mxu2  ;;  %14659 = vst [vmem:[#allocation116_spill] sm:$0xff] %v12340_v30  ;;  %v12342_v41 = vand.u32 4294901760, %v3643_v7  ;;  %v4626_v7 = vld.sshfl [vmem:[#allocation1] sm:$0xff pattern:$0x75316420] }
 0x2e5   : > { %v12319_v58 = vadd.f32 %v2891_v48, %v2853_v36  ;;  %v3607_v36 = vsel %vm492_vm0, %v3600_v61, 0  ;;  %4630 = vrot.lane.b32.xlu0 %v4626_v7, %s14443_s12 }
 0x2e6   : > { %v12322_v22 = vadd.f32 %v2804_v56, %v12141_v28  ;;  %3495 = vmatmul.f32.gmra.mxu1 %v12183_v20  ;;  %3637 = vmatmul.f32.vlgmr.msra.gmra.mxu0 %v12315_v55  ;;  %v2916_v28 = vadd.f32 %v2915_v44, %v12266_v46  ;;  %v14658_v56 = vand.u32 4294901760, %v12248_v50  ;;  %14660 = vst [vmem:[#allocation117_spill] sm:$0xff] %v12342_v41  ;;  %v12344_v48 = vand.u32 4294901760, %v3607_v36  ;;  %v4627_v44 = vld.sshfl [vmem:[#allocation1 + $0x8] sm:$0xff pattern:$0x75316420] }
 0x2e7   : > { %3762 = vmatmul.f32.vlgmr.msra.gmra.mxu3 %v12293_v49  ;;  %3959 = vmatpush.msra.mxu0 %v12248_v50  ;;  %v3651_v46 = vsub.f32 %v12327_v52, %v12340_v30 }
 0x2e8   : > { %4075 = vmatpush.msra.mxu3 %v12242_v24  ;;  %3723 = vmatmul.f32.vlgmr.msra.gmra.mxu2 %v12287_v59  ;;  %14661 = vst [vmem:[#allocation118_spill] sm:$0xff] %v12344_v48  ;;  %v12349_v50 = vsub.f32 %v3607_v36, %v12344_v48 }
 0x2e9   : > { %4041 = vmatpush.msra.mxu2 %v14658_v56  ;;  %4632 = vrot.lane.b32.xlu1 %v4627_v44, %s14443_s12  ;;  %s12723_s12 = scalar_lea.vmem %s14194_s3, %s10869_s21  ;;  %s12851_s21 = sshll.u32 %s11172_s19, 2 }
 0x2ea   : > { %v3030_v53 = vpop.f32.mrf.mxu3  ;;  %14662 = vst [vmem:[#allocation119_spill] sm:$0xff] %v12349_v50 }
 0x2eb   : > { %v2920_v34 = vpop.f32.mrf.mxu0  ;;  %v2954_v27 = vpop.f32.mrf.mxu1 }
 0x2ec   : > { %v2955_v61 = vadd.f32 %v2954_v27, %v2916_v28  ;;  %v2996_v20 = vpop.f32.mrf.mxu2  ;;  %v2921_v27 = vadd.f32 %v2920_v34, %v12279_v2  ;;  %v12363_v28 = vand.u32 4294901760, %v12349_v50  ;;  %v10966_v34 = vld [vmem:[%s11186_s11 + $0x8] sm:$0xff] }
 0x2ed   : > { %4643 = vrot.lane.b32.xlu0 %v10966_v34, %s11063_s20 }
 0x2ee   : > { %v2997_v1 = vadd.f32 %v2996_v20, %v2955_v61  ;;  %3645 = vmatmul.f32.gmra.mxu0 %v12342_v41  ;;  %3687 = vmatmul.f32.vlgmr.msra.gmra.mxu1 %v12277_v13  ;;  %14663 = vst [vmem:[#allocation120_spill] sm:$0xff] %v12363_v28 }
 0x2ef   : > { %3768 = vmatmul.f32.gmra.mxu3 %v12313_v25  ;;  %3997 = vmatpush.msra.mxu1 %v12242_v24  ;;  %v12365_v24 = vand.u32 4294901760, %v3651_v46  ;;  %v10967_v46 = vld [vmem:[%s11186_s11 + $0x10] sm:$0xff]  ;;  %s432_s11 = scalar_lea.vmem %s14195_s4, %s12851_s21 }
 0x2f0   : > { %v3031_v56 = vadd.f32 %v3030_v53, %v2997_v1  ;;  %3728 = vmatmul.f32.gmra.mxu2 %v12305_v63 }
 0x2f1   : > { %14664 = vst [vmem:[#allocation121_spill] sm:$0xff] %v12365_v24  ;;  %4645 = vrot.lane.b32.xlu1 %v10967_v46, %s11063_s20  ;;  %s436_s20 = scalar_lea.vmem %s14196_s5, %s12851_s21 }
 0x2f2   : > { %v12360_v20 = vadd.f32 %v3031_v56, %v12180_v6  ;;  %v3034_v36 = vpop.f32.mrf.mxu3  ;;  %v3659_v6 = vsub.f32 %v12349_v50, %v12363_v28 }
 0x2f3   : > { %v2925_v1 = vpop.f32.mrf.mxu0  ;;  %v2960_v53 = vpop.f32.mrf.mxu1 }
 0x2f4   : > { %v2961_v61 = vadd.f32 %v2960_v53, %v2921_v27  ;;  %v3000_v44 = vpop.f32.mrf.mxu2  ;;  %v2926_v56 = vadd.f32 %v2925_v1, %v12297_v5 }
 0x2f6   : > { %v3001_v7 = vadd.f32 %v3000_v44, %v2961_v61  ;;  %3653 = vmatmul.f32.gmra.mxu0 %v12365_v24  ;;  %3691 = vmatmul.f32.gmra.mxu1 %v12295_v10  ;;  %v12381_v61 = vand.u32 4294901760, %v3659_v6 }
 0x2f7   : > { %3774 = vmatmul.f32.gmra.mxu3 %v12340_v30 }
 0x2f8   : > { %v3035_v2 = vadd.f32 %v3034_v36, %v3001_v7  ;;  %3733 = vmatmul.f32.gmra.mxu2 %v12327_v52  ;;  %14665 = vst [vmem:[#allocation122_spill] sm:$0xff] %v12381_v61 }
 0x2fa   : > { %v12379_v27 = vadd.f32 %v3035_v2, %v12199_v62  ;;  %v3038_v53 = vpop.f32.mrf.mxu3 }
 0x2fb   : > { %v2930_v44 = vpop.f32.mrf.mxu0  ;;  %v2966_v60 = vpop.f32.mrf.mxu1 }
 0x2fc   : > { %v2967_v33 = vadd.f32 %v2966_v60, %v2926_v56  ;;  %v3004_v36 = vpop.f32.mrf.mxu2  ;;  %v2931_v62 = vadd.f32 %v2930_v44, %v12319_v58  ;;  %v4109_v6 = vpop.permute.xlu1 %4108  ;;  %v12395_v60 = vld [vmem:[%s14192_s1] sm:$0xff] }
 0x2fd   : > { %14666 = vst [vmem:[#allocation123_spill] sm:$0xff] %v12395_v60 }
 0x2fe   : > { %v3005_v7 = vadd.f32 %v3004_v36, %v2967_v33  ;;  %3661 = vmatmul.f32.gmra.mxu0 %v12381_v61  ;;  %3695 = vmatmul.f32.gmra.mxu1 %v12317_v23  ;;  %v14373_v33 = vperm.slane %v12395_v60, 6  ;;  %v4107_v36 = vpop.permute.xlu0 %4106 }
 0x2ff   : > { %3780 = vmatmul.f32.gmra.mxu3 %v12363_v28  ;;  %v4111_v58 = vsel %vm4110_vm10, %v4107_v36, %v4109_v6 }
 0x300   : > { %v3039_v34 = vadd.f32 %v3038_v53, %v3005_v7  ;;  %3738 = vmatmul.f32.gmra.mxu2 %v12349_v50  ;;  %v4115_v44 = vmul.f32 %v14373_v33, %v4111_v58 }
 0x302   : > { %v12389_v5 = vadd.f32 %v3039_v34, %v12209_v47  ;;  %v3042_v1 = vpop.f32.mrf.mxu3  ;;  %v4134_v34 = vsel %vm501_vm2, %v4115_v44, 0 }
 0x303   : > { %v2972_v2 = vpop.f32.mrf.mxu1  ;;  %v3114_v46 = vpop.f32.mrf.mxu0 }
 0x304   : > { %v2973_v56 = vadd.f32 %v2972_v2, %v2931_v62  ;;  %v3008_v53 = vpop.f32.mrf.mxu2  ;;  %v12410_v62 = vld [vmem:[%s14192_s1 + $0x8] sm:$0xff] }
 0x305   : > { %14667 = vst [vmem:[#allocation124_spill] sm:$0xff] %v12410_v62  ;;  %v14384_v2 = vperm.slane %v12410_v62, 6 }
 0x306   : > { %v3009_v47 = vadd.f32 %v3008_v53, %v2973_v56  ;;  %3699 = vmatmul.f32.gmra.mxu1 %v12344_v48  ;;  %3804 = vmatmul.f32.vlgmr.msrb.gmra.mxu0 %v12277_v13  ;;  %v12413_v56 = vand.u32 4294901760, %v4134_v34 }
 0x307   : > { %3926 = vmatmul.f32.vlgmr.msrb.gmra.mxu3 %v12277_v13 }
 0x308   : > { %v3043_v7 = vadd.f32 %v3042_v1, %v3009_v47  ;;  %3876 = vmatmul.f32.vlgmr.msrb.gmra.mxu2 %v12315_v55  ;;  %v4112_v1 = vsel %vm4110_vm10, %v4109_v6, %v4107_v36  ;;  %v4205_v33 = vsub.f32 %v4134_v34, %v12413_v56  ;;  %4155 = vmatpush.msrb.mxu0 %v12413_v56 }
 0x309   : > { %4282 = vmatpush.msrb.mxu3 %v12413_v56  ;;  %v4116_v8 = vmul.f32 %v14384_v2, %v4112_v1 }
 0x30a   : > { %v12416_v53 = vadd.f32 %v3043_v7, %v12226_v40  ;;  %v3239_v58 = vpop.f32.mrf.mxu3  ;;  %4244 = vmatpush.msrb.mxu2 %v4205_v33  ;;  %v4206_v6 = vand.u32 4294901760, %v4205_v33 }
 0x30b   : > { %v3122_v47 = vpop.f32.mrf.mxu0  ;;  %v3164_v44 = vpop.f32.mrf.mxu1  ;;  %v4137_v34 = vsel %vm501_vm2, %v4116_v8, 0 }
 0x30c   : > { %v3165_v55 = vadd.f32 %v3164_v44, %v3114_v46  ;;  %v3200_v19 = vpop.f32.mrf.mxu2  ;;  %v4207_v7 = vsub.f32 %v4205_v33, %v4206_v6 }
 0x30e   : > { %v3201_v40 = vadd.f32 %v3200_v19, %v3165_v55  ;;  %3808 = vmatmul.f32.gmra.mxu0 %v12295_v10  ;;  %3838 = vmatmul.f32.vlgmr.msrb.gmra.mxu1 %v12277_v13  ;;  %v4208_v44 = vand.u32 4294901760, %v4207_v7  ;;  %v12430_v19 = vand.u32 4294901760, %v4137_v34 }
 0x30f   : > { %3930 = vmatmul.f32.gmra.mxu3 %v12295_v10 }
 0x310   : > { %v3240_v36 = vadd.f32 %v3239_v58, %v3201_v40  ;;  %3884 = vmatmul.f32.gmra.mxu2 %v12342_v41  ;;  %4209 = vmatpush.msrb.mxu1 %v4208_v44  ;;  %v12436_v33 = vsub.f32 %v4137_v34, %v12430_v19 }
 0x312   : > { %v3245_v46 = vpop.f32.mrf.mxu3  ;;  %v14389_v44 = vand.u32 4294901760, %v12436_v33 }
 0x313   : > { %v3130_v21 = vpop.f32.mrf.mxu0  ;;  %v3168_v4 = vpop.f32.mrf.mxu1 }
 0x314   : > { %v3169_v1 = vadd.f32 %v3168_v4, %v3122_v47  ;;  %v3205_v2 = vpop.f32.mrf.mxu2  ;;  %v4446_v34 = vsub.f32 %v12436_v33, %v14389_v44 }
 0x316   : > { %v3206_v55 = vadd.f32 %v3205_v2, %v3169_v1  ;;  %3812 = vmatmul.f32.gmra.mxu0 %v12317_v23  ;;  %3842 = vmatmul.f32.gmra.mxu1 %v12295_v10  ;;  %v4447_v41 = vand.u32 4294901760, %v4446_v34 }
 0x317   : > { %3934 = vmatmul.f32.gmra.mxu3 %v12317_v23 }
 0x318   : > { %v3246_v8 = vadd.f32 %v3245_v46, %v3206_v55  ;;  %3892 = vmatmul.f32.gmra.mxu2 %v12365_v24 }
 0x31a   : > { %v3251_v58 = vpop.f32.mrf.mxu3 }
 0x31b   : > { %v3138_v40 = vpop.f32.mrf.mxu0  ;;  %v3172_v4 = vpop.f32.mrf.mxu1 }
 0x31c   : > { %v3173_v47 = vadd.f32 %v3172_v4, %v3130_v21  ;;  %v3210_v7 = vpop.f32.mrf.mxu2 }
 0x31e   : > { %v3211_v2 = vadd.f32 %v3210_v7, %v3173_v47  ;;  %3816 = vmatmul.f32.gmra.mxu0 %v12344_v48  ;;  %3846 = vmatmul.f32.gmra.mxu1 %v12317_v23 }
 0x31f   : > { %3938 = vmatmul.f32.gmra.mxu3 %v12344_v48 }
 0x320   : > { %v3252_v46 = vadd.f32 %v3251_v58, %v3211_v2  ;;  %3900 = vmatmul.f32.gmra.mxu2 %v12381_v61 }
 0x322   : > { %v3257_v1 = vpop.f32.mrf.mxu3 }
 0x323   : > { %v3176_v55 = vpop.f32.mrf.mxu1  ;;  %v3281_v21 = vpop.f32.mrf.mxu0 }
 0x324   : > { %v3177_v4 = vadd.f32 %v3176_v55, %v3138_v40  ;;  %v3215_v24 = vpop.f32.mrf.mxu2  ;;  %v3282_v58 = vadd.f32 %v3281_v21, %v3240_v36 }
 0x326   : > { %v3216_v47 = vadd.f32 %v3215_v24, %v3177_v4  ;;  %3850 = vmatmul.f32.gmra.mxu1 %v12344_v48  ;;  %3962 = vmatmul.f32.vlgmr.msra.gmra.mxu0 %v12287_v59  ;;  %v4118_v24 = vpop.permute.xlu2 %4117 }
 0x327   : > { %4077 = vmatmul.f32.vlgmr.msra.gmra.mxu3 %v12277_v13  ;;  %4326 = vmatpush.msra.mxu0 %v4206_v6 }
 0x328   : > { %4448 = vmatpush.msra.mxu3 %v4447_v41  ;;  %v3258_v7 = vadd.f32 %v3257_v1, %v3216_v47  ;;  %4043 = vmatmul.f32.vlgmr.msra.gmra.mxu2 %v12277_v13  ;;  %v4125_v41 = vsel %vm492_vm0, %v4118_v24, 0 }
 0x329   : > { %4394 = vmatpush.msra.mxu2 %v12430_v19  ;;  %v12463_v1 = vand.u32 4294901760, %v4125_v41 }
 0x32a   : > { %v3403_v2 = vpop.f32.mrf.mxu3 }
 0x32b   : > { %v3285_v44 = vpop.f32.mrf.mxu0  ;;  %v3315_v40 = vpop.f32.mrf.mxu1  ;;  %14668 = vst [vmem:[#allocation125_spill] sm:$0xff] %v12463_v1 }
 0x32c   : > { %v3316_v55 = vadd.f32 %v3315_v40, %v3282_v58  ;;  %v3353_v34 = vpop.f32.mrf.mxu2  ;;  %v3286_v6 = vadd.f32 %v3285_v44, %v3246_v8 }
 0x32d   : > { %v12452_v4 = vadd.f32 %v3403_v2, %v3353_v34  ;;  %v4120_v2 = vpop.permute.xlu0 %4119 }
 0x32e   : > { %v12455_v61 = vadd.f32 %v3316_v55, %v12269_v43  ;;  %3967 = vmatmul.f32.gmra.mxu0 %v12305_v63  ;;  %4001 = vmatmul.f32.vlgmr.msra.gmra.mxu1 %v12293_v49  ;;  %v4127_v8 = vsel %vm492_vm0, %v4120_v2, 0 }
 0x32f   : > { %4081 = vmatmul.f32.gmra.mxu3 %v12295_v10  ;;  %4360 = vmatpush.msra.mxu1 %v12413_v56  ;;  %v12473_v56 = vsub.f32 %v4125_v41, %v12463_v1 }
 0x330   : > { %4047 = vmatmul.f32.gmra.mxu2 %v12295_v10 }
 0x331   : > { %14669 = vst [vmem:[#allocation126_spill] sm:$0xff] %v12473_v56  ;;  %v12479_v24 = vand.u32 4294901760, %v12473_v56 }
 0x332   : > { %v3407_v36 = vpop.f32.mrf.mxu3 }
 0x333   : > { %v3289_v21 = vpop.f32.mrf.mxu0  ;;  %v3319_v47 = vpop.f32.mrf.mxu1  ;;  %14670 = vst [vmem:[#allocation127_spill] sm:$0xff] %v12479_v24 }
 0x334   : > { %v3320_v43 = vadd.f32 %v3319_v47, %v3286_v6  ;;  %v3361_v58 = vpop.f32.mrf.mxu2  ;;  %v3290_v44 = vadd.f32 %v3289_v21, %v3252_v46  ;;  %v4159_v21 = vsub.f32 %v12473_v56, %v12479_v24 }
 0x335   : > { %v12465_v40 = vadd.f32 %v3407_v36, %v3361_v58  ;;  %v4122_v58 = vpop.permute.xlu1 %4121 }
 0x336   : > { %v12468_v55 = vadd.f32 %v3320_v43, %v12282_v29  ;;  %3972 = vmatmul.f32.gmra.mxu0 %v12327_v52  ;;  %4007 = vmatmul.f32.gmra.mxu1 %v12313_v25  ;;  %v12481_v29 = vand.u32 4294901760, %v4127_v8  ;;  %v4129_v2 = vsel %vm492_vm0, %v4122_v58, 0 }
 0x337   : > { %4085 = vmatmul.f32.gmra.mxu3 %v12317_v23 }
 0x338   : > { %4051 = vmatmul.f32.gmra.mxu2 %v12317_v23  ;;  %14671 = vst [vmem:[#allocation128_spill] sm:$0xff] %v12481_v29  ;;  %v12491_v46 = vsub.f32 %v4127_v8, %v12481_v29 }
 0x33a   : > { %v3411_v34 = vpop.f32.mrf.mxu3  ;;  %14672 = vst [vmem:[#allocation129_spill] sm:$0xff] %v12491_v46 }
 0x33b   : > { %v3293_v6 = vpop.f32.mrf.mxu0  ;;  %v3323_v36 = vpop.f32.mrf.mxu1 }
 0x33c   : > { %v3324_v47 = vadd.f32 %v3323_v36, %v3290_v44  ;;  %v3369_v43 = vpop.f32.mrf.mxu2  ;;  %v3294_v44 = vadd.f32 %v3293_v6, %v3258_v7  ;;  %v12501_v36 = vand.u32 4294901760, %v4159_v21 }
 0x33d   : > { %v12483_v41 = vadd.f32 %v3411_v34, %v3369_v43 }
 0x33e   : > { %v12486_v52 = vadd.f32 %v3324_v47, %v12300_v37  ;;  %3977 = vmatmul.f32.gmra.mxu0 %v12349_v50  ;;  %4013 = vmatmul.f32.gmra.mxu1 %v12340_v30  ;;  %v12499_v37 = vand.u32 4294901760, %v12491_v46  ;;  %14674 = vst [vmem:[#allocation131_spill] sm:$0xff] %v12501_v36  ;;  %v12503_v47 = vand.u32 4294901760, %v4129_v2  ;;  %v4124_v30 = vpop.permute.xlu2 %4123 }
 0x33f   : > { %4089 = vmatmul.f32.gmra.mxu3 %v12344_v48  ;;  %v4131_v58 = vsel %vm492_vm0, %v4124_v30, 0 }
 0x340   : > { %4055 = vmatmul.f32.gmra.mxu2 %v12344_v48  ;;  %14673 = vst [vmem:[#allocation130_spill] sm:$0xff] %v12499_v37  ;;  %v12511_v7 = vsub.f32 %v4129_v2, %v12503_v47  ;;  %v4167_v6 = vsub.f32 %v12491_v46, %v12499_v37 }
 0x341   : > { %14675 = vst [vmem:[#allocation132_spill] sm:$0xff] %v12503_v47 }
 0x342   : > { %v3415_v34 = vpop.f32.mrf.mxu3  ;;  %14676 = vst [vmem:[#allocation133_spill] sm:$0xff] %v12511_v7  ;;  %v12524_v21 = vand.u32 4294901760, %v12511_v7  ;;  %v12526_v2 = vand.u32 4294901760, %v4167_v6 }
 0x343   : > { %v3327_v8 = vpop.f32.mrf.mxu1  ;;  %v3439_v43 = vpop.f32.mrf.mxu0 }
 0x344   : > { %v3328_v50 = vadd.f32 %v3327_v8, %v3294_v44  ;;  %v3377_v23 = vpop.f32.mrf.mxu2  ;;  %14678 = vst [vmem:[#allocation134_spill] sm:$0xff] %v12524_v21  ;;  %v12528_v44 = vand.u32 4294901760, %v4131_v58 }
 0x345   : > { %v3416_v10 = vadd.f32 %v3415_v34, %v3377_v23  ;;  %v3440_v23 = vadd.f32 %v3439_v43, %v12452_v4  ;;  %14679 = vst [vmem:[#allocation135_spill] sm:$0xff] %v12526_v2  ;;  %v4175_v4 = vsub.f32 %v12511_v7, %v12524_v21 }
 0x346   : > { %v12506_v63 = vadd.f32 %v3328_v50, %v12322_v22  ;;  %4019 = vmatmul.f32.gmra.mxu1 %v12363_v28  ;;  %4161 = vmatmul.f32.vlgmr.msrb.gmra.mxu0 %v12501_v36  ;;  %v14677_v22 = vand.u32 4294901760, %v12436_v33  ;;  %14680 = vst [vmem:[#allocation136_spill] sm:$0xff] %v12528_v44 }
 0x347   : > { %4286 = vmatmul.f32.vlgmr.msrb.gmra.mxu3 %v12479_v24  ;;  %4483 = vmatpush.msrb.mxu0 %v12436_v33  ;;  %v12533_v33 = vsub.f32 %v4131_v58, %v12528_v44  ;;  %v12547_v58 = vand.u32 4294901760, %v4175_v4 }
 0x348   : > { %4599 = vmatpush.msrb.mxu3 %v12430_v19  ;;  %4247 = vmatmul.f32.vlgmr.msrb.gmra.mxu2 %v12473_v56 }
 0x349   : > { %4565 = vmatpush.msrb.mxu2 %v14677_v22  ;;  %14681 = vst [vmem:[#allocation137_spill] sm:$0xff] %v12533_v33  ;;  %v12545_v22 = vand.u32 4294901760, %v12533_v33 }
 0x34a   : > { %v3554_v50 = vpop.f32.mrf.mxu3  ;;  %14683 = vst [vmem:[#allocation139_spill] sm:$0xff] %v12547_v58 }
 0x34b   : > { %v3444_v34 = vpop.f32.mrf.mxu0  ;;  %v3478_v8 = vpop.f32.mrf.mxu1  ;;  %14682 = vst [vmem:[#allocation138_spill] sm:$0xff] %v12545_v22 }
 0x34c   : > { %v3479_v30 = vadd.f32 %v3478_v8, %v3440_v23  ;;  %v3520_v48 = vpop.f32.mrf.mxu2  ;;  %v3445_v6 = vadd.f32 %v3444_v34, %v12465_v40 }
 0x34e   : > { %v3521_v28 = vadd.f32 %v3520_v48, %v3479_v30  ;;  %4169 = vmatmul.f32.gmra.mxu0 %v12526_v2  ;;  %4211 = vmatmul.f32.vlgmr.msrb.gmra.mxu1 %v12463_v1 }
 0x34f   : > { %4292 = vmatmul.f32.gmra.mxu3 %v12499_v37  ;;  %4521 = vmatpush.msrb.mxu1 %v12430_v19 }
 0x350   : > { %v3555_v43 = vadd.f32 %v3554_v50, %v3521_v28  ;;  %4252 = vmatmul.f32.gmra.mxu2 %v12491_v46  ;;  %v4183_v28 = vsub.f32 %v12533_v33, %v12545_v22 }
 0x352   : > { %v12542_v48 = vadd.f32 %v3555_v43, %v12360_v20  ;;  %v3558_v23 = vpop.f32.mrf.mxu3  ;;  %v12559_v34 = vand.u32 4294901760, %v4183_v28 }
 0x353   : > { %v3449_v8 = vpop.f32.mrf.mxu0  ;;  %v3484_v30 = vpop.f32.mrf.mxu1 }
 0x354   : > { %v3485_v25 = vadd.f32 %v3484_v30, %v3445_v6  ;;  %v3524_v13 = vpop.f32.mrf.mxu2  ;;  %v3450_v19 = vadd.f32 %v3449_v8, %v12483_v41  ;;  %14684 = vst [vmem:[#allocation140_spill] sm:$0xff] %v12559_v34  ;;  %v14414_v30 = vperm.slane %v12395_v60, 7 }
 0x356   : > { %v3525_v59 = vadd.f32 %v3524_v13, %v3485_v25  ;;  %4177 = vmatmul.f32.gmra.mxu0 %v12547_v58  ;;  %4215 = vmatmul.f32.gmra.mxu1 %v12481_v29 }
 0x357   : > { %4298 = vmatmul.f32.gmra.mxu3 %v12524_v21 }
 0x358   : > { %v3559_v20 = vadd.f32 %v3558_v23, %v3525_v59  ;;  %4257 = vmatmul.f32.gmra.mxu2 %v12511_v7 }
 0x35a   : > { %v12557_v40 = vadd.f32 %v3559_v20, %v12379_v27  ;;  %v3562_v50 = vpop.f32.mrf.mxu3 }
 0x35b   : > { %v3454_v13 = vpop.f32.mrf.mxu0  ;;  %v3490_v25 = vpop.f32.mrf.mxu1 }
 0x35c   : > { %v3491_v4 = vadd.f32 %v3490_v25, %v3450_v19  ;;  %v3528_v43 = vpop.f32.mrf.mxu2  ;;  %v3455_v41 = vadd.f32 %v3454_v13, %v3416_v10  ;;  %v4633_v8 = vpop.permute.xlu1 %4632 }
 0x35e   : > { %v3529_v6 = vadd.f32 %v3528_v43, %v3491_v4  ;;  %4185 = vmatmul.f32.gmra.mxu0 %v12559_v34  ;;  %4219 = vmatmul.f32.gmra.mxu1 %v12503_v47  ;;  %v4631_v4 = vpop.permute.xlu0 %4630 }
 0x35f   : > { %4304 = vmatmul.f32.gmra.mxu3 %v12545_v22 }
 0x360   : > { %v3563_v59 = vadd.f32 %v3562_v50, %v3529_v6  ;;  %4262 = vmatmul.f32.gmra.mxu2 %v12533_v33  ;;  %v4635_v50 = vsel %vm4634_vm11, %v4631_v4, %v4633_v8  ;;  %v14419_v6 = vperm.slane %v12410_v62, 7 }
 0x361   : > { %v4639_v10 = vmul.f32 %v14414_v30, %v4635_v50 }
 0x362   : > { %v12566_v27 = vadd.f32 %v3563_v59, %v12389_v5  ;;  %v3566_v23 = vpop.f32.mrf.mxu3 }
 0x363   : > { %v3496_v28 = vpop.f32.mrf.mxu1  ;;  %v3638_v20 = vpop.f32.mrf.mxu0  ;;  %v4658_v13 = vsel %vm501_vm2, %v4639_v10, 0 }
 0x364   : > { %v3497_v19 = vadd.f32 %v3496_v28, %v3455_v41  ;;  %v3532_v25 = vpop.f32.mrf.mxu2  ;;  %v12580_v59 = vand.u32 4294901760, %v4658_v13 }
 0x366   : > { %v3533_v43 = vadd.f32 %v3532_v25, %v3497_v19  ;;  %4223 = vmatmul.f32.gmra.mxu1 %v12528_v44  ;;  %4328 = vmatmul.f32.vlgmr.msra.gmra.mxu0 %v12463_v1  ;;  %v4636_v19 = vsel %vm4634_vm11, %v4633_v8, %v4631_v4  ;;  %v4729_v30 = vsub.f32 %v4658_v13, %v12580_v59 }
 0x367   : > { %4450 = vmatmul.f32.vlgmr.msra.gmra.mxu3 %v12463_v1  ;;  %4679 = vmatpush.msra.mxu0 %v12580_v59  ;;  %v4640_v10 = vmul.f32 %v14419_v6, %v4636_v19 }
 0x368   : > { %v3567_v5 = vadd.f32 %v3566_v23, %v3533_v43  ;;  %4400 = vmatmul.f32.vlgmr.msra.gmra.mxu2 %v12501_v36  ;;  %4806 = vmatpush.msra.mxu3 %v12580_v59  ;;  %v4730_v8 = vand.u32 4294901760, %v4729_v30 }
 0x369   : > { %4768 = vmatpush.msra.mxu2 %v4729_v30  ;;  %v4661_v13 = vsel %vm501_vm2, %v4640_v10, 0 }
 0x36a   : > { %v12583_v41 = vadd.f32 %v3567_v5, %v12416_v53  ;;  %v3763_v28 = vpop.f32.mrf.mxu3  ;;  %v4731_v5 = vsub.f32 %v4729_v30, %v4730_v8 }
 0x36b   : > { %v3646_v25 = vpop.f32.mrf.mxu0  ;;  %v3688_v50 = vpop.f32.mrf.mxu1 }
 0x36c   : > { %v3689_v23 = vadd.f32 %v3688_v50, %v3638_v20  ;;  %v3724_v43 = vpop.f32.mrf.mxu2  ;;  %v4732_v50 = vand.u32 4294901760, %v4731_v5 }
 0x36e   : > { %v3725_v53 = vadd.f32 %v3724_v43, %v3689_v23  ;;  %4332 = vmatmul.f32.gmra.mxu0 %v12481_v29  ;;  %4362 = vmatmul.f32.vlgmr.msra.gmra.mxu1 %v12463_v1  ;;  %v12597_v23 = vand.u32 4294901760, %v4661_v13 }
 0x36f   : > { %4454 = vmatmul.f32.gmra.mxu3 %v12481_v29  ;;  %4733 = vmatpush.msra.mxu1 %v4732_v50 }
 0x370   : > { %v3764_v4 = vadd.f32 %v3763_v28, %v3725_v53  ;;  %4408 = vmatmul.f32.gmra.mxu2 %v12526_v2  ;;  %v12603_v30 = vsub.f32 %v4661_v13, %v12597_v23 }
 0x372   : > { %v3769_v20 = vpop.f32.mrf.mxu3  ;;  %v14424_v50 = vand.u32 4294901760, %v12603_v30 }
 0x373   : > { %v3654_v36 = vpop.f32.mrf.mxu0  ;;  %v3692_v62 = vpop.f32.mrf.mxu1 }
 0x374   : > { %v3693_v19 = vadd.f32 %v3692_v62, %v3646_v25  ;;  %v3729_v6 = vpop.f32.mrf.mxu2  ;;  %v4970_v13 = vsub.f32 %v12603_v30, %v14424_v50 }
 0x376   : > { %v3730_v43 = vadd.f32 %v3729_v6, %v3693_v19  ;;  %4336 = vmatmul.f32.gmra.mxu0 %v12503_v47  ;;  %4366 = vmatmul.f32.gmra.mxu1 %v12481_v29  ;;  %v4971_v2 = vand.u32 4294901760, %v4970_v13 }
 0x377   : > { %4458 = vmatmul.f32.gmra.mxu3 %v12503_v47 }
 0x378   : > { %v3770_v28 = vadd.f32 %v3769_v20, %v3730_v43  ;;  %4416 = vmatmul.f32.gmra.mxu2 %v12547_v58 }
 0x37a   : > { %v3775_v10 = vpop.f32.mrf.mxu3 }
 0x37b   : > { %v3662_v53 = vpop.f32.mrf.mxu0  ;;  %v3696_v62 = vpop.f32.mrf.mxu1 }
 0x37c   : > { %v3697_v25 = vadd.f32 %v3696_v62, %v3654_v36  ;;  %v3734_v5 = vpop.f32.mrf.mxu2 }
 0x37e   : > { %v3735_v6 = vadd.f32 %v3734_v5, %v3697_v25  ;;  %4340 = vmatmul.f32.gmra.mxu0 %v12528_v44  ;;  %4370 = vmatmul.f32.gmra.mxu1 %v12503_v47 }
 0x37f   : > { %4462 = vmatmul.f32.gmra.mxu3 %v12528_v44 }
 0x380   : > { %v3776_v20 = vadd.f32 %v3775_v10, %v3735_v6  ;;  %4424 = vmatmul.f32.gmra.mxu2 %v12559_v34 }
 0x382   : > { %v3781_v19 = vpop.f32.mrf.mxu3 }
 0x383   : > { %v3700_v43 = vpop.f32.mrf.mxu1  ;;  %v3805_v36 = vpop.f32.mrf.mxu0 }
 0x384   : > { %v3701_v62 = vadd.f32 %v3700_v43, %v3662_v53  ;;  %v3739_v58 = vpop.f32.mrf.mxu2  ;;  %v3806_v10 = vadd.f32 %v3805_v36, %v3764_v4 }
 0x386   : > { %v3740_v25 = vadd.f32 %v3739_v58, %v3701_v62  ;;  %4374 = vmatmul.f32.gmra.mxu1 %v12528_v44  ;;  %4486 = vmatmul.f32.vlgmr.msrb.gmra.mxu0 %v12473_v56  ;;  %v4642_v58 = vpop.permute.xlu2 %4641 }
 0x387   : > { %4601 = vmatmul.f32.vlgmr.msrb.gmra.mxu3 %v12463_v1  ;;  %4850 = vmatpush.msrb.mxu0 %v4730_v8 }
 0x388   : > { %4972 = vmatpush.msrb.mxu3 %v4971_v2  ;;  %v3782_v5 = vadd.f32 %v3781_v19, %v3740_v25  ;;  %4567 = vmatmul.f32.vlgmr.msrb.gmra.mxu2 %v12463_v1  ;;  %v4649_v2 = vsel %vm492_vm0, %v4642_v58, 0 }
 0x389   : > { %4918 = vmatpush.msrb.mxu2 %v12597_v23  ;;  %v12630_v19 = vand.u32 4294901760, %v4649_v2 }
 0x38a   : > { %v3927_v6 = vpop.f32.mrf.mxu3 }
 0x38b   : > { %v3809_v50 = vpop.f32.mrf.mxu0  ;;  %v3839_v53 = vpop.f32.mrf.mxu1  ;;  %14685 = vst [vmem:[#allocation141_spill] sm:$0xff] %v12630_v19 }
 0x38c   : > { %v3840_v43 = vadd.f32 %v3839_v53, %v3806_v10  ;;  %v3877_v13 = vpop.f32.mrf.mxu2  ;;  %v3810_v8 = vadd.f32 %v3809_v50, %v3770_v28 }
 0x38d   : > { %v12619_v62 = vadd.f32 %v3927_v6, %v3877_v13  ;;  %v4644_v6 = vpop.permute.xlu0 %4643 }
 0x38e   : > { %v12622_v34 = vadd.f32 %v3840_v43, %v12455_v61  ;;  %4491 = vmatmul.f32.gmra.mxu0 %v12491_v46  ;;  %4525 = vmatmul.f32.vlgmr.msrb.gmra.mxu1 %v12479_v24  ;;  %v4651_v28 = vsel %vm492_vm0, %v4644_v6, 0 }
 0x38f   : > { %4605 = vmatmul.f32.gmra.mxu3 %v12481_v29  ;;  %4884 = vmatpush.msrb.mxu1 %v12580_v59  ;;  %v12640_v59 = vsub.f32 %v4649_v2, %v12630_v19 }
 0x390   : > { %4571 = vmatmul.f32.gmra.mxu2 %v12481_v29 }
 0x391   : > { %14686 = vst [vmem:[#allocation142_spill] sm:$0xff] %v12640_v59  ;;  %v12646_v58 = vand.u32 4294901760, %v12640_v59 }
 0x392   : > { %v3931_v4 = vpop.f32.mrf.mxu3 }
 0x393   : > { %v3813_v36 = vpop.f32.mrf.mxu0  ;;  %v3843_v25 = vpop.f32.mrf.mxu1  ;;  %14687 = vst [vmem:[#allocation143_spill] sm:$0xff] %v12646_v58 }
 0x394   : > { %v3844_v61 = vadd.f32 %v3843_v25, %v3810_v8  ;;  %v3885_v10 = vpop.f32.mrf.mxu2  ;;  %v3814_v50 = vadd.f32 %v3813_v36, %v3776_v20  ;;  %v4683_v36 = vsub.f32 %v12640_v59, %v12646_v58 }
 0x395   : > { %v12632_v53 = vadd.f32 %v3931_v4, %v3885_v10  ;;  %v4646_v10 = vpop.permute.xlu1 %4645 }
 0x396   : > { %v12635_v43 = vadd.f32 %v3844_v61, %v12468_v55  ;;  %4496 = vmatmul.f32.gmra.mxu0 %v12511_v7  ;;  %4531 = vmatmul.f32.gmra.mxu1 %v12499_v37  ;;  %v12648_v55 = vand.u32 4294901760, %v4651_v28  ;;  %v4653_v6 = vsel %vm492_vm0, %v4646_v10, 0 }
 0x397   : > { %4609 = vmatmul.f32.gmra.mxu3 %v12503_v47 }
 0x398   : > { %4575 = vmatmul.f32.gmra.mxu2 %v12503_v47  ;;  %14688 = vst [vmem:[#allocation144_spill] sm:$0xff] %v12648_v55  ;;  %v12658_v20 = vsub.f32 %v4651_v28, %v12648_v55 }
 0x39a   : > { %v3935_v13 = vpop.f32.mrf.mxu3  ;;  %14689 = vst [vmem:[#allocation145_spill] sm:$0xff] %v12658_v20 }
 0x39b   : > { %v3817_v8 = vpop.f32.mrf.mxu0  ;;  %v3847_v4 = vpop.f32.mrf.mxu1 }
 0x39c   : > { %v3848_v25 = vadd.f32 %v3847_v4, %v3814_v50  ;;  %v3893_v61 = vpop.f32.mrf.mxu2  ;;  %v3818_v50 = vadd.f32 %v3817_v8, %v3782_v5  ;;  %v12668_v4 = vand.u32 4294901760, %v4683_v36 }
 0x39d   : > { %v12650_v2 = vadd.f32 %v3935_v13, %v3893_v61 }
 0x39e   : > { %v12653_v7 = vadd.f32 %v3848_v25, %v12486_v52  ;;  %4501 = vmatmul.f32.gmra.mxu0 %v12533_v33  ;;  %4537 = vmatmul.f32.gmra.mxu1 %v12524_v21  ;;  %v12666_v52 = vand.u32 4294901760, %v12658_v20  ;;  %14691 = vst [vmem:[#allocation147_spill] sm:$0xff] %v12668_v4  ;;  %v12670_v25 = vand.u32 4294901760, %v4653_v6  ;;  %v4648_v21 = vpop.permute.xlu2 %4647 }
 0x39f   : > { %4613 = vmatmul.f32.gmra.mxu3 %v12528_v44 }
 0x3a0   : > { %4579 = vmatmul.f32.gmra.mxu2 %v12528_v44  ;;  %14690 = vst [vmem:[#allocation146_spill] sm:$0xff] %v12666_v52  ;;  %v12680_v5 = vsub.f32 %v4653_v6, %v12670_v25  ;;  %v4691_v8 = vsub.f32 %v12658_v20, %v12666_v52 }
 0x3a1   : > { %14692 = vst [vmem:[#allocation148_spill] sm:$0xff] %v12670_v25 }
 0x3a2   : > { %v3939_v13 = vpop.f32.mrf.mxu3  ;;  %14693 = vst [vmem:[#allocation149_spill] sm:$0xff] %v12680_v5  ;;  %v12693_v6 = vand.u32 4294901760, %v12680_v5 }
 0x3a3   : > { %v3851_v28 = vpop.f32.mrf.mxu1  ;;  %v3963_v61 = vpop.f32.mrf.mxu0 }
 0x3a4   : > { %v3852_v33 = vadd.f32 %v3851_v28, %v3818_v50  ;;  %v3901_v47 = vpop.f32.mrf.mxu2  ;;  %14695 = vst [vmem:[#allocation150_spill] sm:$0xff] %v12693_v6  ;;  %v12695_v50 = vand.u32 4294901760, %v4691_v8 }
 0x3a5   : > { %v12672_v29 = vadd.f32 %v3939_v13, %v3901_v47  ;;  %v4655_v47 = vsel %vm492_vm0, %v4648_v21, 0 }
 0x3a6   : > { %v12675_v10 = vadd.f32 %v3852_v33, %v12506_v63  ;;  %4543 = vmatmul.f32.gmra.mxu1 %v12545_v22  ;;  %4685 = vmatmul.f32.vlgmr.msra.gmra.mxu0 %v12668_v4  ;;  %v3964_v63 = vadd.f32 %v3963_v61, %v12619_v62  ;;  %v14694_v33 = vand.u32 4294901760, %v12603_v30  ;;  %14696 = vst [vmem:[#allocation151_spill] sm:$0xff] %v12695_v50  ;;  %v12697_v13 = vand.u32 4294901760, %v4655_v47 }
 0x3a7   : > { %4810 = vmatmul.f32.vlgmr.msra.gmra.mxu3 %v12646_v58  ;;  %5007 = vmatpush.msra.mxu0 %v12603_v30  ;;  %v4699_v62 = vsub.f32 %v12680_v5, %v12693_v6 }
 0x3a8   : > { %5123 = vmatpush.msra.mxu3 %v12597_v23  ;;  %4771 = vmatmul.f32.vlgmr.msra.gmra.mxu2 %v12640_v59  ;;  %14697 = vst [vmem:[#allocation152_spill] sm:$0xff] %v12697_v13  ;;  %v12702_v30 = vsub.f32 %v4655_v47, %v12697_v13 }
 0x3a9   : > { %5089 = vmatpush.msra.mxu2 %v14694_v33  ;;  %v12716_v47 = vand.u32 4294901760, %v4699_v62 }
 0x3aa   : > { %v4078_v36 = vpop.f32.mrf.mxu3  ;;  %14698 = vst [vmem:[#allocation153_spill] sm:$0xff] %v12702_v30 }
 0x3ab   : > { %v3968_v28 = vpop.f32.mrf.mxu0  ;;  %v4002_v44 = vpop.f32.mrf.mxu1  ;;  %14701 = vst [vmem:[#allocation156_spill] sm:$0xff] %v12716_v47 }
 0x3ac   : > { %v4003_v21 = vadd.f32 %v4002_v44, %v3964_v63  ;;  %v4044_v22 = vpop.f32.mrf.mxu2  ;;  %v3969_v44 = vadd.f32 %v3968_v28, %v12632_v53  ;;  %v12714_v63 = vand.u32 4294901760, %v12702_v30  ;;  %v11065_v28 = vmov 0  }
 0x3ad   : > { %10948 = vset.pattern.permute.xlu1 %v11065_v28  ;;  %10947 = vset.pattern.permute.xlu0 %v11065_v28 }
 0x3ae   : > { %v4045_v46 = vadd.f32 %v4044_v22, %v4003_v21  ;;  %4693 = vmatmul.f32.gmra.mxu0 %v12695_v50  ;;  %4735 = vmatmul.f32.vlgmr.msra.gmra.mxu1 %v12630_v19  ;;  %14700 = vst [vmem:[#allocation155_spill] sm:$0xff] %v12714_v63 }
 0x3af   : > { %4816 = vmatmul.f32.gmra.mxu3 %v12666_v52  ;;  %5045 = vmatpush.msra.mxu1 %v12597_v23 }
 0x3b0   : > { %v4079_v61 = vadd.f32 %v4078_v36, %v4045_v46  ;;  %4776 = vmatmul.f32.gmra.mxu2 %v12658_v20  ;;  %v452_v36 = vld [vmem:[%s12723_s12 + $0x10] sm:$0xff]  ;;  %10949 = vset.pattern.permute.xlu2 %v11065_v28 }
 0x3b1   : > { %5161 = vperm.xlu1 %10948, %v452_v36  }
 0x3b2   : > { %v12711_v22 = vadd.f32 %v4079_v61, %v12542_v48  ;;  %v4082_v8 = vpop.f32.mrf.mxu3  ;;  %v4707_v48 = vsub.f32 %v12702_v30, %v12714_v63 }
 0x3b3   : > { %v3973_v33 = vpop.f32.mrf.mxu0  ;;  %v4008_v21 = vpop.f32.mrf.mxu1 }
 0x3b4   : > { %14699 = vst [vmem:[#allocation154_spill] sm:$0xff] %v12711_v22  ;;  %v4009_v46 = vadd.f32 %v4008_v21, %v3969_v44  ;;  %v4048_v23 = vpop.f32.mrf.mxu2  ;;  %v3974_v61 = vadd.f32 %v3973_v33, %v12650_v2 }
 0x3b6   : > { %v4049_v53 = vadd.f32 %v4048_v23, %v4009_v46  ;;  %4701 = vmatmul.f32.gmra.mxu0 %v12716_v47  ;;  %4739 = vmatmul.f32.gmra.mxu1 %v12648_v55  ;;  %v12736_v46 = vand.u32 4294901760, %v4707_v48 }
 0x3b7   : > { %4822 = vmatmul.f32.gmra.mxu3 %v12693_v6 }
 0x3b8   : > { %v4083_v62 = vadd.f32 %v4082_v8, %v4049_v53  ;;  %4781 = vmatmul.f32.gmra.mxu2 %v12680_v5  ;;  %14703 = vst [vmem:[#allocation158_spill] sm:$0xff] %v12736_v46  ;;  %v450_v8 = vld [vmem:[%s12723_s12] sm:$0xff] }
 0x3b9   : > { %5151 = vperm.xlu1 %10948, %v450_v8  }
 0x3ba   : > { %v12734_v44 = vadd.f32 %v4083_v62, %v12557_v40  ;;  %v4086_v21 = vpop.f32.mrf.mxu3 }
 0x3bb   : > { %v3978_v23 = vpop.f32.mrf.mxu0  ;;  %v4014_v37 = vpop.f32.mrf.mxu1 }
 0x3bc   : > { %14702 = vst [vmem:[#allocation157_spill] sm:$0xff] %v12734_v44  ;;  %v4015_v1 = vadd.f32 %v4014_v37, %v3974_v61  ;;  %v4052_v56 = vpop.f32.mrf.mxu2  ;;  %v3979_v40 = vadd.f32 %v3978_v23, %v12672_v29 }
 0x3be   : > { %v4053_v24 = vadd.f32 %v4052_v56, %v4015_v1  ;;  %4709 = vmatmul.f32.gmra.mxu0 %v12736_v46  ;;  %4743 = vmatmul.f32.gmra.mxu1 %v12670_v25 }
 0x3bf   : > { %4828 = vmatmul.f32.gmra.mxu3 %v12714_v63 }
 0x3c0   : > { %v4087_v53 = vadd.f32 %v4086_v21, %v4053_v24  ;;  %4786 = vmatmul.f32.gmra.mxu2 %v12702_v30 }
 0x3c2   : > { %v12745_v2 = vadd.f32 %v4087_v53, %v12566_v27  ;;  %v4090_v33 = vpop.f32.mrf.mxu3  ;;  %v453_v53 = vld [vmem:[%s12723_s12 + $0x18] sm:$0xff] }
 0x3c3   : > { %v4020_v37 = vpop.f32.mrf.mxu1  ;;  %v12747_v48 = vpop.f32.mrf.mxu0  ;;  %5166 = vperm.xlu0 %10947, %v453_v53  }
 0x3c4   : > { %14704 = vst [vmem:[#allocation159_spill] sm:$0xff] %v12745_v2  ;;  %v4021_v1 = vadd.f32 %v4020_v37, %v3979_v40  ;;  %v4056_v56 = vpop.f32.mrf.mxu2 }
 0x3c6   : > { %v4057_v36 = vadd.f32 %v4056_v56, %v4021_v1  ;;  %4747 = vmatmul.f32.gmra.mxu1 %v12697_v13  ;;  %4852 = vmatmul.f32.vlgmr.msrb.gmra.mxu0 %v12630_v19  ;;  %v451_v56 = vld [vmem:[%s12723_s12 + $0x8] sm:$0xff] }
 0x3c7   : > { %4974 = vmatmul.f32.vlgmr.msrb.gmra.mxu3 %v12630_v19  ;;  %5156 = vperm.xlu2 %10949, %v451_v56  }
 0x3c8   : > { %v4091_v24 = vadd.f32 %v4090_v33, %v4057_v36  ;;  %4924 = vmatmul.f32.vlgmr.msrb.gmra.mxu2 %v12668_v4 }
 0x3ca   : > { %v12754_v29 = vadd.f32 %v4091_v24, %v12583_v41  ;;  %v12756_v27 = vpop.f32.mrf.mxu3 }
 0x3cb   : > { %v12758_v28 = vpop.f32.mrf.mxu0  ;;  %v12760_v62 = vpop.f32.mrf.mxu1 }
 0x3cc   : > { %14705 = vst [vmem:[#allocation160_spill] sm:$0xff] %v12754_v29  ;;  %v12762_v61 = vpop.f32.mrf.mxu2 }
 0x3ce   : > { %4856 = vmatmul.f32.gmra.mxu0 %v12648_v55  ;;  %4886 = vmatmul.f32.vlgmr.msrb.gmra.mxu1 %v12630_v19 }
 0x3cf   : > { %4978 = vmatmul.f32.gmra.mxu3 %v12648_v55 }
 0x3d0   : > { %4932 = vmatmul.f32.gmra.mxu2 %v12695_v50 }
 0x3d2   : > { %v12768_v21 = vpop.f32.mrf.mxu3 }
 0x3d3   : > { %v12770_v41 = vpop.f32.mrf.mxu0  ;;  %v12772_v23 = vpop.f32.mrf.mxu1 }
 0x3d4   : > { %v12774_v8 = vpop.f32.mrf.mxu2 }
 0x3d6   : > { %4860 = vmatmul.f32.gmra.mxu0 %v12670_v25  ;;  %4890 = vmatmul.f32.gmra.mxu1 %v12648_v55 }
 0x3d7   : > { %4982 = vmatmul.f32.gmra.mxu3 %v12670_v25 }
 0x3d8   : > { %4940 = vmatmul.f32.gmra.mxu2 %v12716_v47 }
 0x3da   : > { %v12781_v40 = vpop.f32.mrf.mxu3 }
 0x3db   : > { %v12783_v33 = vpop.f32.mrf.mxu0  ;;  %v12785_v37 = vpop.f32.mrf.mxu1 }
 0x3dc   : > { %v12787_v1 = vpop.f32.mrf.mxu2 }
 0x3de   : > { %4864 = vmatmul.f32.gmra.mxu0 %v12697_v13  ;;  %4894 = vmatmul.f32.gmra.mxu1 %v12670_v25 }
 0x3df   : > { %4986 = vmatmul.f32.gmra.mxu3 %v12697_v13 }
 0x3e0   : > { %4948 = vmatmul.f32.gmra.mxu2 %v12736_v46 }
 0x3e2   : > { %v12794_v36 = vpop.f32.mrf.mxu3 }
 0x3e3   : > { %v12796_v24 = vpop.f32.mrf.mxu1  ;;  %v12798_v53 = vpop.f32.mrf.mxu0 }
 0x3e4   : > { %v12800_v47 = vpop.f32.mrf.mxu2 }
 0x3e6   : > { %4898 = vmatmul.f32.gmra.mxu1 %v12697_v13  ;;  %5010 = vmatmul.f32.vlgmr.msra.gmra.mxu0 %v12640_v59 }
 0x3e7   : > { %5125 = vmatmul.f32.vlgmr.msra.gmra.mxu3 %v12630_v19 }
 0x3e8   : > { %5091 = vmatmul.f32.vlgmr.msra.gmra.mxu2 %v12630_v19 }
 0x3ea   : > { %v12806_v50 = vpop.f32.mrf.mxu3 }
 0x3eb   : > { %v12808_v56 = vpop.f32.mrf.mxu0  ;;  %v12810_v46 = vpop.f32.mrf.mxu1 }
 0x3ec   : > { %v12812_v4 = vpop.f32.mrf.mxu2 }
 0x3ee   : > { %5015 = vmatmul.f32.gmra.mxu0 %v12658_v20  ;;  %5049 = vmatmul.f32.vlgmr.msra.gmra.mxu1 %v12646_v58 }
 0x3ef   : > { %5129 = vmatmul.f32.gmra.mxu3 %v12648_v55 }
 0x3f0   : > { %5095 = vmatmul.f32.gmra.mxu2 %v12648_v55 }
 0x3f2   : > { %v12818_v59 = vpop.f32.mrf.mxu3 }
 0x3f3   : > { %v12820_v60 = vpop.f32.mrf.mxu0  ;;  %v12822_v19 = vpop.f32.mrf.mxu1 }
 0x3f4   : > { %v12824_v49 = vpop.f32.mrf.mxu2 }
 0x3f6   : > { %5020 = vmatmul.f32.gmra.mxu0 %v12680_v5  ;;  %5055 = vmatmul.f32.gmra.mxu1 %v12666_v52 }
 0x3f7   : > { %5133 = vmatmul.f32.gmra.mxu3 %v12670_v25 }
 0x3f8   : > { %5099 = vmatmul.f32.gmra.mxu2 %v12670_v25 }
 0x3fa   : > { %v12830_v20 = vpop.f32.mrf.mxu3 }
 0x3fb   : > { %v12832_v55 = vpop.f32.mrf.mxu0  ;;  %v12834_v58 = vpop.f32.mrf.mxu1 }
 0x3fc   : > { %v12836_v38 = vpop.f32.mrf.mxu2 }
 0x3fe   : > { %5025 = vmatmul.f32.gmra.mxu0 %v12702_v30  ;;  %5061 = vmatmul.f32.gmra.mxu1 %v12693_v6 }
 0x3ff   : > { %5137 = vmatmul.f32.gmra.mxu3 %v12697_v13 }
 0x400   : > { %5103 = vmatmul.f32.gmra.mxu2 %v12697_v13  ;;  %v455_v13 = vld [vmem:[%s436_s20] sm:$0xf]  ;;  %s444_s20 = scalar_lea.vmem %s14198_s7, %s12851_s21 }
 0x401   : > { %5187 = vperm.xlu2 %10949, %v455_v13  }
 0x402   : > { %v12842_v5 = vpop.f32.mrf.mxu3 }
 0x403   : > { %14706 = vst [vmem:[#allocation161_spill] sm:$0xff] %v12842_v5  ;;  %v12844_v52 = vpop.f32.mrf.mxu1  ;;  %v12846_v25 = vpop.f32.mrf.mxu0  ;;  %v4213_v5 = vadd.f32 %v12760_v62, %v12747_v48 }
 0x404   : > { %14707 = vst [vmem:[#allocation162_spill] sm:$0xff] %v12846_v25  ;;  %v12848_v57 = vpop.f32.mrf.mxu2 }
 0x405   : > { %14708 = vst [vmem:[#allocation163_spill] sm:$0xff] %v12848_v57  ;;  %v4221_v57 = vadd.f32 %v12785_v37, %v12770_v41  ;;  %v4225_v41 = vadd.f32 %v12796_v24, %v12783_v33 }
 0x406   : > { %5067 = vmatmul.f32.gmra.mxu1 %v12714_v63 }
 0x40a   : > { %v12858_v30 = vpop.f32.mrf.mxu3 }
 0x40b   : > { %14709 = vst [vmem:[#allocation164_spill] sm:$0xff] %v12858_v30  ;;  %v12860_v6 = vpop.f32.mrf.mxu0  ;;  %v12862_v14 = vpop.f32.mrf.mxu1 }
 0x40c   : > { %14710 = vst [vmem:[#allocation165_spill] sm:$0xff] %v12862_v14  ;;  %v12864_v31 = vpop.f32.mrf.mxu2 }
 0x40d   : > { %14711 = vst [vmem:[#allocation166_spill] sm:$0xff] %v12864_v31 }
 0x412   : > { %v12866_v26 = vpop.f32.mrf.mxu3 }
 0x413   : > { %14712 = vst [vmem:[#allocation167_spill] sm:$0xff] %v12866_v26  ;;  %v12868_v54 = vpop.f32.mrf.mxu0  ;;  %v12870_v45 = vpop.f32.mrf.mxu1 }
 0x414   : > { %14713 = vst [vmem:[#allocation168_spill] sm:$0xff] %v12868_v54  ;;  %v12872_v63 = vpop.f32.mrf.mxu2  ;;  %v4249_v54 = vadd.f32 %v12762_v61, %v4213_v5 }
 0x415   : > { %14714 = vst [vmem:[#allocation169_spill] sm:$0xff] %v12870_v45 }
 0x416   : > { %14715 = vst [vmem:[#allocation170_spill] sm:$0xff] %v12872_v63 }
 0x41a   : > { %v12874_v11 = vpop.f32.mrf.mxu3 }
 0x41b   : > { %14716 = vst [vmem:[#allocation171_spill] sm:$0xff] %v12874_v11  ;;  %v12876_v39 = vpop.f32.mrf.mxu0  ;;  %v12878_v3 = vpop.f32.mrf.mxu1 }
 0x41c   : > { %14717 = vst [vmem:[#allocation172_spill] sm:$0xff] %v12876_v39  ;;  %v12880_v32 = vpop.f32.mrf.mxu2 }
 0x41d   : > { %14718 = vst [vmem:[#allocation173_spill] sm:$0xff] %v12878_v3 }
 0x41e   : > { %14719 = vst [vmem:[#allocation174_spill] sm:$0xff] %v12880_v32 }
 0x422   : > { %v12882_v42 = vpop.f32.mrf.mxu3 }
 0x423   : > { %14720 = vst [vmem:[#allocation175_spill] sm:$0xff] %v12882_v42  ;;  %v12884_v13 = vpop.f32.mrf.mxu1  ;;  %v4686_v9 = vpop.f32.mrf.mxu0 }
 0x424   : > { %14721 = vst [vmem:[#allocation176_spill] sm:$0xff] %v12884_v13  ;;  %v12886_v51 = vpop.f32.mrf.mxu2 }
 0x425   : > { %14722 = vst [vmem:[#allocation177_spill] sm:$0xff] %v12886_v51  ;;  %v4217_v51 = vadd.f32 %v12772_v23, %v12758_v28  ;;  %v4259_v28 = vadd.f32 %v12787_v1, %v4221_v57 }
 0x427   : > { %v4254_v14 = vadd.f32 %v12774_v8, %v4217_v51 }
 0x429   : > { %v4294_v25 = vadd.f32 %v12768_v21, %v4254_v14  ;;  %v12915_v14 = vpop.permute.xlu1 %5161 }
 0x42a   : > { %v4811_v12 = vpop.f32.mrf.mxu3 }
 0x42b   : > { %v4694_v18 = vpop.f32.mrf.mxu0  ;;  %v4736_v35 = vpop.f32.mrf.mxu1  ;;  %v4334_v51 = vadd.f32 %v12808_v56, %v4294_v25 }
 0x42c   : > { %v4772_v17 = vpop.f32.mrf.mxu2  ;;  %v4737_v45 = vadd.f32 %v4736_v35, %v4686_v9 }
 0x42e   : > { %v4773_v48 = vadd.f32 %v4772_v17, %v4737_v45 }
 0x431   : > { %v12936_v1 = vpop.permute.xlu1 %5151 }
 0x432   : > { %v4817_v16 = vpop.f32.mrf.mxu3 }
 0x433   : > { %v4702_v15 = vpop.f32.mrf.mxu0  ;;  %v4740_v0 = vpop.f32.mrf.mxu1 }
 0x434   : > { %v4777_v29 = vpop.f32.mrf.mxu2  ;;  %v4741_v63 = vadd.f32 %v4740_v0, %v4694_v18  ;;  %v4288_v0 = vadd.f32 %v12756_v27, %v4249_v54  ;;  %v4300_v18 = vadd.f32 %v12781_v40, %v4259_v28  ;;  %v4812_v54 = vadd.f32 %v4811_v12, %v4773_v48 }
 0x436   : > { %v4778_v23 = vadd.f32 %v4777_v29, %v4741_v63  ;;  %v4330_v17 = vadd.f32 %v12798_v53, %v4288_v0  ;;  %v4338_v45 = vadd.f32 %v12820_v60, %v4300_v18  ;;  %v4368_v63 = vadd.f32 %v12822_v19, %v4334_v51 }
 0x437   : > { %v4264_v29 = vadd.f32 %v12800_v47, %v4225_v41 }
 0x438   : > { %v4818_v5 = vadd.f32 %v4817_v16, %v4778_v23  ;;  %v4364_v27 = vadd.f32 %v12810_v46, %v4330_v17  ;;  %v4372_v25 = vadd.f32 %v12834_v58, %v4338_v45  ;;  %v4619_v61 = vadd.f32 %v4368_v63, %v12635_v43  ;;  %v454_v46 = vld [vmem:[%s432_s11] sm:$0xf]  ;;  %v12933_v43 = vpop.permute.xlu2 %5156  ;;  %s10871_s11 = sshll.u32 %s11040_s30, 4 }
 0x439   : > { %v4306_v47 = vadd.f32 %v12794_v36, %v4264_v29  ;;  %v5192_v33 = vsel %vm5190_vm12, %v454_v46, 0  ;;  %v4460_v46 = vadd.f32 %v12830_v20, %v12836_v38 }
 0x43a   : > { %v4823_v2 = vpop.f32.mrf.mxu3  ;;  %v4621_v40 = vadd.f32 %v4372_v25, %v12653_v7  ;;  %v12942_v56 = vand.u32 4294901760, %v5192_v33 }
 0x43b   : > { %v4710_v22 = vpop.f32.mrf.mxu0  ;;  %v4744_v44 = vpop.f32.mrf.mxu1 }
 0x43c   : > { %v4782_v11 = vpop.f32.mrf.mxu2  ;;  %14724 = vst [vmem:[#allocation179_spill] sm:$0xff] %v12942_v56 }
 0x442   : > { %v12888_v30 = vpop.f32.mrf.mxu3 }
 0x443   : > { %v4748_v42 = vpop.f32.mrf.mxu1  ;;  %v4853_v39 = vpop.f32.mrf.mxu0 }
 0x444   : > { %v4787_v13 = vpop.f32.mrf.mxu2  ;;  %v4749_v16 = vadd.f32 %v4748_v42, %v4710_v22 }
 0x446   : > { %v4788_v42 = vadd.f32 %v4787_v13, %v4749_v16 }
 0x448   : > { %v4830_v7 = vadd.f32 %v12888_v30, %v4788_v42  ;;  %v12951_v30 = vsub.f32 %v5192_v33, %v12942_v56 }
 0x44a   : > { %v12892_v26 = vpop.f32.mrf.mxu3  ;;  %14725 = vst [vmem:[#allocation180_spill] sm:$0xff] %v12951_v30  ;;  %v12961_v63 = vand.u32 4294901760, %v12951_v30 }
 0x44b   : > { %14723 = vst [vmem:[#allocation178_spill] sm:$0xff] %v12892_v26  ;;  %v4857_v32 = vpop.f32.mrf.mxu0  ;;  %v4887_v31 = vpop.f32.mrf.mxu1  ;;  %v4745_v26 = vadd.f32 %v4744_v44, %v4702_v15 }
 0x44c   : > { %v12898_v3 = vpop.f32.mrf.mxu2  ;;  %v4858_v44 = vadd.f32 %v4857_v32, %v4818_v5  ;;  %v4617_v32 = vadd.f32 %v4364_v27, %v12622_v34 }
 0x44d   : > { %v4783_v57 = vadd.f32 %v4782_v11, %v4745_v26  ;;  %v4854_v26 = vadd.f32 %v4853_v39, %v4812_v54 }
 0x44f   : > { %v4824_v11 = vadd.f32 %v4823_v2, %v4783_v57  ;;  %v4888_v21 = vadd.f32 %v4887_v31, %v4854_v26  ;;  %v4342_v31 = vadd.f32 %v12832_v55, %v4306_v47 }
 0x451   : > { %v5141_v37 = vadd.f32 %v4888_v21, %v4617_v32  ;;  %v4376_v36 = vadd.f32 %v12844_v52, %v4342_v31  ;;  %v4452_v21 = vadd.f32 %v12806_v50, %v12812_v4 }
 0x452   : > { %v12904_v62 = vpop.f32.mrf.mxu3  ;;  %v14729_v31 = vld [vmem:[#allocation178_spill] sm:$0xff] }
 0x453   : > { %v4861_v9 = vpop.f32.mrf.mxu0  ;;  %v4891_v35 = vpop.f32.mrf.mxu1  ;;  %v5169_v13 = vadd.f32 %v12936_v1, %v5141_v37  ;;  %v4623_v0 = vadd.f32 %v4376_v36, %v12675_v10  ;;  %v4976_v38 = vadd.f32 %v14729_v31, %v12898_v3  ;;  %v14730_v37 = vld [vmem:[#allocation165_spill] sm:$0xff] }
 0x454   : > { %v12911_v15 = vpop.f32.mrf.mxu2  ;;  %v4892_v60 = vadd.f32 %v4891_v35, %v4858_v44  ;;  %v4862_v19 = vadd.f32 %v4861_v9, %v4824_v11  ;;  %v12953_v35 = vpop.permute.xlu0 %5166  ;;  %v14731_v36 = vld [vmem:[#allocation173_spill] sm:$0xff] }
 0x455   : > { %v5177_v51 = vmax.f32 %v5169_v13, 0.0  ;;  %v4980_v4 = vadd.f32 %v12904_v62, %v12911_v15 }
 0x456   : > { %v5143_v39 = vadd.f32 %v4892_v60, %v4619_v61  ;;  %v4456_v60 = vadd.f32 %v12818_v59, %v12824_v49  ;;  %v5217_v61 = vsub.f32 %v12951_v30, %v12961_v63  ;;  %v14726_v59 = vld [vmem:[#allocation162_spill] sm:$0xff] }
 0x457   : > { %v12966_v29 = vand.u32 4294901760, %v5177_v51 }
 0x458   : > { %v5171_v24 = vadd.f32 %v12933_v43, %v5143_v39  ;;  %v4493_v49 = vadd.f32 %v12860_v6, %v4456_v60  ;;  %v14728_v39 = vld [vmem:[#allocation169_spill] sm:$0xff]  ;;  %v13000_v20 = vand.u32 4294901760, %v5217_v61 }
 0x459   : > { %v12985_v32 = vsub.f32 %v5177_v51, %v12966_v29  ;;  %v14736_v60 = vld [vmem:[#allocation161_spill] sm:$0xff] }
 0x45a   : > { %v12926_v12 = vpop.f32.mrf.mxu3  ;;  %v5179_v18 = vmax.f32 %v5171_v24, 0.0 }
 0x45b   : > { %v4865_v58 = vpop.f32.mrf.mxu0  ;;  %v4895_v8 = vpop.f32.mrf.mxu1  ;;  %v5255_v33 = vand.u32 4294901760, %v12985_v32 }
 0x45c   : > { %v4896_v22 = vadd.f32 %v4895_v8, %v4862_v19  ;;  %v12931_v2 = vpop.f32.mrf.mxu2  ;;  %v4866_v28 = vadd.f32 %v4865_v58, %v4830_v7  ;;  %v12958_v45 = vand.u32 4294901760, %v5179_v18  ;;  %v4488_v58 = vadd.f32 %v14726_v59, %v4452_v21  ;;  %v14738_v59 = vld [vmem:[#allocation172_spill] sm:$0xff] }
 0x45d   : > { %v4984_v21 = vadd.f32 %v12926_v12, %v12931_v2 }
 0x45e   : > { %v5145_v34 = vadd.f32 %v4896_v22, %v4621_v40  ;;  %v12973_v11 = vsub.f32 %v5179_v18, %v12958_v45  ;;  %v14727_v40 = vld [vmem:[#allocation168_spill] sm:$0xff]  ;;  %v4533_v22 = vadd.f32 %v14728_v39, %v4493_v49  ;;  %v14740_v39 = vld [vmem:[#allocation171_spill] sm:$0xff] }
 0x45f   : > { %v4498_v42 = vadd.f32 %v14727_v40, %v4460_v46  ;;  %v14737_v46 = vld [vmem:[#allocation167_spill] sm:$0xff]  ;;  %v14739_v40 = vld [vmem:[#allocation164_spill] sm:$0xff] }
 0x460   : > { %v5173_v53 = vadd.f32 %v12915_v14, %v5145_v34  ;;  %v5249_v8 = vand.u32 4294901760, %v12973_v11  ;;  %v4527_v34 = vadd.f32 %v14730_v37, %v4488_v58 }
 0x461   : > { %v4539_v24 = vadd.f32 %v14731_v36, %v4498_v42 }
 0x462   : > { %v5181_v23 = vmax.f32 %v5173_v53, 0.0  ;;  %v12945_v55 = vpop.f32.mrf.mxu3 }
 0x463   : > { %v4899_v48 = vpop.f32.mrf.mxu1  ;;  %v5011_v41 = vpop.f32.mrf.mxu0 }
 0x464   : > { %v4900_v52 = vadd.f32 %v4899_v48, %v4866_v28  ;;  %v12948_v9 = vpop.f32.mrf.mxu2  ;;  %v12955_v5 = vand.u32 4294901760, %v5181_v23  ;;  %v5012_v53 = vadd.f32 %v5011_v41, %v4976_v38  ;;  %v5250_v48 = vsub.f32 %v12973_v11, %v5249_v8 }
 0x466   : > { %v5147_v57 = vadd.f32 %v4900_v52, %v4623_v0  ;;  %v5242_v44 = vsub.f32 %v5181_v23, %v12955_v5  ;;  %v14732_v0 = vld [vmem:[#allocation170_spill] sm:$0xff] }
 0x467   : > { %v4573_v18 = vadd.f32 %v14732_v0, %v4533_v22 }
 0x468   : > { %v5175_v17 = vadd.f32 %v12953_v35, %v5147_v57  ;;  %v5243_v47 = vand.u32 4294901760, %v5242_v44  ;;  %v5256_v57 = vsub.f32 %v12985_v32, %v5255_v33 }
 0x469   : > { %v4607_v49 = vadd.f32 %v14737_v46, %v4573_v18  ;;  %v14746_v18 = vld [vmem:[#allocation175_spill] sm:$0xff] }
 0x46a   : > { %v5183_v10 = vmax.f32 %v5175_v17, 0.0  ;;  %v12963_v54 = vpop.f32.mrf.mxu3  ;;  %v5244_v15 = vsub.f32 %v5242_v44, %v5243_v47  ;;  %v14733_v17 = vld [vmem:[#allocation166_spill] sm:$0xff] }
 0x46b   : > { %v5016_v27 = vpop.f32.mrf.mxu0  ;;  %v5050_v25 = vpop.f32.mrf.mxu1 }
 0x46c   : > { %v12968_v16 = vpop.f32.mrf.mxu2  ;;  %v12970_v26 = vand.u32 4294901760, %v5183_v10  ;;  %v5017_v6 = vadd.f32 %v5016_v27, %v4980_v4  ;;  %v5051_v51 = vadd.f32 %v5050_v25, %v5012_v53  ;;  %v5245_v41 = vand.u32 4294901760, %v5244_v15  ;;  %v14745_v53 = vld [vmem:[#allocation177_spill] sm:$0xff] }
 0x46e   : > { %5207 = vmatpush.msrb.mxu0 %v12970_v26  ;;  %5307 = vmatpush.msrb.mxu3 %v12970_v26  ;;  %v5236_v19 = vsub.f32 %v5183_v10, %v12970_v26  ;;  %v4569_v10 = vadd.f32 %v14733_v17, %v4527_v34  ;;  %v14743_v34 = vld [vmem:[#allocation154_spill] sm:$0xff] }
 0x470   : > { %5209 = vmatpush.msrb.mxu0 %v12955_v5  ;;  %5278 = vmatpush.msrb.mxu2 %v5236_v19  ;;  %v5237_v50 = vand.u32 4294901760, %v5236_v19  ;;  %v4603_v42 = vadd.f32 %v14739_v40, %v4569_v10 }
 0x471   : > { %5309 = vmatpush.msrb.mxu3 %v12955_v5 }
 0x472   : > { %5211 = vmatpush.msrb.mxu0 %v12958_v45  ;;  %5281 = vmatpush.msrb.mxu2 %v5242_v44  ;;  %v5238_v62 = vsub.f32 %v5236_v19, %v5237_v50  ;;  %v5130_v7 = vpop.f32.mrf.mxu3  ;;  %v14734_v44 = vld [vmem:[#allocation174_spill] sm:$0xff]  ;;  %v5251_v19 = vand.u32 4294901760, %v5250_v48  ;;  %v4618_v36 = vadd.f32 %v4603_v42, %v14743_v34 }
 0x473   : > { %5311 = vmatpush.msrb.mxu3 %v12958_v45  ;;  %v5056_v3 = vpop.f32.mrf.mxu1  ;;  %v5021_v52 = vpop.f32.mrf.mxu0  ;;  %v4577_v27 = vadd.f32 %v14734_v44, %v4539_v24  ;;  %v14744_v24 = vld [vmem:[#allocation159_spill] sm:$0xff]  ;;  %v14747_v44 = vld [vmem:[#allocation160_spill] sm:$0xff] }
 0x474   : > { %v5057_v13 = vadd.f32 %v5056_v3, %v5017_v6  ;;  %v5096_v28 = vpop.f32.mrf.mxu2  ;;  %5213 = vmatpush.msrb.mxu0 %v12966_v29  ;;  %5284 = vmatpush.msrb.mxu2 %v12973_v11  ;;  %v5239_v23 = vand.u32 4294901760, %v5238_v62  ;;  %v14735_v11 = vld [vmem:[#allocation163_spill] sm:$0xff]  ;;  %v5022_v4 = vadd.f32 %v5021_v52, %v4984_v21 }
 0x475   : > { %5313 = vmatpush.msrb.mxu3 %v12966_v29  ;;  %5219 = vmatmul.f32.vlgmr.msrb.gmra.mxu0 %v13000_v20  ;;  %v4464_v61 = vadd.f32 %v14736_v60, %v14735_v11  ;;  %v4611_v12 = vadd.f32 %v14740_v39, %v4577_v27 }
 0x476   : > { %5336 = vmatpush.msra.mxu0 %v5237_v50  ;;  %5240 = vmatpush.msrb.mxu1 %v5239_v23  ;;  %v5097_v25 = vadd.f32 %v5096_v28, %v5057_v13  ;;  %v5257_v50 = vand.u32 4294901760, %v5256_v57  ;;  %v4988_v13 = vadd.f32 %v12945_v55, %v12948_v9 }
 0x477   : > { %5287 = vmatpush.msrb.mxu2 %v12985_v32  ;;  %5317 = vmatmul.f32.vlgmr.msrb.gmra.mxu3 %v12961_v63  ;;  %v4503_v58 = vadd.f32 %v14738_v59, %v4464_v61  ;;  %v5093_v32 = vadd.f32 %v12968_v16, %v5051_v51  ;;  %v14742_v16 = vld [vmem:[#allocation157_spill] sm:$0xff] }
 0x478   : > { %5340 = vmatpush.msra.mxu0 %v5243_v47  ;;  %5246 = vmatpush.msrb.mxu1 %v5245_v41  ;;  %v14741_v47 = vld [vmem:[#allocation176_spill] sm:$0xff]  ;;  %v5131_v31 = vadd.f32 %v5130_v7, %v5097_v25  ;;  %v4622_v7 = vadd.f32 %v4611_v12, %v14744_v24 }
 0x479   : > { %5290 = vmatmul.f32.vlgmr.msrb.gmra.mxu2 %v12951_v30  ;;  %v4545_v22 = vadd.f32 %v14741_v47, %v4503_v58  ;;  %v5127_v15 = vadd.f32 %v12963_v54, %v5093_v32 }
 0x47a   : > { %5344 = vmatpush.msra.mxu0 %v5249_v8  ;;  %5252 = vmatpush.msrb.mxu1 %v5251_v19  ;;  %v5134_v62 = vpop.f32.mrf.mxu3  ;;  %v4620_v8 = vadd.f32 %v4607_v49, %v14742_v16 }
 0x47b   : > { %v5062_v2 = vpop.f32.mrf.mxu1  ;;  %v5026_v3 = vpop.f32.mrf.mxu0  ;;  %v5142_v48 = vadd.f32 %v5127_v15, %v4618_v36 }
 0x47c   : > { %v5063_v38 = vadd.f32 %v5062_v2, %v5022_v4  ;;  %v5100_v6 = vpop.f32.mrf.mxu2  ;;  %5348 = vmatpush.msra.mxu0 %v5255_v33  ;;  %5258 = vmatpush.msrb.mxu1 %v5257_v50  ;;  %v4581_v33 = vadd.f32 %v14745_v53, %v4545_v22  ;;  %v5144_v28 = vadd.f32 %v5131_v31, %v4620_v8 }
 0x47d   : > { %5260 = vmatmul.f32.vlgmr.msrb.gmra.mxu1 %v12942_v56  ;;  %5350 = vmatmul.f32.vlgmr.msra.gmra.mxu0 %v12942_v56  ;;  %v5027_v0 = vadd.f32 %v5026_v3, %v4988_v13  ;;  %v5170_v9 = vadd.f32 %v12936_v1, %v5142_v48 }
 0x47e   : > { %v5101_v37 = vadd.f32 %v5100_v6, %v5063_v38  ;;  %5367 = vmatpush.msra.mxu1 %v12970_v26  ;;  %v4615_v52 = vadd.f32 %v14746_v18, %v4581_v33  ;;  %v5172_v51 = vadd.f32 %v12933_v43, %v5144_v28 }
 0x47f   : > { %v5178_v60 = vmax.f32 %v5170_v9, 0.0  ;;  %v11066_v9 = vmov 4.0  }
 0x480   : > { %v5135_v23 = vadd.f32 %v5134_v62, %v5101_v37  ;;  %5369 = vmatpush.msra.mxu1 %v12955_v5  ;;  %v5180_v27 = vmax.f32 %v5172_v51, 0.0  ;;  %v13055_v37 = vpop.permute.xlu2 %5187  ;;  %10950 = vrcp.f32 %v11066_v9  ;;  %v457_v9 = vld [vmem:[%s444_s20] sm:$0xf] }
 0x481   : > { %v5397_v49 = vand.u32 4294901760, %v5178_v60  ;;  %14748 = vst [vmem:[#allocation162_spill] sm:$0xff] %v13055_v37 }
 0x482   : > { %v5146_v54 = vadd.f32 %v5135_v23, %v4622_v7  ;;  %5371 = vmatpush.msra.mxu1 %v12958_v45  ;;  %v5138_v10 = vpop.f32.mrf.mxu3  ;;  %v4624_v45 = vadd.f32 %v4615_v52, %v14747_v44  ;;  %v5395_v19 = vand.u32 4294901760, %v5180_v27  ;;  %v14749_v44 = vld [vmem:[#allocation5_spill] sm:$0xff] }
 0x483   : > { %v5068_v26 = vpop.f32.mrf.mxu1  ;;  %v5439_v4 = vsub.f32 %v5178_v60, %v5397_v49 }
 0x484   : > { %v5174_v41 = vadd.f32 %v12915_v14, %v5146_v54  ;;  %v5069_v57 = vadd.f32 %v5068_v26, %v5027_v0  ;;  %5373 = vmatpush.msra.mxu1 %v12966_v29  ;;  %v5104_v55 = vpop.f32.mrf.mxu2  ;;  %v5433_v58 = vsub.f32 %v5180_v27, %v5395_v19 }
 0x485   : > { %5375 = vmatmul.f32.vlgmr.msra.gmra.mxu1 %v12942_v56  ;;  %v5440_v2 = vand.u32 4294901760, %v5439_v4 }
 0x486   : > { %v5182_v5 = vmax.f32 %v5174_v41, 0.0  ;;  %v5105_v17 = vadd.f32 %v5104_v55, %v5069_v57  ;;  %v5434_v42 = vand.u32 4294901760, %v5433_v58  ;;  %v10951_v27 = vpop.eup %10950 }
 0x487   : > { %v5441_v38 = vsub.f32 %v5439_v4, %v5440_v2  ;;  %vm5595_vm13 = vweird.f32 %v10951_v27 }
 0x488   : > { %v5139_v11 = vadd.f32 %v5138_v10, %v5105_v17  ;;  %v5393_v21 = vand.u32 4294901760, %v5182_v5  ;;  %v5435_v22 = vsub.f32 %v5433_v58, %v5434_v42 }
 0x489   : > { %v5442_v62 = vand.u32 4294901760, %v5441_v38 }
 0x48a   : > { %v5148_v61 = vadd.f32 %v5139_v11, %v4624_v45  ;;  %v5427_v29 = vsub.f32 %v5182_v5, %v5393_v21  ;;  %v5436_v6 = vand.u32 4294901760, %v5435_v22  ;;  %v5591_v11 = vmul.f32 4.0, %v10951_v27 }
 0x48c   : > { %v5176_v25 = vadd.f32 %v12953_v35, %v5148_v61  ;;  %v5428_v50 = vand.u32 4294901760, %v5427_v29  ;;  %v5592_v60 = vsub.f32 1.0, %v5591_v11 }
 0x48e   : > { %v5184_v46 = vmax.f32 %v5176_v25, 0.0  ;;  %v5429_v12 = vsub.f32 %v5427_v29, %v5428_v50 }
 0x490   : > { %v5391_v59 = vand.u32 4294901760, %v5184_v46  ;;  %v5430_v31 = vand.u32 4294901760, %v5429_v12 }
 0x492   : > { %5392 = vmatpush.msra.mxu2 %v5391_v59  ;;  %5492 = vmatpush.msrb.mxu1 %v5391_v59  ;;  %v5421_v32 = vsub.f32 %v5184_v46, %v5391_v59 }
 0x494   : > { %5394 = vmatpush.msra.mxu2 %v5393_v21  ;;  %5463 = vmatpush.msrb.mxu0 %v5421_v32  ;;  %v5422_v40 = vand.u32 4294901760, %v5421_v32 }
 0x495   : > { %5494 = vmatpush.msrb.mxu1 %v5393_v21 }
 0x496   : > { %5396 = vmatpush.msra.mxu2 %v5395_v19  ;;  %5466 = vmatpush.msrb.mxu0 %v5427_v29  ;;  %v5423_v39 = vsub.f32 %v5421_v32, %v5422_v40 }
 0x497   : > { %5496 = vmatpush.msrb.mxu1 %v5395_v19 }
 0x498   : > { %5398 = vmatpush.msra.mxu2 %v5397_v49  ;;  %5469 = vmatpush.msrb.mxu0 %v5433_v58  ;;  %v5424_v47 = vand.u32 4294901760, %v5423_v39 }
 0x499   : > { %5498 = vmatpush.msrb.mxu1 %v5397_v49  ;;  %5404 = vmatmul.f32.vlgmr.msra.gmra.mxu2 %v13000_v20 }
 0x49a   : > { %5521 = vmatpush.msrb.mxu2 %v5422_v40  ;;  %5425 = vmatpush.msra.mxu3 %v5424_v47 }
 0x49b   : > { %5472 = vmatpush.msrb.mxu0 %v5439_v4  ;;  %5502 = vmatmul.f32.vlgmr.msrb.gmra.mxu1 %v12961_v63 }
 0x49c   : > { %5525 = vmatpush.msrb.mxu2 %v5428_v50  ;;  %5431 = vmatpush.msra.mxu3 %v5430_v31 }
 0x49d   : > { %5475 = vmatmul.f32.vlgmr.msrb.gmra.mxu0 %v12951_v30 }
 0x49e   : > { %5529 = vmatpush.msrb.mxu2 %v5434_v42  ;;  %5437 = vmatpush.msra.mxu3 %v5436_v6 }
 0x4a0   : > { %5533 = vmatpush.msrb.mxu2 %v5440_v2  ;;  %5443 = vmatpush.msra.mxu3 %v5442_v62 }
 0x4a1   : > { %5445 = vmatmul.f32.vlgmr.msra.gmra.mxu3 %v12942_v56  ;;  %5535 = vmatmul.f32.vlgmr.msrb.gmra.mxu2 %v12942_v56 }
 0x4a2   : > { %5552 = vmatpush.msrb.mxu3 %v5391_v59 }
 0x4a4   : > { %5554 = vmatpush.msrb.mxu3 %v5393_v21 }
 0x4a6   : > { %5556 = vmatpush.msrb.mxu3 %v5395_v19 }
 0x4a8   : > { %5558 = vmatpush.msrb.mxu3 %v5397_v49  ;;  %v5593_v49 = vmul.f32 %v10951_v27, %v5592_v60 }
 0x4a9   : > { %5560 = vmatmul.f32.vlgmr.msrb.gmra.mxu3 %v12942_v56 }
 0x4aa   : > { %v5594_v50 = vadd.f32 %v10951_v27, %v5593_v49 }
 0x4ac   : > { %v13063_v2 = vsel %vm5595_vm13, %v10951_v27, %v5594_v50 }
 0x4ad   : > { %14750 = vst [vmem:[#allocation168_spill] sm:$0xff] %v13063_v2 }
 0x4f2   : > { %v5220_v16 = vpop.f32.mrf.mxu0 }
 0x4f3   : > { %v5221_v24 = vadd.f32 %v5220_v16, %v13055_v37 }
 0x4fa   : > { %v5261_v8 = vpop.f32.mrf.mxu1  ;;  %v5318_v34 = vpop.f32.mrf.mxu3 }
 0x4fb   : > { %v5351_v36 = vpop.f32.mrf.mxu0  ;;  %v5262_v3 = vadd.f32 %v5261_v8, %v5221_v24 }
 0x4fc   : > { %v5291_v15 = vpop.f32.mrf.mxu2 }
 0x4fd   : > { %v5292_v33 = vadd.f32 %v5291_v15, %v5262_v3  ;;  %v13073_v15 = vld [vmem:[%s11179_s24 + $0x8] sm:$0xff]  ;;  %s14752_s24 = smov 112  }
 0x4fe   : > { %14751 = vst [vmem:[#allocation169_spill] sm:$0xff] %v13073_v15 }
 0x4ff   : > { %v5319_v54 = vadd.f32 %v5318_v34, %v5292_v33 }
 0x501   : > { %v5352_v51 = vadd.f32 %v5351_v36, %v5319_v54 }
 0x502   : > { %v5376_v7 = vpop.f32.mrf.mxu1 }
 0x503   : > { %v5377_v5 = vadd.f32 %v5376_v7, %v5352_v51 }
 0x518   : > { %v5503_v0 = vpop.f32.mrf.mxu1 }
 0x51a   : > { %v5476_v23 = vpop.f32.mrf.mxu0 }
 0x51c   : > { %v5405_v53 = vpop.f32.mrf.mxu2 }
 0x51d   : > { %v5406_v13 = vadd.f32 %v5405_v53, %v13055_v37  ;;  %v14830_v37 = vld [vmem:[#allocation68_spill] sm:$0xff] }
 0x524   : > { %v5446_v28 = vpop.f32.mrf.mxu3  ;;  %v5536_v18 = vpop.f32.mrf.mxu2 }
 0x525   : > { %v5447_v48 = vadd.f32 %v5446_v28, %v5406_v13 }
 0x527   : > { %v5477_v26 = vadd.f32 %v5476_v23, %v5447_v48 }
 0x529   : > { %v5504_v52 = vadd.f32 %v5503_v0, %v5477_v26 }
 0x52b   : > { %v5537_v41 = vadd.f32 %v5536_v18, %v5504_v52 }
 0x52c   : > { %v5561_v57 = vpop.f32.mrf.mxu3 }
 0x52d   : > { %v5562_v55 = vadd.f32 %v5561_v57, %v5537_v41 }
 0x52f   : > { %v5566_v17 = vrot.slane %v5562_v55, 4 }
 0x531   : > { %v5567_v10 = vsel %vm998_vm3, %v5377_v5, %v5566_v17 }
 0x532   : > { %v5569_v45 = vadd.f32 %v5567_v10, %v14749_v44 }
 0x534   : > { %5571 = vst [vmem:[#allocation1] ss:$2 sm:$0xff] %v5569_v45 }
 0x53b   : > { %v5572_v61 = vld.sshfl [vmem:[#allocation1] sm:$0xff pattern:$0x75316420]  ;;  %v5573_v21 = vld.sshfl [vmem:[#allocation1 + $0x8] sm:$0xff pattern:$0x75316420] }
 0x53c   : > { %v5576_v25 = vsel %vm998_vm3, %v5572_v61, 0.0  ;;  %v5583_v19 = vsel %vm998_vm3, %v5573_v21, 0.0 }
 0x53d   : > { %v5577_v46 = vrot.slane %v5576_v25, 4  ;;  %v5584_v29 = vrot.slane %v5583_v19, 4 }
 0x53f   : > { %v5578_v59 = vadd.f32 %v5577_v46, %v5576_v25  ;;  %v5585_v58 = vadd.f32 %v5584_v29, %v5583_v19  ;;  %v14755_v25 = vld [vmem:[#allocation9_spill] sm:$0xff]  ;;  %v14757_v29 = vld [vmem:[#allocation10_spill] sm:$0xff] }
 0x540   : > { %v14756_v19 = vperm.slane %v14755_v25, 0  ;;  %v14758_v49 = vperm.slane %v14757_v29, 0 }
 0x541   : > { %v5579_v32 = vrot.slane %v5578_v59, 2  ;;  %v5586_v4 = vrot.slane %v5585_v58, 2 }
 0x543   : > { %v5580_v40 = vadd.f32 %v5579_v32, %v5578_v59  ;;  %v5587_v42 = vadd.f32 %v5586_v4, %v5585_v58 }
 0x545   : > { %v5581_v39 = vrot.slane %v5580_v40, 1  ;;  %v5588_v12 = vrot.slane %v5587_v42, 1 }
 0x547   : > { %v5582_v47 = vadd.f32 %v5581_v39, %v5580_v40  ;;  %v5589_v22 = vadd.f32 %v5588_v12, %v5587_v42 }
 0x549   : > { %v5598_v31 = vmul.f32 %v13063_v2, %v5589_v22  ;;  %v5597_v38 = vmul.f32 %v13063_v2, %v5582_v47  ;;  %v14759_v22 = vld [vmem:[#allocation16_spill] sm:$0xff] }
 0x54b   : > { %v5601_v6 = vrot.slane %v5598_v31, 4  ;;  %v14760_v31 = vld [vmem:[#allocation11_spill] sm:$0xff] }
 0x54d   : > { %v5602_v62 = vsel %vm998_vm3, %v5597_v38, %v5601_v6 }
 0x54e   : > { %v13068_v16 = vsub.f32 %v5569_v45, %v5602_v62 }
 0x550   : > { %v5605_v8 = vmul.f32 %v13068_v16, %v13068_v16 }
 0x552   : > { %5607 = vst [vmem:[#allocation1] ss:$2 sm:$0xff] %v5605_v8  ;;  %v14761_v8 = vld [vmem:[#allocation7_spill] sm:$0xff] }
 0x559   : > { %v5608_v34 = vld.sshfl [vmem:[#allocation1] sm:$0xff pattern:$0x75316420]  ;;  %v5609_v36 = vld.sshfl [vmem:[#allocation1 + $0x8] sm:$0xff pattern:$0x75316420] }
 0x55a   : > { %5680 = vst [vmem:[#allocation1] ss:$2 sm:$0xff] %v13073_v15  ;;  %v5619_v5 = vsel %vm998_vm3, %v5609_v36, 0.0  ;;  %v5612_v10 = vsel %vm998_vm3, %v5608_v34, 0.0 }
 0x55b   : > { %v5620_v17 = vrot.slane %v5619_v5, 4  ;;  %v5613_v11 = vrot.slane %v5612_v10, 4 }
 0x55d   : > { %v5621_v44 = vadd.f32 %v5620_v17, %v5619_v5  ;;  %v5614_v50 = vadd.f32 %v5613_v11, %v5612_v10  ;;  %v14768_v10 = vld [vmem:[#allocation18_spill] sm:$0xff] }
 0x55f   : > { %v5622_v58 = vrot.slane %v5621_v44, 2  ;;  %v5615_v38 = vrot.slane %v5614_v50, 2 }
 0x561   : > { %v5682_v24 = vld.sshfl [vmem:[#allocation1 + $0x8] sm:$0xff pattern:$0x75316420]  ;;  %v5681_v7 = vld.sshfl [vmem:[#allocation1] sm:$0xff pattern:$0x75316420]  ;;  %v5623_v39 = vadd.f32 %v5622_v58, %v5621_v44 }
 0x562   : > { %5687 = vrot.lane.b32.xlu1 %v5682_v24, %s11051_s14  ;;  %5685 = vrot.lane.b32.xlu0 %v5681_v7, %s11051_s14  ;;  %6177 = vst [vmem:[#allocation1] ss:$2 sm:$0xff] %v13073_v15  ;;  %v5616_v7 = vadd.f32 %v5615_v38, %v5614_v50 }
 0x563   : > { %v5624_v34 = vrot.slane %v5623_v39, 1 }
 0x569   : > { %v13079_v3 = vld.sshfl [vmem:[#allocation1] sm:$0xff pattern:$0x75316420]  ;;  %v13081_v53 = vld.sshfl [vmem:[#allocation1 + $0x8] sm:$0xff pattern:$0x75316420] }
 0x56a   : > { %6662 = vst [vmem:[#allocation1] ss:$2 sm:$0xff] %v13073_v15 }
 0x571   : > { %v6663_v33 = vld.sshfl [vmem:[#allocation1] sm:$0xff pattern:$0x75316420]  ;;  %v6664_v13 = vld.sshfl [vmem:[#allocation1 + $0x8] sm:$0xff pattern:$0x75316420] }
 0x572   : > { %6667 = vrot.lane.b32.xlu2 %v6663_v33, %s11053_s26  ;;  %7167 = vst [vmem:[#allocation1] ss:$2 sm:$0xff] %v13073_v15  ;;  %6669 = vrot.lane.b32.xlu0 %v6664_v13, %s11053_s26  ;;  %s10687_s26 = scalar_lea.hbm %s14199_s8, %s10871_s11  ;;  %s10990_s11 = scalar_lea.hbm %s14199_s8, 32 }
 0x579   : > { %v7168_v28 = vld.sshfl [vmem:[#allocation1] sm:$0xff pattern:$0x75316420]  ;;  %v7169_v23 = vld.sshfl [vmem:[#allocation1 + $0x8] sm:$0xff pattern:$0x75316420] }
 0x57a   : > { %7172 = vrot.lane.b32.xlu1 %v7168_v28, %s11055_s16  ;;  %7174 = vrot.lane.b32.xlu2 %v7169_v23, %s11055_s16  ;;  %7672 = vst [vmem:[#allocation1] ss:$2 sm:$0xff] %v13073_v15  ;;  %s440_s16 = scalar_lea.vmem %s14197_s6, %s12851_s21  ;;  %v5625_v23 = vadd.f32 %v5624_v34, %v5623_v39  ;;  %s405_s21 = sand.u32 1, %s11032_s28  }
 0x57b   : > { %v456_v57 = vld [vmem:[%s440_s16] sm:$0xf]  ;;  %s10850_s19 = sshll.u32 %s405_s21, 4  ;;  %s10673_s30 = scalar_lea.sflag [#allocation3], %s405_s21 }
 0x57c   : > { %s13195_s12 = scalar_lea.vmem [#allocation2], %s10850_s19 }
 0x57d   : > { %s10688_s16 = sshll.u32 %s13195_s12, 4  ;;  %s10689_s16 = int_to_ptr.vmem [resolvable:$true] %s10688_s16 }
 0x581   : > { %v7674_v48 = vld.sshfl [vmem:[#allocation1 + $0x8] sm:$0xff pattern:$0x75316420]  ;;  %v7673_v0 = vld.sshfl [vmem:[#allocation1] sm:$0xff pattern:$0x75316420] }
 0x582   : > { %7679 = vrot.lane.b32.xlu1 %v7674_v48, %s11057_s22  ;;  %8177 = vst [vmem:[#allocation1] ss:$2 sm:$0xff] %v13073_v15  ;;  %7677 = vrot.lane.b32.xlu0 %v7673_v0, %s11057_s22  ;;  %s14753_s22 = smov 111   ;;  %v14762_v48 = vld [vmem:[#allocation19_spill] sm:$0xff]  ;;  %v14763_v0 = vld [vmem:[#allocation6_spill] sm:$0xff] }
 0x589   : > { %v8179_v54 = vld.sshfl [vmem:[#allocation1 + $0x8] sm:$0xff pattern:$0x75316420]  ;;  %v8178_v26 = vld.sshfl [vmem:[#allocation1] sm:$0xff pattern:$0x75316420] }
 0x58a   : > { %8182 = vrot.lane.b32.xlu2 %v8178_v26, %s11059_s25  ;;  %8682 = vst [vmem:[#allocation1] ss:$2 sm:$0xff] %v13073_v15  ;;  %8184 = vrot.lane.b32.xlu0 %v8179_v54, %s11059_s25  ;;  %v5617_v54 = vrot.slane %v5616_v7, 1  ;;  %v14764_v26 = vld [vmem:[#allocation15_spill] sm:$0xff] }
 0x591   : > { %v8683_v18 = vld.sshfl [vmem:[#allocation1] sm:$0xff pattern:$0x75316420]  ;;  %v8684_v52 = vld.sshfl [vmem:[#allocation1 + $0x8] sm:$0xff pattern:$0x75316420] }
 0x592   : > { %8687 = vrot.lane.b32.xlu1 %v8683_v18, %s11061_s23  ;;  %8689 = vrot.lane.b32.xlu2 %v8684_v52, %s11061_s23  ;;  %9187 = vst [vmem:[#allocation1] ss:$2 sm:$0xff] %v13073_v15  ;;  %v5627_v18 = vmul.f32 %v5625_v23, %v13063_v2  ;;  %v14765_v52 = vld [vmem:[#allocation13_spill] sm:$0xff] }
 0x599   : > { %v9188_v51 = vld.sshfl [vmem:[#allocation1] sm:$0xff pattern:$0x75316420]  ;;  %v9189_v41 = vld.sshfl [vmem:[#allocation1 + $0x8] sm:$0xff pattern:$0x75316420] }
 0x59a   : > { %9194 = vrot.lane.b32.xlu1 %v9189_v41, %s14752_s24  ;;  %9692 = vst [vmem:[#allocation1] ss:$2 sm:$0xff] %v13073_v15  ;;  %9192 = vrot.lane.b32.xlu0 %v9188_v51, %s14752_s24  ;;  %v5618_v51 = vadd.f32 %v5617_v54, %v5616_v7  ;;  %v5629_v41 = vadd.f32 1e-05, %v5627_v18  ;;  %v14811_v15 = vld [vmem:[#allocation52_spill] sm:$0xff] }
 0x59c   : > { %v5626_v17 = vmul.f32 %v5618_v51, %v13063_v2  ;;  %10952 = vrsqrt.f32 %v5629_v41  ;;  %vm5646_vm15 = vweird.f32 %v5629_v41 }
 0x59e   : > { %v5628_v11 = vadd.f32 1e-05, %v5626_v17 }
 0x5a0   : > { %10954 = vrsqrt.f32 %v5628_v11  ;;  %vm5636_vm4 = vweird.f32 %v5628_v11 }
 0x5a1   : > { %v9693_v55 = vld.sshfl [vmem:[#allocation1] sm:$0xff pattern:$0x75316420] }
 0x5a2   : > { %5658 = vperm.xlu1 %10948, %v456_v57   ;;  %9697 = vrot.lane.b32.xlu2 %v9693_v55, %s14753_s22  ;;  %v14766_v55 = vld [vmem:[#allocation23_spill] sm:$0xff] }
 0x5aa   : > { %5668 = vperm.xlu2 %10949, %v457_v9   ;;  %v14767_v9 = vld [vmem:[#allocation12_spill] sm:$0xff] }
 0x5cc   : > { %v13126_v28 = vpop.permute.xlu2 %6667 }
 0x5d4   : > { %v5688_v45 = vpop.permute.xlu1 %5687  ;;  %v5686_v27 = vpop.permute.xlu0 %5685 }
 0x5d5   : > { %v5689_v61 = vsel %vm473_vm1, %v5686_v27, %v5688_v45  ;;  %v5690_v21 = vsel %vm473_vm1, %v5688_v45, %v5686_v27  ;;  %v7175_v57 = vpop.permute.xlu2 %7174  ;;  %v14769_v27 = vld [vmem:[#allocation17_spill] sm:$0xff] }
 0x5d6   : > { %v5691_v46 = vmul.f32 %v5690_v21, %v14756_v19  ;;  %v5692_v59 = vmul.f32 %v5689_v61, %v14758_v49  ;;  %v10953_v61 = vpop.eup %10952  ;;  %v14770_v21 = vld [vmem:[#allocation24_spill] sm:$0xff]  ;;  %v14771_v19 = vld [vmem:[#allocation14_spill] sm:$0xff] }
 0x5d7   : > { %v5641_v58 = vmul.f32 %v10953_v61, %v5629_v41  ;;  %vm5647_vm14 = vweird.f32 %v10953_v61 }
 0x5d8   : > { %v5694_v32 = vsel %vm501_vm2, %v5691_v46, 0  ;;  %v5697_v4 = vsel %vm501_vm2, %v5692_v59, 0  ;;  %v14772_v46 = vld [vmem:[#allocation22_spill] sm:$0xff]  ;;  %v14773_v59 = vld [vmem:[#allocation21_spill] sm:$0xff]  ;;  %vm5648_vm0 = vmor %vm5646_vm15, %vm5647_vm14 }
 0x5d9   : > { %v5714_v40 = vand.u32 4294901760, %v5694_v32  ;;  %v5953_v42 = vand.u32 4294901760, %v5697_v4  ;;  %v5642_v50 = vmul.f32 %v10953_v61, %v5641_v58 }
 0x5db   : > { %v5765_v12 = vsub.f32 %v5694_v32, %v5714_v40  ;;  %v6004_v47 = vsub.f32 %v5697_v4, %v5953_v42  ;;  %5715 = vmatpush.msra.mxu0 %v5714_v40  ;;  %5842 = vmatpush.msra.mxu3 %v5714_v40  ;;  %v10955_v32 = vpop.eup %10954  ;;  %v5643_v39 = vmul.f32 0.5, %v5642_v50 }
 0x5dc   : > { %5721 = vmatmul.f32.vlgmr.msra.gmra.mxu0 %v14759_v22  ;;  %5846 = vmatmul.f32.vlgmr.msra.gmra.mxu3 %v14760_v31  ;;  %vm5637_vm1 = vweird.f32 %v10955_v32 }
 0x5dd   : > { %5804 = vmatpush.msra.mxu2 %v5765_v12  ;;  %v5766_v6 = vand.u32 4294901760, %v5765_v12  ;;  %v6005_v62 = vand.u32 4294901760, %v6004_v47  ;;  %v5644_v38 = vsub.f32 1.5, %v5643_v39 }
 0x5de   : > { %5807 = vmatmul.f32.vlgmr.msra.gmra.mxu2 %v14761_v8 }
 0x5df   : > { %5954 = vmatpush.msrb.mxu2 %v5953_v42  ;;  %5886 = vmatpush.msrb.mxu0 %v5766_v6  ;;  %v5767_v36 = vsub.f32 %v5765_v12, %v5766_v6  ;;  %v6006_v24 = vsub.f32 %v6004_v47, %v6005_v62 }
 0x5e1   : > { %6125 = vmatpush.msra.mxu2 %v6005_v62  ;;  %6043 = vmatpush.msra.mxu0 %v6004_v47  ;;  %v5768_v33 = vand.u32 4294901760, %v5767_v36  ;;  %v6007_v13 = vand.u32 4294901760, %v6006_v24  ;;  %v5645_v36 = vmul.f32 %v10953_v61, %v5644_v38  ;;  %v6180_v24 = vsel %vm998_vm3, %v13079_v3, 0  ;;  %v14786_v38 = vld [vmem:[#allocation35_spill] sm:$0xff] }
 0x5e2   : > { %v6199_v7 = vand.u32 4294901760, %v6180_v24 }
 0x5e3   : > { %5769 = vmatpush.msra.mxu1 %v5768_v33  ;;  %6008 = vmatpush.msrb.mxu3 %v6007_v13  ;;  %v5649_v54 = vsel %vm5648_vm0, %v10953_v61, %v5645_v36  ;;  %v14789_v36 = vld [vmem:[#allocation32_spill] sm:$0xff] }
 0x5e4   : > { %5729 = vmatmul.f32.gmra.mxu0 %v14762_v48  ;;  %5771 = vmatmul.f32.vlgmr.msra.gmra.mxu1 %v14763_v0  ;;  %v13149_v49 = vpop.permute.xlu2 %8182  ;;  %v6250_v23 = vsub.f32 %v6180_v24, %v6199_v7  ;;  %v5652_v51 = vrot.slane %v5649_v54, 4  ;;  %v6670_v24 = vpop.permute.xlu0 %6669 }
 0x5e5   : > { %5852 = vmatmul.f32.gmra.mxu3 %v14764_v26  ;;  %5920 = vmatpush.msrb.mxu1 %v5714_v40  ;;  %v14774_v40 = vld [vmem:[#allocation20_spill] sm:$0xff] }
 0x5e6   : > { %6159 = vmatpush.msra.mxu3 %v5953_v42  ;;  %5812 = vmatmul.f32.gmra.mxu2 %v14765_v52  ;;  %v6251_v18 = vand.u32 4294901760, %v6250_v23 }
 0x5e7   : > { %6081 = vmatpush.msra.mxu1 %v5953_v42  ;;  %v5631_v42 = vmul.f32 %v10955_v32, %v5628_v11 }
 0x5e8   : > { %v6252_v41 = vsub.f32 %v6250_v23, %v6251_v18 }
 0x5e9   : > { %v5632_v47 = vmul.f32 %v10955_v32, %v5631_v42 }
 0x5ea   : > { %v6253_v17 = vand.u32 4294901760, %v6252_v41 }
 0x5ec   : > { %5737 = vmatmul.f32.gmra.mxu0 %v14766_v55  ;;  %5775 = vmatmul.f32.gmra.mxu1 %v14767_v9  ;;  %v7173_v5 = vpop.permute.xlu1 %7172  ;;  %v8690_v12 = vpop.permute.xlu2 %8689 }
 0x5ed   : > { %5858 = vmatmul.f32.gmra.mxu3 %v14768_v10  ;;  %v13139_v44 = vsel %vm2014_vm6, %v7173_v5, %v7175_v57  ;;  %v13143_v45 = vsel %vm2014_vm6, %v7175_v57, %v7173_v5  ;;  %v11067_v57 = vmov 839922192   ;;  %vm5638_vm6 = vmor %vm5636_vm4, %vm5637_vm1 }
 0x5ee   : > { %5817 = vmatmul.f32.gmra.mxu2 %v14769_v27  ;;  %v5661_v5 = vunpack.c.l.s4 %v11067_v57  ;;  %v14793_v57 = vld [vmem:[#allocation36_spill] sm:$0xff] }
 0x5f0   : > { %v5662_v50 = vunpack.c.0.s8 %v5661_v5 }
 0x5f4   : > { %5745 = vmatmul.f32.gmra.mxu0 %v14770_v21  ;;  %5779 = vmatmul.f32.gmra.mxu1 %v14771_v19  ;;  %v13152_v4 = vpop.permute.xlu1 %7679 }
 0x5f5   : > { %5864 = vmatmul.f32.gmra.mxu3 %v14772_v46 }
 0x5f6   : > { %5822 = vmatmul.f32.gmra.mxu2 %v14773_v59 }
 0x5fc   : > { %5783 = vmatmul.f32.gmra.mxu1 %v14774_v40  ;;  %5888 = vmatmul.f32.vlgmr.msrb.gmra.mxu0 %v14763_v0  ;;  %v13172_v13 = vpop.permute.xlu2 %9697 }
 0x5fd   : > { %6010 = vmatmul.f32.vlgmr.msrb.gmra.mxu3 %v14763_v0  ;;  %6200 = vmatpush.msrb.mxu0 %v6199_v7 }
 0x5fe   : > { %5960 = vmatmul.f32.vlgmr.msrb.gmra.mxu2 %v14759_v22  ;;  %v5633_v22 = vmul.f32 0.5, %v5632_v47  ;;  %6327 = vmatpush.msrb.mxu3 %v6199_v7 }
 0x5ff   : > { %6289 = vmatpush.msrb.mxu2 %v6250_v23  ;;  %v14791_v23 = vperm.slane %v14755_v25, 1 }
 0x600   : > { %v5634_v33 = vsub.f32 1.5, %v5633_v22  ;;  %v14788_v22 = vld [vmem:[#allocation40_spill] sm:$0xff] }
 0x602   : > { %v5635_v3 = vmul.f32 %v10955_v32, %v5634_v33  ;;  %v6672_v33 = vsel %vm1490_vm5, %v6670_v24, %v13126_v28 }
 0x603   : > { %v6673_v54 = vmul.f32 %v6672_v33, %v14791_v23 }
 0x604   : > { %5892 = vmatmul.f32.gmra.mxu0 %v14767_v9  ;;  %5922 = vmatmul.f32.vlgmr.msrb.gmra.mxu1 %v14763_v0  ;;  %v8688_v6 = vpop.permute.xlu1 %8687  ;;  %v5639_v61 = vsel %vm5638_vm6, %v10955_v32, %v5635_v3  ;;  %v5669_v42 = vpop.permute.xlu2 %5668 }
 0x605   : > { %6014 = vmatmul.f32.gmra.mxu3 %v14767_v9  ;;  %v13163_v62 = vsel %vm3586_vm9, %v8688_v6, %v8690_v12  ;;  %v13167_v34 = vsel %vm3586_vm9, %v8690_v12, %v8688_v6  ;;  %v5653_v58 = vsel %vm998_vm3, %v5639_v61, %v5652_v51  ;;  %6254 = vmatpush.msrb.mxu1 %v6253_v17  ;;  %v14787_v6 = vld [vmem:[#allocation33_spill] sm:$0xff]  ;;  %v6676_v3 = vsel %vm501_vm2, %v6673_v54, 0 }
 0x606   : > { %5968 = vmatmul.f32.gmra.mxu2 %v14762_v48  ;;  %v13190_v32 = vperm.slane %v5669_v42, %v5662_v50  ;;  %v13238_v41 = vand.u32 4294901760, %v6676_v3  ;;  %v6671_v61 = vsel %vm1490_vm5, %v13126_v28, %v6670_v24 }
 0x608   : > { %14776 = vst [vmem:[#allocation165_spill] sm:$0xff] %v13190_v32  ;;  %v6747_v5 = vsub.f32 %v6676_v3, %v13238_v41 }
 0x60c   : > { %5896 = vmatmul.f32.gmra.mxu0 %v14771_v19  ;;  %5926 = vmatmul.f32.gmra.mxu1 %v14767_v9  ;;  %v13176_v48 = vpop.permute.xlu1 %9194 }
 0x60d   : > { %6018 = vmatmul.f32.gmra.mxu3 %v14771_v19 }
 0x60e   : > { %5976 = vmatmul.f32.gmra.mxu2 %v14766_v55  ;;  %v5655_v55 = vmul.f32 %v5653_v58, %v13068_v16  ;;  %v6182_v16 = vsel %vm998_vm3, %v13081_v53, 0  ;;  %v14777_v53 = vld [vmem:[#allocation30_spill] sm:$0xff] }
 0x614   : > { %5900 = vmatmul.f32.gmra.mxu0 %v14774_v40  ;;  %5930 = vmatmul.f32.gmra.mxu1 %v14771_v19  ;;  %v5659_v39 = vpop.permute.xlu1 %5658 }
 0x615   : > { %6022 = vmatmul.f32.gmra.mxu3 %v14774_v40  ;;  %v13188_v11 = vperm.slane %v5659_v39, %v5662_v50 }
 0x616   : > { %5984 = vmatmul.f32.gmra.mxu2 %v14770_v21  ;;  %v6438_v21 = vand.u32 4294901760, %v6182_v16 }
 0x617   : > { %14775 = vst [vmem:[#allocation178_spill] sm:$0xff] %v13188_v11  ;;  %v5665_v12 = vmul.f32 %v13188_v11, %v5655_v55  ;;  %v14794_v55 = vperm.slane %v14757_v29, 1  ;;  %v14809_v11 = vld [vmem:[#allocation54_spill] sm:$0xff] }
 0x619   : > { %v5675_v47 = vadd.f32 %v13190_v32, %v5665_v12  ;;  %v6674_v12 = vmul.f32 %v6671_v61, %v14794_v55  ;;  %v14808_v32 = vld [vmem:[#allocation48_spill] sm:$0xff] }
 0x61b   : > { %5676 = vst [vmem:[%s13195_s12] sm:$0xff] %v5675_v47  ;;  %v6748_v47 = vand.u32 4294901760, %v6747_v5  ;;  %v6679_v28 = vsel %vm501_vm2, %v6674_v12, 0 }
 0x61c   : > { %5934 = vmatmul.f32.gmra.mxu1 %v14774_v40  ;;  %6046 = vmatmul.f32.vlgmr.msra.gmra.mxu0 %v14761_v8  ;;  %v6489_v8 = vsub.f32 %v6182_v16, %v6438_v21  ;;  %v13259_v23 = vand.u32 4294901760, %v6679_v28 }
 0x61d   : > { %6161 = vmatmul.f32.vlgmr.msra.gmra.mxu3 %v14763_v0  ;;  %6371 = vmatpush.msra.mxu0 %v6251_v18  ;;  %v14792_v18 = vld [vmem:[#allocation37_spill] sm:$0xff] }
 0x61e   : > { %6127 = vmatmul.f32.vlgmr.msra.gmra.mxu2 %v14763_v0  ;;  %v6490_v0 = vand.u32 4294901760, %v6489_v8 }
 0x61f   : > { %6439 = vmatpush.msra.mxu2 %v6438_v21 }
 0x624   : > { %6051 = vmatmul.f32.gmra.mxu0 %v14765_v52  ;;  %6085 = vmatmul.f32.vlgmr.msra.gmra.mxu1 %v14760_v31  ;;  %v6491_v52 = vsub.f32 %v6489_v8, %v6490_v0 }
 0x625   : > { %6165 = vmatmul.f32.gmra.mxu3 %v14767_v9  ;;  %6405 = vmatpush.msra.mxu1 %v6199_v7  ;;  %v14790_v7 = vld [vmem:[#allocation39_spill] sm:$0xff] }
 0x626   : > { %6131 = vmatmul.f32.gmra.mxu2 %v14767_v9  ;;  %v6492_v31 = vand.u32 4294901760, %v6491_v52  ;;  %v14779_v9 = vld [vmem:[#allocation26_spill] sm:$0xff] }
 0x628   : > { %6493 = vmatpush.msra.mxu3 %v6492_v31 }
 0x62c   : > { %6056 = vmatmul.f32.gmra.mxu0 %v14769_v27  ;;  %6091 = vmatmul.f32.gmra.mxu1 %v14764_v26  ;;  %v14778_v26 = vld [vmem:[#allocation27_spill] sm:$0xff]  ;;  %v14780_v27 = vld [vmem:[#allocation34_spill] sm:$0xff] }
 0x62d   : > { %6169 = vmatmul.f32.gmra.mxu3 %v14771_v19 }
 0x62e   : > { %6135 = vmatmul.f32.gmra.mxu2 %v14771_v19  ;;  %v14781_v19 = vld [vmem:[#allocation25_spill] sm:$0xff] }
 0x634   : > { %6061 = vmatmul.f32.gmra.mxu0 %v14773_v59  ;;  %6097 = vmatmul.f32.gmra.mxu1 %v14768_v10  ;;  %v14782_v10 = vld [vmem:[#allocation31_spill] sm:$0xff]  ;;  %v14783_v59 = vld [vmem:[#allocation29_spill] sm:$0xff] }
 0x635   : > { %6173 = vmatmul.f32.gmra.mxu3 %v14774_v40 }
 0x636   : > { %6139 = vmatmul.f32.gmra.mxu2 %v14774_v40  ;;  %v14784_v40 = vld [vmem:[#allocation38_spill] sm:$0xff] }
 0x63c   : > { %6103 = vmatmul.f32.gmra.mxu1 %v14772_v46  ;;  %6206 = vmatmul.f32.vlgmr.msrb.gmra.mxu0 %v14777_v53  ;;  %v14785_v46 = vld [vmem:[#allocation28_spill] sm:$0xff] }
 0x63d   : > { %6331 = vmatmul.f32.vlgmr.msrb.gmra.mxu3 %v14778_v26  ;;  %6528 = vmatpush.msrb.mxu0 %v6489_v8 }
 0x63e   : > { %6644 = vmatpush.msrb.mxu3 %v6438_v21  ;;  %6292 = vmatmul.f32.vlgmr.msrb.gmra.mxu2 %v14779_v9 }
 0x63f   : > { %6610 = vmatpush.msrb.mxu2 %v6490_v0 }
 0x644   : > { %6214 = vmatmul.f32.gmra.mxu0 %v14780_v27  ;;  %6256 = vmatmul.f32.vlgmr.msrb.gmra.mxu1 %v14781_v19 }
 0x645   : > { %6337 = vmatmul.f32.gmra.mxu3 %v14782_v10  ;;  %6566 = vmatpush.msrb.mxu1 %v6438_v21  ;;  %v6749_v21 = vsub.f32 %v6747_v5, %v6748_v47 }
 0x646   : > { %6297 = vmatmul.f32.gmra.mxu2 %v14783_v59 }
 0x647   : > { %v6750_v0 = vand.u32 4294901760, %v6749_v21 }
 0x64c   : > { %6222 = vmatmul.f32.gmra.mxu0 %v14784_v40  ;;  %6260 = vmatmul.f32.gmra.mxu1 %v14785_v46 }
 0x64d   : > { %6343 = vmatmul.f32.gmra.mxu3 %v14786_v38 }
 0x64e   : > { %6302 = vmatmul.f32.gmra.mxu2 %v14787_v6 }
 0x654   : > { %6230 = vmatmul.f32.gmra.mxu0 %v14788_v22  ;;  %6264 = vmatmul.f32.gmra.mxu1 %v14789_v36 }
 0x655   : > { %6349 = vmatmul.f32.gmra.mxu3 %v14790_v7 }
 0x656   : > { %6307 = vmatmul.f32.gmra.mxu2 %v14792_v18 }
 0x659   : > { %v5722_v51 = vpop.f32.mrf.mxu0 }
 0x65c   : > { %6268 = vmatmul.f32.gmra.mxu1 %v14793_v57  ;;  %6373 = vmatmul.f32.vlgmr.msra.gmra.mxu0 %v14781_v19 }
 0x65d   : > { %6495 = vmatmul.f32.vlgmr.msra.gmra.mxu3 %v14781_v19  ;;  %6697 = vmatpush.msra.mxu0 %v13238_v41 }
 0x65e   : > { %6824 = vmatpush.msra.mxu3 %v13238_v41  ;;  %6445 = vmatmul.f32.vlgmr.msra.gmra.mxu2 %v14777_v53 }
 0x65f   : > { %v5847_v17 = vpop.f32.mrf.mxu3  ;;  %6786 = vmatpush.msra.mxu2 %v6747_v5 }
 0x661   : > { %v5730_v58 = vpop.f32.mrf.mxu0  ;;  %v5772_v50 = vpop.f32.mrf.mxu1 }
 0x662   : > { %v5773_v42 = vadd.f32 %v5772_v50, %v5722_v51  ;;  %v5808_v39 = vpop.f32.mrf.mxu2 }
 0x664   : > { %v5809_v16 = vadd.f32 %v5808_v39, %v5773_v42  ;;  %6377 = vmatmul.f32.gmra.mxu0 %v14785_v46  ;;  %6407 = vmatmul.f32.vlgmr.msra.gmra.mxu1 %v14781_v19 }
 0x665   : > { %6499 = vmatmul.f32.gmra.mxu3 %v14785_v46  ;;  %6751 = vmatpush.msra.mxu1 %v6750_v0 }
 0x666   : > { %v13255_v8 = vadd.f32 %v5847_v17, %v5809_v16  ;;  %6453 = vmatmul.f32.gmra.mxu2 %v14780_v27  ;;  %v13265_v27 = vsub.f32 %v6679_v28, %v13259_v23 }
 0x668   : > { %v5853_v52 = vpop.f32.mrf.mxu3  ;;  %v6987_v50 = vand.u32 4294901760, %v13265_v27 }
 0x669   : > { %v5738_v31 = vpop.f32.mrf.mxu0  ;;  %v5776_v53 = vpop.f32.mrf.mxu1 }
 0x66a   : > { %v5777_v24 = vadd.f32 %v5776_v53, %v5730_v58  ;;  %v5813_v33 = vpop.f32.mrf.mxu2  ;;  %v6988_v39 = vsub.f32 %v13265_v27, %v6987_v50 }
 0x66c   : > { %v5814_v54 = vadd.f32 %v5813_v33, %v5777_v24  ;;  %6381 = vmatmul.f32.gmra.mxu0 %v14789_v36  ;;  %6411 = vmatmul.f32.gmra.mxu1 %v14785_v46  ;;  %v6989_v0 = vand.u32 4294901760, %v6988_v39  ;;  %v14796_v39 = vld [vmem:[#allocation43_spill] sm:$0xff] }
 0x66d   : > { %6503 = vmatmul.f32.gmra.mxu3 %v14789_v36 }
 0x66e   : > { %v13267_v3 = vadd.f32 %v5853_v52, %v5814_v54  ;;  %6461 = vmatmul.f32.gmra.mxu2 %v14784_v40 }
 0x670   : > { %v5859_v51 = vpop.f32.mrf.mxu3 }
 0x671   : > { %v5746_v5 = vpop.f32.mrf.mxu0  ;;  %v5780_v17 = vpop.f32.mrf.mxu1 }
 0x672   : > { %v5781_v61 = vadd.f32 %v5780_v17, %v5738_v31  ;;  %v5818_v58 = vpop.f32.mrf.mxu2 }
 0x674   : > { %v5819_v42 = vadd.f32 %v5818_v58, %v5781_v61  ;;  %6385 = vmatmul.f32.gmra.mxu0 %v14793_v57  ;;  %6415 = vmatmul.f32.gmra.mxu1 %v14789_v36 }
 0x675   : > { %6507 = vmatmul.f32.gmra.mxu3 %v14793_v57 }
 0x676   : > { %v13277_v55 = vadd.f32 %v5859_v51, %v5819_v42  ;;  %6469 = vmatmul.f32.gmra.mxu2 %v14788_v22  ;;  %v14795_v42 = vld [vmem:[#allocation47_spill] sm:$0xff] }
 0x678   : > { %v5865_v40 = vpop.f32.mrf.mxu3 }
 0x679   : > { %v5784_v12 = vpop.f32.mrf.mxu1  ;;  %v13280_v16 = vpop.f32.mrf.mxu0 }
 0x67a   : > { %v5785_v21 = vadd.f32 %v5784_v12, %v5746_v5  ;;  %v5823_v28 = vpop.f32.mrf.mxu2 }
 0x67c   : > { %v5824_v52 = vadd.f32 %v5823_v28, %v5785_v21  ;;  %6419 = vmatmul.f32.gmra.mxu1 %v14793_v57  ;;  %6531 = vmatmul.f32.vlgmr.msrb.gmra.mxu0 %v14779_v9 }
 0x67d   : > { %6646 = vmatmul.f32.vlgmr.msrb.gmra.mxu3 %v14781_v19  ;;  %6868 = vmatpush.msrb.mxu0 %v6748_v47 }
 0x67e   : > { %6990 = vmatpush.msrb.mxu3 %v6989_v0  ;;  %v13285_v31 = vadd.f32 %v5865_v40, %v5824_v52  ;;  %6612 = vmatmul.f32.vlgmr.msrb.gmra.mxu2 %v14781_v19  ;;  %v14798_v0 = vld [vmem:[#allocation51_spill] sm:$0xff]  ;;  %v14799_v52 = vld [vmem:[#allocation41_spill] sm:$0xff] }
 0x67f   : > { %6936 = vmatpush.msrb.mxu2 %v13259_v23 }
 0x680   : > { %v6011_v22 = vpop.f32.mrf.mxu3 }
 0x681   : > { %v13289_v53 = vpop.f32.mrf.mxu0  ;;  %v13291_v24 = vpop.f32.mrf.mxu1 }
 0x682   : > { %v5961_v33 = vpop.f32.mrf.mxu2 }
 0x683   : > { %v6012_v54 = vadd.f32 %v6011_v22, %v5961_v33  ;;  %v14800_v22 = vld [vmem:[#allocation46_spill] sm:$0xff] }
 0x684   : > { %6536 = vmatmul.f32.gmra.mxu0 %v14783_v59  ;;  %6570 = vmatmul.f32.vlgmr.msrb.gmra.mxu1 %v14778_v26 }
 0x685   : > { %6650 = vmatmul.f32.gmra.mxu3 %v14785_v46  ;;  %6902 = vmatpush.msrb.mxu1 %v13238_v41 }
 0x686   : > { %6616 = vmatmul.f32.gmra.mxu2 %v14785_v46 }
 0x688   : > { %v6015_v9 = vpop.f32.mrf.mxu3 }
 0x689   : > { %v13298_v19 = vpop.f32.mrf.mxu0  ;;  %v13300_v47 = vpop.f32.mrf.mxu1 }
 0x68a   : > { %v5969_v51 = vpop.f32.mrf.mxu2 }
 0x68b   : > { %v6016_v5 = vadd.f32 %v6015_v9, %v5969_v51 }
 0x68c   : > { %6541 = vmatmul.f32.gmra.mxu0 %v14787_v6  ;;  %6576 = vmatmul.f32.gmra.mxu1 %v14782_v10 }
 0x68d   : > { %6654 = vmatmul.f32.gmra.mxu3 %v14789_v36 }
 0x68e   : > { %6620 = vmatmul.f32.gmra.mxu2 %v14789_v36 }
 0x690   : > { %v6019_v26 = vpop.f32.mrf.mxu3 }
 0x691   : > { %v13306_v59 = vpop.f32.mrf.mxu0  ;;  %v13308_v41 = vpop.f32.mrf.mxu1 }
 0x692   : > { %v5977_v46 = vpop.f32.mrf.mxu2 }
 0x693   : > { %v6020_v17 = vadd.f32 %v6019_v26, %v5977_v46 }
 0x694   : > { %6546 = vmatmul.f32.gmra.mxu0 %v14792_v18  ;;  %6582 = vmatmul.f32.gmra.mxu1 %v14786_v38  ;;  %v14797_v38 = vld [vmem:[#allocation42_spill] sm:$0xff] }
 0x695   : > { %6658 = vmatmul.f32.gmra.mxu3 %v14793_v57 }
 0x696   : > { %6624 = vmatmul.f32.gmra.mxu2 %v14793_v57 }
 0x698   : > { %v6023_v10 = vpop.f32.mrf.mxu3 }
 0x699   : > { %v13314_v6 = vpop.f32.mrf.mxu1  ;;  %v6047_v61 = vpop.f32.mrf.mxu0 }
 0x69a   : > { %v5985_v36 = vpop.f32.mrf.mxu2  ;;  %v6048_v18 = vadd.f32 %v6047_v61, %v6012_v54  ;;  %v14801_v54 = vld [vmem:[#allocation45_spill] sm:$0xff]  ;;  %v14802_v61 = vld [vmem:[#allocation55_spill] sm:$0xff] }
 0x69b   : > { %v6024_v58 = vadd.f32 %v6023_v10, %v5985_v36  ;;  %v14803_v36 = vld [vmem:[#allocation44_spill] sm:$0xff] }
 0x69c   : > { %6588 = vmatmul.f32.gmra.mxu1 %v14790_v7  ;;  %6703 = vmatmul.f32.vlgmr.msra.gmra.mxu0 %v14795_v42 }
 0x69d   : > { %6828 = vmatmul.f32.vlgmr.msra.gmra.mxu3 %v14796_v39  ;;  %7025 = vmatpush.msra.mxu0 %v13265_v27 }
 0x69e   : > { %7141 = vmatpush.msra.mxu3 %v13259_v23  ;;  %6789 = vmatmul.f32.vlgmr.msra.gmra.mxu2 %v14797_v38 }
 0x69f   : > { %7107 = vmatpush.msra.mxu2 %v6987_v50 }
 0x6a0   : > { %v6162_v57 = vpop.f32.mrf.mxu3 }
 0x6a1   : > { %v6052_v40 = vpop.f32.mrf.mxu0  ;;  %v6086_v12 = vpop.f32.mrf.mxu1 }
 0x6a2   : > { %v6087_v21 = vadd.f32 %v6086_v12, %v6048_v18  ;;  %v6128_v28 = vpop.f32.mrf.mxu2  ;;  %v6053_v27 = vadd.f32 %v6052_v40, %v6016_v5  ;;  %v14804_v18 = vld [vmem:[#allocation50_spill] sm:$0xff] }
 0x6a4   : > { %v6129_v7 = vadd.f32 %v6128_v28, %v6087_v21  ;;  %6711 = vmatmul.f32.gmra.mxu0 %v14798_v0  ;;  %6753 = vmatmul.f32.vlgmr.msra.gmra.mxu1 %v14799_v52 }
 0x6a5   : > { %6834 = vmatmul.f32.gmra.mxu3 %v14800_v22  ;;  %7063 = vmatpush.msra.mxu1 %v13259_v23  ;;  %v14805_v23 = vld [vmem:[#allocation49_spill] sm:$0xff] }
 0x6a6   : > { %v13328_v33 = vadd.f32 %v6162_v57, %v6129_v7  ;;  %6794 = vmatmul.f32.gmra.mxu2 %v14801_v54 }
 0x6a8   : > { %v6166_v50 = vpop.f32.mrf.mxu3 }
 0x6a9   : > { %v6057_v9 = vpop.f32.mrf.mxu0  ;;  %v6092_v51 = vpop.f32.mrf.mxu1 }
 0x6aa   : > { %v6093_v26 = vadd.f32 %v6092_v51, %v6053_v27  ;;  %v6132_v46 = vpop.f32.mrf.mxu2  ;;  %v6058_v57 = vadd.f32 %v6057_v9, %v6020_v17  ;;  %v14806_v27 = vperm.slane %v14755_v25, 2  ;;  %v14810_v9 = vld [vmem:[#allocation53_spill] sm:$0xff] }
 0x6ac   : > { %v6133_v10 = vadd.f32 %v6132_v46, %v6093_v26  ;;  %6719 = vmatmul.f32.gmra.mxu0 %v14802_v61  ;;  %6757 = vmatmul.f32.gmra.mxu1 %v14803_v36  ;;  %v7178_v51 = vmul.f32 %v13143_v45, %v14806_v27  ;;  %v14807_v46 = vld [vmem:[#allocation56_spill] sm:$0xff] }
 0x6ad   : > { %6840 = vmatmul.f32.gmra.mxu3 %v14804_v18 }
 0x6ae   : > { %v13334_v12 = vadd.f32 %v6166_v50, %v6133_v10  ;;  %6799 = vmatmul.f32.gmra.mxu2 %v14805_v23  ;;  %v7181_v17 = vsel %vm501_vm2, %v7178_v51, 0 }
 0x6af   : > { %v13347_v25 = vand.u32 4294901760, %v7181_v17 }
 0x6b0   : > { %v6170_v21 = vpop.f32.mrf.mxu3 }
 0x6b1   : > { %v6062_v28 = vpop.f32.mrf.mxu0  ;;  %v6098_v5 = vpop.f32.mrf.mxu1 }
 0x6b2   : > { %v6099_v40 = vadd.f32 %v6098_v5, %v6058_v57  ;;  %v6136_v7 = vpop.f32.mrf.mxu2  ;;  %v6063_v10 = vadd.f32 %v6062_v28, %v6024_v58  ;;  %v13356_v58 = vsub.f32 %v7181_v17, %v13347_v25 }
 0x6b4   : > { %v6137_v26 = vadd.f32 %v6136_v7, %v6099_v40  ;;  %6727 = vmatmul.f32.gmra.mxu0 %v14807_v46  ;;  %6761 = vmatmul.f32.gmra.mxu1 %v14808_v32  ;;  %v5890_v7 = vadd.f32 %v13280_v16, %v13255_v8 }
 0x6b5   : > { %6846 = vmatmul.f32.gmra.mxu3 %v14809_v11 }
 0x6b6   : > { %v13343_v50 = vadd.f32 %v6170_v21, %v6137_v26  ;;  %6804 = vmatmul.f32.gmra.mxu2 %v14810_v9  ;;  %v5924_v21 = vadd.f32 %v13291_v24, %v5890_v7  ;;  %v7253_v24 = vand.u32 4294901760, %v13356_v58 }
 0x6b8   : > { %v6174_v57 = vpop.f32.mrf.mxu3 }
 0x6b9   : > { %v6104_v5 = vpop.f32.mrf.mxu1  ;;  %v6207_v2 = vpop.f32.mrf.mxu0 }
 0x6ba   : > { %v6105_v45 = vadd.f32 %v6104_v5, %v6063_v10  ;;  %v6140_v40 = vpop.f32.mrf.mxu2  ;;  %v6208_v8 = vadd.f32 %v6207_v2, %v5924_v21  ;;  %v7254_v2 = vsub.f32 %v13356_v58, %v7253_v24 }
 0x6bc   : > { %v6141_v27 = vadd.f32 %v6140_v40, %v6105_v45  ;;  %6765 = vmatmul.f32.gmra.mxu1 %v14811_v15  ;;  %6870 = vmatmul.f32.vlgmr.msrb.gmra.mxu0 %v14799_v52  ;;  %v14812_v45 = vperm.slane %v14757_v29, 2 }
 0x6bd   : > { %6992 = vmatmul.f32.vlgmr.msrb.gmra.mxu3 %v14799_v52  ;;  %7202 = vmatpush.msrb.mxu0 %v13347_v25 }
 0x6be   : > { %7329 = vmatpush.msrb.mxu3 %v13347_v25  ;;  %v13360_v28 = vadd.f32 %v6174_v57, %v6141_v27  ;;  %6942 = vmatmul.f32.vlgmr.msrb.gmra.mxu2 %v14795_v42  ;;  %v7179_v17 = vmul.f32 %v13139_v44, %v14812_v45  ;;  %v5894_v57 = vadd.f32 %v13289_v53, %v13267_v3  ;;  %v7255_v44 = vand.u32 4294901760, %v7254_v2 }
 0x6bf   : > { %7291 = vmatpush.msrb.mxu2 %v13356_v58  ;;  %v5898_v58 = vadd.f32 %v13298_v19, %v13277_v55  ;;  %v5902_v2 = vadd.f32 %v13306_v59, %v13285_v31 }
 0x6c0   : > { %v6332_v16 = vpop.f32.mrf.mxu3  ;;  %v5928_v42 = vadd.f32 %v13300_v47, %v5894_v57  ;;  %v7184_v29 = vsel %vm501_vm2, %v7179_v17, 0 }
 0x6c1   : > { %v6215_v51 = vpop.f32.mrf.mxu0  ;;  %v6257_v26 = vpop.f32.mrf.mxu1 }
 0x6c2   : > { %v6258_v10 = vadd.f32 %v6257_v26, %v6208_v8  ;;  %v6293_v5 = vpop.f32.mrf.mxu2  ;;  %v6216_v27 = vadd.f32 %v6215_v51, %v5928_v42  ;;  %v13379_v8 = vand.u32 4294901760, %v7184_v29 }
 0x6c4   : > { %v6294_v40 = vadd.f32 %v6293_v5, %v6258_v10  ;;  %6874 = vmatmul.f32.gmra.mxu0 %v14803_v36  ;;  %6904 = vmatmul.f32.vlgmr.msrb.gmra.mxu1 %v14799_v52 }
 0x6c5   : > { %6996 = vmatmul.f32.gmra.mxu3 %v14803_v36  ;;  %7256 = vmatpush.msrb.mxu1 %v7255_v44 }
 0x6c6   : > { %v13375_v7 = vadd.f32 %v6332_v16, %v6294_v40  ;;  %6950 = vmatmul.f32.gmra.mxu2 %v14798_v0  ;;  %v13387_v0 = vsub.f32 %v7184_v29, %v13379_v8  ;;  %v5932_v16 = vadd.f32 %v13308_v41, %v5898_v58  ;;  %v5936_v41 = vadd.f32 %v13314_v6, %v5902_v2  ;;  %v14813_v2 = vld [vmem:[#allocation63_spill] sm:$0xff] }
 0x6c8   : > { %v6338_v3 = vpop.f32.mrf.mxu3  ;;  %v7492_v40 = vand.u32 4294901760, %v13387_v0 }
 0x6c9   : > { %v6223_v53 = vpop.f32.mrf.mxu0  ;;  %v6261_v21 = vpop.f32.mrf.mxu1 }
 0x6ca   : > { %v6262_v26 = vadd.f32 %v6261_v21, %v6216_v27  ;;  %v6298_v10 = vpop.f32.mrf.mxu2  ;;  %v6224_v5 = vadd.f32 %v6223_v53, %v5932_v16 }
 0x6cc   : > { %v6299_v47 = vadd.f32 %v6298_v10, %v6262_v26  ;;  %6878 = vmatmul.f32.gmra.mxu0 %v14808_v32  ;;  %6908 = vmatmul.f32.gmra.mxu1 %v14803_v36 }
 0x6cd   : > { %7000 = vmatmul.f32.gmra.mxu3 %v14808_v32 }
 0x6ce   : > { %v13390_v51 = vadd.f32 %v6338_v3, %v6299_v47  ;;  %6958 = vmatmul.f32.gmra.mxu2 %v14802_v61  ;;  %v7493_v61 = vsub.f32 %v13387_v0, %v7492_v40 }
 0x6d0   : > { %v6344_v45 = vpop.f32.mrf.mxu3  ;;  %v7494_v21 = vand.u32 4294901760, %v7493_v61 }
 0x6d1   : > { %v6231_v17 = vpop.f32.mrf.mxu0  ;;  %v6265_v55 = vpop.f32.mrf.mxu1 }
 0x6d2   : > { %v6266_v19 = vadd.f32 %v6265_v55, %v6224_v5  ;;  %v6303_v57 = vpop.f32.mrf.mxu2  ;;  %v6232_v44 = vadd.f32 %v6231_v17, %v5936_v41 }
 0x6d4   : > { %v6304_v42 = vadd.f32 %v6303_v57, %v6266_v19  ;;  %6882 = vmatmul.f32.gmra.mxu0 %v14811_v15  ;;  %6912 = vmatmul.f32.gmra.mxu1 %v14808_v32 }
 0x6d5   : > { %7004 = vmatmul.f32.gmra.mxu3 %v14811_v15 }
 0x6d6   : > { %v13403_v29 = vadd.f32 %v6344_v45, %v6304_v42  ;;  %6966 = vmatmul.f32.gmra.mxu2 %v14807_v46 }
 0x6d8   : > { %v6350_v27 = vpop.f32.mrf.mxu3 }
 0x6d9   : > { %v6269_v31 = vpop.f32.mrf.mxu1  ;;  %v13406_v59 = vpop.f32.mrf.mxu0 }
 0x6da   : > { %v6270_v3 = vadd.f32 %v6269_v31, %v6232_v44  ;;  %v6308_v53 = vpop.f32.mrf.mxu2  ;;  %v14817_v31 = vld [vmem:[#allocation57_spill] sm:$0xff] }
 0x6dc   : > { %v6309_v26 = vadd.f32 %v6308_v53, %v6270_v3  ;;  %6916 = vmatmul.f32.gmra.mxu1 %v14811_v15  ;;  %7028 = vmatmul.f32.vlgmr.msra.gmra.mxu0 %v14797_v38  ;;  %v14818_v3 = vld [vmem:[#allocation62_spill] sm:$0xff] }
 0x6dd   : > { %7143 = vmatmul.f32.vlgmr.msra.gmra.mxu3 %v14799_v52  ;;  %7373 = vmatpush.msra.mxu0 %v7253_v24 }
 0x6de   : > { %7495 = vmatpush.msra.mxu3 %v7494_v21  ;;  %v13411_v6 = vadd.f32 %v6350_v27, %v6309_v26  ;;  %7109 = vmatmul.f32.vlgmr.msra.gmra.mxu2 %v14799_v52  ;;  %v14816_v27 = vld [vmem:[#allocation67_spill] sm:$0xff]  ;;  %v14819_v21 = vld [vmem:[#allocation61_spill] sm:$0xff] }
 0x6df   : > { %7441 = vmatpush.msra.mxu2 %v13379_v8 }
 0x6e0   : > { %v6496_v46 = vpop.f32.mrf.mxu3 }
 0x6e1   : > { %v13415_v10 = vpop.f32.mrf.mxu0  ;;  %v13417_v58 = vpop.f32.mrf.mxu1 }
 0x6e2   : > { %v6446_v47 = vpop.f32.mrf.mxu2 }
 0x6e3   : > { %v6447_v16 = vadd.f32 %v6446_v47, %v13328_v33 }
 0x6e4   : > { %7033 = vmatmul.f32.gmra.mxu0 %v14801_v54  ;;  %7067 = vmatmul.f32.vlgmr.msra.gmra.mxu1 %v14796_v39 }
 0x6e5   : > { %7147 = vmatmul.f32.gmra.mxu3 %v14803_v36  ;;  %7407 = vmatpush.msra.mxu1 %v13347_v25  ;;  %v6497_v38 = vadd.f32 %v6496_v46, %v6447_v16 }
 0x6e6   : > { %7113 = vmatmul.f32.gmra.mxu2 %v14803_v36 }
 0x6e8   : > { %v6500_v52 = vpop.f32.mrf.mxu3 }
 0x6e9   : > { %v13425_v24 = vpop.f32.mrf.mxu0  ;;  %v13427_v5 = vpop.f32.mrf.mxu1 }
 0x6ea   : > { %v6454_v45 = vpop.f32.mrf.mxu2 }
 0x6eb   : > { %v6455_v17 = vadd.f32 %v6454_v45, %v13334_v12  ;;  %v14821_v45 = vld [vmem:[#allocation60_spill] sm:$0xff] }
 0x6ec   : > { %7038 = vmatmul.f32.gmra.mxu0 %v14805_v23  ;;  %7073 = vmatmul.f32.gmra.mxu1 %v14800_v22 }
 0x6ed   : > { %7151 = vmatmul.f32.gmra.mxu3 %v14808_v32  ;;  %v6501_v39 = vadd.f32 %v6500_v52, %v6455_v17  ;;  %v14820_v52 = vld [vmem:[#allocation71_spill] sm:$0xff]  ;;  %v14822_v17 = vld [vmem:[#allocation66_spill] sm:$0xff] }
 0x6ee   : > { %7117 = vmatmul.f32.gmra.mxu2 %v14808_v32 }
 0x6f0   : > { %v6504_v33 = vpop.f32.mrf.mxu3 }
 0x6f1   : > { %v13434_v54 = vpop.f32.mrf.mxu0  ;;  %v13436_v36 = vpop.f32.mrf.mxu1 }
 0x6f2   : > { %v6462_v25 = vpop.f32.mrf.mxu2 }
 0x6f3   : > { %v6463_v55 = vadd.f32 %v6462_v25, %v13343_v50  ;;  %v14814_v50 = vld [vmem:[#allocation59_spill] sm:$0xff] }
 0x6f4   : > { %7043 = vmatmul.f32.gmra.mxu0 %v14810_v9  ;;  %7079 = vmatmul.f32.gmra.mxu1 %v14804_v18  ;;  %v14815_v9 = vld [vmem:[#allocation58_spill] sm:$0xff] }
 0x6f5   : > { %7155 = vmatmul.f32.gmra.mxu3 %v14811_v15  ;;  %v6505_v22 = vadd.f32 %v6504_v33, %v6463_v55 }
 0x6f6   : > { %7121 = vmatmul.f32.gmra.mxu2 %v14811_v15 }
 0x6f8   : > { %v6508_v12 = vpop.f32.mrf.mxu3 }
 0x6f9   : > { %v13443_v23 = vpop.f32.mrf.mxu1  ;;  %v6532_v32 = vpop.f32.mrf.mxu0 }
 0x6fa   : > { %v6470_v19 = vpop.f32.mrf.mxu2  ;;  %v6533_v15 = vadd.f32 %v6532_v32, %v6497_v38 }
 0x6fb   : > { %v6471_v57 = vadd.f32 %v6470_v19, %v13360_v28 }
 0x6fc   : > { %7085 = vmatmul.f32.gmra.mxu1 %v14809_v11  ;;  %7208 = vmatmul.f32.vlgmr.msrb.gmra.mxu0 %v14813_v2 }
 0x6fd   : > { %7333 = vmatmul.f32.vlgmr.msrb.gmra.mxu3 %v14814_v50  ;;  %7530 = vmatpush.msrb.mxu0 %v13387_v0  ;;  %v6509_v18 = vadd.f32 %v6508_v12, %v6471_v57 }
 0x6fe   : > { %7646 = vmatpush.msrb.mxu3 %v13379_v8  ;;  %7294 = vmatmul.f32.vlgmr.msrb.gmra.mxu2 %v14815_v9 }
 0x6ff   : > { %7612 = vmatpush.msrb.mxu2 %v7492_v40 }
 0x700   : > { %v6647_v42 = vpop.f32.mrf.mxu3 }
 0x701   : > { %v6537_v41 = vpop.f32.mrf.mxu0  ;;  %v6571_v28 = vpop.f32.mrf.mxu1 }
 0x702   : > { %v6572_v61 = vadd.f32 %v6571_v28, %v6533_v15  ;;  %v6613_v11 = vpop.f32.mrf.mxu2  ;;  %v6538_v0 = vadd.f32 %v6537_v41, %v6501_v39  ;;  %v14824_v15 = vld [vmem:[#allocation72_spill] sm:$0xff]  ;;  %v7678_v41 = vpop.permute.xlu0 %7677  ;;  %v14826_v28 = vld [vmem:[#allocation70_spill] sm:$0xff] }
 0x704   : > { %v6614_v44 = vadd.f32 %v6613_v11, %v6572_v61  ;;  %7216 = vmatmul.f32.gmra.mxu0 %v14816_v27  ;;  %7258 = vmatmul.f32.vlgmr.msrb.gmra.mxu1 %v14817_v31  ;;  %v7682_v61 = vsel %vm2538_vm7, %v13152_v4, %v7678_v41 }
 0x705   : > { %7339 = vmatmul.f32.gmra.mxu3 %v14818_v3  ;;  %7568 = vmatpush.msrb.mxu1 %v13379_v8  ;;  %v14823_v8 = vld [vmem:[#allocation65_spill] sm:$0xff] }
 0x706   : > { %v13458_v53 = vadd.f32 %v6647_v42, %v6614_v44  ;;  %7299 = vmatmul.f32.gmra.mxu2 %v14819_v21  ;;  %v14825_v42 = vld [vmem:[#allocation64_spill] sm:$0xff] }
 0x708   : > { %v6651_v40 = vpop.f32.mrf.mxu3 }
 0x709   : > { %v6542_v26 = vpop.f32.mrf.mxu0  ;;  %v6577_v46 = vpop.f32.mrf.mxu1 }
 0x70a   : > { %v6578_v47 = vadd.f32 %v6577_v46, %v6538_v0  ;;  %v6617_v16 = vpop.f32.mrf.mxu2  ;;  %v6543_v25 = vadd.f32 %v6542_v26, %v6505_v22  ;;  %v14827_v22 = vld [vmem:[#allocation73_spill] sm:$0xff] }
 0x70b   : > { %v14828_v44 = vperm.slane %v14827_v22, 3 }
 0x70c   : > { %v6618_v38 = vadd.f32 %v6617_v16, %v6578_v47  ;;  %7224 = vmatmul.f32.gmra.mxu0 %v14820_v52  ;;  %7262 = vmatmul.f32.gmra.mxu1 %v14821_v45 }
 0x70d   : > { %7345 = vmatmul.f32.gmra.mxu3 %v14822_v17  ;;  %v7683_v0 = vmul.f32 %v7682_v61, %v14828_v44 }
 0x70e   : > { %v13464_v33 = vadd.f32 %v6651_v40, %v6618_v38  ;;  %7304 = vmatmul.f32.gmra.mxu2 %v14823_v8  ;;  %v14829_v40 = vld [vmem:[#allocation69_spill] sm:$0xff] }
 0x70f   : > { %v7686_v47 = vsel %vm501_vm2, %v7683_v0, 0 }
 0x710   : > { %v6655_v55 = vpop.f32.mrf.mxu3 }
 0x711   : > { %v6547_v12 = vpop.f32.mrf.mxu0  ;;  %v6583_v39 = vpop.f32.mrf.mxu1 }
 0x712   : > { %v6584_v32 = vadd.f32 %v6583_v39, %v6543_v25  ;;  %v6621_v19 = vpop.f32.mrf.mxu2  ;;  %v6548_v26 = vadd.f32 %v6547_v12, %v6509_v18 }
 0x714   : > { %v6622_v57 = vadd.f32 %v6621_v19, %v6584_v32  ;;  %7232 = vmatmul.f32.gmra.mxu0 %v14824_v15  ;;  %7266 = vmatmul.f32.gmra.mxu1 %v14825_v42  ;;  %v13479_v32 = vand.u32 4294901760, %v7686_v47 }
 0x715   : > { %7351 = vmatmul.f32.gmra.mxu3 %v14826_v28 }
 0x716   : > { %v13473_v11 = vadd.f32 %v6655_v55, %v6622_v57  ;;  %7309 = vmatmul.f32.gmra.mxu2 %v14829_v40  ;;  %v7757_v18 = vsub.f32 %v7686_v47, %v13479_v32  ;;  %v7681_v57 = vsel %vm2538_vm7, %v7678_v41, %v13152_v4 }
 0x718   : > { %v6659_v46 = vpop.f32.mrf.mxu3  ;;  %v7758_v47 = vand.u32 4294901760, %v7757_v18 }
 0x719   : > { %v6589_v16 = vpop.f32.mrf.mxu1  ;;  %v6704_v38 = vpop.f32.mrf.mxu0 }
 0x71a   : > { %v6590_v25 = vadd.f32 %v6589_v16, %v6548_v26  ;;  %v6625_v39 = vpop.f32.mrf.mxu2  ;;  %v14831_v16 = vld [vmem:[#allocation74_spill] sm:$0xff] }
 0x71c   : > { %v6626_v19 = vadd.f32 %v6625_v39, %v6590_v25  ;;  %7270 = vmatmul.f32.gmra.mxu1 %v14830_v37  ;;  %7375 = vmatmul.f32.vlgmr.msra.gmra.mxu0 %v14817_v31  ;;  %v14832_v25 = vperm.slane %v14831_v16, 3 }
 0x71d   : > { %7497 = vmatmul.f32.vlgmr.msra.gmra.mxu3 %v14817_v31  ;;  %7707 = vmatpush.msra.mxu0 %v13479_v32 }
 0x71e   : > { %v13485_v55 = vadd.f32 %v6659_v46, %v6626_v19  ;;  %7834 = vmatpush.msra.mxu3 %v13479_v32  ;;  %7447 = vmatmul.f32.vlgmr.msra.gmra.mxu2 %v14813_v2  ;;  %v7684_v46 = vmul.f32 %v7681_v57, %v14832_v25  ;;  %v7759_v19 = vsub.f32 %v7757_v18, %v7758_v47 }
 0x71f   : > { %7796 = vmatpush.msra.mxu2 %v7757_v18 }
 0x720   : > { %v6829_v12 = vpop.f32.mrf.mxu3  ;;  %v7689_v4 = vsel %vm501_vm2, %v7684_v46, 0 }
 0x721   : > { %v6712_v61 = vpop.f32.mrf.mxu0  ;;  %v6754_v44 = vpop.f32.mrf.mxu1 }
 0x722   : > { %v6755_v0 = vadd.f32 %v6754_v44, %v6704_v38  ;;  %v6790_v26 = vpop.f32.mrf.mxu2  ;;  %v7760_v38 = vand.u32 4294901760, %v7759_v19 }
 0x724   : > { %v6791_v39 = vadd.f32 %v6790_v26, %v6755_v0  ;;  %7379 = vmatmul.f32.gmra.mxu0 %v14821_v45  ;;  %7409 = vmatmul.f32.vlgmr.msra.gmra.mxu1 %v14817_v31  ;;  %v13500_v0 = vand.u32 4294901760, %v7689_v4 }
 0x725   : > { %7501 = vmatmul.f32.gmra.mxu3 %v14821_v45  ;;  %7761 = vmatpush.msra.mxu1 %v7760_v38 }
 0x726   : > { %v6830_v2 = vadd.f32 %v6829_v12, %v6791_v39  ;;  %7455 = vmatmul.f32.gmra.mxu2 %v14816_v27  ;;  %v13506_v27 = vsub.f32 %v7689_v4, %v13500_v0 }
 0x728   : > { %v6835_v41 = vpop.f32.mrf.mxu3  ;;  %v7997_v39 = vand.u32 4294901760, %v13506_v27 }
 0x729   : > { %v6720_v44 = vpop.f32.mrf.mxu0  ;;  %v6758_v56 = vpop.f32.mrf.mxu1 }
 0x72a   : > { %v6759_v30 = vadd.f32 %v6758_v56, %v6712_v61  ;;  %v6795_v57 = vpop.f32.mrf.mxu2  ;;  %v7998_v19 = vsub.f32 %v13506_v27, %v7997_v39 }
 0x72c   : > { %v6796_v26 = vadd.f32 %v6795_v57, %v6759_v30  ;;  %7383 = vmatmul.f32.gmra.mxu0 %v14825_v42  ;;  %7413 = vmatmul.f32.gmra.mxu1 %v14821_v45 }
 0x72d   : > { %7505 = vmatmul.f32.gmra.mxu3 %v14825_v42 }
 0x72e   : > { %v6836_v18 = vadd.f32 %v6835_v41, %v6796_v26  ;;  %7463 = vmatmul.f32.gmra.mxu2 %v14820_v52  ;;  %v7999_v26 = vand.u32 4294901760, %v7998_v19 }
 0x730   : > { %v6841_v12 = vpop.f32.mrf.mxu3 }
 0x731   : > { %v6728_v25 = vpop.f32.mrf.mxu0  ;;  %v6762_v56 = vpop.f32.mrf.mxu1 }
 0x732   : > { %v6763_v61 = vadd.f32 %v6762_v56, %v6720_v44  ;;  %v6800_v46 = vpop.f32.mrf.mxu2 }
 0x734   : > { %v6801_v30 = vadd.f32 %v6800_v46, %v6763_v61  ;;  %7387 = vmatmul.f32.gmra.mxu0 %v14830_v37  ;;  %7417 = vmatmul.f32.gmra.mxu1 %v14825_v42 }
 0x735   : > { %7509 = vmatmul.f32.gmra.mxu3 %v14830_v37 }
 0x736   : > { %v6842_v4 = vadd.f32 %v6841_v12, %v6801_v30  ;;  %7471 = vmatmul.f32.gmra.mxu2 %v14824_v15  ;;  %v6375_v15 = vadd.f32 %v13406_v59, %v13375_v7  ;;  %v6379_v7 = vadd.f32 %v13415_v10, %v13390_v51  ;;  %v6383_v51 = vadd.f32 %v13425_v24, %v13403_v29 }
 0x737   : > { %v6387_v29 = vadd.f32 %v13434_v54, %v13411_v6 }
 0x738   : > { %v6847_v52 = vpop.f32.mrf.mxu3  ;;  %v6409_v19 = vadd.f32 %v13417_v58, %v6375_v15 }
 0x739   : > { %v6766_v41 = vpop.f32.mrf.mxu1  ;;  %v6871_v38 = vpop.f32.mrf.mxu0 }
 0x73a   : > { %v6767_v44 = vadd.f32 %v6766_v41, %v6728_v25  ;;  %v6805_v57 = vpop.f32.mrf.mxu2  ;;  %v6872_v12 = vadd.f32 %v6871_v38, %v6830_v2  ;;  %v6413_v2 = vadd.f32 %v13427_v5, %v6379_v7  ;;  %v14837_v7 = vld [vmem:[#allocation75_spill] sm:$0xff] }
 0x73c   : > { %v6806_v56 = vadd.f32 %v6805_v57, %v6767_v44  ;;  %7421 = vmatmul.f32.gmra.mxu1 %v14830_v37  ;;  %7533 = vmatmul.f32.vlgmr.msrb.gmra.mxu0 %v14815_v9 }
 0x73d   : > { %7648 = vmatmul.f32.vlgmr.msrb.gmra.mxu3 %v14817_v31  ;;  %7878 = vmatpush.msrb.mxu0 %v7758_v47 }
 0x73e   : > { %8000 = vmatpush.msrb.mxu3 %v7999_v26  ;;  %v6848_v61 = vadd.f32 %v6847_v52, %v6806_v56  ;;  %7614 = vmatmul.f32.vlgmr.msrb.gmra.mxu2 %v14817_v31 }
 0x73f   : > { %7946 = vmatpush.msrb.mxu2 %v13500_v0 }
 0x740   : > { %v6993_v46 = vpop.f32.mrf.mxu3 }
 0x741   : > { %v6875_v25 = vpop.f32.mrf.mxu0  ;;  %v6905_v30 = vpop.f32.mrf.mxu1 }
 0x742   : > { %v6906_v41 = vadd.f32 %v6905_v30, %v6872_v12  ;;  %v6943_v9 = vpop.f32.mrf.mxu2  ;;  %v6876_v59 = vadd.f32 %v6875_v25, %v6836_v18 }
 0x743   : > { %v6994_v44 = vadd.f32 %v6993_v46, %v6943_v9  ;;  %v14836_v9 = vld [vmem:[#allocation85_spill] sm:$0xff] }
 0x744   : > { %v13525_v57 = vadd.f32 %v6906_v41, %v6409_v19  ;;  %7538 = vmatmul.f32.gmra.mxu0 %v14819_v21  ;;  %7572 = vmatmul.f32.vlgmr.msrb.gmra.mxu1 %v14814_v50 }
 0x745   : > { %7652 = vmatmul.f32.gmra.mxu3 %v14821_v45  ;;  %7912 = vmatpush.msrb.mxu1 %v13479_v32  ;;  %v6417_v32 = vadd.f32 %v13436_v36, %v6383_v51 }
 0x746   : > { %7618 = vmatmul.f32.gmra.mxu2 %v14821_v45 }
 0x748   : > { %v6997_v58 = vpop.f32.mrf.mxu3 }
 0x749   : > { %v6879_v31 = vpop.f32.mrf.mxu0  ;;  %v6909_v47 = vpop.f32.mrf.mxu1 }
 0x74a   : > { %v6910_v52 = vadd.f32 %v6909_v47, %v6876_v59  ;;  %v6951_v38 = vpop.f32.mrf.mxu2  ;;  %v6880_v10 = vadd.f32 %v6879_v31, %v6842_v4  ;;  %v14838_v59 = vld [vmem:[#allocation80_spill] sm:$0xff]  ;;  %v14839_v31 = vld [vmem:[#allocation79_spill] sm:$0xff] }
 0x74b   : > { %v6998_v21 = vadd.f32 %v6997_v58, %v6951_v38 }
 0x74c   : > { %v13535_v26 = vadd.f32 %v6910_v52, %v6413_v2  ;;  %7543 = vmatmul.f32.gmra.mxu0 %v14823_v8  ;;  %7578 = vmatmul.f32.gmra.mxu1 %v14818_v3 }
 0x74d   : > { %7656 = vmatmul.f32.gmra.mxu3 %v14825_v42 }
 0x74e   : > { %7622 = vmatmul.f32.gmra.mxu2 %v14825_v42  ;;  %v6421_v42 = vadd.f32 %v13443_v23, %v6387_v29 }
 0x750   : > { %v7001_v50 = vpop.f32.mrf.mxu3 }
 0x751   : > { %v6883_v45 = vpop.f32.mrf.mxu0  ;;  %v6913_v5 = vpop.f32.mrf.mxu1 }
 0x752   : > { %v6914_v18 = vadd.f32 %v6913_v5, %v6880_v10  ;;  %v6959_v56 = vpop.f32.mrf.mxu2  ;;  %v6884_v24 = vadd.f32 %v6883_v45, %v6848_v61  ;;  %v14840_v10 = vld [vmem:[#allocation89_spill] sm:$0xff]  ;;  %v14842_v45 = vld [vmem:[#allocation84_spill] sm:$0xff]  ;;  %v14843_v5 = vld [vmem:[#allocation83_spill] sm:$0xff] }
 0x753   : > { %v7002_v15 = vadd.f32 %v7001_v50, %v6959_v56  ;;  %v14841_v50 = vld [vmem:[#allocation78_spill] sm:$0xff] }
 0x754   : > { %v13544_v12 = vadd.f32 %v6914_v18, %v6417_v32  ;;  %7548 = vmatmul.f32.gmra.mxu0 %v14829_v40  ;;  %7584 = vmatmul.f32.gmra.mxu1 %v14822_v17  ;;  %v14833_v17 = vld [vmem:[#allocation81_spill] sm:$0xff] }
 0x755   : > { %7660 = vmatmul.f32.gmra.mxu3 %v14830_v37  ;;  %v14834_v40 = vld [vmem:[#allocation77_spill] sm:$0xff] }
 0x756   : > { %7626 = vmatmul.f32.gmra.mxu2 %v14830_v37  ;;  %v14835_v37 = vld [vmem:[#allocation76_spill] sm:$0xff] }
 0x758   : > { %v7005_v3 = vpop.f32.mrf.mxu3 }
 0x759   : > { %v6917_v8 = vpop.f32.mrf.mxu1  ;;  %v7029_v36 = vpop.f32.mrf.mxu0 }
 0x75a   : > { %v6918_v4 = vadd.f32 %v6917_v8, %v6884_v24  ;;  %v6967_v46 = vpop.f32.mrf.mxu2  ;;  %v7030_v6 = vadd.f32 %v7029_v36, %v6994_v44  ;;  %v14844_v8 = vld [vmem:[#allocation90_spill] sm:$0xff] }
 0x75b   : > { %v7006_v25 = vadd.f32 %v7005_v3, %v6967_v46  ;;  %v14845_v36 = vld [vmem:[#allocation82_spill] sm:$0xff] }
 0x75c   : > { %v13553_v30 = vadd.f32 %v6918_v4, %v6421_v42  ;;  %7590 = vmatmul.f32.gmra.mxu1 %v14826_v28  ;;  %7713 = vmatmul.f32.vlgmr.msra.gmra.mxu0 %v14833_v17  ;;  %v8185_v42 = vpop.permute.xlu0 %8184  ;;  %v14846_v4 = vld [vmem:[#allocation88_spill] sm:$0xff] }
 0x75d   : > { %7838 = vmatmul.f32.vlgmr.msra.gmra.mxu3 %v14834_v40  ;;  %8035 = vmatpush.msra.mxu0 %v13506_v27 }
 0x75e   : > { %8151 = vmatpush.msra.mxu3 %v13500_v0  ;;  %7799 = vmatmul.f32.vlgmr.msra.gmra.mxu2 %v14835_v37 }
 0x75f   : > { %8117 = vmatpush.msra.mxu2 %v7997_v39 }
 0x760   : > { %v7144_v54 = vpop.f32.mrf.mxu3 }
 0x761   : > { %v7034_v23 = vpop.f32.mrf.mxu0  ;;  %v7068_v61 = vpop.f32.mrf.mxu1 }
 0x762   : > { %v7069_v19 = vadd.f32 %v7068_v61, %v7030_v6  ;;  %v7110_v41 = vpop.f32.mrf.mxu2  ;;  %v7035_v44 = vadd.f32 %v7034_v23, %v6998_v21 }
 0x764   : > { %v7111_v28 = vadd.f32 %v7110_v41, %v7069_v19  ;;  %7721 = vmatmul.f32.gmra.mxu0 %v14836_v9  ;;  %7763 = vmatmul.f32.vlgmr.msra.gmra.mxu1 %v14837_v7 }
 0x765   : > { %7844 = vmatmul.f32.gmra.mxu3 %v14838_v59  ;;  %8073 = vmatpush.msra.mxu1 %v13500_v0 }
 0x766   : > { %v7145_v58 = vadd.f32 %v7144_v54, %v7111_v28  ;;  %7804 = vmatmul.f32.gmra.mxu2 %v14839_v31  ;;  %v14848_v54 = vld [vmem:[#allocation87_spill] sm:$0xff] }
 0x768   : > { %v13569_v27 = vadd.f32 %v7145_v58, %v13458_v53  ;;  %v7148_v39 = vpop.f32.mrf.mxu3 }
 0x769   : > { %v7039_v47 = vpop.f32.mrf.mxu0  ;;  %v7074_v2 = vpop.f32.mrf.mxu1 }
 0x76a   : > { %v7075_v52 = vadd.f32 %v7074_v2, %v7035_v44  ;;  %v7114_v38 = vpop.f32.mrf.mxu2  ;;  %v7040_v32 = vadd.f32 %v7039_v47, %v7002_v15  ;;  %v8186_v15 = vsel %vm3062_vm8, %v13149_v49, %v8185_v42 }
 0x76c   : > { %v7115_v51 = vadd.f32 %v7114_v38, %v7075_v52  ;;  %7729 = vmatmul.f32.gmra.mxu0 %v14840_v10  ;;  %7767 = vmatmul.f32.gmra.mxu1 %v14841_v50  ;;  %v14849_v52 = vld [vmem:[#allocation86_spill] sm:$0xff] }
 0x76d   : > { %7850 = vmatmul.f32.gmra.mxu3 %v14842_v45 }
 0x76e   : > { %v7149_v0 = vadd.f32 %v7148_v39, %v7115_v51  ;;  %7809 = vmatmul.f32.gmra.mxu2 %v14843_v5 }
 0x770   : > { %v13576_v21 = vadd.f32 %v7149_v0, %v13464_v33  ;;  %v7152_v53 = vpop.f32.mrf.mxu3  ;;  %v14847_v33 = vperm.slane %v14827_v22, 4  ;;  %v8187_v0 = vsel %vm3062_vm8, %v8185_v42, %v13149_v49 }
 0x771   : > { %v7044_v18 = vpop.f32.mrf.mxu0  ;;  %v7080_v56 = vpop.f32.mrf.mxu1 }
 0x772   : > { %v7081_v29 = vadd.f32 %v7080_v56, %v7040_v32  ;;  %v7118_v24 = vpop.f32.mrf.mxu2  ;;  %v8188_v6 = vmul.f32 %v8186_v15, %v14847_v33  ;;  %v7045_v23 = vadd.f32 %v7044_v18, %v7006_v25 }
 0x774   : > { %v7119_v3 = vadd.f32 %v7118_v24, %v7081_v29  ;;  %7737 = vmatmul.f32.gmra.mxu0 %v14844_v8  ;;  %7771 = vmatmul.f32.gmra.mxu1 %v14845_v36  ;;  %v8191_v41 = vsel %vm501_vm2, %v8188_v6, 0  ;;  %v14850_v29 = vperm.slane %v14831_v16, 4 }
 0x775   : > { %7856 = vmatmul.f32.gmra.mxu3 %v14846_v4  ;;  %v13591_v47 = vand.u32 4294901760, %v8191_v41 }
 0x776   : > { %v7153_v46 = vadd.f32 %v7152_v53, %v7119_v3  ;;  %7814 = vmatmul.f32.gmra.mxu2 %v14848_v54  ;;  %v8189_v24 = vmul.f32 %v8187_v0, %v14850_v29 }
 0x777   : > { %v8262_v25 = vsub.f32 %v8191_v41, %v13591_v47 }
 0x778   : > { %v13588_v61 = vadd.f32 %v7153_v46, %v13473_v11  ;;  %v7156_v19 = vpop.f32.mrf.mxu3  ;;  %v8194_v49 = vsel %vm501_vm2, %v8189_v24, 0 }
 0x779   : > { %v7086_v28 = vpop.f32.mrf.mxu1  ;;  %v7209_v58 = vpop.f32.mrf.mxu0  ;;  %v13613_v41 = vand.u32 4294901760, %v8194_v49 }
 0x77a   : > { %v7087_v44 = vadd.f32 %v7086_v28, %v7045_v23  ;;  %v7122_v39 = vpop.f32.mrf.mxu2 }
 0x77c   : > { %v7123_v2 = vadd.f32 %v7122_v39, %v7087_v44  ;;  %7775 = vmatmul.f32.gmra.mxu1 %v14849_v52  ;;  %7880 = vmatmul.f32.vlgmr.msrb.gmra.mxu0 %v14837_v7 }
 0x77d   : > { %8002 = vmatmul.f32.vlgmr.msrb.gmra.mxu3 %v14837_v7  ;;  %8212 = vmatpush.msrb.mxu0 %v13591_v47 }
 0x77e   : > { %v7157_v11 = vadd.f32 %v7156_v19, %v7123_v2  ;;  %8339 = vmatpush.msrb.mxu3 %v13591_v47  ;;  %7952 = vmatmul.f32.vlgmr.msrb.gmra.mxu2 %v14833_v17 }
 0x77f   : > { %8301 = vmatpush.msrb.mxu2 %v8262_v25 }
 0x780   : > { %v13601_v38 = vadd.f32 %v7157_v11, %v13485_v55  ;;  %v7334_v51 = vpop.f32.mrf.mxu3  ;;  %v8263_v55 = vand.u32 4294901760, %v8262_v25 }
 0x781   : > { %v7217_v32 = vpop.f32.mrf.mxu0  ;;  %v7259_v53 = vpop.f32.mrf.mxu1 }
 0x782   : > { %v7260_v18 = vadd.f32 %v7259_v53, %v7209_v58  ;;  %v7295_v56 = vpop.f32.mrf.mxu2  ;;  %v8264_v15 = vsub.f32 %v8262_v25, %v8263_v55 }
 0x784   : > { %v7296_v3 = vadd.f32 %v7295_v56, %v7260_v18  ;;  %7884 = vmatmul.f32.gmra.mxu0 %v14841_v50  ;;  %7914 = vmatmul.f32.vlgmr.msrb.gmra.mxu1 %v14837_v7  ;;  %v8265_v46 = vand.u32 4294901760, %v8264_v15 }
 0x785   : > { %8006 = vmatmul.f32.gmra.mxu3 %v14841_v50 }
 0x786   : > { %v7335_v17 = vadd.f32 %v7334_v51, %v7296_v3  ;;  %7960 = vmatmul.f32.gmra.mxu2 %v14836_v9  ;;  %8266 = vmatpush.msrb.mxu1 %v8265_v46  ;;  %v13619_v9 = vsub.f32 %v8194_v49, %v13613_v41 }
 0x788   : > { %v7340_v42 = vpop.f32.mrf.mxu3  ;;  %v8502_v51 = vand.u32 4294901760, %v13619_v9 }
 0x789   : > { %v7225_v33 = vpop.f32.mrf.mxu0  ;;  %v7263_v6 = vpop.f32.mrf.mxu1 }
 0x78a   : > { %v7264_v23 = vadd.f32 %v7263_v6, %v7217_v32  ;;  %v7300_v19 = vpop.f32.mrf.mxu2  ;;  %v8503_v32 = vsub.f32 %v13619_v9, %v8502_v51 }
 0x78c   : > { %v7301_v28 = vadd.f32 %v7300_v19, %v7264_v23  ;;  %7888 = vmatmul.f32.gmra.mxu0 %v14845_v36  ;;  %7918 = vmatmul.f32.gmra.mxu1 %v14841_v50  ;;  %v8504_v3 = vand.u32 4294901760, %v8503_v32 }
 0x78d   : > { %8010 = vmatmul.f32.gmra.mxu3 %v14845_v36 }
 0x78e   : > { %v7341_v58 = vadd.f32 %v7340_v42, %v7301_v28  ;;  %7968 = vmatmul.f32.gmra.mxu2 %v14840_v10 }
 0x790   : > { %v7346_v44 = vpop.f32.mrf.mxu3 }
 0x791   : > { %v7233_v39 = vpop.f32.mrf.mxu0  ;;  %v7267_v2 = vpop.f32.mrf.mxu1 }
 0x792   : > { %v7268_v11 = vadd.f32 %v7267_v2, %v7225_v33  ;;  %v7305_v25 = vpop.f32.mrf.mxu2 }
 0x794   : > { %v7306_v0 = vadd.f32 %v7305_v25, %v7268_v11  ;;  %7892 = vmatmul.f32.gmra.mxu0 %v14849_v52  ;;  %7922 = vmatmul.f32.gmra.mxu1 %v14845_v36 }
 0x795   : > { %8014 = vmatmul.f32.gmra.mxu3 %v14849_v52 }
 0x796   : > { %v7347_v53 = vadd.f32 %v7346_v44, %v7306_v0  ;;  %7976 = vmatmul.f32.gmra.mxu2 %v14844_v8 }
 0x798   : > { %v7352_v10 = vpop.f32.mrf.mxu3 }
 0x799   : > { %v7271_v18 = vpop.f32.mrf.mxu1  ;;  %v7376_v56 = vpop.f32.mrf.mxu0 }
 0x79a   : > { %v7272_v29 = vadd.f32 %v7271_v18, %v7233_v39  ;;  %v7310_v24 = vpop.f32.mrf.mxu2  ;;  %v7377_v42 = vadd.f32 %v7376_v56, %v7335_v17 }
 0x79c   : > { %v7311_v15 = vadd.f32 %v7310_v24, %v7272_v29  ;;  %7926 = vmatmul.f32.gmra.mxu1 %v14849_v52  ;;  %8038 = vmatmul.f32.vlgmr.msra.gmra.mxu0 %v14835_v37 }
 0x79d   : > { %8153 = vmatmul.f32.vlgmr.msra.gmra.mxu3 %v14837_v7  ;;  %8383 = vmatpush.msra.mxu0 %v8263_v55 }
 0x79e   : > { %8505 = vmatpush.msra.mxu3 %v8504_v3  ;;  %v7353_v49 = vadd.f32 %v7352_v10, %v7311_v15  ;;  %8119 = vmatmul.f32.vlgmr.msra.gmra.mxu2 %v14837_v7  ;;  %v14854_v15 = vld [vmem:[#allocation101_spill] sm:$0xff] }
 0x79f   : > { %8451 = vmatpush.msra.mxu2 %v13613_v41 }
 0x7a0   : > { %v7498_v8 = vpop.f32.mrf.mxu3 }
 0x7a1   : > { %v7380_v46 = vpop.f32.mrf.mxu0  ;;  %v7410_v33 = vpop.f32.mrf.mxu1 }
 0x7a2   : > { %v7411_v6 = vadd.f32 %v7410_v33, %v7377_v42  ;;  %v7448_v23 = vpop.f32.mrf.mxu2  ;;  %v7381_v37 = vadd.f32 %v7380_v46, %v7341_v58  ;;  %v14856_v42 = vld [vmem:[#allocation96_spill] sm:$0xff]  ;;  %v14857_v46 = vld [vmem:[#allocation95_spill] sm:$0xff] }
 0x7a3   : > { %v7499_v19 = vadd.f32 %v7498_v8, %v7448_v23 }
 0x7a4   : > { %v13636_v28 = vadd.f32 %v7411_v6, %v13525_v57  ;;  %8043 = vmatmul.f32.gmra.mxu0 %v14839_v31  ;;  %8077 = vmatmul.f32.vlgmr.msra.gmra.mxu1 %v14834_v40 }
 0x7a5   : > { %8157 = vmatmul.f32.gmra.mxu3 %v14841_v50  ;;  %8417 = vmatpush.msra.mxu1 %v13591_v47 }
 0x7a6   : > { %8123 = vmatmul.f32.gmra.mxu2 %v14841_v50 }
 0x7a8   : > { %v7502_v7 = vpop.f32.mrf.mxu3 }
 0x7a9   : > { %v7384_v55 = vpop.f32.mrf.mxu0  ;;  %v7414_v17 = vpop.f32.mrf.mxu1 }
 0x7aa   : > { %v7415_v44 = vadd.f32 %v7414_v17, %v7381_v37  ;;  %v7456_v39 = vpop.f32.mrf.mxu2  ;;  %v7385_v40 = vadd.f32 %v7384_v55, %v7347_v53  ;;  %v14858_v55 = vld [vmem:[#allocation105_spill] sm:$0xff]  ;;  %v14859_v17 = vld [vmem:[#allocation94_spill] sm:$0xff] }
 0x7ab   : > { %v7503_v2 = vadd.f32 %v7502_v7, %v7456_v39  ;;  %v14861_v39 = vld [vmem:[#allocation99_spill] sm:$0xff] }
 0x7ac   : > { %v13644_v57 = vadd.f32 %v7415_v44, %v13535_v26  ;;  %8048 = vmatmul.f32.gmra.mxu0 %v14843_v5  ;;  %8083 = vmatmul.f32.gmra.mxu1 %v14838_v59  ;;  %v14860_v44 = vld [vmem:[#allocation100_spill] sm:$0xff] }
 0x7ad   : > { %8161 = vmatmul.f32.gmra.mxu3 %v14845_v36 }
 0x7ae   : > { %8127 = vmatmul.f32.gmra.mxu2 %v14845_v36 }
 0x7b0   : > { %v7506_v31 = vpop.f32.mrf.mxu3 }
 0x7b1   : > { %v7388_v50 = vpop.f32.mrf.mxu0  ;;  %v7418_v47 = vpop.f32.mrf.mxu1 }
 0x7b2   : > { %v7419_v58 = vadd.f32 %v7418_v47, %v7385_v40  ;;  %v7464_v11 = vpop.f32.mrf.mxu2  ;;  %v7389_v26 = vadd.f32 %v7388_v50, %v7353_v49  ;;  %v14855_v49 = vld [vmem:[#allocation91_spill] sm:$0xff] }
 0x7b3   : > { %v7507_v25 = vadd.f32 %v7506_v31, %v7464_v11  ;;  %v14862_v11 = vperm.slane %v14827_v22, 5 }
 0x7b4   : > { %v13651_v0 = vadd.f32 %v7419_v58, %v13544_v12  ;;  %8053 = vmatmul.f32.gmra.mxu0 %v14848_v54  ;;  %8089 = vmatmul.f32.gmra.mxu1 %v14842_v45  ;;  %v14851_v12 = vld [vmem:[#allocation97_spill] sm:$0xff]  ;;  %v14853_v45 = vld [vmem:[#allocation92_spill] sm:$0xff] }
 0x7b5   : > { %8165 = vmatmul.f32.gmra.mxu3 %v14849_v52  ;;  %v14852_v54 = vld [vmem:[#allocation93_spill] sm:$0xff] }
 0x7b6   : > { %8131 = vmatmul.f32.gmra.mxu2 %v14849_v52 }
 0x7b8   : > { %v7510_v59 = vpop.f32.mrf.mxu3 }
 0x7b9   : > { %v7422_v5 = vpop.f32.mrf.mxu1  ;;  %v7534_v36 = vpop.f32.mrf.mxu0 }
 0x7ba   : > { %v7423_v32 = vadd.f32 %v7422_v5, %v7389_v26  ;;  %v7472_v53 = vpop.f32.mrf.mxu2  ;;  %v7535_v52 = vadd.f32 %v7534_v36, %v7499_v19  ;;  %v8693_v26 = vmul.f32 %v13163_v62, %v14862_v11  ;;  %v14863_v5 = vld [vmem:[#allocation106_spill] sm:$0xff] }
 0x7bb   : > { %v7511_v10 = vadd.f32 %v7510_v59, %v7472_v53  ;;  %v14864_v36 = vld [vmem:[#allocation98_spill] sm:$0xff]  ;;  %v14866_v53 = vld [vmem:[#allocation103_spill] sm:$0xff] }
 0x7bc   : > { %v13658_v18 = vadd.f32 %v7423_v32, %v13553_v30  ;;  %8095 = vmatmul.f32.gmra.mxu1 %v14846_v4  ;;  %8218 = vmatmul.f32.vlgmr.msrb.gmra.mxu0 %v14851_v12  ;;  %v14865_v32 = vld [vmem:[#allocation104_spill] sm:$0xff] }
 0x7bd   : > { %8343 = vmatmul.f32.vlgmr.msrb.gmra.mxu3 %v14852_v54  ;;  %8540 = vmatpush.msrb.mxu0 %v13619_v9 }
 0x7be   : > { %8656 = vmatpush.msrb.mxu3 %v13613_v41  ;;  %8304 = vmatmul.f32.vlgmr.msrb.gmra.mxu2 %v14853_v45 }
 0x7bf   : > { %8622 = vmatpush.msrb.mxu2 %v8502_v51 }
 0x7c0   : > { %v7649_v56 = vpop.f32.mrf.mxu3 }
 0x7c1   : > { %v7539_v29 = vpop.f32.mrf.mxu0  ;;  %v7573_v30 = vpop.f32.mrf.mxu1 }
 0x7c2   : > { %v7574_v24 = vadd.f32 %v7573_v30, %v7535_v52  ;;  %v7615_v3 = vpop.f32.mrf.mxu2  ;;  %v7540_v33 = vadd.f32 %v7539_v29, %v7503_v2 }
 0x7c4   : > { %v7616_v4 = vadd.f32 %v7615_v3, %v7574_v24  ;;  %8226 = vmatmul.f32.gmra.mxu0 %v14854_v15  ;;  %8268 = vmatmul.f32.vlgmr.msrb.gmra.mxu1 %v14855_v49 }
 0x7c5   : > { %8349 = vmatmul.f32.gmra.mxu3 %v14856_v42  ;;  %8578 = vmatpush.msrb.mxu1 %v13613_v41 }
 0x7c6   : > { %v7650_v8 = vadd.f32 %v7649_v56, %v7616_v4  ;;  %8309 = vmatmul.f32.gmra.mxu2 %v14857_v46 }
 0x7c8   : > { %v13674_v9 = vadd.f32 %v7650_v8, %v13569_v27  ;;  %v7653_v51 = vpop.f32.mrf.mxu3  ;;  %v14867_v8 = vld [vmem:[#allocation102_spill] sm:$0xff] }
 0x7c9   : > { %v7544_v6 = vpop.f32.mrf.mxu0  ;;  %v7579_v23 = vpop.f32.mrf.mxu1 }
 0x7ca   : > { %v7580_v19 = vadd.f32 %v7579_v23, %v7540_v33  ;;  %v7619_v37 = vpop.f32.mrf.mxu2  ;;  %v7545_v40 = vadd.f32 %v7544_v6, %v7507_v25 }
 0x7cc   : > { %v7620_v7 = vadd.f32 %v7619_v37, %v7580_v19  ;;  %8234 = vmatmul.f32.gmra.mxu0 %v14858_v55  ;;  %8272 = vmatmul.f32.gmra.mxu1 %v14859_v17 }
 0x7cd   : > { %8355 = vmatmul.f32.gmra.mxu3 %v14860_v44 }
 0x7ce   : > { %v7654_v41 = vadd.f32 %v7653_v51, %v7620_v7  ;;  %8314 = vmatmul.f32.gmra.mxu2 %v14861_v39  ;;  %v14868_v7 = vperm.slane %v14831_v16, 5 }
 0x7d0   : > { %v13681_v2 = vadd.f32 %v7654_v41, %v13576_v21  ;;  %v7657_v27 = vpop.f32.mrf.mxu3  ;;  %v8696_v21 = vsel %vm501_vm2, %v8693_v26, 0  ;;  %v8694_v41 = vmul.f32 %v13167_v34, %v14868_v7 }
 0x7d1   : > { %v7549_v31 = vpop.f32.mrf.mxu0  ;;  %v7585_v50 = vpop.f32.mrf.mxu1  ;;  %v13694_v62 = vand.u32 4294901760, %v8696_v21 }
 0x7d2   : > { %v7586_v47 = vadd.f32 %v7585_v50, %v7545_v40  ;;  %v7623_v58 = vpop.f32.mrf.mxu2  ;;  %v7550_v52 = vadd.f32 %v7549_v31, %v7511_v10  ;;  %v8699_v31 = vsel %vm501_vm2, %v8694_v41, 0 }
 0x7d3   : > { %v8767_v10 = vsub.f32 %v8696_v21, %v13694_v62  ;;  %v13714_v11 = vand.u32 4294901760, %v8699_v31 }
 0x7d4   : > { %v7624_v59 = vadd.f32 %v7623_v58, %v7586_v47  ;;  %8242 = vmatmul.f32.gmra.mxu0 %v14863_v5  ;;  %8276 = vmatmul.f32.gmra.mxu1 %v14864_v36 }
 0x7d5   : > { %8361 = vmatmul.f32.gmra.mxu3 %v14865_v32 }
 0x7d6   : > { %v7658_v25 = vadd.f32 %v7657_v27, %v7624_v59  ;;  %8319 = vmatmul.f32.gmra.mxu2 %v14866_v53  ;;  %v8768_v27 = vand.u32 4294901760, %v8767_v10 }
 0x7d8   : > { %v13692_v56 = vadd.f32 %v7658_v25, %v13588_v61  ;;  %v7661_v29 = vpop.f32.mrf.mxu3  ;;  %v13720_v25 = vsub.f32 %v8699_v31, %v13714_v11 }
 0x7d9   : > { %v7591_v22 = vpop.f32.mrf.mxu1  ;;  %v7714_v30 = vpop.f32.mrf.mxu0 }
 0x7da   : > { %v7592_v24 = vadd.f32 %v7591_v22, %v7550_v52  ;;  %v7627_v3 = vpop.f32.mrf.mxu2 }
 0x7dc   : > { %v7628_v4 = vadd.f32 %v7627_v3, %v7592_v24  ;;  %8280 = vmatmul.f32.gmra.mxu1 %v14867_v8  ;;  %8385 = vmatmul.f32.vlgmr.msra.gmra.mxu0 %v14855_v49  ;;  %v9007_v24 = vand.u32 4294901760, %v13720_v25 }
 0x7dd   : > { %8507 = vmatmul.f32.vlgmr.msra.gmra.mxu3 %v14855_v49  ;;  %8717 = vmatpush.msra.mxu0 %v13694_v62 }
 0x7de   : > { %v7662_v61 = vadd.f32 %v7661_v29, %v7628_v4  ;;  %8844 = vmatpush.msra.mxu3 %v13694_v62  ;;  %8457 = vmatmul.f32.vlgmr.msra.gmra.mxu2 %v14851_v12  ;;  %v8769_v12 = vsub.f32 %v8767_v10, %v8768_v27  ;;  %v9008_v4 = vsub.f32 %v13720_v25, %v9007_v24 }
 0x7df   : > { %8806 = vmatpush.msra.mxu2 %v8767_v10 }
 0x7e0   : > { %v13704_v33 = vadd.f32 %v7662_v61, %v13601_v38  ;;  %v7839_v51 = vpop.f32.mrf.mxu3  ;;  %v8770_v47 = vand.u32 4294901760, %v8769_v12 }
 0x7e1   : > { %v7722_v6 = vpop.f32.mrf.mxu0  ;;  %v7764_v23 = vpop.f32.mrf.mxu1 }
 0x7e2   : > { %v7765_v19 = vadd.f32 %v7764_v23, %v7714_v30  ;;  %v7800_v37 = vpop.f32.mrf.mxu2 }
 0x7e4   : > { %v7801_v40 = vadd.f32 %v7800_v37, %v7765_v19  ;;  %8389 = vmatmul.f32.gmra.mxu0 %v14859_v17  ;;  %8419 = vmatmul.f32.vlgmr.msra.gmra.mxu1 %v14855_v49  ;;  %v9009_v19 = vand.u32 4294901760, %v9008_v4 }
 0x7e5   : > { %8511 = vmatmul.f32.gmra.mxu3 %v14859_v17  ;;  %8771 = vmatpush.msra.mxu1 %v8770_v47 }
 0x7e6   : > { %v7840_v38 = vadd.f32 %v7839_v51, %v7801_v40  ;;  %8465 = vmatmul.f32.gmra.mxu2 %v14854_v15 }
 0x7e8   : > { %v7845_v50 = vpop.f32.mrf.mxu3 }
 0x7e9   : > { %v7730_v58 = vpop.f32.mrf.mxu0  ;;  %v7768_v16 = vpop.f32.mrf.mxu1 }
 0x7ea   : > { %v7769_v34 = vadd.f32 %v7768_v16, %v7722_v6  ;;  %v7805_v26 = vpop.f32.mrf.mxu2 }
 0x7ec   : > { %v7806_v59 = vadd.f32 %v7805_v26, %v7769_v34  ;;  %8393 = vmatmul.f32.gmra.mxu0 %v14864_v36  ;;  %8423 = vmatmul.f32.gmra.mxu1 %v14859_v17 }
 0x7ed   : > { %8515 = vmatmul.f32.gmra.mxu3 %v14864_v36 }
 0x7ee   : > { %v7846_v15 = vadd.f32 %v7845_v50, %v7806_v59  ;;  %8473 = vmatmul.f32.gmra.mxu2 %v14858_v55 }
 0x7f0   : > { %v7851_v21 = vpop.f32.mrf.mxu3 }
 0x7f1   : > { %v7738_v52 = vpop.f32.mrf.mxu0  ;;  %v7772_v29 = vpop.f32.mrf.mxu1 }
 0x7f2   : > { %v7773_v22 = vadd.f32 %v7772_v29, %v7730_v58  ;;  %v7810_v30 = vpop.f32.mrf.mxu2 }
 0x7f4   : > { %v7811_v3 = vadd.f32 %v7810_v30, %v7773_v22  ;;  %8397 = vmatmul.f32.gmra.mxu0 %v14867_v8  ;;  %8427 = vmatmul.f32.gmra.mxu1 %v14864_v36 }
 0x7f5   : > { %8519 = vmatmul.f32.gmra.mxu3 %v14867_v8 }
 0x7f6   : > { %v7852_v10 = vadd.f32 %v7851_v21, %v7811_v3  ;;  %8481 = vmatmul.f32.gmra.mxu2 %v14863_v5 }
 0x7f8   : > { %v7857_v55 = vpop.f32.mrf.mxu3 }
 0x7f9   : > { %v7776_v61 = vpop.f32.mrf.mxu1  ;;  %v7881_v51 = vpop.f32.mrf.mxu0 }
 0x7fa   : > { %v7777_v6 = vadd.f32 %v7776_v61, %v7738_v52  ;;  %v7815_v23 = vpop.f32.mrf.mxu2  ;;  %v7882_v41 = vadd.f32 %v7881_v51, %v7840_v38  ;;  %v14872_v51 = vld [vmem:[#allocation117_spill] sm:$0xff] }
 0x7fc   : > { %v7816_v37 = vadd.f32 %v7815_v23, %v7777_v6  ;;  %8431 = vmatmul.f32.gmra.mxu1 %v14867_v8  ;;  %8543 = vmatmul.f32.vlgmr.msrb.gmra.mxu0 %v14853_v45  ;;  %v14873_v6 = vld [vmem:[#allocation107_spill] sm:$0xff]  ;;  %v9694_v23 = vld.sshfl [vmem:[#allocation1 + $0x8] sm:$0xff pattern:$0x75316420] }
 0x7fd   : > { %8658 = vmatmul.f32.vlgmr.msrb.gmra.mxu3 %v14855_v49  ;;  %8888 = vmatpush.msrb.mxu0 %v8768_v27 }
 0x7fe   : > { %9010 = vmatpush.msrb.mxu3 %v9009_v19  ;;  %v7858_v7 = vadd.f32 %v7857_v55, %v7816_v37  ;;  %8624 = vmatmul.f32.vlgmr.msrb.gmra.mxu2 %v14855_v49  ;;  %v14874_v19 = vld [vmem:[#allocation112_spill] sm:$0xff] }
 0x7ff   : > { %8956 = vmatpush.msrb.mxu2 %v13714_v11  ;;  %9699 = vrot.lane.b32.xlu0 %v9694_v23, %s14753_s22  ;;  %s10690_s22 = sshll.u32 %s10687_s26, 4  ;;  %s10691_s22 = int_to_ptr.hbm [resolvable:$true] %s10690_s22 }
 0x800   : > { %v8003_v5 = vpop.f32.mrf.mxu3  ;;  %s10984_s25 = sshra.s32 %s10691_s22, 4  ;;  %s10985_s25 = int_to_ptr.hbm [resolvable:$true] %s10984_s25 }
 0x801   : > { %v7885_v40 = vpop.f32.mrf.mxu0  ;;  %v7915_v12 = vpop.f32.mrf.mxu1  ;;  %s10986_s23 = scalar_lea.hbm %s10985_s25, 16  ;;  %p10991_p1 = scmp.lt.s32.totalorder %s10985_s25, %s14199_s8 }
 0x802   : > { %v7916_v31 = vadd.f32 %v7915_v12, %v7882_v41  ;;  %v7953_v50 = vpop.f32.mrf.mxu2  ;;  %v7886_v45 = vadd.f32 %v7885_v40, %v7846_v15  ;;  %p10987_p12 = scmp.ne.s32.totalorder %s10985_s25, %s10986_s23  ;;  %p10992_p2 = scmp.lt.s32.totalorder %s10990_s11, %s10986_s23 }
 0x803   : > { %v8004_v47 = vadd.f32 %v8003_v5, %v7953_v50 }
 0x804   : > { %v13737_v58 = vadd.f32 %v7916_v31, %v13636_v28  ;;  %8548 = vmatmul.f32.gmra.mxu0 %v14857_v46  ;;  %8582 = vmatmul.f32.vlgmr.msrb.gmra.mxu1 %v14852_v54  ;;  %p10988_p13 = pnand %p10987_p12, %p11155_p4  ;;  %p10993_p3 = por %p10992_p2, %p10991_p1 }
 0x805   : > { %8662 = vmatmul.f32.gmra.mxu3 %v14859_v17  ;;  %8922 = vmatpush.msrb.mxu1 %v13694_v62 }
 0x806   : > { %8628 = vmatmul.f32.gmra.mxu2 %v14859_v17  ;;  %p10989_p0 = pneg %p10988_p13 }
 0x808   : > { %v8007_v49 = vpop.f32.mrf.mxu3  ;;  %p10994_p5 = pnand %p10993_p3, %p10989_p0 }
 0x809   : > { %v7889_v27 = vpop.f32.mrf.mxu0  ;;  %v7919_v38 = vpop.f32.mrf.mxu1 }
 0x80a   : > { %v7920_v16 = vadd.f32 %v7919_v38, %v7886_v45  ;;  %v7961_v34 = vpop.f32.mrf.mxu2  ;;  %v7890_v54 = vadd.f32 %v7889_v27, %v7852_v10  ;;  %v14877_v45 = vld [vmem:[#allocation110_spill] sm:$0xff]  ;;  %v14879_v27 = vld [vmem:[#allocation115_spill] sm:$0xff] }
 0x80b   : > { %v8008_v26 = vadd.f32 %v8007_v49, %v7961_v34 }
 0x80c   : > { %v13745_v28 = vadd.f32 %v7920_v16, %v13644_v57  ;;  %8553 = vmatmul.f32.gmra.mxu0 %v14861_v39  ;;  %8588 = vmatmul.f32.gmra.mxu1 %v14856_v42 }
 0x80d   : > { %8666 = vmatmul.f32.gmra.mxu3 %v14864_v36 }
 0x80e   : > { %8632 = vmatmul.f32.gmra.mxu2 %v14864_v36 }
 0x810   : > { %v8011_v46 = vpop.f32.mrf.mxu3 }
 0x811   : > { %v7893_v17 = vpop.f32.mrf.mxu0  ;;  %v7923_v62 = vpop.f32.mrf.mxu1 }
 0x812   : > { %v7924_v59 = vadd.f32 %v7923_v62, %v7890_v54  ;;  %v7969_v15 = vpop.f32.mrf.mxu2  ;;  %v7894_v57 = vadd.f32 %v7893_v17, %v7858_v7  ;;  %v14880_v62 = vld [vmem:[#allocation122_spill] sm:$0xff] }
 0x813   : > { %v8012_v21 = vadd.f32 %v8011_v46, %v7969_v15  ;;  %v9193_v15 = vpop.permute.xlu0 %9192 }
 0x814   : > { %v13752_v52 = vadd.f32 %v7924_v59, %v13651_v0  ;;  %8558 = vmatmul.f32.gmra.mxu0 %v14866_v53  ;;  %8594 = vmatmul.f32.gmra.mxu1 %v14860_v44  ;;  %v14869_v0 = vld [vmem:[#allocation113_spill] sm:$0xff]  ;;  %v14871_v44 = vld [vmem:[#allocation108_spill] sm:$0xff]  ;;  %v14881_v59 = vld [vmem:[#allocation114_spill] sm:$0xff] }
 0x815   : > { %8670 = vmatmul.f32.gmra.mxu3 %v14867_v8  ;;  %v14870_v53 = vld [vmem:[#allocation109_spill] sm:$0xff] }
 0x816   : > { %8636 = vmatmul.f32.gmra.mxu2 %v14867_v8 }
 0x818   : > { %v8015_v42 = vpop.f32.mrf.mxu3 }
 0x819   : > { %v7927_v39 = vpop.f32.mrf.mxu1  ;;  %v8039_v36 = vpop.f32.mrf.mxu0 }
 0x81a   : > { %v7928_v29 = vadd.f32 %v7927_v39, %v7894_v57  ;;  %v7977_v22 = vpop.f32.mrf.mxu2  ;;  %v8040_v8 = vadd.f32 %v8039_v36, %v8004_v47  ;;  %v14876_v47 = vld [vmem:[#allocation121_spill] sm:$0xff]  ;;  %v14882_v57 = vld [vmem:[#allocation120_spill] sm:$0xff] }
 0x81b   : > { %v8016_v30 = vadd.f32 %v8015_v42, %v7977_v22 }
 0x81c   : > { %v13759_v3 = vadd.f32 %v7928_v29, %v13658_v18  ;;  %8600 = vmatmul.f32.gmra.mxu1 %v14865_v32  ;;  %8723 = vmatmul.f32.vlgmr.msra.gmra.mxu0 %v14869_v0  ;;  %v14885_v29 = vld [vmem:[#allocation119_spill] sm:$0xff] }
 0x81d   : > { %8848 = vmatmul.f32.vlgmr.msra.gmra.mxu3 %v14870_v53  ;;  %9045 = vmatpush.msra.mxu0 %v13720_v25  ;;  %v14875_v25 = vld [vmem:[#allocation111_spill] sm:$0xff] }
 0x81e   : > { %9161 = vmatpush.msra.mxu3 %v13714_v11  ;;  %8809 = vmatmul.f32.vlgmr.msra.gmra.mxu2 %v14871_v44 }
 0x81f   : > { %9127 = vmatpush.msra.mxu2 %v9007_v24 }
 0x820   : > { %v8154_v4 = vpop.f32.mrf.mxu3 }
 0x821   : > { %v8044_v10 = vpop.f32.mrf.mxu0  ;;  %v8078_v18 = vpop.f32.mrf.mxu1 }
 0x822   : > { %v8079_v55 = vadd.f32 %v8078_v18, %v8040_v8  ;;  %v8120_v61 = vpop.f32.mrf.mxu2  ;;  %v8045_v24 = vadd.f32 %v8044_v10, %v8008_v26 }
 0x824   : > { %v8121_v32 = vadd.f32 %v8120_v61, %v8079_v55  ;;  %8731 = vmatmul.f32.gmra.mxu0 %v14872_v51  ;;  %8773 = vmatmul.f32.vlgmr.msra.gmra.mxu1 %v14873_v6 }
 0x825   : > { %8854 = vmatmul.f32.gmra.mxu3 %v14874_v19  ;;  %9083 = vmatpush.msra.mxu1 %v13714_v11  ;;  %v14878_v11 = vld [vmem:[#allocation116_spill] sm:$0xff] }
 0x826   : > { %v8155_v37 = vadd.f32 %v8154_v4, %v8121_v32  ;;  %8814 = vmatmul.f32.gmra.mxu2 %v14875_v25 }
 0x828   : > { %v13776_v7 = vadd.f32 %v8155_v37, %v13674_v9  ;;  %v8158_v41 = vpop.f32.mrf.mxu3 }
 0x829   : > { %v8049_v5 = vpop.f32.mrf.mxu0  ;;  %v8084_v40 = vpop.f32.mrf.mxu1 }
 0x82a   : > { %v8085_v12 = vadd.f32 %v8084_v40, %v8045_v24  ;;  %v8124_v31 = vpop.f32.mrf.mxu2  ;;  %v8050_v38 = vadd.f32 %v8049_v5, %v8012_v21  ;;  %v9196_v21 = vsel %vm4110_vm10, %v9193_v15, %v13176_v48  ;;  %v14886_v24 = vld [vmem:[#allocation118_spill] sm:$0xff]  ;;  %v9197_v40 = vsel %vm4110_vm10, %v13176_v48, %v9193_v15 }
 0x82c   : > { %v8125_v50 = vadd.f32 %v8124_v31, %v8085_v12  ;;  %8739 = vmatmul.f32.gmra.mxu0 %v14876_v47  ;;  %8777 = vmatmul.f32.gmra.mxu1 %v14877_v45 }
 0x82d   : > { %8860 = vmatmul.f32.gmra.mxu3 %v14878_v11 }
 0x82e   : > { %v8159_v49 = vadd.f32 %v8158_v41, %v8125_v50  ;;  %8819 = vmatmul.f32.gmra.mxu2 %v14879_v27 }
 0x830   : > { %v13783_v16 = vadd.f32 %v8159_v49, %v13681_v2  ;;  %v8162_v9 = vpop.f32.mrf.mxu3  ;;  %v14883_v2 = vld [vmem:[#allocation123_spill] sm:$0xff] }
 0x831   : > { %v8054_v34 = vpop.f32.mrf.mxu0  ;;  %v8090_v26 = vpop.f32.mrf.mxu1  ;;  %v14884_v39 = vperm.slane %v14883_v2, 6 }
 0x832   : > { %v8091_v54 = vadd.f32 %v8090_v26, %v8050_v38  ;;  %v8128_v46 = vpop.f32.mrf.mxu2  ;;  %v8055_v22 = vadd.f32 %v8054_v34, %v8016_v30  ;;  %v14887_v38 = vld [vmem:[#allocation124_spill] sm:$0xff] }
 0x833   : > { %v9198_v36 = vmul.f32 %v9196_v21, %v14884_v39 }
 0x834   : > { %v8129_v17 = vadd.f32 %v8128_v46, %v8091_v54  ;;  %8747 = vmatmul.f32.gmra.mxu0 %v14880_v62  ;;  %8781 = vmatmul.f32.gmra.mxu1 %v14881_v59 }
 0x835   : > { %8866 = vmatmul.f32.gmra.mxu3 %v14882_v57  ;;  %v9201_v10 = vsel %vm501_vm2, %v9198_v36, 0 }
 0x836   : > { %v8163_v42 = vadd.f32 %v8162_v9, %v8129_v17  ;;  %8824 = vmatmul.f32.gmra.mxu2 %v14885_v29  ;;  %v13798_v23 = vand.u32 4294901760, %v9201_v10  ;;  %v14888_v9 = vperm.slane %v14887_v38, 6 }
 0x838   : > { %v13795_v8 = vadd.f32 %v8163_v42, %v13692_v56  ;;  %v8166_v4 = vpop.f32.mrf.mxu3  ;;  %v9272_v30 = vsub.f32 %v9201_v10, %v13798_v23  ;;  %v9199_v34 = vmul.f32 %v9197_v40, %v14888_v9 }
 0x839   : > { %v8096_v18 = vpop.f32.mrf.mxu1  ;;  %v8219_v55 = vpop.f32.mrf.mxu0 }
 0x83a   : > { %v8097_v61 = vadd.f32 %v8096_v18, %v8055_v22  ;;  %v8132_v32 = vpop.f32.mrf.mxu2  ;;  %v9204_v48 = vsel %vm501_vm2, %v9199_v34, 0 }
 0x83b   : > { %v13820_v36 = vand.u32 4294901760, %v9204_v48 }
 0x83c   : > { %v8133_v37 = vadd.f32 %v8132_v32, %v8097_v61  ;;  %8785 = vmatmul.f32.gmra.mxu1 %v14886_v24  ;;  %8890 = vmatmul.f32.vlgmr.msrb.gmra.mxu0 %v14873_v6 }
 0x83d   : > { %9012 = vmatmul.f32.vlgmr.msrb.gmra.mxu3 %v14873_v6  ;;  %9222 = vmatpush.msrb.mxu0 %v13798_v23 }
 0x83e   : > { %v8167_v56 = vadd.f32 %v8166_v4, %v8133_v37  ;;  %9349 = vmatpush.msrb.mxu3 %v13798_v23  ;;  %8962 = vmatmul.f32.vlgmr.msrb.gmra.mxu2 %v14869_v0 }
 0x83f   : > { %9311 = vmatpush.msrb.mxu2 %v9272_v30 }
 0x840   : > { %v13808_v41 = vadd.f32 %v8167_v56, %v13704_v33  ;;  %v8344_v5 = vpop.f32.mrf.mxu3  ;;  %v9273_v33 = vand.u32 4294901760, %v9272_v30 }
 0x841   : > { %v8227_v12 = vpop.f32.mrf.mxu0  ;;  %v8269_v31 = vpop.f32.mrf.mxu1 }
 0x842   : > { %v8270_v50 = vadd.f32 %v8269_v31, %v8219_v55  ;;  %v8305_v49 = vpop.f32.mrf.mxu2  ;;  %v9274_v54 = vsub.f32 %v9272_v30, %v9273_v33 }
 0x844   : > { %v8306_v26 = vadd.f32 %v8305_v49, %v8270_v50  ;;  %8894 = vmatmul.f32.gmra.mxu0 %v14877_v45  ;;  %8924 = vmatmul.f32.vlgmr.msrb.gmra.mxu1 %v14873_v6  ;;  %v9275_v17 = vand.u32 4294901760, %v9274_v54 }
 0x845   : > { %9016 = vmatmul.f32.gmra.mxu3 %v14877_v45 }
 0x846   : > { %v8345_v0 = vadd.f32 %v8344_v5, %v8306_v26  ;;  %8970 = vmatmul.f32.gmra.mxu2 %v14872_v51  ;;  %9276 = vmatpush.msrb.mxu1 %v9275_v17  ;;  %v13826_v51 = vsub.f32 %v9204_v48, %v13820_v36 }
 0x848   : > { %v8350_v46 = vpop.f32.mrf.mxu3  ;;  %v9512_v37 = vand.u32 4294901760, %v13826_v51 }
 0x849   : > { %v8235_v15 = vpop.f32.mrf.mxu0  ;;  %v8273_v21 = vpop.f32.mrf.mxu1 }
 0x84a   : > { %v8274_v42 = vadd.f32 %v8273_v21, %v8227_v12  ;;  %v8310_v39 = vpop.f32.mrf.mxu2  ;;  %v9513_v30 = vsub.f32 %v13826_v51, %v9512_v37 }
 0x84c   : > { %v8311_v22 = vadd.f32 %v8310_v39, %v8274_v42  ;;  %8898 = vmatmul.f32.gmra.mxu0 %v14881_v59  ;;  %8928 = vmatmul.f32.gmra.mxu1 %v14877_v45  ;;  %v9514_v49 = vand.u32 4294901760, %v9513_v30 }
 0x84d   : > { %9020 = vmatmul.f32.gmra.mxu3 %v14881_v59 }
 0x84e   : > { %v8351_v4 = vadd.f32 %v8350_v46, %v8311_v22  ;;  %8978 = vmatmul.f32.gmra.mxu2 %v14876_v47 }
 0x850   : > { %v8356_v10 = vpop.f32.mrf.mxu3 }
 0x851   : > { %v8243_v18 = vpop.f32.mrf.mxu0  ;;  %v8277_v55 = vpop.f32.mrf.mxu1 }
 0x852   : > { %v8278_v61 = vadd.f32 %v8277_v55, %v8235_v15  ;;  %v8315_v32 = vpop.f32.mrf.mxu2 }
 0x854   : > { %v8316_v56 = vadd.f32 %v8315_v32, %v8278_v61  ;;  %8902 = vmatmul.f32.gmra.mxu0 %v14886_v24  ;;  %8932 = vmatmul.f32.gmra.mxu1 %v14881_v59 }
 0x855   : > { %9024 = vmatmul.f32.gmra.mxu3 %v14886_v24 }
 0x856   : > { %v8357_v5 = vadd.f32 %v8356_v10, %v8316_v56  ;;  %8986 = vmatmul.f32.gmra.mxu2 %v14880_v62 }
 0x858   : > { %v8362_v47 = vpop.f32.mrf.mxu3 }
 0x859   : > { %v8281_v40 = vpop.f32.mrf.mxu1  ;;  %v8386_v12 = vpop.f32.mrf.mxu0 }
 0x85a   : > { %v8282_v31 = vadd.f32 %v8281_v40, %v8243_v18  ;;  %v8320_v50 = vpop.f32.mrf.mxu2  ;;  %v8387_v26 = vadd.f32 %v8386_v12, %v8345_v0 }
 0x85c   : > { %v8321_v9 = vadd.f32 %v8320_v50, %v8282_v31  ;;  %8936 = vmatmul.f32.gmra.mxu1 %v14886_v24  ;;  %9048 = vmatmul.f32.vlgmr.msra.gmra.mxu0 %v14871_v44  ;;  %v14892_v31 = vld [vmem:[#allocation135_spill] sm:$0xff]  ;;  %v14893_v50 = vld [vmem:[#allocation125_spill] sm:$0xff] }
 0x85d   : > { %9163 = vmatmul.f32.vlgmr.msra.gmra.mxu3 %v14873_v6  ;;  %9393 = vmatpush.msra.mxu0 %v9273_v33 }
 0x85e   : > { %9515 = vmatpush.msra.mxu3 %v9514_v49  ;;  %v8363_v34 = vadd.f32 %v8362_v47, %v8321_v9  ;;  %9129 = vmatmul.f32.vlgmr.msra.gmra.mxu2 %v14873_v6  ;;  %v14894_v49 = vld [vmem:[#allocation130_spill] sm:$0xff] }
 0x85f   : > { %9461 = vmatpush.msra.mxu2 %v13820_v36 }
 0x860   : > { %v8508_v62 = vpop.f32.mrf.mxu3 }
 0x861   : > { %v8390_v54 = vpop.f32.mrf.mxu0  ;;  %v8420_v48 = vpop.f32.mrf.mxu1 }
 0x862   : > { %v8421_v46 = vadd.f32 %v8420_v48, %v8387_v26  ;;  %v8458_v17 = vpop.f32.mrf.mxu2  ;;  %v8391_v44 = vadd.f32 %v8390_v54, %v8351_v4 }
 0x863   : > { %v8509_v15 = vadd.f32 %v8508_v62, %v8458_v17 }
 0x864   : > { %v13843_v21 = vadd.f32 %v8421_v46, %v13737_v58  ;;  %9053 = vmatmul.f32.gmra.mxu0 %v14875_v25  ;;  %9087 = vmatmul.f32.vlgmr.msra.gmra.mxu1 %v14870_v53 }
 0x865   : > { %9167 = vmatmul.f32.gmra.mxu3 %v14877_v45  ;;  %9427 = vmatpush.msra.mxu1 %v13798_v23 }
 0x866   : > { %9133 = vmatmul.f32.gmra.mxu2 %v14877_v45 }
 0x868   : > { %v8512_v6 = vpop.f32.mrf.mxu3 }
 0x869   : > { %v8394_v33 = vpop.f32.mrf.mxu0  ;;  %v8424_v0 = vpop.f32.mrf.mxu1 }
 0x86a   : > { %v8425_v42 = vadd.f32 %v8424_v0, %v8391_v44  ;;  %v8466_v39 = vpop.f32.mrf.mxu2  ;;  %v8395_v53 = vadd.f32 %v8394_v33, %v8357_v5  ;;  %v14897_v44 = vld [vmem:[#allocation128_spill] sm:$0xff]  ;;  %v14899_v33 = vld [vmem:[#allocation133_spill] sm:$0xff] }
 0x86b   : > { %v8513_v22 = vadd.f32 %v8512_v6, %v8466_v39  ;;  %v14898_v6 = vld [vmem:[#allocation134_spill] sm:$0xff] }
 0x86c   : > { %v13851_v58 = vadd.f32 %v8425_v42, %v13745_v28  ;;  %9058 = vmatmul.f32.gmra.mxu0 %v14879_v27  ;;  %9093 = vmatmul.f32.gmra.mxu1 %v14874_v19 }
 0x86d   : > { %9171 = vmatmul.f32.gmra.mxu3 %v14881_v59 }
 0x86e   : > { %9137 = vmatmul.f32.gmra.mxu2 %v14881_v59 }
 0x870   : > { %v8516_v25 = vpop.f32.mrf.mxu3 }
 0x871   : > { %v8398_v45 = vpop.f32.mrf.mxu0  ;;  %v8428_v23 = vpop.f32.mrf.mxu1 }
 0x872   : > { %v8429_v4 = vadd.f32 %v8428_v23, %v8395_v53  ;;  %v8474_v10 = vpop.f32.mrf.mxu2  ;;  %v8399_v28 = vadd.f32 %v8398_v45, %v8363_v34  ;;  %v14895_v34 = vld [vmem:[#allocation129_spill] sm:$0xff]  ;;  %v14900_v23 = vld [vmem:[#allocation140_spill] sm:$0xff] }
 0x873   : > { %v8517_v18 = vadd.f32 %v8516_v25, %v8474_v10  ;;  %v14902_v10 = vld [vmem:[#allocation138_spill] sm:$0xff] }
 0x874   : > { %v13858_v55 = vadd.f32 %v8429_v4, %v13752_v52  ;;  %9063 = vmatmul.f32.gmra.mxu0 %v14885_v29  ;;  %9099 = vmatmul.f32.gmra.mxu1 %v14878_v11  ;;  %v14889_v52 = vld [vmem:[#allocation131_spill] sm:$0xff]  ;;  %v14891_v11 = vld [vmem:[#allocation126_spill] sm:$0xff]  ;;  %v14901_v4 = vld [vmem:[#allocation132_spill] sm:$0xff] }
 0x875   : > { %9175 = vmatmul.f32.gmra.mxu3 %v14886_v24  ;;  %v14890_v29 = vld [vmem:[#allocation127_spill] sm:$0xff] }
 0x876   : > { %9141 = vmatmul.f32.gmra.mxu2 %v14886_v24 }
 0x878   : > { %v8520_v19 = vpop.f32.mrf.mxu3 }
 0x879   : > { %v8432_v27 = vpop.f32.mrf.mxu1  ;;  %v8544_v59 = vpop.f32.mrf.mxu0 }
 0x87a   : > { %v8433_v61 = vadd.f32 %v8432_v27, %v8399_v28  ;;  %v8482_v32 = vpop.f32.mrf.mxu2  ;;  %v8545_v24 = vadd.f32 %v8544_v59, %v8509_v15  ;;  %v14896_v15 = vld [vmem:[#allocation139_spill] sm:$0xff]  ;;  %v9700_v59 = vpop.permute.xlu0 %9699 }
 0x87b   : > { %v8521_v56 = vadd.f32 %v8520_v19, %v8482_v32  ;;  %v14903_v19 = vld [vmem:[#allocation137_spill] sm:$0xff] }
 0x87c   : > { %v13865_v30 = vadd.f32 %v8433_v61, %v13759_v3  ;;  %9105 = vmatmul.f32.gmra.mxu1 %v14882_v57  ;;  %9228 = vmatmul.f32.vlgmr.msrb.gmra.mxu0 %v14889_v52 }
 0x87d   : > { %9353 = vmatmul.f32.vlgmr.msrb.gmra.mxu3 %v14890_v29  ;;  %9550 = vmatpush.msrb.mxu0 %v13826_v51 }
 0x87e   : > { %9666 = vmatpush.msrb.mxu3 %v13820_v36  ;;  %9314 = vmatmul.f32.vlgmr.msrb.gmra.mxu2 %v14891_v11 }
 0x87f   : > { %9632 = vmatpush.msrb.mxu2 %v9512_v37 }
 0x880   : > { %v8659_v5 = vpop.f32.mrf.mxu3 }
 0x881   : > { %v8549_v47 = vpop.f32.mrf.mxu0  ;;  %v8583_v3 = vpop.f32.mrf.mxu1 }
 0x882   : > { %v8584_v40 = vadd.f32 %v8583_v3, %v8545_v24  ;;  %v8625_v12 = vpop.f32.mrf.mxu2  ;;  %v8550_v26 = vadd.f32 %v8549_v47, %v8513_v22  ;;  %v9701_v24 = vsel %vm4634_vm11, %v13172_v13, %v9700_v59  ;;  %v14904_v3 = vperm.slane %v14883_v2, 7 }
 0x884   : > { %v8626_v57 = vadd.f32 %v8625_v12, %v8584_v40  ;;  %9236 = vmatmul.f32.gmra.mxu0 %v14892_v31  ;;  %9278 = vmatmul.f32.vlgmr.msrb.gmra.mxu1 %v14893_v50  ;;  %v9703_v40 = vmul.f32 %v9701_v24, %v14904_v3 }
 0x885   : > { %9359 = vmatmul.f32.gmra.mxu3 %v14894_v49  ;;  %9588 = vmatpush.msrb.mxu1 %v13820_v36 }
 0x886   : > { %v8660_v9 = vadd.f32 %v8659_v5, %v8626_v57  ;;  %9319 = vmatmul.f32.gmra.mxu2 %v14895_v34  ;;  %v14905_v57 = vld [vmem:[#allocation136_spill] sm:$0xff] }
 0x888   : > { %v13881_v51 = vadd.f32 %v8660_v9, %v13776_v7  ;;  %v8663_v37 = vpop.f32.mrf.mxu3 }
 0x889   : > { %v8554_v62 = vpop.f32.mrf.mxu0  ;;  %v8589_v54 = vpop.f32.mrf.mxu1 }
 0x88a   : > { %v8590_v48 = vadd.f32 %v8589_v54, %v8550_v26  ;;  %v8629_v46 = vpop.f32.mrf.mxu2  ;;  %v8555_v0 = vadd.f32 %v8554_v62, %v8517_v18  ;;  %v9702_v62 = vsel %vm4634_vm11, %v9700_v59, %v13172_v13 }
 0x88c   : > { %v8630_v17 = vadd.f32 %v8629_v46, %v8590_v48  ;;  %9244 = vmatmul.f32.gmra.mxu0 %v14896_v15  ;;  %9282 = vmatmul.f32.gmra.mxu1 %v14897_v44 }
 0x88d   : > { %9365 = vmatmul.f32.gmra.mxu3 %v14898_v6 }
 0x88e   : > { %v8664_v36 = vadd.f32 %v8663_v37, %v8630_v17  ;;  %9324 = vmatmul.f32.gmra.mxu2 %v14899_v33 }
 0x890   : > { %v13888_v42 = vadd.f32 %v8664_v36, %v13783_v16  ;;  %v8667_v7 = vpop.f32.mrf.mxu3 }
 0x891   : > { %v8559_v39 = vpop.f32.mrf.mxu0  ;;  %v8595_v22 = vpop.f32.mrf.mxu1 }
 0x892   : > { %v8596_v53 = vadd.f32 %v8595_v22, %v8555_v0  ;;  %v8633_v25 = vpop.f32.mrf.mxu2  ;;  %v8560_v27 = vadd.f32 %v8559_v39, %v8521_v56 }
 0x894   : > { %v8634_v45 = vadd.f32 %v8633_v25, %v8596_v53  ;;  %9252 = vmatmul.f32.gmra.mxu0 %v14900_v23  ;;  %9286 = vmatmul.f32.gmra.mxu1 %v14901_v4 }
 0x895   : > { %9371 = vmatmul.f32.gmra.mxu3 %v14902_v10 }
 0x896   : > { %v8668_v28 = vadd.f32 %v8667_v7, %v8634_v45  ;;  %9329 = vmatmul.f32.gmra.mxu2 %v14903_v19 }
 0x898   : > { %v13895_v18 = vadd.f32 %v8668_v28, %v13795_v8  ;;  %v8671_v16 = vpop.f32.mrf.mxu3  ;;  %v9706_v8 = vsel %vm501_vm2, %v9703_v40, 0 }
 0x899   : > { %v8601_v61 = vpop.f32.mrf.mxu1  ;;  %v8724_v32 = vpop.f32.mrf.mxu0  ;;  %v13906_v56 = vand.u32 4294901760, %v9706_v8 }
 0x89a   : > { %v8602_v5 = vadd.f32 %v8601_v61, %v8560_v27  ;;  %v8637_v47 = vpop.f32.mrf.mxu2 }
 0x89b   : > { %v9777_v26 = vsub.f32 %v9706_v8, %v13906_v56 }
 0x89c   : > { %v8638_v12 = vadd.f32 %v8637_v47, %v8602_v5  ;;  %9290 = vmatmul.f32.gmra.mxu1 %v14905_v57  ;;  %9395 = vmatmul.f32.vlgmr.msra.gmra.mxu0 %v14893_v50 }
 0x89d   : > { %9517 = vmatmul.f32.vlgmr.msra.gmra.mxu3 %v14893_v50  ;;  %9727 = vmatpush.msra.mxu0 %v13906_v56 }
 0x89e   : > { %v8672_v9 = vadd.f32 %v8671_v16, %v8638_v12  ;;  %9467 = vmatmul.f32.vlgmr.msra.gmra.mxu2 %v14889_v52  ;;  %9854 = vmatpush.msra.mxu3 %v13906_v56  ;;  %v14906_v52 = vperm.slane %v14887_v38, 7 }
 0x89f   : > { %9816 = vmatpush.msra.mxu2 %v9777_v26 }
 0x8a0   : > { %v13912_v2 = vadd.f32 %v8672_v9, %v13808_v41  ;;  %v8849_v37 = vpop.f32.mrf.mxu3  ;;  %v9704_v36 = vmul.f32 %v9702_v62, %v14906_v52  ;;  %v9778_v41 = vand.u32 4294901760, %v9777_v26 }
 0x8a1   : > { %v8732_v54 = vpop.f32.mrf.mxu0  ;;  %v8774_v48 = vpop.f32.mrf.mxu1 }
 0x8a2   : > { %v8775_v46 = vadd.f32 %v8774_v48, %v8724_v32  ;;  %v8810_v17 = vpop.f32.mrf.mxu2  ;;  %v9779_v13 = vsub.f32 %v9777_v26, %v9778_v41  ;;  %v9709_v7 = vsel %vm501_vm2, %v9704_v36, 0 }
 0x8a3   : > { %v13925_v28 = vand.u32 4294901760, %v9709_v7 }
 0x8a4   : > { %v8811_v0 = vadd.f32 %v8810_v17, %v8775_v46  ;;  %9399 = vmatmul.f32.gmra.mxu0 %v14897_v44  ;;  %9429 = vmatmul.f32.vlgmr.msra.gmra.mxu1 %v14893_v50  ;;  %v9780_v22 = vand.u32 4294901760, %v9779_v13 }
 0x8a5   : > { %9521 = vmatmul.f32.gmra.mxu3 %v14897_v44 }
 0x8a6   : > { %v8850_v60 = vadd.f32 %v8849_v37, %v8811_v0  ;;  %9475 = vmatmul.f32.gmra.mxu2 %v14892_v31  ;;  %9781 = vmatpush.msra.mxu1 %v9780_v22  ;;  %v13931_v31 = vsub.f32 %v9709_v7, %v13925_v28 }
 0x8a8   : > { %v8855_v39 = vpop.f32.mrf.mxu3  ;;  %v10017_v47 = vand.u32 4294901760, %v13931_v31 }
 0x8a9   : > { %v8740_v53 = vpop.f32.mrf.mxu0  ;;  %v8778_v25 = vpop.f32.mrf.mxu1 }
 0x8aa   : > { %v8779_v38 = vadd.f32 %v8778_v25, %v8732_v54  ;;  %v8815_v45 = vpop.f32.mrf.mxu2  ;;  %v10018_v40 = vsub.f32 %v13931_v31, %v10017_v47 }
 0x8ac   : > { %v8816_v27 = vadd.f32 %v8815_v45, %v8779_v38  ;;  %9403 = vmatmul.f32.gmra.mxu0 %v14901_v4  ;;  %9433 = vmatmul.f32.gmra.mxu1 %v14897_v44  ;;  %v10019_v62 = vand.u32 4294901760, %v10018_v40 }
 0x8ad   : > { %9525 = vmatmul.f32.gmra.mxu3 %v14901_v4 }
 0x8ae   : > { %v8856_v16 = vadd.f32 %v8855_v39, %v8816_v27  ;;  %9483 = vmatmul.f32.gmra.mxu2 %v14896_v15 }
 0x8b0   : > { %v8861_v59 = vpop.f32.mrf.mxu3 }
 0x8b1   : > { %v8748_v61 = vpop.f32.mrf.mxu0  ;;  %v8782_v32 = vpop.f32.mrf.mxu1 }
 0x8b2   : > { %v8783_v24 = vadd.f32 %v8782_v32, %v8740_v53  ;;  %v8820_v5 = vpop.f32.mrf.mxu2 }
 0x8b4   : > { %v8821_v3 = vadd.f32 %v8820_v5, %v8783_v24  ;;  %9407 = vmatmul.f32.gmra.mxu0 %v14905_v57  ;;  %9437 = vmatmul.f32.gmra.mxu1 %v14901_v4 }
 0x8b5   : > { %9529 = vmatmul.f32.gmra.mxu3 %v14905_v57 }
 0x8b6   : > { %v8862_v12 = vadd.f32 %v8861_v59, %v8821_v3  ;;  %9491 = vmatmul.f32.gmra.mxu2 %v14900_v23 }
 0x8b8   : > { %v8867_v15 = vpop.f32.mrf.mxu3 }
 0x8b9   : > { %v8786_v8 = vpop.f32.mrf.mxu1  ;;  %v8891_v9 = vpop.f32.mrf.mxu0 }
 0x8ba   : > { %v8787_v26 = vadd.f32 %v8786_v8, %v8748_v61  ;;  %v8825_v37 = vpop.f32.mrf.mxu2  ;;  %v8892_v46 = vadd.f32 %v8891_v9, %v8850_v60  ;;  %v14912_v8 = vld [vmem:[#allocation146_spill] sm:$0xff] }
 0x8bc   : > { %v8826_v54 = vadd.f32 %v8825_v37, %v8787_v26  ;;  %9441 = vmatmul.f32.gmra.mxu1 %v14905_v57  ;;  %9553 = vmatmul.f32.vlgmr.msrb.gmra.mxu0 %v14891_v11  ;;  %v14913_v26 = vld [vmem:[#allocation145_spill] sm:$0xff] }
 0x8bd   : > { %9668 = vmatmul.f32.vlgmr.msrb.gmra.mxu3 %v14893_v50  ;;  %9898 = vmatpush.msrb.mxu0 %v9778_v41 }
 0x8be   : > { %10020 = vmatpush.msrb.mxu3 %v10019_v62  ;;  %v8868_v48 = vadd.f32 %v8867_v15, %v8826_v54  ;;  %9634 = vmatmul.f32.vlgmr.msrb.gmra.mxu2 %v14893_v50  ;;  %v14911_v15 = vld [vmem:[#allocation141_spill] sm:$0xff] }
 0x8bf   : > { %9966 = vmatpush.msrb.mxu2 %v13925_v28 }
 0x8c0   : > { %v9013_v23 = vpop.f32.mrf.mxu3 }
 0x8c1   : > { %v8895_v17 = vpop.f32.mrf.mxu0  ;;  %v8925_v52 = vpop.f32.mrf.mxu1 }
 0x8c2   : > { %v8926_v36 = vadd.f32 %v8925_v52, %v8892_v46  ;;  %v8963_v0 = vpop.f32.mrf.mxu2  ;;  %v8896_v11 = vadd.f32 %v8895_v17, %v8856_v16  ;;  %v14914_v17 = vld [vmem:[#allocation156_spill] sm:$0xff] }
 0x8c3   : > { %v9014_v13 = vadd.f32 %v9013_v23, %v8963_v0  ;;  %v14915_v52 = vld [vmem:[#allocation144_spill] sm:$0xff]  ;;  %v14917_v0 = vld [vmem:[#allocation149_spill] sm:$0xff] }
 0x8c4   : > { %v13948_v7 = vadd.f32 %v8926_v36, %v13843_v21  ;;  %9558 = vmatmul.f32.gmra.mxu0 %v14895_v34  ;;  %9592 = vmatmul.f32.vlgmr.msrb.gmra.mxu1 %v14890_v29  ;;  %v14916_v36 = vld [vmem:[#allocation150_spill] sm:$0xff] }
 0x8c5   : > { %9672 = vmatmul.f32.gmra.mxu3 %v14897_v44  ;;  %9932 = vmatpush.msrb.mxu1 %v13906_v56 }
 0x8c6   : > { %9638 = vmatmul.f32.gmra.mxu2 %v14897_v44 }
 0x8c8   : > { %v9017_v50 = vpop.f32.mrf.mxu3 }
 0x8c9   : > { %v8899_v41 = vpop.f32.mrf.mxu0  ;;  %v8929_v60 = vpop.f32.mrf.mxu1 }
 0x8ca   : > { %v8930_v39 = vadd.f32 %v8929_v60, %v8896_v11  ;;  %v8971_v22 = vpop.f32.mrf.mxu2  ;;  %v8900_v29 = vadd.f32 %v8899_v41, %v8862_v12  ;;  %v14910_v12 = vld [vmem:[#allocation151_spill] sm:$0xff] }
 0x8cb   : > { %v9018_v53 = vadd.f32 %v9017_v50, %v8971_v22 }
 0x8cc   : > { %v13956_v21 = vadd.f32 %v8930_v39, %v13851_v58  ;;  %9563 = vmatmul.f32.gmra.mxu0 %v14899_v33  ;;  %9598 = vmatmul.f32.gmra.mxu1 %v14894_v49 }
 0x8cd   : > { %9676 = vmatmul.f32.gmra.mxu3 %v14901_v4 }
 0x8ce   : > { %9642 = vmatmul.f32.gmra.mxu2 %v14901_v4 }
 0x8d0   : > { %v9021_v34 = vpop.f32.mrf.mxu3 }
 0x8d1   : > { %v8903_v44 = vpop.f32.mrf.mxu0  ;;  %v8933_v56 = vpop.f32.mrf.mxu1 }
 0x8d2   : > { %v8934_v25 = vadd.f32 %v8933_v56, %v8900_v29  ;;  %v8979_v38 = vpop.f32.mrf.mxu2  ;;  %v8904_v58 = vadd.f32 %v8903_v44, %v8868_v48  ;;  %v14919_v29 = vld [vmem:[#allocation148_spill] sm:$0xff]  ;;  %v14921_v56 = vld [vmem:[#allocation153_spill] sm:$0xff] }
 0x8d3   : > { %v9022_v45 = vadd.f32 %v9021_v34, %v8979_v38  ;;  %v14920_v34 = vld [vmem:[#allocation155_spill] sm:$0xff] }
 0x8d4   : > { %v13963_v27 = vadd.f32 %v8934_v25, %v13858_v55  ;;  %9568 = vmatmul.f32.gmra.mxu0 %v14903_v19  ;;  %9604 = vmatmul.f32.gmra.mxu1 %v14898_v6  ;;  %v14907_v55 = vld [vmem:[#allocation147_spill] sm:$0xff]  ;;  %v14909_v6 = vld [vmem:[#allocation142_spill] sm:$0xff] }
 0x8d5   : > { %9680 = vmatmul.f32.gmra.mxu3 %v14905_v57  ;;  %v14908_v19 = vld [vmem:[#allocation143_spill] sm:$0xff] }
 0x8d6   : > { %9646 = vmatmul.f32.gmra.mxu2 %v14905_v57 }
 0x8d8   : > { %v9025_v49 = vpop.f32.mrf.mxu3 }
 0x8d9   : > { %v8937_v33 = vpop.f32.mrf.mxu1  ;;  %v9049_v4 = vpop.f32.mrf.mxu0 }
 0x8da   : > { %v8938_v16 = vadd.f32 %v8937_v33, %v8904_v58  ;;  %v8987_v59 = vpop.f32.mrf.mxu2  ;;  %v9050_v57 = vadd.f32 %v9049_v4, %v9014_v13 }
 0x8db   : > { %v9026_v61 = vadd.f32 %v9025_v49, %v8987_v59 }
 0x8dc   : > { %v13970_v32 = vadd.f32 %v8938_v16, %v13865_v30  ;;  %9610 = vmatmul.f32.gmra.mxu1 %v14902_v10  ;;  %9733 = vmatmul.f32.vlgmr.msra.gmra.mxu0 %v14907_v55  ;;  %v14922_v16 = vld [vmem:[#allocation152_spill] sm:$0xff] }
 0x8dd   : > { %9858 = vmatmul.f32.vlgmr.msra.gmra.mxu3 %v14908_v19  ;;  %10055 = vmatpush.msra.mxu0 %v13931_v31 }
 0x8de   : > { %10171 = vmatpush.msra.mxu3 %v13925_v28  ;;  %9819 = vmatmul.f32.vlgmr.msra.gmra.mxu2 %v14909_v6 }
 0x8df   : > { %10137 = vmatpush.msra.mxu2 %v10017_v47 }
 0x8e0   : > { %v9164_v24 = vpop.f32.mrf.mxu3 }
 0x8e1   : > { %v9054_v5 = vpop.f32.mrf.mxu0  ;;  %v9088_v30 = vpop.f32.mrf.mxu1 }
 0x8e2   : > { %v9089_v3 = vadd.f32 %v9088_v30, %v9050_v57  ;;  %v9130_v40 = vpop.f32.mrf.mxu2  ;;  %v9055_v37 = vadd.f32 %v9054_v5, %v9018_v53  ;;  %v14918_v53 = vld [vmem:[#allocation158_spill] sm:$0xff] }
 0x8e4   : > { %v9131_v10 = vadd.f32 %v9130_v40, %v9089_v3  ;;  %9741 = vmatmul.f32.gmra.mxu0 %v14910_v12  ;;  %9783 = vmatmul.f32.vlgmr.msra.gmra.mxu1 %v14911_v15 }
 0x8e5   : > { %9864 = vmatmul.f32.gmra.mxu3 %v14912_v8  ;;  %10093 = vmatpush.msra.mxu1 %v13925_v28 }
 0x8e6   : > { %v9165_v9 = vadd.f32 %v9164_v24, %v9131_v10  ;;  %9824 = vmatmul.f32.gmra.mxu2 %v14913_v26 }
 0x8e8   : > { %v13986_v31 = vadd.f32 %v9165_v9, %v13881_v51  ;;  %v9168_v47 = vpop.f32.mrf.mxu3 }
 0x8e9   : > { %v9059_v62 = vpop.f32.mrf.mxu0  ;;  %v9094_v54 = vpop.f32.mrf.mxu1 }
 0x8ea   : > { %v9095_v48 = vadd.f32 %v9094_v54, %v9055_v37  ;;  %v9134_v46 = vpop.f32.mrf.mxu2  ;;  %v9060_v13 = vadd.f32 %v9059_v62, %v9022_v45 }
 0x8ec   : > { %v9135_v23 = vadd.f32 %v9134_v46, %v9095_v48  ;;  %9749 = vmatmul.f32.gmra.mxu0 %v14914_v17  ;;  %9787 = vmatmul.f32.gmra.mxu1 %v14915_v52 }
 0x8ed   : > { %9870 = vmatmul.f32.gmra.mxu3 %v14916_v36 }
 0x8ee   : > { %v9169_v28 = vadd.f32 %v9168_v47, %v9135_v23  ;;  %9829 = vmatmul.f32.gmra.mxu2 %v14917_v0 }
 0x8f0   : > { %v13993_v11 = vadd.f32 %v9169_v28, %v13888_v42  ;;  %v9172_v51 = vpop.f32.mrf.mxu3 }
 0x8f1   : > { %v9064_v50 = vpop.f32.mrf.mxu0  ;;  %v9100_v41 = vpop.f32.mrf.mxu1 }
 0x8f2   : > { %v9101_v60 = vadd.f32 %v9100_v41, %v9060_v13  ;;  %v9138_v39 = vpop.f32.mrf.mxu2  ;;  %v9065_v25 = vadd.f32 %v9064_v50, %v9026_v61 }
 0x8f4   : > { %v9139_v22 = vadd.f32 %v9138_v39, %v9101_v60  ;;  %9757 = vmatmul.f32.gmra.mxu0 %v14918_v53  ;;  %9791 = vmatmul.f32.gmra.mxu1 %v14919_v29 }
 0x8f5   : > { %9876 = vmatmul.f32.gmra.mxu3 %v14920_v34 }
 0x8f6   : > { %v9173_v44 = vadd.f32 %v9172_v51, %v9139_v22  ;;  %9834 = vmatmul.f32.gmra.mxu2 %v14921_v56 }
 0x8f8   : > { %v14000_v38 = vadd.f32 %v9173_v44, %v13895_v18  ;;  %v9176_v42 = vpop.f32.mrf.mxu3 }
 0x8f9   : > { %v9106_v45 = vpop.f32.mrf.mxu1  ;;  %v9229_v58 = vpop.f32.mrf.mxu0 }
 0x8fa   : > { %v9107_v49 = vadd.f32 %v9106_v45, %v9065_v25  ;;  %v9142_v33 = vpop.f32.mrf.mxu2 }
 0x8fc   : > { %v9143_v4 = vadd.f32 %v9142_v33, %v9107_v49  ;;  %9795 = vmatmul.f32.gmra.mxu1 %v14922_v16  ;;  %9900 = vmatmul.f32.vlgmr.msrb.gmra.mxu0 %v14911_v15 }
 0x8fd   : > { %10022 = vmatmul.f32.vlgmr.msrb.gmra.mxu3 %v14911_v15 }
 0x8fe   : > { %v9177_v59 = vadd.f32 %v9176_v42, %v9143_v4  ;;  %9972 = vmatmul.f32.vlgmr.msrb.gmra.mxu2 %v14907_v55 }
 0x900   : > { %v14007_v61 = vadd.f32 %v9177_v59, %v13912_v2  ;;  %v9354_v18 = vpop.f32.mrf.mxu3 }
 0x901   : > { %v9237_v57 = vpop.f32.mrf.mxu0  ;;  %v9279_v24 = vpop.f32.mrf.mxu1 }
 0x902   : > { %v9315_v5 = vpop.f32.mrf.mxu2 }
 0x904   : > { %9904 = vmatmul.f32.gmra.mxu0 %v14915_v52  ;;  %9934 = vmatmul.f32.vlgmr.msrb.gmra.mxu1 %v14911_v15 }
 0x905   : > { %10026 = vmatmul.f32.gmra.mxu3 %v14915_v52 }
 0x906   : > { %9980 = vmatmul.f32.gmra.mxu2 %v14910_v12  ;;  %v9280_v12 = vadd.f32 %v9279_v24, %v9229_v58 }
 0x908   : > { %v9360_v30 = vpop.f32.mrf.mxu3  ;;  %v9316_v48 = vadd.f32 %v9315_v5, %v9280_v12 }
 0x909   : > { %v9245_v3 = vpop.f32.mrf.mxu0  ;;  %v9283_v40 = vpop.f32.mrf.mxu1 }
 0x90a   : > { %v9320_v10 = vpop.f32.mrf.mxu2  ;;  %v9284_v28 = vadd.f32 %v9283_v40, %v9237_v57  ;;  %v9355_v13 = vadd.f32 %v9354_v18, %v9316_v48 }
 0x90c   : > { %9908 = vmatmul.f32.gmra.mxu0 %v14919_v29  ;;  %9938 = vmatmul.f32.gmra.mxu1 %v14915_v52  ;;  %v9321_v22 = vadd.f32 %v9320_v10, %v9284_v28 }
 0x90d   : > { %10030 = vmatmul.f32.gmra.mxu3 %v14919_v29 }
 0x90e   : > { %9988 = vmatmul.f32.gmra.mxu2 %v14914_v17  ;;  %v9361_v45 = vadd.f32 %v9360_v30, %v9321_v22 }
 0x910   : > { %v9366_v2 = vpop.f32.mrf.mxu3 }
 0x911   : > { %v9253_v55 = vpop.f32.mrf.mxu0  ;;  %v9287_v9 = vpop.f32.mrf.mxu1 }
 0x912   : > { %v9325_v37 = vpop.f32.mrf.mxu2 }
 0x914   : > { %9912 = vmatmul.f32.gmra.mxu0 %v14922_v16  ;;  %9942 = vmatmul.f32.gmra.mxu1 %v14919_v29 }
 0x915   : > { %10034 = vmatmul.f32.gmra.mxu3 %v14922_v16 }
 0x916   : > { %9996 = vmatmul.f32.gmra.mxu2 %v14918_v53 }
 0x918   : > { %v9372_v47 = vpop.f32.mrf.mxu3 }
 0x919   : > { %v9291_v62 = vpop.f32.mrf.mxu1  ;;  %v9396_v54 = vpop.f32.mrf.mxu0 }
 0x91a   : > { %v9292_v46 = vadd.f32 %v9291_v62, %v9253_v55  ;;  %v9330_v23 = vpop.f32.mrf.mxu2  ;;  %v9397_v50 = vadd.f32 %v9396_v54, %v9355_v13 }
 0x91c   : > { %v9331_v17 = vadd.f32 %v9330_v23, %v9292_v46  ;;  %9946 = vmatmul.f32.gmra.mxu1 %v14922_v16  ;;  %10058 = vmatmul.f32.vlgmr.msra.gmra.mxu0 %v14909_v6  ;;  %v9288_v6 = vadd.f32 %v9287_v9, %v9245_v3 }
 0x91d   : > { %10173 = vmatmul.f32.vlgmr.msra.gmra.mxu3 %v14911_v15 }
 0x91e   : > { %v9373_v51 = vadd.f32 %v9372_v47, %v9331_v17  ;;  %10139 = vmatmul.f32.vlgmr.msra.gmra.mxu2 %v14911_v15  ;;  %v9326_v4 = vadd.f32 %v9325_v37, %v9288_v6 }
 0x920   : > { %v9518_v41 = vpop.f32.mrf.mxu3 }
 0x921   : > { %v9400_v60 = vpop.f32.mrf.mxu0  ;;  %v9430_v39 = vpop.f32.mrf.mxu1 }
 0x922   : > { %v9431_v53 = vadd.f32 %v9430_v39, %v9397_v50  ;;  %v9468_v44 = vpop.f32.mrf.mxu2  ;;  %v9401_v15 = vadd.f32 %v9400_v60, %v9361_v45 }
 0x923   : > { %v9519_v25 = vadd.f32 %v9518_v41, %v9468_v44 }
 0x924   : > { %v14026_v42 = vadd.f32 %v9431_v53, %v13948_v7  ;;  %10063 = vmatmul.f32.gmra.mxu0 %v14913_v26  ;;  %10097 = vmatmul.f32.vlgmr.msra.gmra.mxu1 %v14908_v19  ;;  %v9367_v19 = vadd.f32 %v9366_v2, %v9326_v4 }
 0x925   : > { %10177 = vmatmul.f32.gmra.mxu3 %v14915_v52 }
 0x926   : > { %10143 = vmatmul.f32.gmra.mxu2 %v14915_v52 }
 0x928   : > { %v9522_v58 = vpop.f32.mrf.mxu3 }
 0x929   : > { %v9404_v49 = vpop.f32.mrf.mxu0  ;;  %v9434_v33 = vpop.f32.mrf.mxu1 }
 0x92a   : > { %v9435_v59 = vadd.f32 %v9434_v33, %v9401_v15  ;;  %v9476_v18 = vpop.f32.mrf.mxu2  ;;  %v9405_v26 = vadd.f32 %v9404_v49, %v9367_v19 }
 0x92b   : > { %v9523_v57 = vadd.f32 %v9522_v58, %v9476_v18 }
 0x92c   : > { %v14033_v7 = vadd.f32 %v9435_v59, %v13956_v21  ;;  %10068 = vmatmul.f32.gmra.mxu0 %v14917_v0  ;;  %10103 = vmatmul.f32.gmra.mxu1 %v14912_v8 }
 0x92d   : > { %10181 = vmatmul.f32.gmra.mxu3 %v14919_v29 }
 0x92e   : > { %10147 = vmatmul.f32.gmra.mxu2 %v14919_v29 }
 0x930   : > { %v9526_v52 = vpop.f32.mrf.mxu3 }
 0x931   : > { %v9408_v24 = vpop.f32.mrf.mxu0  ;;  %v9438_v5 = vpop.f32.mrf.mxu1 }
 0x932   : > { %v9409_v30 = vadd.f32 %v9408_v24, %v9373_v51  ;;  %v9439_v3 = vadd.f32 %v9438_v5, %v9405_v26  ;;  %v9484_v40 = vpop.f32.mrf.mxu2 }
 0x933   : > { %v9527_v10 = vadd.f32 %v9526_v52, %v9484_v40 }
 0x934   : > { %v14040_v21 = vadd.f32 %v9439_v3, %v13963_v27  ;;  %10073 = vmatmul.f32.gmra.mxu0 %v14921_v56  ;;  %10109 = vmatmul.f32.gmra.mxu1 %v14916_v36 }
 0x935   : > { %10185 = vmatmul.f32.gmra.mxu3 %v14922_v16 }
 0x936   : > { %10151 = vmatmul.f32.gmra.mxu2 %v14922_v16 }
 0x938   : > { %v9530_v8 = vpop.f32.mrf.mxu3 }
 0x939   : > { %v9442_v0 = vpop.f32.mrf.mxu1  ;;  %v9554_v29 = vpop.f32.mrf.mxu0 }
 0x93a   : > { %v9443_v2 = vadd.f32 %v9442_v0, %v9409_v30  ;;  %v9492_v55 = vpop.f32.mrf.mxu2  ;;  %v9555_v9 = vadd.f32 %v9554_v29, %v9519_v25 }
 0x93b   : > { %v9531_v37 = vadd.f32 %v9530_v8, %v9492_v55 }
 0x93c   : > { %v14047_v12 = vadd.f32 %v9443_v2, %v13970_v32  ;;  %10115 = vmatmul.f32.gmra.mxu1 %v14920_v34 }
 0x940   : > { %v9669_v27 = vpop.f32.mrf.mxu3 }
 0x941   : > { %v9559_v56 = vpop.f32.mrf.mxu0  ;;  %v9593_v47 = vpop.f32.mrf.mxu1 }
 0x942   : > { %v9560_v36 = vadd.f32 %v9559_v56, %v9523_v57  ;;  %v9594_v62 = vadd.f32 %v9593_v47, %v9555_v9  ;;  %v9635_v54 = vpop.f32.mrf.mxu2 }
 0x944   : > { %v9636_v48 = vadd.f32 %v9635_v54, %v9594_v62 }
 0x946   : > { %v9670_v16 = vadd.f32 %v9669_v27, %v9636_v48 }
 0x948   : > { %v14051_v46 = vadd.f32 %v9670_v16, %v13986_v31  ;;  %v9673_v23 = vpop.f32.mrf.mxu3 }
 0x949   : > { %v9564_v17 = vpop.f32.mrf.mxu0  ;;  %v9599_v28 = vpop.f32.mrf.mxu1 }
 0x94a   : > { %v9565_v13 = vadd.f32 %v9564_v17, %v9527_v10  ;;  %v9600_v51 = vadd.f32 %v9599_v28, %v9560_v36  ;;  %v9639_v32 = vpop.f32.mrf.mxu2 }
 0x94c   : > { %v9640_v50 = vadd.f32 %v9639_v32, %v9600_v51 }
 0x94e   : > { %v9674_v41 = vadd.f32 %v9673_v23, %v9640_v50 }
 0x950   : > { %v14054_v34 = vadd.f32 %v9674_v41, %v13993_v11  ;;  %v9677_v60 = vpop.f32.mrf.mxu3 }
 0x951   : > { %v9569_v39 = vpop.f32.mrf.mxu0  ;;  %v9605_v22 = vpop.f32.mrf.mxu1 }
 0x952   : > { %v9570_v53 = vadd.f32 %v9569_v39, %v9531_v37  ;;  %v9606_v44 = vadd.f32 %v9605_v22, %v9565_v13  ;;  %v9643_v25 = vpop.f32.mrf.mxu2 }
 0x954   : > { %v9644_v6 = vadd.f32 %v9643_v25, %v9606_v44 }
 0x956   : > { %v9678_v31 = vadd.f32 %v9677_v60, %v9644_v6 }
 0x958   : > { %v14057_v45 = vadd.f32 %v9678_v31, %v14000_v38  ;;  %v9681_v15 = vpop.f32.mrf.mxu3 }
 0x959   : > { %v9611_v58 = vpop.f32.mrf.mxu1  ;;  %v9734_v49 = vpop.f32.mrf.mxu0 }
 0x95a   : > { %v9612_v33 = vadd.f32 %v9611_v58, %v9570_v53  ;;  %v9647_v4 = vpop.f32.mrf.mxu2 }
 0x95c   : > { %v9648_v59 = vadd.f32 %v9647_v4, %v9612_v33 }
 0x95e   : > { %v9682_v18 = vadd.f32 %v9681_v15, %v9648_v59 }
 0x960   : > { %v14060_v11 = vadd.f32 %v9682_v18, %v14007_v61  ;;  %v9859_v57 = vpop.f32.mrf.mxu3 }
 0x961   : > { %v9742_v19 = vpop.f32.mrf.mxu0  ;;  %v9784_v26 = vpop.f32.mrf.mxu1 }
 0x962   : > { %v9820_v52 = vpop.f32.mrf.mxu2  ;;  %v9785_v47 = vadd.f32 %v9784_v26, %v9734_v49 }
 0x964   : > { %v9821_v54 = vadd.f32 %v9820_v52, %v9785_v47 }
 0x966   : > { %v9860_v51 = vadd.f32 %v9859_v57, %v9821_v54 }
 0x968   : > { %v9865_v24 = vpop.f32.mrf.mxu3 }
 0x969   : > { %v9750_v5 = vpop.f32.mrf.mxu0  ;;  %v9788_v30 = vpop.f32.mrf.mxu1 }
 0x96a   : > { %v9825_v3 = vpop.f32.mrf.mxu2  ;;  %v9789_v27 = vadd.f32 %v9788_v30, %v9742_v19 }
 0x96c   : > { %v9826_v36 = vadd.f32 %v9825_v3, %v9789_v27 }
 0x96e   : > { %v9866_v28 = vadd.f32 %v9865_v24, %v9826_v36 }
 0x970   : > { %v9871_v38 = vpop.f32.mrf.mxu3 }
 0x971   : > { %v9758_v40 = vpop.f32.mrf.mxu0  ;;  %v9792_v10 = vpop.f32.mrf.mxu1 }
 0x972   : > { %v9830_v8 = vpop.f32.mrf.mxu2  ;;  %v9793_v62 = vadd.f32 %v9792_v10, %v9750_v5 }
 0x974   : > { %v9831_v17 = vadd.f32 %v9830_v8, %v9793_v62 }
 0x976   : > { %v9872_v60 = vadd.f32 %v9871_v38, %v9831_v17 }
 0x978   : > { %v9877_v0 = vpop.f32.mrf.mxu3 }
 0x979   : > { %v9796_v29 = vpop.f32.mrf.mxu1  ;;  %v9901_v2 = vpop.f32.mrf.mxu0 }
 0x97a   : > { %v9835_v55 = vpop.f32.mrf.mxu2  ;;  %v9797_v50 = vadd.f32 %v9796_v29, %v9758_v40  ;;  %v9902_v41 = vadd.f32 %v9901_v2, %v9860_v51 }
 0x97c   : > { %v9836_v31 = vadd.f32 %v9835_v55, %v9797_v50 }
 0x97e   : > { %v9878_v18 = vadd.f32 %v9877_v0, %v9836_v31 }
 0x980   : > { %v14062_v9 = vpop.f32.mrf.mxu3 }
 0x981   : > { %v9905_v61 = vpop.f32.mrf.mxu0  ;;  %v9935_v37 = vpop.f32.mrf.mxu1 }
 0x982   : > { %v14064_v56 = vpop.f32.mrf.mxu2  ;;  %v9906_v32 = vadd.f32 %v9905_v61, %v9866_v28  ;;  %v9936_v22 = vadd.f32 %v9935_v37, %v9902_v41 }
 0x983   : > { %v10024_v28 = vadd.f32 %v14062_v9, %v14064_v56 }
 0x984   : > { %v10189_v33 = vadd.f32 %v9936_v22, %v14026_v42 }
 0x986   : > { %v10197_v19 = vadd.f32 %v10189_v33, %v12936_v1 }
 0x988   : > { %v10027_v48 = vpop.f32.mrf.mxu3  ;;  %v10205_v42 = vmax.f32 %v10197_v19, 0.0 }
 0x989   : > { %v9909_v16 = vpop.f32.mrf.mxu0  ;;  %v9939_v23 = vpop.f32.mrf.mxu1 }
 0x98a   : > { %v9981_v13 = vpop.f32.mrf.mxu2  ;;  %v9940_v39 = vadd.f32 %v9939_v23, %v9906_v32  ;;  %v9910_v53 = vadd.f32 %v9909_v16, %v9872_v60  ;;  %v14086_v0 = vand.u32 4294901760, %v10205_v42 }
 0x98b   : > { %v10028_v16 = vadd.f32 %v10027_v48, %v9981_v13 }
 0x98c   : > { %v10191_v15 = vadd.f32 %v9940_v39, %v14033_v7  ;;  %v10273_v62 = vsub.f32 %v10205_v42, %v14086_v0 }
 0x98e   : > { %v10199_v59 = vadd.f32 %v10191_v15, %v12933_v43  ;;  %v10274_v41 = vand.u32 4294901760, %v10273_v62 }
 0x990   : > { %v14066_v44 = vpop.f32.mrf.mxu3  ;;  %v10207_v30 = vmax.f32 %v10199_v59, 0.0  ;;  %v10275_v31 = vsub.f32 %v10273_v62, %v10274_v41 }
 0x991   : > { %v9913_v25 = vpop.f32.mrf.mxu0  ;;  %v9943_v6 = vpop.f32.mrf.mxu1 }
 0x992   : > { %v9944_v58 = vadd.f32 %v9943_v6, %v9910_v53  ;;  %v14069_v49 = vpop.f32.mrf.mxu2  ;;  %v9914_v26 = vadd.f32 %v9913_v25, %v9878_v18  ;;  %v14083_v10 = vand.u32 4294901760, %v10207_v30 }
 0x993   : > { %v10032_v15 = vadd.f32 %v14066_v44, %v14069_v49 }
 0x994   : > { %v10193_v4 = vadd.f32 %v9944_v58, %v14040_v21  ;;  %v10267_v36 = vsub.f32 %v10207_v30, %v14083_v10  ;;  %v14924_v30 = vld [vmem:[#allocation179_spill] sm:$0xff] }
 0x996   : > { %v10201_v57 = vadd.f32 %v10193_v4, %v12915_v14  ;;  %v10268_v17 = vand.u32 4294901760, %v10267_v36  ;;  %v14923_v4 = vld [vmem:[#allocation180_spill] sm:$0xff] }
 0x998   : > { %v10209_v52 = vmax.f32 %v10201_v57, 0.0  ;;  %v14076_v24 = vpop.f32.mrf.mxu3  ;;  %v10269_v56 = vsub.f32 %v10267_v36, %v10268_v17  ;;  %v10276_v57 = vand.u32 4294901760, %v10275_v31 }
 0x999   : > { %v9947_v5 = vpop.f32.mrf.mxu1  ;;  %v10059_v7 = vpop.f32.mrf.mxu0 }
 0x99a   : > { %v9948_v3 = vadd.f32 %v9947_v5, %v9914_v26  ;;  %v14078_v38 = vpop.f32.mrf.mxu2  ;;  %v14080_v40 = vand.u32 4294901760, %v10209_v52  ;;  %v10060_v13 = vadd.f32 %v10059_v7, %v10024_v28  ;;  %v10270_v33 = vand.u32 4294901760, %v10269_v56 }
 0x99b   : > { %v10036_v42 = vadd.f32 %v14076_v24, %v14078_v38 }
 0x99c   : > { %v10195_v21 = vadd.f32 %v9948_v3, %v14047_v12  ;;  %v10261_v55 = vsub.f32 %v10209_v52, %v14080_v40 }
 0x99e   : > { %v10203_v8 = vadd.f32 %v10195_v21, %v12953_v35  ;;  %v10262_v54 = vand.u32 4294901760, %v10261_v55 }
 0x9a0   : > { %v10211_v29 = vmax.f32 %v10203_v8, 0.0  ;;  %v14088_v2 = vpop.f32.mrf.mxu3  ;;  %v10263_v50 = vsub.f32 %v10261_v55, %v10262_v54 }
 0x9a1   : > { %v10064_v61 = vpop.f32.mrf.mxu0  ;;  %v10098_v37 = vpop.f32.mrf.mxu1 }
 0x9a2   : > { %v14091_v27 = vand.u32 4294901760, %v10211_v29  ;;  %v10140_v47 = vpop.f32.mrf.mxu2  ;;  %v10065_v51 = vadd.f32 %v10064_v61, %v10028_v16  ;;  %v10099_v25 = vadd.f32 %v10098_v37, %v10060_v13  ;;  %v10264_v6 = vand.u32 4294901760, %v10263_v50 }
 0x9a4   : > { %v10255_v12 = vsub.f32 %v10211_v29, %v14091_v27  ;;  %10226 = vmatpush.msrb.mxu0 %v14091_v27  ;;  %10326 = vmatpush.msrb.mxu3 %v14091_v27  ;;  %v10141_v59 = vadd.f32 %v10140_v47, %v10099_v25 }
 0x9a6   : > { %10228 = vmatpush.msrb.mxu0 %v14080_v40  ;;  %10297 = vmatpush.msrb.mxu2 %v10255_v12  ;;  %v10256_v23 = vand.u32 4294901760, %v10255_v12  ;;  %v10175_v44 = vadd.f32 %v14088_v2, %v10141_v59 }
 0x9a7   : > { %10328 = vmatpush.msrb.mxu3 %v14080_v40 }
 0x9a8   : > { %10230 = vmatpush.msrb.mxu0 %v14083_v10  ;;  %10300 = vmatpush.msrb.mxu2 %v10261_v55  ;;  %v10257_v32 = vsub.f32 %v10255_v12, %v10256_v23  ;;  %v10178_v60 = vpop.f32.mrf.mxu3  ;;  %v10190_v29 = vadd.f32 %v10175_v44, %v14051_v46 }
 0x9a9   : > { %10330 = vmatpush.msrb.mxu3 %v14083_v10  ;;  %v10104_v48 = vpop.f32.mrf.mxu1  ;;  %v10069_v53 = vpop.f32.mrf.mxu0 }
 0x9aa   : > { %v10105_v39 = vadd.f32 %v10104_v48, %v10065_v51  ;;  %v10144_v22 = vpop.f32.mrf.mxu2  ;;  %10232 = vmatpush.msrb.mxu0 %v14086_v0  ;;  %10303 = vmatpush.msrb.mxu2 %v10267_v36  ;;  %v10258_v9 = vand.u32 4294901760, %v10257_v32  ;;  %v10070_v18 = vadd.f32 %v10069_v53, %v10032_v15 }
 0x9ab   : > { %10332 = vmatpush.msrb.mxu3 %v14086_v0  ;;  %10238 = vmatmul.f32.vlgmr.msrb.gmra.mxu0 %v13000_v20 }
 0x9ac   : > { %10355 = vmatpush.msra.mxu0 %v10256_v23  ;;  %10259 = vmatpush.msrb.mxu1 %v10258_v9  ;;  %v10145_v58 = vadd.f32 %v10144_v22, %v10105_v39 }
 0x9ad   : > { %10306 = vmatpush.msrb.mxu2 %v10273_v62  ;;  %10336 = vmatmul.f32.vlgmr.msrb.gmra.mxu3 %v12961_v63 }
 0x9ae   : > { %10359 = vmatpush.msra.mxu0 %v10262_v54  ;;  %10265 = vmatpush.msrb.mxu1 %v10264_v6  ;;  %v10179_v26 = vadd.f32 %v10178_v60, %v10145_v58  ;;  %v14925_v6 = vld [vmem:[#allocation162_spill] sm:$0xff] }
 0x9af   : > { %10309 = vmatmul.f32.vlgmr.msrb.gmra.mxu2 %v14923_v4 }
 0x9b0   : > { %10363 = vmatpush.msra.mxu0 %v10268_v17  ;;  %10271 = vmatpush.msrb.mxu1 %v10270_v33  ;;  %v10182_v7 = vpop.f32.mrf.mxu3  ;;  %v10192_v21 = vadd.f32 %v10179_v26, %v14054_v34  ;;  %v10198_v34 = vadd.f32 %v10190_v29, %v12936_v1 }
 0x9b1   : > { %v10110_v19 = vpop.f32.mrf.mxu1  ;;  %v10074_v3 = vpop.f32.mrf.mxu0 }
 0x9b2   : > { %v10111_v52 = vadd.f32 %v10110_v19, %v10070_v18  ;;  %v10148_v5 = vpop.f32.mrf.mxu2  ;;  %10367 = vmatpush.msra.mxu0 %v10274_v41  ;;  %10277 = vmatpush.msrb.mxu1 %v10276_v57  ;;  %v10075_v55 = vadd.f32 %v10074_v3, %v10036_v42  ;;  %v10200_v37 = vadd.f32 %v10192_v21, %v12933_v43  ;;  %v10206_v12 = vmax.f32 %v10198_v34, 0.0 }
 0x9b3   : > { %10279 = vmatmul.f32.vlgmr.msrb.gmra.mxu1 %v14924_v30  ;;  %10369 = vmatmul.f32.vlgmr.msra.gmra.mxu0 %v14924_v30 }
 0x9b4   : > { %v10149_v49 = vadd.f32 %v10148_v5, %v10111_v52  ;;  %10386 = vmatpush.msra.mxu1 %v14091_v27  ;;  %v10208_v36 = vmax.f32 %v10200_v37, 0.0 }
 0x9b6   : > { %v10183_v8 = vadd.f32 %v10182_v7, %v10149_v49  ;;  %10388 = vmatpush.msra.mxu1 %v14080_v40 }
 0x9b8   : > { %v10194_v61 = vadd.f32 %v10183_v8, %v14057_v45  ;;  %10390 = vmatpush.msra.mxu1 %v14083_v10  ;;  %v10186_v40 = vpop.f32.mrf.mxu3 }
 0x9b9   : > { %v10116_v2 = vpop.f32.mrf.mxu1 }
 0x9ba   : > { %v10202_v27 = vadd.f32 %v10194_v61, %v12915_v14  ;;  %v10117_v47 = vadd.f32 %v10116_v2, %v10075_v55  ;;  %10392 = vmatpush.msra.mxu1 %v14086_v0  ;;  %v10152_v24 = vpop.f32.mrf.mxu2  ;;  %v10414_v14 = vand.u32 4294901760, %v10208_v36  ;;  %v10416_v0 = vand.u32 4294901760, %v10206_v12  ;;  %v14926_v55 = vld [vmem:[#allocation169_spill] sm:$0xff] }
 0x9bb   : > { %10394 = vmatmul.f32.vlgmr.msra.gmra.mxu1 %v14924_v30 }
 0x9bc   : > { %v10210_v38 = vmax.f32 %v10202_v27, 0.0  ;;  %v10153_v46 = vadd.f32 %v10152_v24, %v10117_v47  ;;  %v10452_v17 = vsub.f32 %v10208_v36, %v10414_v14  ;;  %v10458_v28 = vsub.f32 %v10206_v12, %v10416_v0 }
 0x9be   : > { %v10187_v45 = vadd.f32 %v10186_v40, %v10153_v46  ;;  %v10412_v62 = vand.u32 4294901760, %v10210_v38  ;;  %v10453_v50 = vand.u32 4294901760, %v10452_v17  ;;  %v10459_v41 = vand.u32 4294901760, %v10458_v28 }
 0x9c0   : > { %v10196_v10 = vadd.f32 %v10187_v45, %v14060_v11  ;;  %v10446_v16 = vsub.f32 %v10210_v38, %v10412_v62  ;;  %v10454_v48 = vsub.f32 %v10452_v17, %v10453_v50  ;;  %v10460_v39 = vsub.f32 %v10458_v28, %v10459_v41 }
 0x9c2   : > { %v10204_v43 = vadd.f32 %v10196_v10, %v12953_v35  ;;  %v10447_v51 = vand.u32 4294901760, %v10446_v16  ;;  %v10455_v22 = vand.u32 4294901760, %v10454_v48  ;;  %v10461_v9 = vand.u32 4294901760, %v10460_v39 }
 0x9c4   : > { %v10212_v54 = vmax.f32 %v10204_v43, 0.0  ;;  %v10448_v35 = vsub.f32 %v10446_v16, %v10447_v51 }
 0x9c6   : > { %v10410_v23 = vand.u32 4294901760, %v10212_v54  ;;  %v10449_v13 = vand.u32 4294901760, %v10448_v35 }
 0x9c8   : > { %10411 = vmatpush.msra.mxu2 %v10410_v23  ;;  %10511 = vmatpush.msrb.mxu1 %v10410_v23  ;;  %v10440_v1 = vsub.f32 %v10212_v54, %v10410_v23  ;;  %v14927_v54 = vld [vmem:[#allocation168_spill] sm:$0xff] }
 0x9ca   : > { %10413 = vmatpush.msra.mxu2 %v10412_v62  ;;  %10482 = vmatpush.msrb.mxu0 %v10440_v1  ;;  %v10441_v32 = vand.u32 4294901760, %v10440_v1 }
 0x9cb   : > { %10513 = vmatpush.msrb.mxu1 %v10412_v62 }
 0x9cc   : > { %10415 = vmatpush.msra.mxu2 %v10414_v14  ;;  %10485 = vmatpush.msrb.mxu0 %v10446_v16  ;;  %v10442_v11 = vsub.f32 %v10440_v1, %v10441_v32 }
 0x9cd   : > { %10515 = vmatpush.msrb.mxu1 %v10414_v14 }
 0x9ce   : > { %10417 = vmatpush.msra.mxu2 %v10416_v0  ;;  %10488 = vmatpush.msrb.mxu0 %v10452_v17  ;;  %v10443_v60 = vand.u32 4294901760, %v10442_v11 }
 0x9cf   : > { %10517 = vmatpush.msrb.mxu1 %v10416_v0  ;;  %10423 = vmatmul.f32.vlgmr.msra.gmra.mxu2 %v13000_v20 }
 0x9d0   : > { %10540 = vmatpush.msrb.mxu2 %v10441_v32  ;;  %10444 = vmatpush.msra.mxu3 %v10443_v60 }
 0x9d1   : > { %10491 = vmatpush.msrb.mxu0 %v10458_v28  ;;  %10521 = vmatmul.f32.vlgmr.msrb.gmra.mxu1 %v12961_v63 }
 0x9d2   : > { %10544 = vmatpush.msrb.mxu2 %v10447_v51  ;;  %10450 = vmatpush.msra.mxu3 %v10449_v13 }
 0x9d3   : > { %10494 = vmatmul.f32.vlgmr.msrb.gmra.mxu0 %v14923_v4 }
 0x9d4   : > { %10548 = vmatpush.msrb.mxu2 %v10453_v50  ;;  %10456 = vmatpush.msra.mxu3 %v10455_v22 }
 0x9d6   : > { %10552 = vmatpush.msrb.mxu2 %v10459_v41  ;;  %10462 = vmatpush.msra.mxu3 %v10461_v9 }
 0x9d7   : > { %10464 = vmatmul.f32.vlgmr.msra.gmra.mxu3 %v14924_v30  ;;  %10554 = vmatmul.f32.vlgmr.msrb.gmra.mxu2 %v14924_v30 }
 0x9d8   : > { %10571 = vmatpush.msrb.mxu3 %v10410_v23 }
 0x9da   : > { %10573 = vmatpush.msrb.mxu3 %v10412_v62 }
 0x9dc   : > { %10575 = vmatpush.msrb.mxu3 %v10414_v14 }
 0x9de   : > { %10577 = vmatpush.msrb.mxu3 %v10416_v0 }
 0x9df   : > { %10579 = vmatmul.f32.vlgmr.msrb.gmra.mxu3 %v14924_v30 }
 0xa28   : > { %v10239_v63 = vpop.f32.mrf.mxu0 }
 0xa29   : > { %v10240_v31 = vadd.f32 %v10239_v63, %v14925_v6 }
 0xa30   : > { %v10280_v20 = vpop.f32.mrf.mxu1  ;;  %v10337_v53 = vpop.f32.mrf.mxu3 }
 0xa31   : > { %v10370_v25 = vpop.f32.mrf.mxu0  ;;  %v10281_v58 = vadd.f32 %v10280_v20, %v10240_v31 }
 0xa32   : > { %v10310_v56 = vpop.f32.mrf.mxu2 }
 0xa33   : > { %v10311_v4 = vadd.f32 %v10310_v56, %v10281_v58 }
 0xa35   : > { %v10338_v52 = vadd.f32 %v10337_v53, %v10311_v4 }
 0xa37   : > { %v10371_v44 = vadd.f32 %v10370_v25, %v10338_v52 }
 0xa38   : > { %v10395_v15 = vpop.f32.mrf.mxu1 }
 0xa39   : > { %v10396_v21 = vadd.f32 %v10395_v15, %v10371_v44 }
 0xa4e   : > { %v10522_v26 = vpop.f32.mrf.mxu1 }
 0xa50   : > { %v10495_v57 = vpop.f32.mrf.mxu0 }
 0xa52   : > { %v10424_v33 = vpop.f32.mrf.mxu2 }
 0xa53   : > { %v10425_v59 = vadd.f32 %v10424_v33, %v14925_v6 }
 0xa5a   : > { %v10465_v18 = vpop.f32.mrf.mxu3  ;;  %v10555_v7 = vpop.f32.mrf.mxu2 }
 0xa5b   : > { %v10466_v19 = vadd.f32 %v10465_v18, %v10425_v59 }
 0xa5d   : > { %v10496_v5 = vadd.f32 %v10495_v57, %v10466_v19 }
 0xa5f   : > { %v10523_v30 = vadd.f32 %v10522_v26, %v10496_v5 }
 0xa61   : > { %v10556_v49 = vadd.f32 %v10555_v7, %v10523_v30 }
 0xa62   : > { %v10580_v3 = vpop.f32.mrf.mxu3 }
 0xa63   : > { %v10581_v42 = vadd.f32 %v10580_v3, %v10556_v49 }
 0xa65   : > { %v10585_v8 = vrot.slane %v10581_v42, 4 }
 0xa67   : > { %v10586_v29 = vsel %vm998_vm3, %v10396_v21, %v10585_v8  ;;  %v14928_v8 = vld [vmem:[#allocation178_spill] sm:$0xff] }
 0xa68   : > { %v10588_v61 = vadd.f32 %v14926_v55, %v10586_v29  ;;  %v14929_v55 = vld [vmem:[#allocation165_spill] sm:$0xff] }
 0xa6a   : > { %10590 = vst [vmem:[#allocation1] ss:$2 sm:$0xff] %v10588_v61 }
 0xa71   : > { %v10591_v2 = vld.sshfl [vmem:[#allocation1] sm:$0xff pattern:$0x75316420]  ;;  %v10592_v37 = vld.sshfl [vmem:[#allocation1 + $0x8] sm:$0xff pattern:$0x75316420] }
 0xa72   : > { %v10595_v27 = vsel %vm998_vm3, %v10591_v2, 0.0  ;;  %v10602_v47 = vsel %vm998_vm3, %v10592_v37, 0.0 }
 0xa73   : > { %v10596_v24 = vrot.slane %v10595_v27, 4  ;;  %v10603_v34 = vrot.slane %v10602_v47, 4 }
 0xa75   : > { %v10597_v38 = vadd.f32 %v10596_v24, %v10595_v27  ;;  %v10604_v46 = vadd.f32 %v10603_v34, %v10602_v47 }
 0xa77   : > { %v10598_v40 = vrot.slane %v10597_v38, 2  ;;  %v10605_v36 = vrot.slane %v10604_v46, 2 }
 0xa79   : > { %v10599_v45 = vadd.f32 %v10598_v40, %v10597_v38  ;;  %v10606_v12 = vadd.f32 %v10605_v36, %v10604_v46 }
 0xa7b   : > { %v10600_v10 = vrot.slane %v10599_v45, 1  ;;  %v10607_v62 = vrot.slane %v10606_v12, 1 }
 0xa7d   : > { %v10601_v43 = vadd.f32 %v10600_v10, %v10599_v45  ;;  %v10608_v14 = vadd.f32 %v10607_v62, %v10606_v12 }
 0xa7f   : > { %v10610_v16 = vmul.f32 %v10608_v14, %v14927_v54  ;;  %v10609_v0 = vmul.f32 %v10601_v43, %v14927_v54 }
 0xa81   : > { %v10613_v23 = vrot.slane %v10610_v16, 4 }
 0xa83   : > { %v10614_v17 = vsel %vm998_vm3, %v10609_v0, %v10613_v23 }
 0xa84   : > { %v10616_v1 = vsub.f32 %v10588_v61, %v10614_v17 }
 0xa86   : > { %v10617_v28 = vmul.f32 %v10616_v1, %v10616_v1 }
 0xa88   : > { %10619 = vst [vmem:[#allocation1] ss:$2 sm:$0xff] %v10617_v28 }
 0xa8f   : > { %v10620_v51 = vld.sshfl [vmem:[#allocation1] sm:$0xff pattern:$0x75316420]  ;;  %v10621_v32 = vld.sshfl [vmem:[#allocation1 + $0x8] sm:$0xff pattern:$0x75316420] }
 0xa90   : > { %v10624_v50 = vsel %vm998_vm3, %v10620_v51, 0.0  ;;  %v10631_v11 = vsel %vm998_vm3, %v10621_v32, 0.0 }
 0xa91   : > { %v10625_v35 = vrot.slane %v10624_v50, 4  ;;  %v10632_v41 = vrot.slane %v10631_v11, 4 }
 0xa93   : > { %v10626_v60 = vadd.f32 %v10625_v35, %v10624_v50  ;;  %v10633_v48 = vadd.f32 %v10632_v41, %v10631_v11 }
 0xa95   : > { %v10627_v13 = vrot.slane %v10626_v60, 2  ;;  %v10634_v39 = vrot.slane %v10633_v48, 2 }
 0xa97   : > { %v10628_v22 = vadd.f32 %v10627_v13, %v10626_v60  ;;  %v10635_v9 = vadd.f32 %v10634_v39, %v10633_v48 }
 0xa99   : > { %v10629_v63 = vrot.slane %v10628_v22, 1  ;;  %v10636_v20 = vrot.slane %v10635_v9, 1 }
 0xa9b   : > { %v10630_v56 = vadd.f32 %v10629_v63, %v10628_v22  ;;  %v10637_v53 = vadd.f32 %v10636_v20, %v10635_v9 }
 0xa9d   : > { %v10638_v25 = vmul.f32 %v10630_v56, %v14927_v54  ;;  %v10639_v6 = vmul.f32 %v10637_v53, %v14927_v54 }
 0xa9f   : > { %v10640_v31 = vadd.f32 1e-05, %v10638_v25  ;;  %v10641_v15 = vadd.f32 1e-05, %v10639_v6 }
 0xaa1   : > { %10956 = vrsqrt.f32 %v10640_v31  ;;  %vm10658_vm7 = vweird.f32 %v10641_v15  ;;  %vm10648_vm9 = vweird.f32 %v10640_v31 }
 0xaa2   : > { %10958 = vrsqrt.f32 %v10641_v15 }
 0xaa7   : > { %v10957_v58 = vpop.eup %10956 }
 0xaa8   : > { %v10959_v33 = vpop.eup %10958  ;;  %v10643_v4 = vmul.f32 %v10957_v58, %v10640_v31  ;;  %vm10649_vm5 = vweird.f32 %v10957_v58 }
 0xaa9   : > { %v10653_v59 = vmul.f32 %v10959_v33, %v10641_v15  ;;  %vm10659_vm2 = vweird.f32 %v10959_v33  ;;  %vm10650_vm10 = vmor %vm10648_vm9, %vm10649_vm5 }
 0xaaa   : > { %v10644_v18 = vmul.f32 %v10957_v58, %v10643_v4  ;;  %vm10660_vm8 = vmor %vm10658_vm7, %vm10659_vm2 }
 0xaab   : > { %v10654_v57 = vmul.f32 %v10959_v33, %v10653_v59 }
 0xaac   : > { %v10645_v19 = vmul.f32 0.5, %v10644_v18 }
 0xaad   : > { %v10655_v26 = vmul.f32 0.5, %v10654_v57 }
 0xaae   : > { %v10646_v52 = vsub.f32 1.5, %v10645_v19 }
 0xaaf   : > { %v10656_v5 = vsub.f32 1.5, %v10655_v26 }
 0xab0   : > { %v10647_v7 = vmul.f32 %v10957_v58, %v10646_v52 }
 0xab1   : > { %v10657_v30 = vmul.f32 %v10959_v33, %v10656_v5 }
 0xab2   : > { %v10651_v3 = vsel %vm10650_vm10, %v10957_v58, %v10647_v7 }
 0xab3   : > { %v10661_v44 = vsel %vm10660_vm8, %v10959_v33, %v10657_v30 }
 0xab4   : > { %v10664_v49 = vrot.slane %v10661_v44, 4 }
 0xab6   : > { %v10665_v42 = vsel %vm998_vm3, %v10651_v3, %v10664_v49 }
 0xab7   : > { %v10667_v21 = vmul.f32 %v10665_v42, %v10616_v1 }
 0xab9   : > { %v10668_v29 = vmul.f32 %v10667_v21, %v14928_v8 }
 0xabb   : > { %v10669_v61 = vadd.f32 %v10668_v29, %v14929_v55 }
 0xabd   : > { %10862 = vst [vmem:[%s13195_s12 + $0x8] sm:$0xff] %v10669_v61 }
 0xabe   : > { %10997 = shalt.err (!%p10994_p5)
}
 0xabf   : > { %s11068_s21 = smov 128   ;;  %s11069_s12 = smov 8  }
 0xac0   : > { %10872 = dma.vmem_to_hbm [thread:$0]  (%p11155_p4), %s10689_s16, 256, %s10691_s22, %s10673_s30, %s11068_s21, %s11068_s21, %s11069_s12  }
 0xac1 PF: > { %p10878_p6 = scmp.ge.s32.totalorder %s11048_s10, 2  ;;  %s10705_s26 = sand.u32 1, %s11028_s27  }
 0xac2   : > { %s10706_s20 = scalar_lea.sflag [#allocation3], %s10705_s26 }
 0xac3   : > { %p10875_p7 = pnand %p10878_p6, %p11162_p8 }
 0xac5   : > { %p10876_p9 = pneg %p10875_p7 }
 0xac7   : > { %11023 = dma.done.wait (%p10876_p9), %s10706_s20, 256  }
 0xac8   : > { %11025 = vsyncadd (%p10876_p9), %s10706_s20, 4294967040  ;;  %s21_s10 = sadd.s32 1, %s11048_s10   ;;  %s14930_s27 = smov %s11032_s28 }
 0xac9   : > { %p18_p10 = scmp.ge.s32.totalorder %s21_s10, 4   ;;  %s14931_s28 = smov %s11036_s29 }
 0xaca   : > { %s14932_s29 = smov %s11168_s18  ;;  %s14933_s30 = smov %s11044_s9 }
 0xacb   : > { %s14934_s9 = smov %s14936_s13  ;;  %20 = sbr.rel (!%p18_p10) target bundleno = 4 (0x4), region = 107 }
 0xad0   :  { %10712 = vsyncpa [#allocation3], 1 }
 0xad1   :  { %10714 = vsyncpa [#allocation3 + $0x1], 1 }

// kernel: tpu_custom_call.1
= control target key start
LH: loop header
LB: loop body
LE: loop exit
PB: predicated region body
PF: predicated region fallthrough
CT: control target
= control target key end

     0   :  { %13 = vsyncpa [#allocation3], 0  ;;  %s4047_s0 = inlined_call_operand.vmem [shape: f32[2,2,4,256], index: 0, kind: input, shape index: {}]   ;;  %s4048_s1 = inlined_call_operand.vmem [shape: f32[8,256], index: 1, kind: input, shape index: {}]   ;;  %s4049_s2 = inlined_call_operand.vmem [shape: f32[2,32,20], index: 2, kind: input, shape index: {}]   ;;  %s4050_s3 = inlined_call_operand.vmem [shape: f32[2,32,1], index: 3, kind: input, shape index: {}]   ;;  %s4051_s4 = inlined_call_operand.vmem [shape: f32[2,4,32], index: 4, kind: input, shape index: {}]   ;;  %s4052_s5 = inlined_call_operand.vmem [shape: f32[2,4,1], index: 5, kind: input, shape index: {}]   ;;  %s4053_s6 = inlined_call_operand.vmem [shape: f32[2,4,1], index: 6, kind: input, shape index: {}]   ;;  %s4054_s7 = inlined_call_operand.vmem [shape: f32[2,4,1], index: 7, kind: input, shape index: {}]   ;;  %s4055_s8 = inlined_call_operand.hbm [shape: f32[2,2,4,256], index: 8, kind: output, shape index: {}]  }
   0x1   :  { %15 = vsyncpa [#allocation3 + $0x1], 0  ;;  %s3073_s27 = smov 0   ;;  %s3075_s28 = smov 0  }
   0x2   :  { %s3077_s29 = smov 0   ;;  %s3079_s30 = smov 0  }
   0x3   :  { %s3081_s9 = smov 0   ;;  %s3083_s10 = smov 0  }
   0x4 LB: > { %s2625_s11 = sadd.s32 4294967295, %s3006_s10   ;;  %s2626_s12 = sadd.s32 4294967294, %s3006_s10   ;;  %s3006_s10 = sphi %s3083_s10, %s21_s10   ;;  %s3002_s9 = sphi %s3081_s9, %s4283_s9   ;;  %s2998_s30 = sphi %s3079_s30, %s4282_s30   ;;  %s2994_s29 = sphi %s3077_s29, %s4281_s29   ;;  %s2990_s28 = sphi %s3075_s28, %s4280_s28   ;;  %s2986_s27 = sphi %s3073_s27, %s4279_s27  }
   0x5   : > { %s33_s13 = sadd.s32 1, %s3002_s9  ;;  %s247_s14 = sadd.s32 1, %s2994_s29 }
   0x6   : > { %p35_p0 = scmp.ge.s32.totalorder %s33_s13, 2  ;;  %p257_p1 = scmp.ne.s32.totalorder %s2994_s29, %s2990_s28 }
   0x7   : > { %p258_p2 = scmp.eq.s32.totalorder %s2625_s11, 1  ;;  %p263_p3 = scmp.ne.s32.totalorder %s2990_s28, %s2986_s27 }
   0x8   : > { %s4285_s13 = smov (%p35_p0, %s33_s13), 0  ;;  %p264_p5 = scmp.eq.s32.totalorder %s2626_s12, 1 }
   0x9   : > { %p3113_p4 = por %p258_p2, %p257_p1  ;;  %s242_s16 = ssub.s32 %s3002_s9, %s4285_s13 }
   0xa   : > { %p2629_p6 = scmp.ge.s32.totalorder %s3006_s10, 1  ;;  %p245_p7 = scmp.eq.s32.totalorder %s242_s16, 0 }
   0xb   : > { %p3120_p8 = por %p264_p5, %p263_p3  ;;  %p343_p9 = scmp.lt.s32.totalorder %s3006_s10, 3 }
   0xc   : > { %s3126_s18 = scalar_select %p245_p7, %s2994_s29, %s247_s14  }
   0xd   : > { %p344_p10 = pnand %p2629_p6, %p343_p9 }
   0xf   : > { %347 = sbr.rel (%p344_p10) target bundleno = 1275 (0x4fb), region = 52 }
  0x14   : > { %p409_p11 = scmp.lt.s32.totalorder %s2998_s30, 1  ;;  %s3008_s12 = smov 124   ;;  %vm578_vm0 = vcmask 1043456   ;;  %vm569_vm1 = vcmask 31744   ;;  %v471_v27 = vlaneseq  ;;  %v3249_v30 = vld [vmem:[%s4048_s1] sm:$0xff]  ;;  %v3254_v31 = vld [vmem:[%s4048_s1 + $0x8] sm:$0xff] }
  0x15   : > { %s3009_s14 = smov 17   ;;  %s3010_s16 = smov 122   ;;  %4166 = vst [vmem:[#allocation11_spill] sm:$0xff] %v3249_v30  ;;  %v4081_v32 = vperm.slane %v3249_v30, 0  ;;  %v4080_v33 = vperm.slane %v3254_v31, 0  ;;  %vm501_vm3 = vcmask 1041408  }
  0x16   : > { %s3130_s19 = scalar_select %p409_p11, %s2998_s30, 1  ;;  %v3244_v29 = vand.u32 127, %v471_v27  ;;  %4167 = vst [vmem:[#allocation12_spill] sm:$0xff] %v3254_v31  ;;  %vm492_vm4 = vcmask 15360   ;;  %v4079_v41 = vperm.slane %v3249_v30, 1  ;;  %v4078_v42 = vperm.slane %v3254_v31, 1 }
  0x17   : > { %s4064_s22 = smov 15   ;;  %s3013_s23 = smov 120   ;;  %v4075_v53 = vperm.slane %v3249_v30, 2  ;;  %v4074_v54 = vperm.slane %v3254_v31, 2  ;;  %v4077_v62 = vperm.slane %v3249_v30, 3  ;;  %v4076_v63 = vperm.slane %v3254_v31, 3 }
  0x18   : > { %s2832_s20 = sshll.u32 %s3130_s19, 4  ;;  %s2833_s21 = sshll.u32 %s3130_s19, 5  ;;  %4165 = vst [vmem:[#allocation10_spill] sm:$0xff] %v3244_v29  ;;  %vm473_vm2 = vcmp.lt.s32.totalorder %v3244_v29, 17  ;;  %vm650_vm5 = vcmp.lt.s32.totalorder %v3244_v29, 16  ;;  %vm754_vm6 = vcmp.lt.s32.totalorder %v3244_v29, 15 }
  0x19   : > { %s3137_s24 = scalar_lea.vmem %s4047_s0, %s2832_s20  ;;  %s3144_s11 = scalar_lea.vmem %s4049_s2, %s2833_s21  ;;  %vm858_vm7 = vcmp.lt.s32.totalorder %v3244_v29, 1  ;;  %vm962_vm8 = vcmp.lt.s32.totalorder %v3244_v29, 127  ;;  %vm1066_vm9 = vcmp.lt.s32.totalorder %v3244_v29, 113  ;;  %v4070_v27 = vperm.slane %v3254_v31, 5 }
  0x1a   : > { %v3147_v0 = vld [vmem:[%s3137_s24] sm:$0xff]  ;;  %v3155_v2 = vld [vmem:[%s3144_s11 + $0x10] sm:$0xff]  ;;  %v3159_v3 = vld [vmem:[%s3144_s11 + $0x8] sm:$0xff]  ;;  %s3011_s20 = smov 16   ;;  %s4056_s25 = smov 1   ;;  %vm1170_vm10 = vcmp.lt.s32.totalorder %v3244_v29, 112 }
  0x1b   : > { %4160 = vst [vmem:[#allocation5_spill] sm:$0xff] %v3147_v0  ;;  %v3150_v1 = vld [vmem:[%s3144_s11] sm:$0xff]  ;;  %488 = vrot.lane.b32.xlu2 %v3155_v2, %s3008_s12  ;;  %v3165_v6 = vld [vmem:[%s3144_s11 + $0x18] sm:$0xff]  ;;  %s3015_s26 = smov 118   ;;  %vm1274_vm11 = vcmp.lt.s32.totalorder %v3244_v29, 111  ;;  %vm1410_vm12 = vcmask 261120  }
  0x1c   : > { %462 = vst [vmem:[#allocation1] ss:$2 sm:$0xff] %v3147_v0  ;;  %484 = vrot.lane.b32.xlu1 %v3150_v1, %s3008_s12 }
  0x23   : > { %v463_v4 = vld.sshfl [vmem:[#allocation1] sm:$0xff pattern:$0x75316420]  ;;  %v464_v5 = vld.sshfl [vmem:[#allocation1 + $0x8] sm:$0xff pattern:$0x75316420]  ;;  %490 = vrot.lane.b32.xlu2 %v3165_v6, %s3008_s12 }
  0x24   : > { %467 = vrot.lane.b32.xlu0 %v463_v4, %s3009_s14  ;;  %566 = vst [vmem:[#allocation1] ss:$2 sm:$0xff] %v3147_v0  ;;  %486 = vrot.lane.b32.xlu1 %v3159_v3, %s3008_s12  ;;  %s4060_s12 = smov 127  }
  0x2b   : > { %v567_v7 = vld.sshfl [vmem:[#allocation1] sm:$0xff pattern:$0x75316420]  ;;  %v568_v8 = vld.sshfl [vmem:[#allocation1 + $0x8] sm:$0xff pattern:$0x75316420]  ;;  %657 = vrot.lane.b32.xlu2 %v3150_v1, %s3010_s16 }
  0x2c   : > { %469 = vrot.lane.b32.xlu0 %v464_v5, %s3009_s14  ;;  %641 = vst [vmem:[#allocation1] ss:$2 sm:$0xff] %v3147_v0  ;;  %2656 = vmatpush.msk.msra.mxu3 %vm578_vm0, %v568_v8 }
  0x2d   : > { %2651 = vmatpush.msk.msra.mxu2 %vm578_vm0, %v567_v7  ;;  %2657 = vmatmul.msk.f32.vlgmr.msra.gmra.mxu3 %vm569_vm1, %v3150_v1 }
  0x2e   : > { %2652 = vmatmul.msk.f32.vlgmr.msra.gmra.mxu2 %vm569_vm1, %v3150_v1 }
  0x33   : > { %v642_v9 = vld.sshfl [vmem:[#allocation1] sm:$0xff pattern:$0x75316420]  ;;  %v643_v10 = vld.sshfl [vmem:[#allocation1 + $0x8] sm:$0xff pattern:$0x75316420] }
  0x34   : > { %646 = vrot.lane.b32.xlu0 %v642_v9, %s3011_s20  ;;  %648 = vrot.lane.b32.xlu1 %v643_v10, %s3011_s20  ;;  %745 = vst [vmem:[#allocation1] ss:$2 sm:$0xff] %v3147_v0 }
  0x35   : > { %2658 = vmatmul.msk.f32.gmra.mxu3 %vm569_vm1, %v3159_v3 }
  0x36   : > { %2653 = vmatmul.msk.f32.gmra.mxu2 %vm569_vm1, %v3159_v3 }
  0x3b   : > { %v747_v11 = vld.sshfl [vmem:[#allocation1 + $0x8] sm:$0xff pattern:$0x75316420]  ;;  %v746_v12 = vld.sshfl [vmem:[#allocation1] sm:$0xff pattern:$0x75316420] }
  0x3c   : > { %659 = vrot.lane.b32.xlu0 %v3159_v3, %s3010_s16  ;;  %661 = vrot.lane.b32.xlu1 %v3155_v2, %s3010_s16  ;;  %849 = vst [vmem:[#allocation1] ss:$2 sm:$0xff] %v3147_v0 }
  0x3d   : > { %750 = vrot.lane.b32.xlu2 %v746_v12, %s4064_s22  ;;  %2659 = vmatmul.msk.f32.gmra.mxu3 %vm569_vm1, %v3155_v2 }
  0x3e   : > { %2654 = vmatmul.msk.f32.gmra.mxu2 %vm569_vm1, %v3155_v2 }
  0x43   : > { %v850_v13 = vld.sshfl [vmem:[#allocation1] sm:$0xff pattern:$0x75316420]  ;;  %v851_v14 = vld.sshfl [vmem:[#allocation1 + $0x8] sm:$0xff pattern:$0x75316420] }
  0x44   : > { %752 = vrot.lane.b32.xlu0 %v747_v11, %s4064_s22  ;;  %663 = vrot.lane.b32.xlu1 %v3165_v6, %s3010_s16  ;;  %953 = vst [vmem:[#allocation1] ss:$2 sm:$0xff] %v3147_v0  ;;  %s3017_s16 = smov 116  }
  0x45   : > { %761 = vrot.lane.b32.xlu2 %v3150_v1, %s3013_s23  ;;  %2660 = vmatmul.msk.f32.gmra.mxu3 %vm569_vm1, %v3165_v6 }
  0x46   : > { %2655 = vmatmul.msk.f32.gmra.mxu2 %vm569_vm1, %v3165_v6 }
  0x4b   : > { %v955_v15 = vld.sshfl [vmem:[#allocation1 + $0x8] sm:$0xff pattern:$0x75316420]  ;;  %v954_v16 = vld.sshfl [vmem:[#allocation1] sm:$0xff pattern:$0x75316420] }
  0x4c   : > { %854 = vrot.lane.b32.xlu0 %v850_v13, %s4056_s25  ;;  %856 = vrot.lane.b32.xlu1 %v851_v14, %s4056_s25  ;;  %1057 = vst [vmem:[#allocation1] ss:$2 sm:$0xff] %v3147_v0  ;;  %s4062_s25 = smov 113   ;;  %v4073_v13 = vperm.slane %v3249_v30, 4  ;;  %v4072_v14 = vperm.slane %v3254_v31, 4 }
  0x4d   : > { %763 = vrot.lane.b32.xlu2 %v3159_v3, %s3013_s23 }
  0x53   : > { %v1058_v17 = vld.sshfl [vmem:[#allocation1] sm:$0xff pattern:$0x75316420]  ;;  %v1059_v18 = vld.sshfl [vmem:[#allocation1 + $0x8] sm:$0xff pattern:$0x75316420] }
  0x54   : > { %865 = vrot.lane.b32.xlu0 %v3150_v1, %s3015_s26  ;;  %765 = vrot.lane.b32.xlu1 %v3155_v2, %s3013_s23  ;;  %1161 = vst [vmem:[#allocation1] ss:$2 sm:$0xff] %v3147_v0 }
  0x55   : > { %867 = vrot.lane.b32.xlu2 %v3159_v3, %s3015_s26 }
  0x5b   : > { %v1163_v19 = vld.sshfl [vmem:[#allocation1 + $0x8] sm:$0xff pattern:$0x75316420]  ;;  %v1162_v20 = vld.sshfl [vmem:[#allocation1] sm:$0xff pattern:$0x75316420] }
  0x5c   : > { %767 = vrot.lane.b32.xlu0 %v3165_v6, %s3013_s23  ;;  %869 = vrot.lane.b32.xlu1 %v3155_v2, %s3015_s26  ;;  %1265 = vst [vmem:[#allocation1] ss:$2 sm:$0xff] %v3147_v0  ;;  %s3019_s23 = smov 114  }
  0x5d   : > { %958 = vrot.lane.b32.xlu2 %v954_v16, %s4060_s12 }
  0x63   : > { %v1267_v22 = vld.sshfl [vmem:[#allocation1 + $0x8] sm:$0xff pattern:$0x75316420]  ;;  %v1266_v23 = vld.sshfl [vmem:[#allocation1] sm:$0xff pattern:$0x75316420] }
  0x64   : > { %960 = vrot.lane.b32.xlu0 %v955_v15, %s4060_s12  ;;  %871 = vrot.lane.b32.xlu1 %v3165_v6, %s3015_s26  ;;  %s3020_s26 = smov 112   ;;  %s3505_s12 = scalar_lea.vmem %s4050_s3, %s2833_s21 }
  0x65   : > { %969 = vrot.lane.b32.xlu2 %v3150_v1, %s3017_s16  ;;  %s3580_s21 = sshll.u32 %s3130_s19, 2 }
  0x66   : > { %s436_s22 = scalar_lea.vmem %s4052_s5, %s3580_s21  ;;  %s444_s19 = scalar_lea.vmem %s4054_s7, %s3580_s21 }
  0x6c   : > { %1062 = vrot.lane.b32.xlu0 %v1058_v17, %s4062_s25  ;;  %1064 = vrot.lane.b32.xlu1 %v1059_v18, %s4062_s25 }
  0x6d   : > { %971 = vrot.lane.b32.xlu2 %v3159_v3, %s3017_s16 }
  0x74   : > { %1073 = vrot.lane.b32.xlu0 %v3150_v1, %s3019_s23  ;;  %973 = vrot.lane.b32.xlu1 %v3155_v2, %s3017_s16 }
  0x75   : > { %1075 = vrot.lane.b32.xlu2 %v3159_v3, %s3019_s23  ;;  %v3212_v21 = vpop.permute.xlu2 %488 }
  0x76   : > { %4161 = vst [vmem:[#allocation6_spill] sm:$0xff] %v3212_v21 }
  0x7c   : > { %975 = vrot.lane.b32.xlu0 %v3165_v6, %s3017_s16  ;;  %1077 = vrot.lane.b32.xlu1 %v3155_v2, %s3019_s23  ;;  %s4058_s16 = smov 111  }
  0x7d   : > { %1166 = vrot.lane.b32.xlu2 %v1162_v20, %s3020_s26  ;;  %v3226_v24 = vpop.permute.xlu2 %490 }
  0x7e   : > { %4162 = vst [vmem:[#allocation7_spill] sm:$0xff] %v3226_v24 }
  0x84   : > { %1168 = vrot.lane.b32.xlu0 %v1163_v19, %s3020_s26  ;;  %1079 = vrot.lane.b32.xlu1 %v3165_v6, %s3019_s23  ;;  %s3022_s23 = smov 110  }
  0x85   : > { %1177 = vrot.lane.b32.xlu2 %v3150_v1, %s3020_s26  ;;  %v3238_v26 = vpop.permute.xlu2 %657 }
  0x86   : > { %4164 = vst [vmem:[#allocation9_spill] sm:$0xff] %v3238_v26 }
  0x8c   : > { %1272 = vrot.lane.b32.xlu1 %v1267_v22, %s4058_s16  ;;  %1270 = vrot.lane.b32.xlu0 %v1266_v23, %s4058_s16  ;;  %v4071_v23 = vperm.slane %v3249_v30, 5  ;;  %s4220_s16 = smov 127  }
  0x8d   : > { %1179 = vrot.lane.b32.xlu2 %v3159_v3, %s3020_s26 }
  0x8e   : > { %v3236_v25 = vpop.permute.xlu1 %484 }
  0x8f   : > { %4163 = vst [vmem:[#allocation8_spill] sm:$0xff] %v3236_v25 }
  0x94   : > { %1181 = vrot.lane.b32.xlu1 %v3155_v2, %s3020_s26  ;;  %1281 = vrot.lane.b32.xlu0 %v3150_v1, %s3022_s23 }
  0x95   : > { %1283 = vrot.lane.b32.xlu2 %v3159_v3, %s3022_s23 }
  0x96   : > { %v468_v28 = vpop.permute.xlu0 %467  ;;  %v3261_v34 = vpop.permute.xlu1 %486 }
  0x97   : > { %4168 = vst [vmem:[#allocation13_spill] sm:$0xff] %v3261_v34  ;;  %v751_v35 = vpop.permute.xlu2 %750 }
  0x9c   : > { %1183 = vrot.lane.b32.xlu0 %v3165_v6, %s3020_s26  ;;  %1285 = vrot.lane.b32.xlu1 %v3155_v2, %s3022_s23 }
  0x9d   : > { %1287 = vrot.lane.b32.xlu2 %v3165_v6, %s3022_s23 }
  0x9e   : > { %v470_v36 = vpop.permute.xlu0 %469 }
  0x9f   : > { %v474_v37 = vsel %vm473_vm2, %v468_v28, %v470_v36  ;;  %v475_v38 = vsel %vm473_vm2, %v470_v36, %v468_v28  ;;  %v3286_v47 = vpop.permute.xlu2 %761 }
  0xa0   : > { %v478_v39 = vmul.f32 %v4081_v32, %v475_v38  ;;  %v479_v40 = vmul.f32 %v4080_v33, %v474_v37  ;;  %4169 = vst [vmem:[#allocation14_spill] sm:$0xff] %v3286_v47 }
  0xa2   : > { %2641 = vmatpush.msk.msra.mxu0 %vm501_vm3, %v478_v39  ;;  %2646 = vmatpush.msk.msra.mxu1 %vm501_vm3, %v479_v40 }
  0xa3   : > { %2642 = vmatmul.msk.f32.vlgmr.msra.gmra.mxu0 %vm492_vm4, %v3236_v25  ;;  %2647 = vmatmul.msk.f32.vlgmr.msra.gmra.mxu1 %vm492_vm4, %v3236_v25 }
  0xa6   : > { %v647_v43 = vpop.permute.xlu0 %646  ;;  %v649_v44 = vpop.permute.xlu1 %648 }
  0xa7   : > { %v651_v45 = vsel %vm650_vm5, %v647_v43, %v649_v44  ;;  %v652_v46 = vsel %vm650_vm5, %v649_v44, %v647_v43  ;;  %v3302_v52 = vpop.permute.xlu2 %763 }
  0xa8   : > { %v655_v48 = vmul.f32 %v4079_v41, %v652_v46  ;;  %v656_v49 = vmul.f32 %v4078_v42, %v651_v45  ;;  %4172 = vst [vmem:[#allocation17_spill] sm:$0xff] %v3302_v52 }
  0xaa   : > { %2661 = vmatpush.msk.msrb.mxu0 %vm501_vm3, %v655_v48  ;;  %2666 = vmatpush.msk.msrb.mxu1 %vm501_vm3, %v656_v49  ;;  %v4067_v49 = vperm.slane %v3249_v30, 6 }
  0xab   : > { %2643 = vmatmul.msk.f32.gmra.mxu0 %vm492_vm4, %v3261_v34  ;;  %2648 = vmatmul.msk.f32.gmra.mxu1 %vm492_vm4, %v3261_v34 }
  0xae   : > { %v3298_v50 = vpop.permute.xlu0 %659  ;;  %v3300_v51 = vpop.permute.xlu1 %661 }
  0xaf   : > { %4170 = vst [vmem:[#allocation15_spill] sm:$0xff] %v3298_v50  ;;  %v3327_v61 = vpop.permute.xlu2 %867 }
  0xb0   : > { %4171 = vst [vmem:[#allocation16_spill] sm:$0xff] %v3300_v51 }
  0xb1   : > { %4174 = vst [vmem:[#allocation19_spill] sm:$0xff] %v3327_v61 }
  0xb3   : > { %2644 = vmatmul.msk.f32.gmra.mxu0 %vm492_vm4, %v3212_v21  ;;  %2649 = vmatmul.msk.f32.gmra.mxu1 %vm492_vm4, %v3212_v21 }
  0xb6   : > { %v753_v55 = vpop.permute.xlu0 %752  ;;  %v3311_v56 = vpop.permute.xlu1 %663 }
  0xb7   : > { %4173 = vst [vmem:[#allocation18_spill] sm:$0xff] %v3311_v56  ;;  %v755_v57 = vsel %vm754_vm6, %v751_v35, %v753_v55  ;;  %v756_v58 = vsel %vm754_vm6, %v753_v55, %v751_v35  ;;  %v959_v7 = vpop.permute.xlu2 %958  ;;  %v4066_v55 = vperm.slane %v3254_v31, 6 }
  0xb8   : > { %v759_v59 = vmul.f32 %v4075_v53, %v756_v58  ;;  %v760_v60 = vmul.f32 %v4074_v54, %v755_v57 }
  0xba   : > { %2676 = vmatpush.msk.msrb.mxu3 %vm501_vm3, %v760_v60  ;;  %2671 = vmatpush.msk.msrb.mxu2 %vm501_vm3, %v759_v59 }
  0xbb   : > { %2645 = vmatmul.msk.f32.gmra.mxu0 %vm492_vm4, %v3226_v24  ;;  %2650 = vmatmul.msk.f32.gmra.mxu1 %vm492_vm4, %v3226_v24 }
  0xbc   : > { %2672 = vmatmul.msk.f32.vlgmr.msrb.gmra.mxu2 %vm492_vm4, %v3286_v47  ;;  %2677 = vmatmul.msk.f32.vlgmr.msrb.gmra.mxu3 %vm492_vm4, %v3286_v47 }
  0xbe   : > { %v855_v1 = vpop.permute.xlu0 %854  ;;  %v857_v2 = vpop.permute.xlu1 %856 }
  0xbf   : > { %v859_v3 = vsel %vm858_vm7, %v855_v1, %v857_v2  ;;  %v860_v4 = vsel %vm858_vm7, %v857_v2, %v855_v1  ;;  %v3370_v12 = vpop.permute.xlu2 %969 }
  0xc0   : > { %v863_v5 = vmul.f32 %v4077_v62, %v860_v4  ;;  %v864_v6 = vmul.f32 %v4076_v63, %v859_v3  ;;  %4179 = vst [vmem:[#allocation24_spill] sm:$0xff] %v3370_v12  ;;  %v4069_v4 = vperm.slane %v3249_v30, 7 }
  0xc2   : > { %2681 = vmatpush.msk.msra.mxu0 %vm501_vm3, %v863_v5  ;;  %2686 = vmatpush.msk.msra.mxu1 %vm501_vm3, %v864_v6  ;;  %v4068_v5 = vperm.slane %v3254_v31, 7 }
  0xc3   : > { %2662 = vmatmul.msk.f32.vlgmr.msrb.gmra.mxu0 %vm492_vm4, %v3238_v26  ;;  %2667 = vmatmul.msk.f32.vlgmr.msrb.gmra.mxu1 %vm492_vm4, %v3238_v26 }
  0xc4   : > { %2673 = vmatmul.msk.f32.gmra.mxu2 %vm492_vm4, %v3302_v52  ;;  %2678 = vmatmul.msk.f32.gmra.mxu3 %vm492_vm4, %v3302_v52 }
  0xc6   : > { %v3354_v8 = vpop.permute.xlu0 %865  ;;  %v3356_v9 = vpop.permute.xlu1 %765 }
  0xc7   : > { %4175 = vst [vmem:[#allocation20_spill] sm:$0xff] %v3354_v8  ;;  %v3393_v22 = vpop.permute.xlu2 %971 }
  0xc8   : > { %4176 = vst [vmem:[#allocation21_spill] sm:$0xff] %v3356_v9 }
  0xc9   : > { %4181 = vst [vmem:[#allocation26_spill] sm:$0xff] %v3393_v22 }
  0xcb   : > { %2663 = vmatmul.msk.f32.gmra.mxu0 %vm492_vm4, %v3298_v50  ;;  %2668 = vmatmul.msk.f32.gmra.mxu1 %vm492_vm4, %v3298_v50 }
  0xcc   : > { %2674 = vmatmul.msk.f32.gmra.mxu2 %vm492_vm4, %v3356_v9  ;;  %2679 = vmatmul.msk.f32.gmra.mxu3 %vm492_vm4, %v3356_v9 }
  0xce   : > { %v3366_v10 = vpop.permute.xlu0 %767  ;;  %v3368_v11 = vpop.permute.xlu1 %869 }
  0xcf   : > { %4177 = vst [vmem:[#allocation22_spill] sm:$0xff] %v3366_v10  ;;  %v3422_v40 = vpop.permute.xlu2 %1075 }
  0xd0   : > { %4178 = vst [vmem:[#allocation23_spill] sm:$0xff] %v3368_v11 }
  0xd1   : > { %4182 = vst [vmem:[#allocation27_spill] sm:$0xff] %v3422_v40 }
  0xd3   : > { %2664 = vmatmul.msk.f32.gmra.mxu0 %vm492_vm4, %v3300_v51  ;;  %2669 = vmatmul.msk.f32.gmra.mxu1 %vm492_vm4, %v3300_v51 }
  0xd4   : > { %2675 = vmatmul.msk.f32.gmra.mxu2 %vm492_vm4, %v3366_v10  ;;  %2680 = vmatmul.msk.f32.gmra.mxu3 %vm492_vm4, %v3366_v10 }
  0xd6   : > { %v961_v15 = vpop.permute.xlu0 %960  ;;  %v3383_v16 = vpop.permute.xlu1 %871 }
  0xd7   : > { %4180 = vst [vmem:[#allocation25_spill] sm:$0xff] %v3383_v16  ;;  %v963_v17 = vsel %vm962_vm8, %v959_v7, %v961_v15  ;;  %v964_v18 = vsel %vm962_vm8, %v961_v15, %v959_v7  ;;  %v1167_v45 = vpop.permute.xlu2 %1166 }
  0xd8   : > { %v967_v19 = vmul.f32 %v4073_v13, %v963_v17  ;;  %v968_v20 = vmul.f32 %v4072_v14, %v964_v18  ;;  %v455_v14 = vld [vmem:[%s436_s22] sm:$0xf] }
  0xda   : > { %2696 = vmatpush.msk.msra.mxu3 %vm501_vm3, %v968_v20  ;;  %2691 = vmatpush.msk.msra.mxu2 %vm501_vm3, %v967_v19 }
  0xdb   : > { %2665 = vmatmul.msk.f32.gmra.mxu0 %vm492_vm4, %v3311_v56  ;;  %2670 = vmatmul.msk.f32.gmra.mxu1 %vm492_vm4, %v3311_v56 }
  0xdc   : > { %2692 = vmatmul.msk.f32.vlgmr.msra.gmra.mxu2 %vm492_vm4, %v3370_v12  ;;  %2697 = vmatmul.msk.f32.vlgmr.msra.gmra.mxu3 %vm492_vm4, %v3370_v12 }
  0xde   : > { %v1063_v28 = vpop.permute.xlu0 %1062  ;;  %v1065_v35 = vpop.permute.xlu1 %1064 }
  0xdf   : > { %v1067_v36 = vsel %vm1066_vm9, %v1063_v28, %v1065_v35  ;;  %v1068_v37 = vsel %vm1066_vm9, %v1065_v35, %v1063_v28  ;;  %v3461_v1 = vpop.permute.xlu2 %1177  ;;  %v3023_v28 = vmov 0  }
  0xe0   : > { %v1071_v38 = vmul.f32 %v4071_v23, %v1067_v36  ;;  %v1072_v39 = vmul.f32 %v4070_v27, %v1068_v37  ;;  %4188 = vst [vmem:[#allocation33_spill] sm:$0xff] %v3461_v1  ;;  %2912 = vset.pattern.permute.xlu1 %v3023_v28  ;;  %2911 = vset.pattern.permute.xlu0 %v3023_v28  ;;  %v452_v36 = vld [vmem:[%s3505_s12 + $0x10] sm:$0xff] }
  0xe1   : > { %2913 = vset.pattern.permute.xlu2 %v3023_v28  ;;  %1381 = vperm.xlu1 %2912, %v452_v36  }
  0xe2   : > { %2701 = vmatpush.msk.msrb.mxu0 %vm501_vm3, %v1071_v38  ;;  %2706 = vmatpush.msk.msrb.mxu1 %vm501_vm3, %v1072_v39  ;;  %v450_v38 = vld [vmem:[%s3505_s12] sm:$0xff] }
  0xe3   : > { %2682 = vmatmul.msk.f32.vlgmr.msra.gmra.mxu0 %vm492_vm4, %v3354_v8  ;;  %2687 = vmatmul.msk.f32.vlgmr.msra.gmra.mxu1 %vm492_vm4, %v3354_v8 }
  0xe4   : > { %2693 = vmatmul.msk.f32.gmra.mxu2 %vm492_vm4, %v3393_v22  ;;  %2698 = vmatmul.msk.f32.gmra.mxu3 %vm492_vm4, %v3393_v22 }
  0xe6   : > { %v3428_v43 = vpop.permute.xlu0 %1073  ;;  %v3430_v44 = vpop.permute.xlu1 %973 }
  0xe7   : > { %4183 = vst [vmem:[#allocation28_spill] sm:$0xff] %v3428_v43  ;;  %v3488_v20 = vpop.permute.xlu2 %1179 }
  0xe8   : > { %4184 = vst [vmem:[#allocation29_spill] sm:$0xff] %v3430_v44 }
  0xe9   : > { %4189 = vst [vmem:[#allocation34_spill] sm:$0xff] %v3488_v20  ;;  %1371 = vperm.xlu1 %2912, %v450_v38  }
  0xeb   : > { %2683 = vmatmul.msk.f32.gmra.mxu0 %vm492_vm4, %v3327_v61  ;;  %2688 = vmatmul.msk.f32.gmra.mxu1 %vm492_vm4, %v3327_v61 }
  0xec   : > { %2694 = vmatmul.msk.f32.gmra.mxu2 %vm492_vm4, %v3430_v44  ;;  %2699 = vmatmul.msk.f32.gmra.mxu3 %vm492_vm4, %v3430_v44 }
  0xee   : > { %v3440_v46 = vpop.permute.xlu0 %975  ;;  %v3442_v48 = vpop.permute.xlu1 %1077 }
  0xef   : > { %4185 = vst [vmem:[#allocation30_spill] sm:$0xff] %v3440_v46 }
  0xf0   : > { %4186 = vst [vmem:[#allocation31_spill] sm:$0xff] %v3442_v48 }
  0xf3   : > { %2684 = vmatmul.msk.f32.gmra.mxu0 %vm492_vm4, %v3368_v11  ;;  %2689 = vmatmul.msk.f32.gmra.mxu1 %vm492_vm4, %v3368_v11 }
  0xf4   : > { %2695 = vmatmul.msk.f32.gmra.mxu2 %vm492_vm4, %v3440_v46  ;;  %2700 = vmatmul.msk.f32.gmra.mxu3 %vm492_vm4, %v3440_v46 }
  0xf6   : > { %v1169_v57 = vpop.permute.xlu0 %1168  ;;  %v3455_v58 = vpop.permute.xlu1 %1079 }
  0xf7   : > { %4187 = vst [vmem:[#allocation32_spill] sm:$0xff] %v3455_v58  ;;  %v1171_v59 = vsel %vm1170_vm10, %v1167_v45, %v1169_v57  ;;  %v1172_v60 = vsel %vm1170_vm10, %v1169_v57, %v1167_v45  ;;  %v3535_v45 = vpop.f32.mrf.mxu2  ;;  %v3537_v57 = vpop.f32.mrf.mxu3 }
  0xf8   : > { %v1175_v2 = vmul.f32 %v4067_v49, %v1171_v59  ;;  %v1176_v3 = vmul.f32 %v4066_v55, %v1172_v60 }
  0xfa   : > { %2716 = vmatpush.msk.msrb.mxu3 %vm501_vm3, %v1176_v3  ;;  %2711 = vmatpush.msk.msrb.mxu2 %vm501_vm3, %v1175_v2  ;;  %v3547_v2 = vpop.permute.xlu2 %1283  ;;  %v453_v3 = vld [vmem:[%s3505_s12 + $0x18] sm:$0xff] }
  0xfb   : > { %2685 = vmatmul.msk.f32.gmra.mxu0 %vm492_vm4, %v3383_v16  ;;  %2690 = vmatmul.msk.f32.gmra.mxu1 %vm492_vm4, %v3383_v16  ;;  %4193 = vst [vmem:[#allocation38_spill] sm:$0xff] %v3547_v2 }
  0xfc   : > { %2712 = vmatmul.msk.f32.vlgmr.msrb.gmra.mxu2 %vm492_vm4, %v3461_v1  ;;  %2717 = vmatmul.msk.f32.vlgmr.msrb.gmra.mxu3 %vm492_vm4, %v3461_v1 }
  0xfd   : > { %1386 = vperm.xlu0 %2911, %v453_v3  }
  0xfe   : > { %v1273_v6 = vpop.permute.xlu1 %1272  ;;  %v1271_v7 = vpop.permute.xlu0 %1270 }
  0xff   : > { %v1275_v15 = vsel %vm1274_vm11, %v1271_v7, %v1273_v6  ;;  %v1276_v17 = vsel %vm1274_vm11, %v1273_v6, %v1271_v7 }
 0x100   : > { %v1279_v18 = vmul.f32 %v4069_v4, %v1275_v15  ;;  %v1280_v19 = vmul.f32 %v4068_v5, %v1276_v17  ;;  %v3554_v15 = vpop.f32.mrf.mxu3  ;;  %v3556_v17 = vpop.f32.mrf.mxu2 }
 0x102   : > { %2721 = vmatpush.msk.msra.mxu0 %vm501_vm3, %v1279_v18  ;;  %2726 = vmatpush.msk.msra.mxu1 %vm501_vm3, %v1280_v19  ;;  %v451_v19 = vld [vmem:[%s3505_s12 + $0x8] sm:$0xff]  ;;  %v3573_v55 = vpop.permute.xlu2 %1287  ;;  %s432_s12 = scalar_lea.vmem %s4051_s4, %s3580_s21 }
 0x103   : > { %2702 = vmatmul.msk.f32.vlgmr.msrb.gmra.mxu0 %vm492_vm4, %v3428_v43  ;;  %2707 = vmatmul.msk.f32.vlgmr.msrb.gmra.mxu1 %vm492_vm4, %v3428_v43  ;;  %4195 = vst [vmem:[#allocation40_spill] sm:$0xff] %v3573_v55 }
 0x104   : > { %2713 = vmatmul.msk.f32.gmra.mxu2 %vm492_vm4, %v3488_v20  ;;  %2718 = vmatmul.msk.f32.gmra.mxu3 %vm492_vm4, %v3488_v20 }
 0x105   : > { %1376 = vperm.xlu2 %2913, %v451_v19  }
 0x106   : > { %v3507_v35 = vpop.permute.xlu0 %1281  ;;  %v3510_v37 = vpop.permute.xlu1 %1181 }
 0x107   : > { %4190 = vst [vmem:[#allocation35_spill] sm:$0xff] %v3507_v35 }
 0x108   : > { %4191 = vst [vmem:[#allocation36_spill] sm:$0xff] %v3510_v37  ;;  %v635_v38 = vpop.f32.mrf.mxu3  ;;  %v606_v3 = vpop.f32.mrf.mxu2 }
 0x10b   : > { %2703 = vmatmul.msk.f32.gmra.mxu0 %vm492_vm4, %v3422_v40  ;;  %2708 = vmatmul.msk.f32.gmra.mxu1 %vm492_vm4, %v3422_v40 }
 0x10c   : > { %2714 = vmatmul.msk.f32.gmra.mxu2 %vm492_vm4, %v3510_v37  ;;  %2719 = vmatmul.msk.f32.gmra.mxu3 %vm492_vm4, %v3510_v37 }
 0x10d   : > { %1407 = vperm.xlu2 %2913, %v455_v14  }
 0x10e   : > { %v3521_v39 = vpop.permute.xlu0 %1183  ;;  %v3562_v18 = vpop.permute.xlu1 %1285 }
 0x10f   : > { %4192 = vst [vmem:[#allocation37_spill] sm:$0xff] %v3521_v39 }
 0x110   : > { %4194 = vst [vmem:[#allocation39_spill] sm:$0xff] %v3562_v18  ;;  %v609_v4 = vpop.f32.mrf.mxu2  ;;  %v638_v19 = vpop.f32.mrf.mxu3 }
 0x113   : > { %2704 = vmatmul.msk.f32.gmra.mxu0 %vm492_vm4, %v3442_v48  ;;  %2709 = vmatmul.msk.f32.gmra.mxu1 %vm492_vm4, %v3442_v48 }
 0x114   : > { %2715 = vmatmul.msk.f32.gmra.mxu2 %vm492_vm4, %v3521_v39  ;;  %2720 = vmatmul.msk.f32.gmra.mxu3 %vm492_vm4, %v3521_v39 }
 0x11b   : > { %2705 = vmatmul.msk.f32.gmra.mxu0 %vm492_vm4, %v3455_v58  ;;  %2710 = vmatmul.msk.f32.gmra.mxu1 %vm492_vm4, %v3455_v58 }
 0x120   : > { %v3539_v59 = vpop.f32.mrf.mxu0  ;;  %v3541_v60 = vpop.f32.mrf.mxu1 }
 0x123   : > { %2722 = vmatmul.msk.f32.vlgmr.msra.gmra.mxu0 %vm492_vm4, %v3507_v35  ;;  %2727 = vmatmul.msk.f32.vlgmr.msra.gmra.mxu1 %vm492_vm4, %v3507_v35 }
 0x128   : > { %v3550_v6 = vpop.f32.mrf.mxu0  ;;  %v3552_v7 = vpop.f32.mrf.mxu1 }
 0x12b   : > { %2723 = vmatmul.msk.f32.gmra.mxu0 %vm492_vm4, %v3547_v2  ;;  %2728 = vmatmul.msk.f32.gmra.mxu1 %vm492_vm4, %v3547_v2 }
 0x130   : > { %v3565_v28 = vpop.f32.mrf.mxu0  ;;  %v3567_v36 = vpop.f32.mrf.mxu1 }
 0x131   : > { %v636_v29 = vadd.f32 %v635_v38, %v3567_v36  ;;  %v607_v0 = vadd.f32 %v606_v3, %v3565_v28 }
 0x133   : > { %2724 = vmatmul.msk.f32.gmra.mxu0 %vm492_vm4, %v3562_v18  ;;  %2729 = vmatmul.msk.f32.gmra.mxu1 %vm492_vm4, %v3562_v18 }
 0x138   : > { %v534_v49 = vpop.f32.mrf.mxu0  ;;  %v563_v5 = vpop.f32.mrf.mxu1 }
 0x13b   : > { %2725 = vmatmul.msk.f32.gmra.mxu0 %vm492_vm4, %v3573_v55  ;;  %2730 = vmatmul.msk.f32.gmra.mxu1 %vm492_vm4, %v3573_v55 }
 0x13f   : > { %v3590_v13 = vpop.f32.mrf.mxu2  ;;  %v3592_v54 = vpop.f32.mrf.mxu3 }
 0x140   : > { %v3582_v27 = vpop.f32.mrf.mxu0  ;;  %v3584_v23 = vpop.f32.mrf.mxu1 }
 0x147   : > { %v803_v62 = vpop.f32.mrf.mxu2  ;;  %v832_v42 = vpop.f32.mrf.mxu3 }
 0x148   : > { %v699_v53 = vpop.f32.mrf.mxu0  ;;  %v728_v63 = vpop.f32.mrf.mxu1 }
 0x14f   : > { %v806_v18 = vpop.f32.mrf.mxu2  ;;  %v835_v2 = vpop.f32.mrf.mxu3 }
 0x150   : > { %v702_v41 = vpop.f32.mrf.mxu0  ;;  %v731_v33 = vpop.f32.mrf.mxu1 }
 0x157   : > { %v809_v37 = vpop.f32.mrf.mxu2  ;;  %v838_v14 = vpop.f32.mrf.mxu3 }
 0x158   : > { %v705_v32 = vpop.f32.mrf.mxu0  ;;  %v734_v55 = vpop.f32.mrf.mxu1 }
 0x15f   : > { %v3598_v48 = vpop.f32.mrf.mxu2  ;;  %v3600_v1 = vpop.f32.mrf.mxu3 }
 0x160   : > { %v3594_v39 = vpop.f32.mrf.mxu0  ;;  %v3596_v35 = vpop.f32.mrf.mxu1  ;;  %4196 = vst [vmem:[#allocation41_spill] sm:$0xff] %v3600_v1  ;;  %v741_v1 = vadd.f32 %v702_v41, %v607_v0 }
 0x167   : > { %v1011_v43 = vpop.f32.mrf.mxu2  ;;  %v1040_v44 = vpop.f32.mrf.mxu3 }
 0x168   : > { %v907_v58 = vpop.f32.mrf.mxu0  ;;  %v936_v20 = vpop.f32.mrf.mxu1 }
 0x16f   : > { %v1014_v61 = vpop.f32.mrf.mxu2  ;;  %v1043_v10 = vpop.f32.mrf.mxu3 }
 0x170   : > { %v910_v40 = vpop.f32.mrf.mxu0  ;;  %v939_v46 = vpop.f32.mrf.mxu1 }
 0x177   : > { %v1017_v56 = vpop.f32.mrf.mxu2  ;;  %v1046_v52 = vpop.f32.mrf.mxu3 }
 0x178   : > { %v913_v16 = vpop.f32.mrf.mxu0  ;;  %v942_v22 = vpop.f32.mrf.mxu1 }
 0x17f   : > { %v3606_v50 = vpop.f32.mrf.mxu2  ;;  %v3608_v26 = vpop.f32.mrf.mxu3 }
 0x180   : > { %v3602_v11 = vpop.f32.mrf.mxu0  ;;  %v3604_v12 = vpop.f32.mrf.mxu1  ;;  %4199 = vst [vmem:[#allocation44_spill] sm:$0xff] %v3606_v50  ;;  %v610_v50 = vadd.f32 %v609_v4, %v534_v49  ;;  %v845_v49 = vadd.f32 %v806_v18, %v741_v1 }
 0x181   : > { %4197 = vst [vmem:[#allocation42_spill] sm:$0xff] %v3602_v11  ;;  %v639_v11 = vadd.f32 %v638_v19, %v563_v5  ;;  %v3636_v1 = vpop.permute.xlu1 %1381  ;;  %v3642_v18 = vpop.permute.xlu0 %1386 }
 0x182   : > { %4198 = vst [vmem:[#allocation43_spill] sm:$0xff] %v3604_v12  ;;  %v633_v12 = vadd.f32 %v3554_v15, %v3552_v7  ;;  %v743_v38 = vadd.f32 %v705_v32, %v610_v50 }
 0x183   : > { %4200 = vst [vmem:[#allocation45_spill] sm:$0xff] %v3608_v26  ;;  %v604_v26 = vadd.f32 %v3556_v17, %v3550_v6  ;;  %v744_v28 = vadd.f32 %v734_v55, %v639_v11  ;;  %v4205_v55 = vld [vmem:[#allocation41_spill] sm:$0xff] }
 0x184   : > { %v740_v36 = vadd.f32 %v728_v63, %v633_v12  ;;  %v847_v5 = vadd.f32 %v809_v37, %v743_v38 }
 0x187   : > { %v3610_v34 = vpop.f32.mrf.mxu2  ;;  %v3612_v25 = vpop.f32.mrf.mxu3 }
 0x188   : > { %v1115_v8 = vpop.f32.mrf.mxu0  ;;  %v1144_v9 = vpop.f32.mrf.mxu1  ;;  %4201 = vst [vmem:[#allocation46_spill] sm:$0xff] %v3610_v34  ;;  %v742_v34 = vadd.f32 %v731_v33, %v636_v29  ;;  %v844_v29 = vadd.f32 %v832_v42, %v740_v36 }
 0x189   : > { %4202 = vst [vmem:[#allocation47_spill] sm:$0xff] %v3612_v25  ;;  %v601_v25 = vadd.f32 %v3535_v45, %v3539_v59  ;;  %v848_v45 = vadd.f32 %v838_v14, %v744_v28  ;;  %v949_v59 = vadd.f32 %v910_v40, %v845_v49 }
 0x18a   : > { %v846_v4 = vadd.f32 %v835_v2, %v742_v34  ;;  %v4211_v19 = vld [vmem:[#allocation45_spill] sm:$0xff] }
 0x18b   : > { %v737_v3 = vadd.f32 %v3582_v27, %v601_v25  ;;  %v948_v25 = vadd.f32 %v936_v20, %v844_v29 }
 0x18d   : > { %v1052_v11 = vadd.f32 %v1040_v44, %v948_v25 }
 0x18f   : > { %v1222_v33 = vpop.f32.mrf.mxu2  ;;  %v1251_v41 = vpop.f32.mrf.mxu3 }
 0x190   : > { %v1118_v51 = vpop.f32.mrf.mxu0  ;;  %v1147_v47 = vpop.f32.mrf.mxu1 }
 0x197   : > { %v1225_v37 = vpop.f32.mrf.mxu2 }
 0x198   : > { %v1121_v24 = vpop.f32.mrf.mxu0  ;;  %v1150_v21 = vpop.f32.mrf.mxu1 }
 0x1a0   : > { %v3614_v31 = vpop.f32.mrf.mxu0  ;;  %v3616_v30 = vpop.f32.mrf.mxu1 }
 0x1a1   : > { %4203 = vst [vmem:[#allocation48_spill] sm:$0xff] %v3614_v31  ;;  %v739_v31 = vadd.f32 %v699_v53, %v604_v26  ;;  %v841_v26 = vadd.f32 %v3590_v13, %v737_v3  ;;  %v951_v53 = vadd.f32 %v913_v16, %v847_v5 }
 0x1a2   : > { %4204 = vst [vmem:[#allocation49_spill] sm:$0xff] %v3616_v30  ;;  %v630_v30 = vadd.f32 %v3537_v57, %v3541_v60  ;;  %v950_v57 = vadd.f32 %v939_v46, %v846_v4  ;;  %v4209_v60 = vld [vmem:[#allocation47_spill] sm:$0xff] }
 0x1a3   : > { %v843_v0 = vadd.f32 %v803_v62, %v739_v31  ;;  %v945_v63 = vadd.f32 %v3594_v39, %v841_v26  ;;  %v1053_v31 = vadd.f32 %v1014_v61, %v949_v59  ;;  %v1055_v27 = vadd.f32 %v1017_v56, %v951_v53  ;;  %v4206_v61 = vld [vmem:[#allocation42_spill] sm:$0xff]  ;;  %v1254_v39 = vpop.f32.mrf.mxu3  ;;  %v3654_v26 = vpop.permute.xlu1 %1371 }
 0x1a4   : > { %v738_v7 = vadd.f32 %v3584_v23, %v630_v30  ;;  %v952_v30 = vadd.f32 %v942_v22, %v848_v45  ;;  %v1054_v42 = vadd.f32 %v1043_v10, %v950_v57  ;;  %v1156_v22 = vadd.f32 %v1144_v9, %v1052_v11  ;;  %v3664_v11 = vld [vmem:[%s432_s12] sm:$0xf] }
 0x1a5   : > { %v947_v50 = vadd.f32 %v907_v58, %v843_v0  ;;  %v1157_v46 = vadd.f32 %v1118_v51, %v1053_v31  ;;  %v1159_v20 = vadd.f32 %v1121_v24, %v1055_v27  ;;  %v4208_v51 = vld [vmem:[#allocation46_spill] sm:$0xff]  ;;  %v4210_v24 = vld [vmem:[#allocation44_spill] sm:$0xff] }
 0x1a6   : > { %v842_v32 = vadd.f32 %v3592_v54, %v738_v7  ;;  %v1056_v40 = vadd.f32 %v1046_v52, %v952_v30  ;;  %v1158_v13 = vadd.f32 %v1147_v47, %v1054_v42  ;;  %v1049_v54 = vadd.f32 %v3598_v48, %v945_v63 }
 0x1a7   : > { %v1051_v62 = vadd.f32 %v1011_v43, %v947_v50  ;;  %v4207_v43 = vld [vmem:[#allocation43_spill] sm:$0xff]  ;;  %v1261_v56 = vadd.f32 %v1222_v33, %v1157_v46  ;;  %v1260_v48 = vadd.f32 %v4209_v60, %v1156_v22  ;;  %v1263_v2 = vadd.f32 %v1225_v37, %v1159_v20 }
 0x1a8   : > { %v1323_v15 = vpop.f32.mrf.mxu0  ;;  %v1352_v6 = vpop.f32.mrf.mxu1  ;;  %v946_v34 = vadd.f32 %v3596_v35, %v842_v32  ;;  %v1160_v35 = vadd.f32 %v1150_v21, %v1056_v40  ;;  %v1153_v10 = vadd.f32 %v4206_v61, %v1049_v54  ;;  %v1262_v52 = vadd.f32 %v1251_v41, %v1158_v13  ;;  %v4212_v4 = vld [vmem:[#allocation48_spill] sm:$0xff] }
 0x1a9   : > { %v1155_v16 = vadd.f32 %v1115_v8, %v1051_v62  ;;  %v1364_v3 = vadd.f32 %v1352_v6, %v1260_v48  ;;  %v4213_v29 = vld [vmem:[#allocation49_spill] sm:$0xff]  ;;  %v3648_v41 = vpop.permute.xlu2 %1376  ;;  %v3024_v46 = vmov 4.0  }
 0x1aa   : > { %v1050_v58 = vadd.f32 %v4205_v55, %v946_v34  ;;  %v1264_v17 = vadd.f32 %v1254_v39, %v1160_v35  ;;  %v1257_v21 = vadd.f32 %v4210_v24, %v1153_v10  ;;  %2914 = vrcp.f32 %v3024_v46 }
 0x1ab   : > { %v1259_v47 = vadd.f32 %v4208_v51, %v1155_v16  ;;  %v1392_v50 = vadd.f32 %v3648_v41, %v1364_v3 }
 0x1ac   : > { %v1154_v44 = vadd.f32 %v4207_v43, %v1050_v58  ;;  %v1361_v0 = vadd.f32 %v4212_v4, %v1257_v21  ;;  %v4214_v58 = vld [vmem:[#allocation5_spill] sm:$0xff] }
 0x1ad   : > { %v1363_v28 = vadd.f32 %v1323_v15, %v1259_v47  ;;  %v1400_v31 = vmax.f32 %v1392_v50, 0.0 }
 0x1ae   : > { %v1258_v14 = vadd.f32 %v4211_v19, %v1154_v44  ;;  %v1389_v30 = vadd.f32 %v3654_v26, %v1361_v0 }
 0x1af   : > { %v1391_v32 = vadd.f32 %v3648_v41, %v1363_v28 }
 0x1b0   : > { %v1326_v12 = vpop.f32.mrf.mxu0  ;;  %v1355_v23 = vpop.f32.mrf.mxu1  ;;  %v1362_v33 = vadd.f32 %v4213_v29, %v1258_v14  ;;  %v1397_v42 = vmax.f32 %v1389_v30, 0.0 }
 0x1b1   : > { %v1365_v8 = vadd.f32 %v1326_v12, %v1261_v56  ;;  %v1366_v9 = vadd.f32 %v1355_v23, %v1262_v52  ;;  %v1399_v34 = vmax.f32 %v1391_v32, 0.0  ;;  %v3670_v12 = vpop.permute.xlu2 %1407  ;;  %v2915_v22 = vpop.eup %2914 }
 0x1b2   : > { %v1390_v63 = vadd.f32 %v3654_v26, %v1362_v33  ;;  %v1481_v20 = vmul.f32 4.0, %v2915_v22  ;;  %vm1485_vm13 = vweird.f32 %v2915_v22 }
 0x1b3   : > { %v1393_v5 = vadd.f32 %v3636_v1, %v1365_v8  ;;  %v1394_v45 = vadd.f32 %v3636_v1, %v1366_v9 }
 0x1b4   : > { %v1398_v62 = vmax.f32 %v1390_v63, 0.0  ;;  %v1482_v35 = vsub.f32 1.0, %v1481_v20  ;;  %v2927_v63 = vld [vmem:[%s3144_s11 + $0x18] sm:$0xff] }
 0x1b5   : > { %v1401_v25 = vmax.f32 %v1393_v5, 0.0  ;;  %v1402_v53 = vmax.f32 %v1394_v45, 0.0 }
 0x1b6   : > { %v1483_v56 = vmul.f32 %v2915_v22, %v1482_v35 }
 0x1b8   : > { %v1329_v36 = vpop.f32.mrf.mxu0  ;;  %v1358_v38 = vpop.f32.mrf.mxu1  ;;  %v1484_v48 = vadd.f32 %v2915_v22, %v1483_v56 }
 0x1b9   : > { %v1367_v7 = vadd.f32 %v1329_v36, %v1263_v2  ;;  %v1368_v49 = vadd.f32 %v1358_v38, %v1264_v17 }
 0x1ba   : > { %v3678_v24 = vsel %vm1485_vm13, %v2915_v22, %v1484_v48  ;;  %v4257_v22 = vld [vmem:[#allocation24_spill] sm:$0xff] }
 0x1bb   : > { %v1395_v59 = vadd.f32 %v3642_v18, %v1367_v7  ;;  %v1396_v57 = vadd.f32 %v3642_v18, %v1368_v49  ;;  %4215 = vst [vmem:[#allocation41_spill] sm:$0xff] %v3678_v24  ;;  %v3688_v49 = vld [vmem:[%s3137_s24 + $0x8] sm:$0xff]  ;;  %s4217_s24 = smov 15  }
 0x1bc   : > { %4216 = vst [vmem:[#allocation42_spill] sm:$0xff] %v3688_v49 }
 0x1bd   : > { %v1403_v15 = vmax.f32 %v1395_v59, 0.0  ;;  %v1404_v6 = vmax.f32 %v1396_v57, 0.0  ;;  %v2924_v59 = vld [vmem:[%s3144_s11] sm:$0xff] }
 0x1bf   : > { %1426 = vmatpush.msra.mxu2 %v1403_v15  ;;  %1446 = vmatpush.msra.mxu3 %v1404_v6  ;;  %v2925_v6 = vld [vmem:[%s3144_s11 + $0x8] sm:$0xff] }
 0x1c1   : > { %1427 = vmatpush.msra.mxu2 %v1401_v25  ;;  %1447 = vmatpush.msra.mxu3 %v1402_v53  ;;  %v2926_v25 = vld [vmem:[%s3144_s11 + $0x10] sm:$0xff]  ;;  %s4221_s11 = smov 111  }
 0x1c3   : > { %1428 = vmatpush.msra.mxu2 %v1399_v34  ;;  %1448 = vmatpush.msra.mxu3 %v1400_v31 }
 0x1c5   : > { %1429 = vmatpush.msra.mxu2 %v1397_v42  ;;  %1449 = vmatpush.msra.mxu3 %v1398_v62 }
 0x1c6   : > { %2731 = vmatmul.msk.f32.vlgmr.msra.gmra.mxu2 %vm1410_vm12, %v3664_v11  ;;  %2732 = vmatmul.msk.f32.vlgmr.msra.gmra.mxu3 %vm1410_vm12, %v3664_v11 }
 0x249   : > { %v1431_v23 = vpop.f32.mrf.mxu2  ;;  %v1451_v27 = vpop.f32.mrf.mxu3 }
 0x24a   : > { %v1452_v40 = vadd.f32 %v1451_v27, %v3670_v12  ;;  %v1432_v13 = vadd.f32 %v1431_v23, %v3670_v12 }
 0x24c   : > { %v1456_v54 = vrot.slane %v1452_v40, 4 }
 0x24e   : > { %v1457_v55 = vsel %vm578_vm0, %v1432_v13, %v1456_v54  ;;  %v457_v13 = vld [vmem:[%s444_s19] sm:$0xf] }
 0x24f   : > { %v1459_v16 = vadd.f32 %v1457_v55, %v4214_v58 }
 0x251   : > { %1461 = vst [vmem:[#allocation1] ss:$2 sm:$0xff] %v1459_v16 }
 0x258   : > { %v1462_v61 = vld.sshfl [vmem:[#allocation1] sm:$0xff pattern:$0x75316420]  ;;  %v1463_v10 = vld.sshfl [vmem:[#allocation1 + $0x8] sm:$0xff pattern:$0x75316420] }
 0x259   : > { %v1466_v43 = vsel %vm578_vm0, %v1462_v61, 0.0  ;;  %v1473_v44 = vsel %vm578_vm0, %v1463_v10, 0.0  ;;  %v4223_v61 = vld [vmem:[#allocation11_spill] sm:$0xff] }
 0x25a   : > { %v1467_v37 = vrot.slane %v1466_v43, 4  ;;  %v1474_v39 = vrot.slane %v1473_v44, 4  ;;  %v4224_v10 = vperm.slane %v4223_v61, 0 }
 0x25c   : > { %v1468_v52 = vadd.f32 %v1467_v37, %v1466_v43  ;;  %v1475_v51 = vadd.f32 %v1474_v39, %v1473_v44  ;;  %v4225_v44 = vld [vmem:[#allocation12_spill] sm:$0xff] }
 0x25d   : > { %v4226_v37 = vperm.slane %v4225_v44, 0 }
 0x25e   : > { %v1469_v47 = vrot.slane %v1468_v52, 2  ;;  %v1476_v60 = vrot.slane %v1475_v51, 2 }
 0x260   : > { %v1470_v2 = vadd.f32 %v1469_v47, %v1468_v52  ;;  %v1477_v17 = vadd.f32 %v1476_v60, %v1475_v51  ;;  %v4227_v52 = vld [vmem:[#allocation8_spill] sm:$0xff] }
 0x262   : > { %v1471_v8 = vrot.slane %v1470_v2, 1  ;;  %v1478_v9 = vrot.slane %v1477_v17, 1 }
 0x264   : > { %v1472_v21 = vadd.f32 %v1471_v8, %v1470_v2  ;;  %v1479_v19 = vadd.f32 %v1478_v9, %v1477_v17  ;;  %v4228_v17 = vld [vmem:[#allocation13_spill] sm:$0xff] }
 0x266   : > { %v1488_v14 = vmul.f32 %v3678_v24, %v1479_v19  ;;  %v1487_v36 = vmul.f32 %v3678_v24, %v1472_v21 }
 0x268   : > { %v1491_v38 = vrot.slane %v1488_v14, 4 }
 0x26a   : > { %v1492_v28 = vsel %vm578_vm0, %v1487_v36, %v1491_v38  ;;  %v4229_v38 = vperm.slane %v4223_v61, 1 }
 0x26b   : > { %v3683_v3 = vsub.f32 %v1459_v16, %v1492_v28 }
 0x26d   : > { %v1495_v7 = vmul.f32 %v3683_v3, %v3683_v3 }
 0x26f   : > { %1497 = vst [vmem:[#allocation1] ss:$2 sm:$0xff] %v1495_v7  ;;  %v4230_v7 = vperm.slane %v4225_v44, 1 }
 0x276   : > { %v3690_v4 = vld.sshfl [vmem:[#allocation1] sm:$0xff pattern:$0x75316420]  ;;  %v3692_v0 = vld.sshfl [vmem:[#allocation1 + $0x8] sm:$0xff pattern:$0x75316420] }
 0x277   : > { %1570 = vst [vmem:[#allocation1] ss:$2 sm:$0xff] %v3688_v49  ;;  %v1509_v55 = vsel %vm578_vm0, %v3692_v0, 0.0  ;;  %v1502_v51 = vsel %vm578_vm0, %v3690_v4, 0.0 }
 0x278   : > { %v1510_v56 = vrot.slane %v1509_v55, 4  ;;  %v1503_v60 = vrot.slane %v1502_v51, 4 }
 0x27a   : > { %v1511_v47 = vadd.f32 %v1510_v56, %v1509_v55  ;;  %v1504_v2 = vadd.f32 %v1503_v60, %v1502_v51 }
 0x27c   : > { %v1512_v48 = vrot.slane %v1511_v47, 2  ;;  %v1505_v19 = vrot.slane %v1504_v2, 2 }
 0x27e   : > { %v1572_v29 = vld.sshfl [vmem:[#allocation1 + $0x8] sm:$0xff pattern:$0x75316420]  ;;  %v1571_v33 = vld.sshfl [vmem:[#allocation1] sm:$0xff pattern:$0x75316420]  ;;  %v1513_v8 = vadd.f32 %v1512_v48, %v1511_v47 }
 0x27f   : > { %1577 = vrot.lane.b32.xlu1 %v1572_v29, %s3009_s14  ;;  %1575 = vrot.lane.b32.xlu0 %v1571_v33, %s3009_s14  ;;  %1647 = vst [vmem:[#allocation1] ss:$2 sm:$0xff] %v3688_v49  ;;  %s4218_s14 = smov 1   ;;  %v1506_v29 = vadd.f32 %v1505_v19, %v1504_v2  ;;  %v4231_v33 = vld [vmem:[#allocation6_spill] sm:$0xff]  ;;  %v4240_v2 = vperm.slane %v4223_v61, 4  ;;  %v4242_v19 = vld [vmem:[#allocation16_spill] sm:$0xff] }
 0x280   : > { %v1514_v0 = vrot.slane %v1513_v8, 1 }
 0x286   : > { %v1648_v5 = vld.sshfl [vmem:[#allocation1] sm:$0xff pattern:$0x75316420]  ;;  %v1649_v45 = vld.sshfl [vmem:[#allocation1 + $0x8] sm:$0xff pattern:$0x75316420] }
 0x287   : > { %1712 = vst [vmem:[#allocation1] ss:$2 sm:$0xff] %v3688_v49  ;;  %2744 = vmatpush.msk.msrb.mxu0 %vm578_vm0, %v1648_v5  ;;  %2749 = vmatpush.msk.msrb.mxu1 %vm578_vm0, %v1649_v45  ;;  %v1515_v5 = vadd.f32 %v1514_v0, %v1513_v8  ;;  %v1507_v45 = vrot.slane %v1506_v29, 1  ;;  %v4241_v8 = vperm.slane %v4225_v44, 4  ;;  %v4244_v0 = vperm.slane %v4223_v61, 5 }
 0x288   : > { %2745 = vmatmul.msk.f32.vlgmr.msrb.gmra.mxu0 %vm569_vm1, %v2924_v59  ;;  %2750 = vmatmul.msk.f32.vlgmr.msrb.gmra.mxu1 %vm569_vm1, %v2924_v59 }
 0x289   : > { %v1517_v59 = vmul.f32 %v1515_v5, %v3678_v24 }
 0x28e   : > { %v1714_v57 = vld.sshfl [vmem:[#allocation1 + $0x8] sm:$0xff pattern:$0x75316420]  ;;  %v1713_v15 = vld.sshfl [vmem:[#allocation1] sm:$0xff pattern:$0x75316420] }
 0x28f   : > { %1719 = vrot.lane.b32.xlu0 %v1714_v57, %s3011_s20  ;;  %1717 = vrot.lane.b32.xlu2 %v1713_v15, %s3011_s20  ;;  %1797 = vst [vmem:[#allocation1] ss:$2 sm:$0xff] %v3688_v49  ;;  %s4219_s20 = smov 113   ;;  %v1508_v15 = vadd.f32 %v1507_v45, %v1506_v29 }
 0x290   : > { %2746 = vmatmul.msk.f32.gmra.mxu0 %vm569_vm1, %v2925_v6  ;;  %2751 = vmatmul.msk.f32.gmra.mxu1 %vm569_vm1, %v2925_v6  ;;  %v4232_v6 = vld [vmem:[#allocation7_spill] sm:$0xff] }
 0x296   : > { %v1798_v32 = vld.sshfl [vmem:[#allocation1] sm:$0xff pattern:$0x75316420]  ;;  %v1799_v50 = vld.sshfl [vmem:[#allocation1 + $0x8] sm:$0xff pattern:$0x75316420] }
 0x297   : > { %1882 = vst [vmem:[#allocation1] ss:$2 sm:$0xff] %v3688_v49  ;;  %1802 = vrot.lane.b32.xlu0 %v1798_v32, %s4217_s24  ;;  %v3782_v32 = vadd.f32 1e-05, %v1517_v59 }
 0x298   : > { %2747 = vmatmul.msk.f32.gmra.mxu0 %vm569_vm1, %v2926_v25  ;;  %2752 = vmatmul.msk.f32.gmra.mxu1 %vm569_vm1, %v2926_v25  ;;  %v1516_v25 = vmul.f32 %v1508_v15, %v3678_v24 }
 0x299   : > { %2916 = vrsqrt.f32 %v3782_v32  ;;  %vm1536_vm15 = vweird.f32 %v3782_v32 }
 0x29e   : > { %v1883_v53 = vld.sshfl [vmem:[#allocation1] sm:$0xff pattern:$0x75316420]  ;;  %v1884_v30 = vld.sshfl [vmem:[#allocation1 + $0x8] sm:$0xff pattern:$0x75316420] }
 0x29f   : > { %1887 = vrot.lane.b32.xlu1 %v1883_v53, %s4218_s14  ;;  %1889 = vrot.lane.b32.xlu2 %v1884_v30, %s4218_s14  ;;  %1967 = vst [vmem:[#allocation1] ss:$2 sm:$0xff] %v3688_v49 }
 0x2a0   : > { %2748 = vmatmul.msk.f32.gmra.mxu0 %vm569_vm1, %v2927_v63  ;;  %2753 = vmatmul.msk.f32.gmra.mxu1 %vm569_vm1, %v2927_v63  ;;  %v4233_v63 = vperm.slane %v4223_v61, 3 }
 0x2a6   : > { %v1968_v34 = vld.sshfl [vmem:[#allocation1] sm:$0xff pattern:$0x75316420]  ;;  %v1969_v31 = vld.sshfl [vmem:[#allocation1 + $0x8] sm:$0xff pattern:$0x75316420] }
 0x2a7   : > { %2052 = vst [vmem:[#allocation1] ss:$2 sm:$0xff] %v3688_v49  ;;  %1804 = vrot.lane.b32.xlu1 %v1799_v50, %s4217_s24  ;;  %s440_s24 = scalar_lea.vmem %s4053_s6, %s3580_s21 }
 0x2a8   : > { %v456_v54 = vld [vmem:[%s440_s24] sm:$0xf] }
 0x2ae   : > { %v2054_v42 = vld.sshfl [vmem:[#allocation1 + $0x8] sm:$0xff pattern:$0x75316420]  ;;  %v2053_v62 = vld.sshfl [vmem:[#allocation1] sm:$0xff pattern:$0x75316420] }
 0x2af   : > { %2057 = vrot.lane.b32.xlu2 %v2053_v62, %s4219_s20  ;;  %2137 = vst [vmem:[#allocation1] ss:$2 sm:$0xff] %v3688_v49  ;;  %1972 = vrot.lane.b32.xlu1 %v1968_v34, %s4220_s16  ;;  %v3796_v62 = vadd.f32 1e-05, %v1516_v25 }
 0x2b0   : > { %2059 = vrot.lane.b32.xlu0 %v2054_v42, %s4219_s20  ;;  %s2835_s20 = sshll.u32 %s2998_s30, 4 }
 0x2b1   : > { %2918 = vrsqrt.f32 %v3796_v62  ;;  %s2467_s23 = scalar_lea.hbm %s4055_s8, %s2835_s20  ;;  %s2948_s20 = scalar_lea.hbm %s4055_s8, 32 }
 0x2b2   : > { %s2470_s19 = sshll.u32 %s2467_s23, 4  ;;  %s2471_s19 = int_to_ptr.hbm [resolvable:$true] %s2470_s19 }
 0x2b3   : > { %s2942_s25 = sshra.s32 %s2471_s19, 4  ;;  %s2943_s25 = int_to_ptr.hbm [resolvable:$true] %s2942_s25 }
 0x2b4   : > { %s2944_s12 = scalar_lea.hbm %s2943_s25, 16  ;;  %p2949_p1 = scmp.lt.s32.totalorder %s2943_s25, %s4055_s8 }
 0x2b5   : > { %p2945_p12 = scmp.ne.s32.totalorder %s2943_s25, %s2944_s12  ;;  %p2950_p2 = scmp.lt.s32.totalorder %s2948_s20, %s2944_s12 }
 0x2b6   : > { %v2139_v23 = vld.sshfl [vmem:[#allocation1 + $0x8] sm:$0xff pattern:$0x75316420]  ;;  %v2138_v27 = vld.sshfl [vmem:[#allocation1] sm:$0xff pattern:$0x75316420] }
 0x2b7   : > { %1974 = vrot.lane.b32.xlu2 %v1969_v31, %s4220_s16  ;;  %2222 = vst [vmem:[#allocation1] ss:$2 sm:$0xff] %v3688_v49  ;;  %v4234_v31 = vperm.slane %v4225_v44, 3  ;;  %p2946_p13 = pnand %p2945_p12, %p3113_p4  ;;  %p2951_p3 = por %p2950_p2, %p2949_p1 }
 0x2b9   : > { %p2947_p0 = pneg %p2946_p13 }
 0x2bb   : > { %p2952_p5 = pnand %p2951_p3, %p2947_p0 }
 0x2be   : > { %v2224_v40 = vld.sshfl [vmem:[#allocation1 + $0x8] sm:$0xff pattern:$0x75316420]  ;;  %v2223_v46 = vld.sshfl [vmem:[#allocation1] sm:$0xff pattern:$0x75316420] }
 0x2bf   : > { %2142 = vrot.lane.b32.xlu2 %v2138_v27, %s3020_s26  ;;  %2229 = vrot.lane.b32.xlu1 %v2224_v40, %s4221_s11 }
 0x2c0   : > { %2227 = vrot.lane.b32.xlu0 %v2223_v46, %s4221_s11  ;;  %v2917_v46 = vpop.eup %2916 }
 0x2c1   : > { %vm1537_vm14 = vweird.f32 %v2917_v46 }
 0x2c2   : > { %vm1538_vm1 = vmor %vm1536_vm15, %vm1537_vm14 }
 0x2c7   : > { %1558 = vperm.xlu2 %2913, %v457_v13   ;;  %1548 = vperm.xlu1 %2912, %v456_v54  }
 0x2c8   : > { %2144 = vrot.lane.b32.xlu0 %v2139_v23, %s3020_s26  ;;  %v4235_v23 = vld [vmem:[#allocation9_spill] sm:$0xff]  ;;  %s405_s26 = sand.u32 1, %s2990_s28  }
 0x2c9   : > { %s2630_s21 = sshll.u32 %s405_s26, 4  ;;  %s2453_s30 = scalar_lea.sflag [#allocation3], %s405_s26 }
 0x2ca   : > { %s3906_s14 = scalar_lea.vmem [#allocation2], %s2630_s21 }
 0x2cb   : > { %s2468_s22 = sshll.u32 %s3906_s14, 4  ;;  %s2469_s22 = int_to_ptr.vmem [resolvable:$true] %s2468_s22 }
 0x2e9   : > { %v1718_v9 = vpop.permute.xlu2 %1717 }
 0x2f1   : > { %v1578_v58 = vpop.permute.xlu1 %1577  ;;  %v1576_v16 = vpop.permute.xlu0 %1575 }
 0x2f2   : > { %v1579_v20 = vsel %vm473_vm2, %v1576_v16, %v1578_v58  ;;  %v1580_v35 = vsel %vm473_vm2, %v1578_v58, %v1576_v16  ;;  %v4236_v58 = vperm.slane %v4223_v61, 2 }
 0x2f3   : > { %v1581_v43 = vmul.f32 %v1580_v35, %v4224_v10  ;;  %v1582_v39 = vmul.f32 %v1579_v20, %v4226_v37  ;;  %v4237_v20 = vperm.slane %v4225_v44, 2  ;;  %v1531_v10 = vmul.f32 %v2917_v46, %v3782_v32  ;;  %v2919_v37 = vpop.eup %2918 }
 0x2f4   : > { %v1521_v48 = vmul.f32 %v2919_v37, %v3796_v62  ;;  %vm1527_vm2 = vweird.f32 %v2919_v37 }
 0x2f5   : > { %2734 = vmatpush.msk.msrb.mxu2 %vm501_vm3, %v1581_v43  ;;  %2739 = vmatpush.msk.msrb.mxu3 %vm501_vm3, %v1582_v39  ;;  %v4238_v43 = vld [vmem:[#allocation15_spill] sm:$0xff]  ;;  %v4239_v39 = vld [vmem:[#allocation14_spill] sm:$0xff]  ;;  %v1532_v56 = vmul.f32 %v2917_v46, %v1531_v10 }
 0x2f6   : > { %2735 = vmatmul.msk.f32.vlgmr.msrb.gmra.mxu2 %vm492_vm4, %v4227_v52  ;;  %2740 = vmatmul.msk.f32.vlgmr.msrb.gmra.mxu3 %vm492_vm4, %v4227_v52 }
 0x2f9   : > { %v1890_v57 = vpop.permute.xlu2 %1889 }
 0x2fe   : > { %2736 = vmatmul.msk.f32.gmra.mxu2 %vm492_vm4, %v4228_v17  ;;  %2741 = vmatmul.msk.f32.gmra.mxu3 %vm492_vm4, %v4228_v17 }
 0x301   : > { %v1720_v21 = vpop.permute.xlu0 %1719 }
 0x302   : > { %v1721_v14 = vsel %vm650_vm5, %v1718_v9, %v1720_v21  ;;  %v1722_v36 = vsel %vm650_vm5, %v1720_v21, %v1718_v9  ;;  %v1533_v21 = vmul.f32 0.5, %v1532_v56  ;;  %vm1526_vm5 = vweird.f32 %v3796_v62 }
 0x303   : > { %v1723_v28 = vmul.f32 %v1722_v36, %v4229_v38  ;;  %v1724_v4 = vmul.f32 %v1721_v14, %v4230_v7  ;;  %v1522_v14 = vmul.f32 %v2919_v37, %v1521_v48  ;;  %v4243_v36 = vld [vmem:[#allocation17_spill] sm:$0xff]  ;;  %v4255_v48 = vperm.slane %v4225_v44, 6 }
 0x305   : > { %2754 = vmatpush.msk.msra.mxu2 %vm501_vm3, %v1723_v28  ;;  %2759 = vmatpush.msk.msra.mxu3 %vm501_vm3, %v1724_v4  ;;  %v1534_v28 = vsub.f32 1.5, %v1533_v21  ;;  %v1523_v45 = vmul.f32 0.5, %v1522_v14  ;;  %v4262_v21 = vld [vmem:[#allocation28_spill] sm:$0xff]  ;;  %v4264_v14 = vld [vmem:[#allocation27_spill] sm:$0xff] }
 0x306   : > { %2737 = vmatmul.msk.f32.gmra.mxu2 %vm492_vm4, %v4231_v33  ;;  %2742 = vmatmul.msk.f32.gmra.mxu3 %vm492_vm4, %v4231_v33  ;;  %v4245_v33 = vperm.slane %v4225_v44, 5 }
 0x307   : > { %v1535_v59 = vmul.f32 %v2917_v46, %v1534_v28  ;;  %v1524_v15 = vsub.f32 1.5, %v1523_v45  ;;  %v4267_v28 = vld [vmem:[#allocation34_spill] sm:$0xff] }
 0x309   : > { %v2058_v27 = vpop.permute.xlu2 %2057  ;;  %v1803_v40 = vpop.permute.xlu0 %1802  ;;  %v1539_v25 = vsel %vm1538_vm1, %v2917_v46, %v1535_v59  ;;  %v4249_v46 = vperm.slane %v4225_v44, 7  ;;  %v4259_v44 = vld [vmem:[#allocation26_spill] sm:$0xff] }
 0x30e   : > { %2738 = vmatmul.msk.f32.gmra.mxu2 %vm492_vm4, %v4232_v6  ;;  %2743 = vmatmul.msk.f32.gmra.mxu3 %vm492_vm4, %v4232_v6 }
 0x311   : > { %v1888_v50 = vpop.permute.xlu1 %1887  ;;  %v1975_v52 = vpop.permute.xlu2 %1974 }
 0x312   : > { %v1891_v53 = vsel %vm858_vm7, %v1888_v50, %v1890_v57  ;;  %v1892_v30 = vsel %vm858_vm7, %v1890_v57, %v1888_v50  ;;  %v4246_v57 = vld [vmem:[#allocation18_spill] sm:$0xff]  ;;  %v4247_v50 = vld [vmem:[#allocation21_spill] sm:$0xff] }
 0x313   : > { %v1893_v34 = vmul.f32 %v1892_v30, %v4233_v63  ;;  %v1894_v42 = vmul.f32 %v1891_v53, %v4234_v31  ;;  %v1525_v30 = vmul.f32 %v2919_v37, %v1524_v15 }
 0x315   : > { %2774 = vmatpush.msk.msrb.mxu2 %vm501_vm3, %v1893_v34  ;;  %2779 = vmatpush.msk.msrb.mxu3 %vm501_vm3, %v1894_v42  ;;  %v1542_v34 = vrot.slane %v1539_v25, 4  ;;  %v3025_v42 = vmov 839922192   ;;  %v4272_v25 = vld [vmem:[#allocation38_spill] sm:$0xff] }
 0x316   : > { %2755 = vmatmul.msk.f32.vlgmr.msra.gmra.mxu2 %vm492_vm4, %v4235_v23  ;;  %2760 = vmatmul.msk.f32.vlgmr.msra.gmra.mxu3 %vm492_vm4, %v4235_v23  ;;  %v1551_v23 = vunpack.c.l.s4 %v3025_v42  ;;  %v4273_v42 = vld [vmem:[#allocation39_spill] sm:$0xff] }
 0x319   : > { %v1805_v13 = vpop.permute.xlu1 %1804  ;;  %v2143_v6 = vpop.permute.xlu2 %2142 }
 0x31a   : > { %v1806_v54 = vsel %vm754_vm6, %v1803_v40, %v1805_v13  ;;  %v1807_v55 = vsel %vm754_vm6, %v1805_v13, %v1803_v40  ;;  %vm1528_vm6 = vmor %vm1526_vm5, %vm1527_vm2 }
 0x31b   : > { %v1808_v16 = vmul.f32 %v1807_v55, %v4236_v58  ;;  %v1809_v35 = vmul.f32 %v1806_v54, %v4237_v20  ;;  %v4250_v54 = vld [vmem:[#allocation20_spill] sm:$0xff]  ;;  %v1529_v55 = vsel %vm1528_vm6, %v2919_v37, %v1525_v30  ;;  %v4251_v58 = vld [vmem:[#allocation22_spill] sm:$0xff] }
 0x31c   : > { %v1543_v62 = vsel %vm578_vm0, %v1529_v55, %v1542_v34 }
 0x31d   : > { %2764 = vmatpush.msk.msra.mxu0 %vm501_vm3, %v1808_v16  ;;  %2769 = vmatpush.msk.msra.mxu1 %vm501_vm3, %v1809_v35  ;;  %v1552_v16 = vunpack.c.0.s8 %v1551_v23  ;;  %v1545_v10 = vmul.f32 %v1543_v62, %v3683_v3 }
 0x31e   : > { %2756 = vmatmul.msk.f32.gmra.mxu2 %vm492_vm4, %v4238_v43  ;;  %2761 = vmatmul.msk.f32.gmra.mxu3 %vm492_vm4, %v4238_v43 }
 0x31f   : > { %2765 = vmatmul.msk.f32.vlgmr.msra.gmra.mxu0 %vm492_vm4, %v4239_v39  ;;  %2770 = vmatmul.msk.f32.vlgmr.msra.gmra.mxu1 %vm492_vm4, %v4239_v39 }
 0x321   : > { %v1973_v51 = vpop.permute.xlu1 %1972  ;;  %v1559_v20 = vpop.permute.xlu2 %1558 }
 0x322   : > { %v1976_v47 = vsel %vm962_vm8, %v1973_v51, %v1975_v52  ;;  %v1977_v60 = vsel %vm962_vm8, %v1975_v52, %v1973_v51  ;;  %v2060_v38 = vpop.permute.xlu0 %2059  ;;  %v3890_v52 = vperm.slane %v1559_v20, %v1552_v16 }
 0x323   : > { %v1978_v17 = vmul.f32 %v1976_v47, %v4240_v2  ;;  %v1979_v9 = vmul.f32 %v1977_v60, %v4241_v8  ;;  %v2061_v7 = vsel %vm1066_vm9, %v2058_v27, %v2060_v38  ;;  %v2062_v4 = vsel %vm1066_vm9, %v2060_v38, %v2058_v27  ;;  %v4260_v8 = vld [vmem:[#allocation25_spill] sm:$0xff]  ;;  %v4266_v38 = vld [vmem:[#allocation31_spill] sm:$0xff] }
 0x324   : > { %v2063_v29 = vmul.f32 %v2061_v7, %v4244_v0  ;;  %v2064_v5 = vmul.f32 %v2062_v4, %v4245_v33  ;;  %v4248_v27 = vperm.slane %v4223_v61, 7  ;;  %4253 = vst [vmem:[#allocation46_spill] sm:$0xff] %v3890_v52  ;;  %v4254_v47 = vperm.slane %v4223_v61, 6  ;;  %v4258_v61 = vld [vmem:[#allocation23_spill] sm:$0xff]  ;;  %v4268_v7 = vld [vmem:[#allocation32_spill] sm:$0xff]  ;;  %v1671_v0 = vpop.f32.mrf.mxu0 }
 0x325   : > { %2784 = vmatpush.msk.msrb.mxu0 %vm501_vm3, %v1978_v17  ;;  %2789 = vmatpush.msk.msrb.mxu1 %vm501_vm3, %v1979_v9  ;;  %v4256_v17 = vld [vmem:[#allocation19_spill] sm:$0xff]  ;;  %v4261_v9 = vld [vmem:[#allocation29_spill] sm:$0xff]  ;;  %v4269_v4 = vld [vmem:[#allocation36_spill] sm:$0xff] }
 0x326   : > { %2757 = vmatmul.msk.f32.gmra.mxu2 %vm492_vm4, %v4242_v19  ;;  %2762 = vmatmul.msk.f32.gmra.mxu3 %vm492_vm4, %v4242_v19  ;;  %v4263_v19 = vld [vmem:[#allocation30_spill] sm:$0xff]  ;;  %v4270_v33 = vld [vmem:[#allocation35_spill] sm:$0xff] }
 0x327   : > { %2766 = vmatmul.msk.f32.gmra.mxu0 %vm492_vm4, %v4243_v36  ;;  %2771 = vmatmul.msk.f32.gmra.mxu1 %vm492_vm4, %v4243_v36  ;;  %v4265_v36 = vld [vmem:[#allocation33_spill] sm:$0xff] }
 0x328   : > { %2794 = vmatpush.msk.msra.mxu2 %vm501_vm3, %v2063_v29  ;;  %2799 = vmatpush.msk.msra.mxu3 %vm501_vm3, %v2064_v5  ;;  %v1700_v29 = vpop.f32.mrf.mxu1  ;;  %v4271_v5 = vld [vmem:[#allocation37_spill] sm:$0xff] }
 0x32e   : > { %2758 = vmatmul.msk.f32.gmra.mxu2 %vm492_vm4, %v4246_v57  ;;  %2763 = vmatmul.msk.f32.gmra.mxu3 %vm492_vm4, %v4246_v57 }
 0x32f   : > { %2767 = vmatmul.msk.f32.gmra.mxu0 %vm492_vm4, %v4247_v50  ;;  %2772 = vmatmul.msk.f32.gmra.mxu1 %vm492_vm4, %v4247_v50 }
 0x330   : > { %v1703_v50 = vpop.f32.mrf.mxu1 }
 0x331   : > { %v2230_v53 = vpop.permute.xlu1 %2229 }
 0x332   : > { %v2228_v63 = vpop.permute.xlu0 %2227 }
 0x333   : > { %v2231_v31 = vsel %vm1274_vm11, %v2228_v63, %v2230_v53  ;;  %v2232_v32 = vsel %vm1274_vm11, %v2230_v53, %v2228_v63 }
 0x334   : > { %v2233_v40 = vmul.f32 %v2231_v31, %v4248_v27  ;;  %v2234_v13 = vmul.f32 %v2232_v32, %v4249_v46 }
 0x336   : > { %2775 = vmatmul.msk.f32.vlgmr.msrb.gmra.mxu2 %vm492_vm4, %v4250_v54  ;;  %2780 = vmatmul.msk.f32.vlgmr.msrb.gmra.mxu3 %vm492_vm4, %v4250_v54 }
 0x337   : > { %2768 = vmatmul.msk.f32.gmra.mxu0 %vm492_vm4, %v4251_v58  ;;  %2773 = vmatmul.msk.f32.gmra.mxu1 %vm492_vm4, %v4251_v58 }
 0x338   : > { %2814 = vmatpush.msk.msrb.mxu2 %vm501_vm3, %v2233_v40  ;;  %2819 = vmatpush.msk.msrb.mxu3 %vm501_vm3, %v2234_v13  ;;  %v1706_v32 = vpop.f32.mrf.mxu1  ;;  %v4274_v13 = vld [vmem:[#allocation40_spill] sm:$0xff] }
 0x339   : > { %v1549_v35 = vpop.permute.xlu1 %1548 }
 0x33a   : > { %v3884_v43 = vperm.slane %v1549_v35, %v1552_v16  ;;  %v2145_v37 = vpop.permute.xlu0 %2144 }
 0x33b   : > { %v2146_v39 = vsel %vm1170_vm10, %v2143_v6, %v2145_v37  ;;  %v2147_v56 = vsel %vm1170_vm10, %v2145_v37, %v2143_v6  ;;  %v1674_v6 = vpop.f32.mrf.mxu0 }
 0x33c   : > { %4252 = vst [vmem:[#allocation43_spill] sm:$0xff] %v3884_v43  ;;  %v1555_v51 = vmul.f32 %v3884_v43, %v1545_v10  ;;  %v2148_v60 = vmul.f32 %v2146_v39, %v4254_v47  ;;  %v2149_v2 = vmul.f32 %v2147_v56, %v4255_v48 }
 0x33e   : > { %v1565_v3 = vadd.f32 %v3890_v52, %v1555_v51  ;;  %2776 = vmatmul.msk.f32.gmra.mxu2 %vm492_vm4, %v4256_v17  ;;  %2781 = vmatmul.msk.f32.gmra.mxu3 %vm492_vm4, %v4256_v17 }
 0x33f   : > { %2785 = vmatmul.msk.f32.vlgmr.msrb.gmra.mxu0 %vm492_vm4, %v4257_v22  ;;  %2790 = vmatmul.msk.f32.vlgmr.msrb.gmra.mxu1 %vm492_vm4, %v4257_v22 }
 0x340   : > { %1566 = vst [vmem:[%s3906_s14] sm:$0xff] %v1565_v3  ;;  %2804 = vmatpush.msk.msra.mxu0 %vm501_vm3, %v2148_v60  ;;  %2809 = vmatpush.msk.msra.mxu1 %vm501_vm3, %v2149_v2  ;;  %v1709_v55 = vpop.f32.mrf.mxu1 }
 0x343   : > { %v1677_v31 = vpop.f32.mrf.mxu0 }
 0x346   : > { %2777 = vmatmul.msk.f32.gmra.mxu2 %vm492_vm4, %v4258_v61  ;;  %2782 = vmatmul.msk.f32.gmra.mxu3 %vm492_vm4, %v4258_v61 }
 0x347   : > { %2786 = vmatmul.msk.f32.gmra.mxu0 %vm492_vm4, %v4259_v44  ;;  %2791 = vmatmul.msk.f32.gmra.mxu1 %vm492_vm4, %v4259_v44 }
 0x34b   : > { %v1680_v54 = vpop.f32.mrf.mxu0 }
 0x34e   : > { %2778 = vmatmul.msk.f32.gmra.mxu2 %vm492_vm4, %v4260_v8  ;;  %2783 = vmatmul.msk.f32.gmra.mxu3 %vm492_vm4, %v4260_v8 }
 0x34f   : > { %2787 = vmatmul.msk.f32.gmra.mxu0 %vm492_vm4, %v4261_v9  ;;  %2792 = vmatmul.msk.f32.gmra.mxu1 %vm492_vm4, %v4261_v9 }
 0x356   : > { %2795 = vmatmul.msk.f32.vlgmr.msra.gmra.mxu2 %vm492_vm4, %v4262_v21  ;;  %2800 = vmatmul.msk.f32.vlgmr.msra.gmra.mxu3 %vm492_vm4, %v4262_v21 }
 0x357   : > { %2788 = vmatmul.msk.f32.gmra.mxu0 %vm492_vm4, %v4263_v19  ;;  %2793 = vmatmul.msk.f32.gmra.mxu1 %vm492_vm4, %v4263_v19 }
 0x35e   : > { %2796 = vmatmul.msk.f32.gmra.mxu2 %vm492_vm4, %v4264_v14  ;;  %2801 = vmatmul.msk.f32.gmra.mxu3 %vm492_vm4, %v4264_v14 }
 0x35f   : > { %2805 = vmatmul.msk.f32.vlgmr.msra.gmra.mxu0 %vm492_vm4, %v4265_v36  ;;  %2810 = vmatmul.msk.f32.vlgmr.msra.gmra.mxu1 %vm492_vm4, %v4265_v36 }
 0x366   : > { %2797 = vmatmul.msk.f32.gmra.mxu2 %vm492_vm4, %v4266_v38  ;;  %2802 = vmatmul.msk.f32.gmra.mxu3 %vm492_vm4, %v4266_v38 }
 0x367   : > { %2806 = vmatmul.msk.f32.gmra.mxu0 %vm492_vm4, %v4267_v28  ;;  %2811 = vmatmul.msk.f32.gmra.mxu1 %vm492_vm4, %v4267_v28 }
 0x36e   : > { %2798 = vmatmul.msk.f32.gmra.mxu2 %vm492_vm4, %v4268_v7  ;;  %2803 = vmatmul.msk.f32.gmra.mxu3 %vm492_vm4, %v4268_v7 }
 0x36f   : > { %2807 = vmatmul.msk.f32.gmra.mxu0 %vm492_vm4, %v4269_v4  ;;  %2812 = vmatmul.msk.f32.gmra.mxu1 %vm492_vm4, %v4269_v4 }
 0x376   : > { %2815 = vmatmul.msk.f32.vlgmr.msrb.gmra.mxu2 %vm492_vm4, %v4270_v33  ;;  %2820 = vmatmul.msk.f32.vlgmr.msrb.gmra.mxu3 %vm492_vm4, %v4270_v33 }
 0x377   : > { %2808 = vmatmul.msk.f32.gmra.mxu0 %vm492_vm4, %v4271_v5  ;;  %2813 = vmatmul.msk.f32.gmra.mxu1 %vm492_vm4, %v4271_v5 }
 0x379   : > { %v1606_v45 = vpop.f32.mrf.mxu2  ;;  %v1635_v59 = vpop.f32.mrf.mxu3 }
 0x37a   : > { %v1672_v57 = vadd.f32 %v1671_v0, %v1606_v45  ;;  %v1701_v15 = vadd.f32 %v1700_v29, %v1635_v59 }
 0x37e   : > { %2816 = vmatmul.msk.f32.gmra.mxu2 %vm492_vm4, %v4272_v25  ;;  %2821 = vmatmul.msk.f32.gmra.mxu3 %vm492_vm4, %v4272_v25 }
 0x381   : > { %v1609_v53 = vpop.f32.mrf.mxu2  ;;  %v1638_v30 = vpop.f32.mrf.mxu3 }
 0x382   : > { %v1675_v63 = vadd.f32 %v1674_v6, %v1609_v53  ;;  %v1704_v34 = vadd.f32 %v1703_v50, %v1638_v30 }
 0x386   : > { %2817 = vmatmul.msk.f32.gmra.mxu2 %vm492_vm4, %v4273_v42  ;;  %2822 = vmatmul.msk.f32.gmra.mxu3 %vm492_vm4, %v4273_v42 }
 0x389   : > { %v1612_v23 = vpop.f32.mrf.mxu2  ;;  %v1641_v27 = vpop.f32.mrf.mxu3 }
 0x38a   : > { %v1678_v40 = vadd.f32 %v1677_v31, %v1612_v23  ;;  %v1707_v46 = vadd.f32 %v1706_v32, %v1641_v27 }
 0x38e   : > { %2818 = vmatmul.msk.f32.gmra.mxu2 %vm492_vm4, %v4274_v13  ;;  %2823 = vmatmul.msk.f32.gmra.mxu3 %vm492_vm4, %v4274_v13 }
 0x391   : > { %v1615_v58 = vpop.f32.mrf.mxu2  ;;  %v1644_v62 = vpop.f32.mrf.mxu3 }
 0x392   : > { %v1681_v16 = vadd.f32 %v1680_v54, %v1615_v58  ;;  %v1710_v20 = vadd.f32 %v1709_v55, %v1644_v62 }
 0x399   : > { %v1748_v35 = vpop.f32.mrf.mxu2  ;;  %v1777_v10 = vpop.f32.mrf.mxu3 }
 0x39a   : > { %v1789_v37 = vadd.f32 %v1748_v35, %v1672_v57  ;;  %v1790_v39 = vadd.f32 %v1777_v10, %v1701_v15 }
 0x39c   : > { %v1833_v56 = vpop.f32.mrf.mxu0  ;;  %v1862_v51 = vpop.f32.mrf.mxu1 }
 0x39d   : > { %v1874_v47 = vadd.f32 %v1833_v56, %v1789_v37  ;;  %v1875_v60 = vadd.f32 %v1862_v51, %v1790_v39 }
 0x3a1   : > { %v1751_v48 = vpop.f32.mrf.mxu2  ;;  %v1780_v2 = vpop.f32.mrf.mxu3 }
 0x3a2   : > { %v1791_v3 = vadd.f32 %v1751_v48, %v1675_v63  ;;  %v1792_v17 = vadd.f32 %v1780_v2, %v1704_v34 }
 0x3a4   : > { %v1836_v22 = vpop.f32.mrf.mxu0  ;;  %v1865_v61 = vpop.f32.mrf.mxu1 }
 0x3a5   : > { %v1876_v44 = vadd.f32 %v1836_v22, %v1791_v3  ;;  %v1877_v8 = vadd.f32 %v1865_v61, %v1792_v17 }
 0x3a9   : > { %v1754_v9 = vpop.f32.mrf.mxu2  ;;  %v1783_v21 = vpop.f32.mrf.mxu3 }
 0x3aa   : > { %v1793_v19 = vadd.f32 %v1754_v9, %v1678_v40  ;;  %v1794_v14 = vadd.f32 %v1783_v21, %v1707_v46 }
 0x3ac   : > { %v1839_v36 = vpop.f32.mrf.mxu0  ;;  %v1868_v38 = vpop.f32.mrf.mxu1 }
 0x3ad   : > { %v1878_v28 = vadd.f32 %v1839_v36, %v1793_v19  ;;  %v1879_v7 = vadd.f32 %v1868_v38, %v1794_v14 }
 0x3b1   : > { %v1757_v4 = vpop.f32.mrf.mxu2  ;;  %v1786_v0 = vpop.f32.mrf.mxu3 }
 0x3b2   : > { %v1795_v29 = vadd.f32 %v1757_v4, %v1681_v16  ;;  %v1796_v33 = vadd.f32 %v1786_v0, %v1710_v20 }
 0x3b4   : > { %v1842_v15 = vpop.f32.mrf.mxu0  ;;  %v1871_v6 = vpop.f32.mrf.mxu1 }
 0x3b5   : > { %v1880_v9 = vadd.f32 %v1842_v15, %v1795_v29  ;;  %v1881_v21 = vadd.f32 %v1871_v6, %v1796_v33 }
 0x3b9   : > { %v1918_v5 = vpop.f32.mrf.mxu2  ;;  %v1947_v45 = vpop.f32.mrf.mxu3 }
 0x3ba   : > { %v1959_v59 = vadd.f32 %v1918_v5, %v1874_v47  ;;  %v1960_v57 = vadd.f32 %v1947_v45, %v1875_v60 }
 0x3bc   : > { %v2003_v63 = vpop.f32.mrf.mxu0  ;;  %v2032_v34 = vpop.f32.mrf.mxu1 }
 0x3c1   : > { %v1921_v50 = vpop.f32.mrf.mxu2  ;;  %v1950_v25 = vpop.f32.mrf.mxu3 }
 0x3c2   : > { %v1961_v53 = vadd.f32 %v1921_v50, %v1876_v44  ;;  %v1962_v30 = vadd.f32 %v1950_v25, %v1877_v8 }
 0x3c4   : > { %v2006_v27 = vpop.f32.mrf.mxu0  ;;  %v2035_v40 = vpop.f32.mrf.mxu1 }
 0x3c9   : > { %v1924_v31 = vpop.f32.mrf.mxu2  ;;  %v1953_v32 = vpop.f32.mrf.mxu3 }
 0x3ca   : > { %v1963_v42 = vadd.f32 %v1924_v31, %v1878_v28  ;;  %v1964_v23 = vadd.f32 %v1953_v32, %v1879_v7  ;;  %v2046_v28 = vadd.f32 %v2006_v27, %v1961_v53  ;;  %v2047_v7 = vadd.f32 %v2035_v40, %v1962_v30 }
 0x3cb   : > { %v2044_v31 = vadd.f32 %v2003_v63, %v1959_v59  ;;  %v2045_v32 = vadd.f32 %v2032_v34, %v1960_v57 }
 0x3cc   : > { %v2009_v58 = vpop.f32.mrf.mxu0  ;;  %v2038_v62 = vpop.f32.mrf.mxu1 }
 0x3cd   : > { %v2048_v36 = vadd.f32 %v2009_v58, %v1963_v42  ;;  %v2049_v38 = vadd.f32 %v2038_v62, %v1964_v23 }
 0x3d1   : > { %v1927_v46 = vpop.f32.mrf.mxu2  ;;  %v1956_v13 = vpop.f32.mrf.mxu3 }
 0x3d2   : > { %v1965_v19 = vadd.f32 %v1927_v46, %v1880_v9  ;;  %v1966_v14 = vadd.f32 %v1956_v13, %v1881_v21 }
 0x3d4   : > { %v2012_v35 = vpop.f32.mrf.mxu0  ;;  %v2041_v10 = vpop.f32.mrf.mxu1 }
 0x3d5   : > { %v2050_v5 = vadd.f32 %v2012_v35, %v1965_v19  ;;  %v2051_v45 = vadd.f32 %v2041_v10, %v1966_v14 }
 0x3d9   : > { %v2088_v54 = vpop.f32.mrf.mxu2  ;;  %v2117_v55 = vpop.f32.mrf.mxu3 }
 0x3da   : > { %v2129_v29 = vadd.f32 %v2088_v54, %v2044_v31  ;;  %v2130_v33 = vadd.f32 %v2117_v55, %v2045_v32  ;;  %v4276_v31 = vld [vmem:[#allocation41_spill] sm:$0xff] }
 0x3dc   : > { %v2173_v56 = vpop.f32.mrf.mxu0  ;;  %v2202_v51 = vpop.f32.mrf.mxu1 }
 0x3dd   : > { %v2214_v58 = vadd.f32 %v2173_v56, %v2129_v29  ;;  %v2215_v62 = vadd.f32 %v2202_v51, %v2130_v33 }
 0x3e1   : > { %v2091_v16 = vpop.f32.mrf.mxu2  ;;  %v2120_v20 = vpop.f32.mrf.mxu3 }
 0x3e2   : > { %v2131_v52 = vadd.f32 %v2091_v16, %v2046_v28  ;;  %v2132_v43 = vadd.f32 %v2120_v20, %v2047_v7 }
 0x3e4   : > { %v2176_v48 = vpop.f32.mrf.mxu0  ;;  %v2205_v2 = vpop.f32.mrf.mxu1 }
 0x3e5   : > { %v2216_v53 = vadd.f32 %v2176_v48, %v2131_v52  ;;  %v2217_v30 = vadd.f32 %v2205_v2, %v2132_v43 }
 0x3e9   : > { %v2094_v37 = vpop.f32.mrf.mxu2  ;;  %v2123_v39 = vpop.f32.mrf.mxu3 }
 0x3ea   : > { %v2133_v50 = vadd.f32 %v2094_v37, %v2048_v36  ;;  %v2134_v25 = vadd.f32 %v2123_v39, %v2049_v38 }
 0x3ec   : > { %v2179_v44 = vpop.f32.mrf.mxu0  ;;  %v2208_v8 = vpop.f32.mrf.mxu1 }
 0x3ed   : > { %v2218_v42 = vadd.f32 %v2179_v44, %v2133_v50  ;;  %v2219_v23 = vadd.f32 %v2208_v8, %v2134_v25  ;;  %v4275_v44 = vld [vmem:[#allocation42_spill] sm:$0xff] }
 0x3f1   : > { %v2097_v47 = vpop.f32.mrf.mxu2  ;;  %v2126_v60 = vpop.f32.mrf.mxu3 }
 0x3f2   : > { %v2135_v24 = vadd.f32 %v2097_v47, %v2050_v5  ;;  %v2136_v49 = vadd.f32 %v2126_v60, %v2051_v45 }
 0x3f4   : > { %v2182_v15 = vpop.f32.mrf.mxu0  ;;  %v2211_v6 = vpop.f32.mrf.mxu1 }
 0x3f5   : > { %v2220_v27 = vadd.f32 %v2182_v15, %v2135_v24  ;;  %v2221_v40 = vadd.f32 %v2211_v6, %v2136_v49 }
 0x3f9   : > { %v2258_v3 = vpop.f32.mrf.mxu2  ;;  %v2287_v17 = vpop.f32.mrf.mxu3 }
 0x3fa   : > { %v2299_v54 = vadd.f32 %v2258_v3, %v2214_v58  ;;  %v2300_v55 = vadd.f32 %v2287_v17, %v2215_v62 }
 0x3fc   : > { %v2307_v56 = vadd.f32 %v2299_v54, %v3654_v26  ;;  %v2308_v51 = vadd.f32 %v2300_v55, %v3654_v26 }
 0x3fe   : > { %v2315_v2 = vmax.f32 %v2307_v56, 0.0 }
 0x401   : > { %v2261_v22 = vpop.f32.mrf.mxu2  ;;  %v2290_v61 = vpop.f32.mrf.mxu3 }
 0x402   : > { %v2301_v63 = vadd.f32 %v2261_v22, %v2216_v53  ;;  %v2302_v34 = vadd.f32 %v2290_v61, %v2217_v30 }
 0x404   : > { %v2309_v49 = vadd.f32 %v2301_v63, %v3648_v41  ;;  %v2310_v52 = vadd.f32 %v2302_v34, %v3648_v41 }
 0x406   : > { %v2317_v48 = vmax.f32 %v2309_v49, 0.0 }
 0x409   : > { %v2264_v4 = vpop.f32.mrf.mxu2  ;;  %v2293_v0 = vpop.f32.mrf.mxu3 }
 0x40a   : > { %v2303_v46 = vadd.f32 %v2264_v4, %v2218_v42  ;;  %v2304_v13 = vadd.f32 %v2293_v0, %v2219_v23 }
 0x40c   : > { %v2311_v35 = vadd.f32 %v2303_v46, %v3636_v1  ;;  %v2312_v10 = vadd.f32 %v2304_v13, %v3636_v1  ;;  %v2318_v1 = vmax.f32 %v2310_v52, 0.0 }
 0x40e   : > { %v2319_v47 = vmax.f32 %v2311_v35, 0.0  ;;  %v2320_v60 = vmax.f32 %v2312_v10, 0.0 }
 0x411   : > { %v2267_v59 = vpop.f32.mrf.mxu2  ;;  %v2296_v57 = vpop.f32.mrf.mxu3 }
 0x412   : > { %v2305_v16 = vadd.f32 %v2267_v59, %v2220_v27  ;;  %v2306_v20 = vadd.f32 %v2296_v57, %v2221_v40 }
 0x414   : > { %v2313_v43 = vadd.f32 %v2305_v16, %v3642_v18  ;;  %v2314_v24 = vadd.f32 %v2306_v20, %v3642_v18  ;;  %v2316_v18 = vmax.f32 %v2308_v51, 0.0 }
 0x416   : > { %v2321_v37 = vmax.f32 %v2313_v43, 0.0  ;;  %v2322_v39 = vmax.f32 %v2314_v24, 0.0 }
 0x418   : > { %2335 = vmatpush.msrb.mxu0 %v2321_v37  ;;  %2355 = vmatpush.msrb.mxu1 %v2322_v39 }
 0x41a   : > { %2336 = vmatpush.msrb.mxu0 %v2319_v47  ;;  %2356 = vmatpush.msrb.mxu1 %v2320_v60 }
 0x41c   : > { %2337 = vmatpush.msrb.mxu0 %v2317_v48  ;;  %2357 = vmatpush.msrb.mxu1 %v2318_v1 }
 0x41e   : > { %2338 = vmatpush.msrb.mxu0 %v2315_v2  ;;  %2358 = vmatpush.msrb.mxu1 %v2316_v18 }
 0x41f   : > { %2824 = vmatmul.msk.f32.vlgmr.msrb.gmra.mxu0 %vm1410_vm12, %v3664_v11  ;;  %2825 = vmatmul.msk.f32.vlgmr.msrb.gmra.mxu1 %vm1410_vm12, %v3664_v11 }
 0x49c   : > { %v2340_v41 = vpop.f32.mrf.mxu0  ;;  %v2360_v26 = vpop.f32.mrf.mxu1 }
 0x49d   : > { %v2361_v3 = vadd.f32 %v2360_v26, %v3670_v12  ;;  %v2341_v17 = vadd.f32 %v2340_v41, %v3670_v12 }
 0x49f   : > { %v2365_v22 = vrot.slane %v2361_v3, 4 }
 0x4a1   : > { %v2366_v61 = vsel %vm578_vm0, %v2341_v17, %v2365_v22  ;;  %v4277_v22 = vld [vmem:[#allocation43_spill] sm:$0xff] }
 0x4a2   : > { %v2368_v8 = vadd.f32 %v4275_v44, %v2366_v61  ;;  %v4278_v44 = vld [vmem:[#allocation46_spill] sm:$0xff] }
 0x4a4   : > { %2370 = vst [vmem:[#allocation1] ss:$2 sm:$0xff] %v2368_v8 }
 0x4ab   : > { %v2371_v9 = vld.sshfl [vmem:[#allocation1] sm:$0xff pattern:$0x75316420]  ;;  %v2372_v21 = vld.sshfl [vmem:[#allocation1 + $0x8] sm:$0xff pattern:$0x75316420] }
 0x4ac   : > { %v2375_v19 = vsel %vm578_vm0, %v2371_v9, 0.0  ;;  %v2382_v14 = vsel %vm578_vm0, %v2372_v21, 0.0 }
 0x4ad   : > { %v2376_v36 = vrot.slane %v2375_v19, 4  ;;  %v2383_v11 = vrot.slane %v2382_v14, 4 }
 0x4af   : > { %v2377_v38 = vadd.f32 %v2376_v36, %v2375_v19  ;;  %v2384_v28 = vadd.f32 %v2383_v11, %v2382_v14 }
 0x4b1   : > { %v2378_v7 = vrot.slane %v2377_v38, 2  ;;  %v2385_v4 = vrot.slane %v2384_v28, 2 }
 0x4b3   : > { %v2379_v0 = vadd.f32 %v2378_v7, %v2377_v38  ;;  %v2386_v12 = vadd.f32 %v2385_v4, %v2384_v28 }
 0x4b5   : > { %v2380_v5 = vrot.slane %v2379_v0, 1  ;;  %v2387_v45 = vrot.slane %v2386_v12, 1 }
 0x4b7   : > { %v2381_v50 = vadd.f32 %v2380_v5, %v2379_v0  ;;  %v2388_v25 = vadd.f32 %v2387_v45, %v2386_v12 }
 0x4b9   : > { %v2390_v32 = vmul.f32 %v2388_v25, %v4276_v31  ;;  %v2389_v29 = vmul.f32 %v2381_v50, %v4276_v31 }
 0x4bb   : > { %v2393_v33 = vrot.slane %v2390_v32, 4 }
 0x4bd   : > { %v2394_v15 = vsel %vm578_vm0, %v2389_v29, %v2393_v33 }
 0x4be   : > { %v2396_v6 = vsub.f32 %v2368_v8, %v2394_v15 }
 0x4c0   : > { %v2397_v42 = vmul.f32 %v2396_v6, %v2396_v6 }
 0x4c2   : > { %2399 = vst [vmem:[#allocation1] ss:$2 sm:$0xff] %v2397_v42 }
 0x4c9   : > { %v2400_v23 = vld.sshfl [vmem:[#allocation1] sm:$0xff pattern:$0x75316420]  ;;  %v2401_v53 = vld.sshfl [vmem:[#allocation1 + $0x8] sm:$0xff pattern:$0x75316420] }
 0x4ca   : > { %v2404_v30 = vsel %vm578_vm0, %v2400_v23, 0.0  ;;  %v2411_v27 = vsel %vm578_vm0, %v2401_v53, 0.0 }
 0x4cb   : > { %v2405_v40 = vrot.slane %v2404_v30, 4  ;;  %v2412_v46 = vrot.slane %v2411_v27, 4 }
 0x4cd   : > { %v2406_v13 = vadd.f32 %v2405_v40, %v2404_v30  ;;  %v2413_v58 = vadd.f32 %v2412_v46, %v2411_v27 }
 0x4cf   : > { %v2407_v62 = vrot.slane %v2406_v13, 2  ;;  %v2414_v59 = vrot.slane %v2413_v58, 2 }
 0x4d1   : > { %v2408_v57 = vadd.f32 %v2407_v62, %v2406_v13  ;;  %v2415_v63 = vadd.f32 %v2414_v59, %v2413_v58 }
 0x4d3   : > { %v2409_v34 = vrot.slane %v2408_v57, 1  ;;  %v2416_v16 = vrot.slane %v2415_v63, 1 }
 0x4d5   : > { %v2410_v20 = vadd.f32 %v2409_v34, %v2408_v57  ;;  %v2417_v54 = vadd.f32 %v2416_v16, %v2415_v63 }
 0x4d7   : > { %v2418_v55 = vmul.f32 %v2410_v20, %v4276_v31  ;;  %v2419_v35 = vmul.f32 %v2417_v54, %v4276_v31 }
 0x4d9   : > { %v2420_v10 = vadd.f32 1e-05, %v2418_v55  ;;  %v2421_v43 = vadd.f32 1e-05, %v2419_v35 }
 0x4db   : > { %2920 = vrsqrt.f32 %v2420_v10  ;;  %vm2438_vm7 = vweird.f32 %v2421_v43  ;;  %vm2428_vm9 = vweird.f32 %v2420_v10 }
 0x4dc   : > { %2922 = vrsqrt.f32 %v2421_v43 }
 0x4e1   : > { %v2921_v24 = vpop.eup %2920 }
 0x4e2   : > { %v2923_v49 = vpop.eup %2922  ;;  %v2423_v52 = vmul.f32 %v2921_v24, %v2420_v10  ;;  %vm2429_vm4 = vweird.f32 %v2921_v24 }
 0x4e3   : > { %v2433_v37 = vmul.f32 %v2923_v49, %v2421_v43  ;;  %vm2439_vm3 = vweird.f32 %v2923_v49  ;;  %vm2430_vm10 = vmor %vm2428_vm9, %vm2429_vm4 }
 0x4e4   : > { %v2424_v39 = vmul.f32 %v2921_v24, %v2423_v52  ;;  %vm2440_vm8 = vmor %vm2438_vm7, %vm2439_vm3 }
 0x4e5   : > { %v2434_v56 = vmul.f32 %v2923_v49, %v2433_v37 }
 0x4e6   : > { %v2425_v51 = vmul.f32 0.5, %v2424_v39 }
 0x4e7   : > { %v2435_v47 = vmul.f32 0.5, %v2434_v56 }
 0x4e8   : > { %v2426_v60 = vsub.f32 1.5, %v2425_v51 }
 0x4e9   : > { %v2436_v48 = vsub.f32 1.5, %v2435_v47 }
 0x4ea   : > { %v2427_v1 = vmul.f32 %v2921_v24, %v2426_v60 }
 0x4eb   : > { %v2437_v2 = vmul.f32 %v2923_v49, %v2436_v48 }
 0x4ec   : > { %v2431_v26 = vsel %vm2430_vm10, %v2921_v24, %v2427_v1 }
 0x4ed   : > { %v2441_v18 = vsel %vm2440_vm8, %v2923_v49, %v2437_v2 }
 0x4ee   : > { %v2444_v41 = vrot.slane %v2441_v18, 4 }
 0x4f0   : > { %v2445_v3 = vsel %vm578_vm0, %v2431_v26, %v2444_v41 }
 0x4f1   : > { %v2447_v17 = vmul.f32 %v2445_v3, %v2396_v6 }
 0x4f3   : > { %v2448_v61 = vmul.f32 %v2447_v17, %v4277_v22 }
 0x4f5   : > { %v2449_v8 = vadd.f32 %v2448_v61, %v4278_v44 }
 0x4f7   : > { %2826 = vst [vmem:[%s3906_s14 + $0x8] sm:$0xff] %v2449_v8 }
 0x4f8   : > { %2955 = shalt.err (!%p2952_p5)
}
 0x4f9   : > { %s3026_s26 = smov 128   ;;  %s3027_s14 = smov 8  }
 0x4fa   : > { %2836 = dma.vmem_to_hbm [thread:$0]  (%p3113_p4), %s2469_s22, 256, %s2471_s19, %s2453_s30, %s3026_s26, %s3026_s26, %s3027_s14  }
 0x4fb PF: > { %p2842_p6 = scmp.ge.s32.totalorder %s3006_s10, 2  ;;  %s2485_s23 = sand.u32 1, %s2986_s27  }
 0x4fc   : > { %s2486_s24 = scalar_lea.sflag [#allocation3], %s2485_s23 }
 0x4fd   : > { %p2839_p7 = pnand %p2842_p6, %p3120_p8 }
 0x4ff   : > { %p2840_p9 = pneg %p2839_p7 }
 0x501   : > { %2981 = dma.done.wait (%p2840_p9), %s2486_s24, 256  }
 0x502   : > { %2983 = vsyncadd (%p2840_p9), %s2486_s24, 4294967040  ;;  %s21_s10 = sadd.s32 1, %s3006_s10   ;;  %s4279_s27 = smov %s2990_s28 }
 0x503   : > { %p18_p10 = scmp.ge.s32.totalorder %s21_s10, 4   ;;  %s4280_s28 = smov %s2994_s29 }
 0x504   : > { %s4281_s29 = smov %s3126_s18  ;;  %s4282_s30 = smov %s3002_s9 }
 0x505   : > { %s4283_s9 = smov %s4285_s13  ;;  %20 = sbr.rel (!%p18_p10) target bundleno = 4 (0x4), region = 107 }
 0x50a   :  { %2492 = vsyncpa [#allocation3], 1 }
 0x50b   :  { %2494 = vsyncpa [#allocation3 + $0x1], 1 }

</bundles_post_ra>
